<compile_context>
chip_gen: v7x
topology: tpu7x:2x2x1
jax: 0.10.0
libtpu: 0.0.40
codegen_flags: <defaults>
</compile_context>

<pallas_src>
import numpy as np
import jax
import jax.numpy as jnp
from jax.experimental import pallas as pl
from jax.experimental.pallas import tpu as pltpu


# --------------------------------------------------------------------------
# Fused kernel:
#   conv1 (1x1, bias)                       -> MXU matmul
#   conv2 + kernel_conv + channel repeat    -> ONE folded im2col MXU matmul
#   KernelConv / kernel_pred (3x3, rate=1)  -> 9 VPU multiply-adds
# --------------------------------------------------------------------------
def _fused_convop_kernel(x_ref, w1_ref, b1_ref, wall_ref, ball_ref, out_ref):
    H, W, C = x_ref.shape[1], x_ref.shape[2], x_ref.shape[3]
    HW = H * W

    x3 = x_ref[0]                                      # (H, W, C) f32
    x2d = x3.reshape(HW, C)

    # --- conv1: 1x1 conv == per-pixel matmul (bf16 MXU inputs, f32 accumulate)
    y1 = jnp.dot(x2d.astype(jnp.bfloat16), w1_ref[...],
                 preferred_element_type=jnp.float32) + b1_ref[...]       # (HW, C)
    y1_3d = y1.reshape(H, W, C)

    # --- zero-pad H and W by 1 (value-level, no scratch round trip)
    def pad_hw(a):
        zc = jnp.zeros((a.shape[0], 1, C), a.dtype)
        a = jnp.concatenate([zc, a, zc], axis=1)          # (.., W+2, C)
        zr = jnp.zeros((1, a.shape[1], C), a.dtype)
        return jnp.concatenate([zr, a, zr], axis=0)       # (H+2, W+2, C)

    y1p = pad_hw(y1_3d)
    xp = pad_hw(x3)

    # --- im2col over the 9 taps: patches[p, m*C + c] = y1_pad[h+i, w+j, c], m = 3i+j
    y_slabs, x_slabs = [], []
    for i in range(3):
        for j in range(3):
            y_slabs.append(y1p[i:i + H, j:j + W, :].reshape(HW, C))
            x_slabs.append(xp[i:i + H, j:j + W, :].reshape(HW, C))
    patches = jnp.concatenate(y_slabs, axis=1)            # (HW, 9C) f32

    # --- conv2 (depthwise) + kernel_conv (1x1) + nearest x4 channel repeat,
    #     all folded into `wall`: core[p, m*C + c] is the predicted kernel tap m
    #     for output channel c at pixel p.
    core = jnp.dot(patches.astype(jnp.bfloat16), wall_ref[...],
                   preferred_element_type=jnp.float32) + ball_ref[...]   # (HW, 9C)

    # --- kernel_pred: out[p, c] = sum_m core[p, m*C + c] * x_pad[h+i, w+j, c]
    acc = jnp.zeros((HW, C), jnp.float32)
    for m in range(9):
        acc = acc + core[:, m * C:(m + 1) * C] * x_slabs[m]

    out_ref[0] = acc.reshape(H, W, C)                     # white_level == 1.0


# --------------------------------------------------------------------------
# Wrapper: weight folding + single pallas_call
# --------------------------------------------------------------------------
def conv_op_forward(x_nchw, params):
    B, C, H, W = x_nchw.shape
    if C % 4 != 0:
        raise ValueError("ConvOp requires channels divisible by 4")
    # TODO(synk): non-square inputs would need the module's (degenerate) nearest-
    #             interp spatial remap as a per-pixel gather; only the square case
    #             (identity remap) is fused here.
    if H != W:
        raise NotImplementedError("fused ConvOp kernel assumes square inputs (H == W)")

    KC = (C // 4) * 9
    C9 = 9 * C
    w1, b1, w2, b2, wk, bk = (params[k] for k in ("w1", "b1", "w2", "b2", "wk", "bk"))

    # Fold conv2 (depthwise 3x3) + kernel_conv (1x1) + the nearest-interp x4
    # channel repeat into ONE (9C, 9C) matrix applied to im2col patches of y1:
    #   kc[p, k]           = sum_{m,c} w2[m,c] * wk[c,k] * y1_pad[p_m, c] + bk_eff[k]
    #   core[p, (m, cout)] = kc[p, (9*cout + m) // 4]      (square / identity remap)
    w2k = (w2[:, :, None] * wk[None, :, :]).reshape(C9, KC)     # rows: (m, c_in)
    bk_eff = bk[0] + b2[0] @ wk                                 # (KC,)
    kidx = (9 * jnp.arange(C)[None, :] + jnp.arange(9)[:, None]) // 4   # (9, C)
    wall = w2k[:, kidx].reshape(C9, C9)                         # cols: (m, c_out)
    ball = bk_eff[kidx].reshape(1, C9)

    x_nhwc = jnp.transpose(x_nchw, (0, 2, 3, 1)).astype(jnp.float32)

    out_nhwc = pl.pallas_call(
        _fused_convop_kernel,
        out_shape=jax.ShapeDtypeStruct((B, H, W, C), jnp.float32),
        grid=(B,),
        in_specs=[
            pl.BlockSpec((1, H, W, C), lambda b: (b, 0, 0, 0)),
            pl.BlockSpec((C, C), lambda b: (0, 0)),
            pl.BlockSpec((1, C), lambda b: (0, 0)),
            pl.BlockSpec((C9, C9), lambda b: (0, 0)),
            pl.BlockSpec((1, C9), lambda b: (0, 0)),
        ],
        out_specs=pl.BlockSpec((1, H, W, C), lambda b: (b, 0, 0, 0)),
        compiler_params=pltpu.CompilerParams(dimension_semantics=("parallel",)),
    )(x_nhwc, w1.astype(jnp.bfloat16), b1, wall.astype(jnp.bfloat16), ball)

    return jnp.transpose(out_nhwc, (0, 3, 1, 2))          # back to NCHW


# --------------------------------------------------------------------------
# Deterministic parameter init (shapes from ConvOp.__init__; no checkpoint)
# --------------------------------------------------------------------------
def init_params(key, C):
    KC = (C // 4) * 9
    ks = jax.random.split(key, 6)
    s = 0.1
    return dict(
        w1=jax.random.normal(ks[0], (C, C), jnp.float32) * s,    # conv1  weight [C_in, C_out]
        b1=jax.random.normal(ks[1], (1, C), jnp.float32) * s,
        w2=jax.random.normal(ks[2], (9, C), jnp.float32) * s,    # conv2  depthwise taps [3*i+j, C]
        b2=jax.random.normal(ks[3], (1, C), jnp.float32) * s,
        wk=jax.random.normal(ks[4], (C, KC), jnp.float32) * s,   # kernel_conv weight [C_in, KC]
        bk=jax.random.normal(ks[5], (1, KC), jnp.float32) * s,
    )


# --------------------------------------------------------------------------
# Pure-JAX reference (unfused math, independent code path) for a sanity check
# --------------------------------------------------------------------------
def reference_forward(x, params):
    B, C, H, W = x.shape
    KC = (C // 4) * 9
    w1, b1, w2, b2, wk, bk = (params[k] for k in ("w1", "b1", "w2", "b2", "wk", "bk"))
    hp = jax.lax.Precision.HIGHEST
    y1 = jnp.einsum("bchw,cd->bdhw", x, w1, precision=hp) + b1[0][None, :, None, None]
    y1p = jnp.pad(y1, ((0, 0), (0, 0), (1, 1), (1, 1)))
    y2 = jnp.zeros_like(y1)
    for i in range(3):
        for j in range(3):
            y2 = y2 + y1p[:, :, i:i + H, j:j + W] * w2[i * 3 + j][None, :, None, None]
    y2 = y2 + b2[0][None, :, None, None]
    kc = jnp.einsum("bchw,ck->bkhw", y2, wk, precision=hp) + bk[0][None, :, None, None]
    ch_idx = jnp.arange(KC * 4) // 4
    r_idx = (jnp.arange(W) * H) // W
    c_idx = (jnp.arange(H) * W) // H
    interp = kc[:, ch_idx][:, :, r_idx][:, :, :, c_idx]
    core = interp.reshape(B, C, 9, H, W)
    xp = jnp.pad(x, ((0, 0), (0, 0), (1, 1), (1, 1)))
    out = jnp.zeros_like(x)
    for i in range(3):
        for j in range(3):
            out = out + core[:, :, i * 3 + j] * xp[:, :, i:i + H, j:j + W]
    return out


if __name__ == "__main__":
    B, C, H, W = 2, 8, 16, 16          # C must be divisible by 4 (as in the module)
    key = jax.random.PRNGKey(0)
    kx, kp = jax.random.split(key)
    x = jax.random.normal(kx, (B, C, H, W), jnp.float32)
    params = init_params(kp, C)

    fwd = jax.jit(conv_op_forward)
    out = fwd(x, params)
    out = jax.block_until_ready(out)
    assert out.shape == (B, C, H, W)

    ref = reference_forward(x, params)
    # bf16 MXU inputs (f32 accumulate) vs a Precision.HIGHEST f32 reference.
    if not np.allclose(np.asarray(out), np.asarray(ref), atol=5e-3, rtol=5e-3):
        max_err = float(np.max(np.abs(np.asarray(out) - np.asarray(ref))))
        raise AssertionError(f"mismatch vs reference, max abs err = {max_err}")

    print("KERNEL_OK")
</pallas_src>

<mosaic_0001>
module attributes {stable_mosaic.version = 11 : i64} {
  func.func @_fused_convop_kernel(%arg0: i32, %arg1: memref<1x16x16x8xf32, #tpu.memory_space<vmem>>, %arg2: memref<8x8xbf16, #tpu.memory_space<vmem>>, %arg3: memref<1x8xf32, #tpu.memory_space<vmem>>, %arg4: memref<72x72xbf16, #tpu.memory_space<vmem>>, %arg5: memref<1x72xf32, #tpu.memory_space<vmem>>, %arg6: memref<1x16x16x8xf32, #tpu.memory_space<vmem>>) attributes {dimension_semantics = [#tpu.dimension_semantics<parallel>], iteration_bounds = array<i64: 2>, scalar_prefetch = 0 : i64, scratch_operands = 0 : i64, tpu.core_type = #tpu.core_type<tc>, window_params = [{transform_indices = @transform_0, window_bounds = array<i64: 1, 16, 16, 8>}, {pipeline_mode = #tpu.pipeline_mode<synchronous>, transform_indices = @transform_1, window_bounds = array<i64: 8, 8>}, {pipeline_mode = #tpu.pipeline_mode<synchronous>, transform_indices = @transform_2, window_bounds = array<i64: 1, 8>}, {pipeline_mode = #tpu.pipeline_mode<synchronous>, transform_indices = @transform_3, window_bounds = array<i64: 72, 72>}, {pipeline_mode = #tpu.pipeline_mode<synchronous>, transform_indices = @transform_4, window_bounds = array<i64: 1, 72>}, {transform_indices = @transform_5, window_bounds = array<i64: 1, 16, 16, 8>}]} {
    %c0 = arith.constant 0 : index
    %c0_0 = arith.constant 0 : index
    %c0_1 = arith.constant 0 : index
    %c0_2 = arith.constant 0 : index
    %0 = vector.load %arg1[%c0, %c0_0, %c0_1, %c0_2] : memref<1x16x16x8xf32, #tpu.memory_space<vmem>>, vector<1x16x16x8xf32>
    %1 = vector.shape_cast %0 : vector<1x16x16x8xf32> to vector<16x16x8xf32>
    %2 = vector.shape_cast %1 : vector<16x16x8xf32> to vector<256x8xf32>
    %3 = arith.truncf %2 : vector<256x8xf32> to vector<256x8xbf16>
    %c0_3 = arith.constant 0 : index
    %c0_4 = arith.constant 0 : index
    %4 = vector.load %arg2[%c0_3, %c0_4] : memref<8x8xbf16, #tpu.memory_space<vmem>>, vector<8x8xbf16>
    %cst = arith.constant dense<0.000000e+00> : vector<256x8xf32>
    %5 = tpu.matmul %3, %4, %cst {dimension_numbers = #tpu.dot_dimension_numbers<[1], [0], [0], [1], [0, 0, 1, 1], [], []>} : vector<256x8xbf16>, vector<8x8xbf16>, vector<256x8xf32> -> vector<256x8xf32>
    %c0_5 = arith.constant 0 : index
    %c0_6 = arith.constant 0 : index
    %6 = vector.load %arg3[%c0_5, %c0_6] : memref<1x8xf32, #tpu.memory_space<vmem>>, vector<1x8xf32>
    %7 = vector.broadcast %6 : vector<1x8xf32> to vector<256x8xf32>
    %8 = arith.addf %5, %7 : vector<256x8xf32>
    %9 = vector.shape_cast %8 : vector<256x8xf32> to vector<16x16x8xf32>
    %cst_7 = arith.constant 0.000000e+00 : f32
    %10 = vector.broadcast %cst_7 : f32 to vector<16x1x8xf32>
    %11 = tpu.concatenate %10, %9, %10 in 1 : vector<16x1x8xf32>, vector<16x16x8xf32>, vector<16x1x8xf32> -> vector<16x18x8xf32>
    %cst_8 = arith.constant 0.000000e+00 : f32
    %12 = vector.broadcast %cst_8 : f32 to vector<1x18x8xf32>
    %13 = tpu.concatenate %12, %11, %12 in 0 : vector<1x18x8xf32>, vector<16x18x8xf32>, vector<1x18x8xf32> -> vector<18x18x8xf32>
    %cst_9 = arith.constant 0.000000e+00 : f32
    %14 = vector.broadcast %cst_9 : f32 to vector<16x1x8xf32>
    %15 = tpu.concatenate %14, %1, %14 in 1 : vector<16x1x8xf32>, vector<16x16x8xf32>, vector<16x1x8xf32> -> vector<16x18x8xf32>
    %cst_10 = arith.constant 0.000000e+00 : f32
    %16 = vector.broadcast %cst_10 : f32 to vector<1x18x8xf32>
    %17 = tpu.concatenate %16, %15, %16 in 0 : vector<1x18x8xf32>, vector<16x18x8xf32>, vector<1x18x8xf32> -> vector<18x18x8xf32>
    %18 = vector.extract_strided_slice %13 {offsets = [0, 0, 0], sizes = [16, 16, 8], strides = [1, 1, 1]} : vector<18x18x8xf32> to vector<16x16x8xf32>
    %19 = vector.shape_cast %18 : vector<16x16x8xf32> to vector<256x8xf32>
    %20 = vector.extract_strided_slice %17 {offsets = [0, 0, 0], sizes = [16, 16, 8], strides = [1, 1, 1]} : vector<18x18x8xf32> to vector<16x16x8xf32>
    %21 = vector.shape_cast %20 : vector<16x16x8xf32> to vector<256x8xf32>
    %22 = vector.extract_strided_slice %13 {offsets = [0, 1, 0], sizes = [16, 16, 8], strides = [1, 1, 1]} : vector<18x18x8xf32> to vector<16x16x8xf32>
    %23 = vector.shape_cast %22 : vector<16x16x8xf32> to vector<256x8xf32>
    %24 = vector.extract_strided_slice %17 {offsets = [0, 1, 0], sizes = [16, 16, 8], strides = [1, 1, 1]} : vector<18x18x8xf32> to vector<16x16x8xf32>
    %25 = vector.shape_cast %24 : vector<16x16x8xf32> to vector<256x8xf32>
    %26 = vector.extract_strided_slice %13 {offsets = [0, 2, 0], sizes = [16, 16, 8], strides = [1, 1, 1]} : vector<18x18x8xf32> to vector<16x16x8xf32>
    %27 = vector.shape_cast %26 : vector<16x16x8xf32> to vector<256x8xf32>
    %28 = vector.extract_strided_slice %17 {offsets = [0, 2, 0], sizes = [16, 16, 8], strides = [1, 1, 1]} : vector<18x18x8xf32> to vector<16x16x8xf32>
    %29 = vector.shape_cast %28 : vector<16x16x8xf32> to vector<256x8xf32>
    %30 = vector.extract_strided_slice %13 {offsets = [1, 0, 0], sizes = [16, 16, 8], strides = [1, 1, 1]} : vector<18x18x8xf32> to vector<16x16x8xf32>
    %31 = vector.shape_cast %30 : vector<16x16x8xf32> to vector<256x8xf32>
    %32 = vector.extract_strided_slice %17 {offsets = [1, 0, 0], sizes = [16, 16, 8], strides = [1, 1, 1]} : vector<18x18x8xf32> to vector<16x16x8xf32>
    %33 = vector.shape_cast %32 : vector<16x16x8xf32> to vector<256x8xf32>
    %34 = vector.extract_strided_slice %13 {offsets = [1, 1, 0], sizes = [16, 16, 8], strides = [1, 1, 1]} : vector<18x18x8xf32> to vector<16x16x8xf32>
    %35 = vector.shape_cast %34 : vector<16x16x8xf32> to vector<256x8xf32>
    %36 = vector.extract_strided_slice %17 {offsets = [1, 1, 0], sizes = [16, 16, 8], strides = [1, 1, 1]} : vector<18x18x8xf32> to vector<16x16x8xf32>
    %37 = vector.shape_cast %36 : vector<16x16x8xf32> to vector<256x8xf32>
    %38 = vector.extract_strided_slice %13 {offsets = [1, 2, 0], sizes = [16, 16, 8], strides = [1, 1, 1]} : vector<18x18x8xf32> to vector<16x16x8xf32>
    %39 = vector.shape_cast %38 : vector<16x16x8xf32> to vector<256x8xf32>
    %40 = vector.extract_strided_slice %17 {offsets = [1, 2, 0], sizes = [16, 16, 8], strides = [1, 1, 1]} : vector<18x18x8xf32> to vector<16x16x8xf32>
    %41 = vector.shape_cast %40 : vector<16x16x8xf32> to vector<256x8xf32>
    %42 = vector.extract_strided_slice %13 {offsets = [2, 0, 0], sizes = [16, 16, 8], strides = [1, 1, 1]} : vector<18x18x8xf32> to vector<16x16x8xf32>
    %43 = vector.shape_cast %42 : vector<16x16x8xf32> to vector<256x8xf32>
    %44 = vector.extract_strided_slice %17 {offsets = [2, 0, 0], sizes = [16, 16, 8], strides = [1, 1, 1]} : vector<18x18x8xf32> to vector<16x16x8xf32>
    %45 = vector.shape_cast %44 : vector<16x16x8xf32> to vector<256x8xf32>
    %46 = vector.extract_strided_slice %13 {offsets = [2, 1, 0], sizes = [16, 16, 8], strides = [1, 1, 1]} : vector<18x18x8xf32> to vector<16x16x8xf32>
    %47 = vector.shape_cast %46 : vector<16x16x8xf32> to vector<256x8xf32>
    %48 = vector.extract_strided_slice %17 {offsets = [2, 1, 0], sizes = [16, 16, 8], strides = [1, 1, 1]} : vector<18x18x8xf32> to vector<16x16x8xf32>
    %49 = vector.shape_cast %48 : vector<16x16x8xf32> to vector<256x8xf32>
    %50 = vector.extract_strided_slice %13 {offsets = [2, 2, 0], sizes = [16, 16, 8], strides = [1, 1, 1]} : vector<18x18x8xf32> to vector<16x16x8xf32>
    %51 = vector.shape_cast %50 : vector<16x16x8xf32> to vector<256x8xf32>
    %52 = vector.extract_strided_slice %17 {offsets = [2, 2, 0], sizes = [16, 16, 8], strides = [1, 1, 1]} : vector<18x18x8xf32> to vector<16x16x8xf32>
    %53 = vector.shape_cast %52 : vector<16x16x8xf32> to vector<256x8xf32>
    %54 = tpu.concatenate %19, %23, %27, %31, %35, %39, %43, %47, %51 in 1 : vector<256x8xf32>, vector<256x8xf32>, vector<256x8xf32>, vector<256x8xf32>, vector<256x8xf32>, vector<256x8xf32>, vector<256x8xf32>, vector<256x8xf32>, vector<256x8xf32> -> vector<256x72xf32>
    %55 = arith.truncf %54 : vector<256x72xf32> to vector<256x72xbf16>
    %c0_11 = arith.constant 0 : index
    %c0_12 = arith.constant 0 : index
    %56 = vector.load %arg4[%c0_11, %c0_12] : memref<72x72xbf16, #tpu.memory_space<vmem>>, vector<72x72xbf16>
    %cst_13 = arith.constant dense<0.000000e+00> : vector<256x72xf32>
    %57 = tpu.matmul %55, %56, %cst_13 {dimension_numbers = #tpu.dot_dimension_numbers<[1], [0], [0], [1], [0, 0, 1, 1], [], []>} : vector<256x72xbf16>, vector<72x72xbf16>, vector<256x72xf32> -> vector<256x72xf32>
    %c0_14 = arith.constant 0 : index
    %c0_15 = arith.constant 0 : index
    %58 = vector.load %arg5[%c0_14, %c0_15] : memref<1x72xf32, #tpu.memory_space<vmem>>, vector<1x72xf32>
    %59 = vector.broadcast %58 : vector<1x72xf32> to vector<256x72xf32>
    %60 = arith.addf %57, %59 : vector<256x72xf32>
    %cst_16 = arith.constant 0.000000e+00 : f32
    %61 = vector.broadcast %cst_16 : f32 to vector<256x8xf32>
    %62 = vector.extract_strided_slice %60 {offsets = [0, 0], sizes = [256, 8], strides = [1, 1]} : vector<256x72xf32> to vector<256x8xf32>
    %63 = arith.mulf %62, %21 : vector<256x8xf32>
    %64 = arith.addf %61, %63 : vector<256x8xf32>
    %65 = vector.extract_strided_slice %60 {offsets = [0, 8], sizes = [256, 8], strides = [1, 1]} : vector<256x72xf32> to vector<256x8xf32>
    %66 = arith.mulf %65, %25 : vector<256x8xf32>
    %67 = arith.addf %64, %66 : vector<256x8xf32>
    %68 = vector.extract_strided_slice %60 {offsets = [0, 16], sizes = [256, 8], strides = [1, 1]} : vector<256x72xf32> to vector<256x8xf32>
    %69 = arith.mulf %68, %29 : vector<256x8xf32>
    %70 = arith.addf %67, %69 : vector<256x8xf32>
    %71 = vector.extract_strided_slice %60 {offsets = [0, 24], sizes = [256, 8], strides = [1, 1]} : vector<256x72xf32> to vector<256x8xf32>
    %72 = arith.mulf %71, %33 : vector<256x8xf32>
    %73 = arith.addf %70, %72 : vector<256x8xf32>
    %74 = vector.extract_strided_slice %60 {offsets = [0, 32], sizes = [256, 8], strides = [1, 1]} : vector<256x72xf32> to vector<256x8xf32>
    %75 = arith.mulf %74, %37 : vector<256x8xf32>
    %76 = arith.addf %73, %75 : vector<256x8xf32>
    %77 = vector.extract_strided_slice %60 {offsets = [0, 40], sizes = [256, 8], strides = [1, 1]} : vector<256x72xf32> to vector<256x8xf32>
    %78 = arith.mulf %77, %41 : vector<256x8xf32>
    %79 = arith.addf %76, %78 : vector<256x8xf32>
    %80 = vector.extract_strided_slice %60 {offsets = [0, 48], sizes = [256, 8], strides = [1, 1]} : vector<256x72xf32> to vector<256x8xf32>
    %81 = arith.mulf %80, %45 : vector<256x8xf32>
    %82 = arith.addf %79, %81 : vector<256x8xf32>
    %83 = vector.extract_strided_slice %60 {offsets = [0, 56], sizes = [256, 8], strides = [1, 1]} : vector<256x72xf32> to vector<256x8xf32>
    %84 = arith.mulf %83, %49 : vector<256x8xf32>
    %85 = arith.addf %82, %84 : vector<256x8xf32>
    %86 = vector.extract_strided_slice %60 {offsets = [0, 64], sizes = [256, 8], strides = [1, 1]} : vector<256x72xf32> to vector<256x8xf32>
    %87 = arith.mulf %86, %53 : vector<256x8xf32>
    %88 = arith.addf %85, %87 : vector<256x8xf32>
    %89 = vector.shape_cast %88 : vector<256x8xf32> to vector<16x16x8xf32>
    %c0_17 = arith.constant 0 : index
    %c0_18 = arith.constant 0 : index
    %c0_19 = arith.constant 0 : index
    %c0_20 = arith.constant 0 : index
    %90 = vector.load %arg6[%c0_17, %c0_18, %c0_19, %c0_20] : memref<1x16x16x8xf32, #tpu.memory_space<vmem>>, vector<1x16x16x8xf32>
    %91 = vector.shape_cast %90 : vector<1x16x16x8xf32> to vector<16x16x8xf32>
    %92 = vector.shape_cast %89 : vector<16x16x8xf32> to vector<1x16x16x8xf32>
    tpu.vector_store %arg6[%c0_17, %c0_18, %c0_19, %c0_20], %92 {strides = array<i32>} : memref<1x16x16x8xf32, #tpu.memory_space<vmem>>, vector<1x16x16x8xf32>,
    return
  }
  func.func @transform_0(%arg0: i32) -> (i32, i32, i32, i32) {
    %c0_i32 = arith.constant 0 : i32
    %c0_i32_0 = arith.constant 0 : i32
    %c0_i32_1 = arith.constant 0 : i32
    %c0_i32_2 = arith.constant 0 : i32
    return %arg0, %c0_i32, %c0_i32_0, %c0_i32_1 : i32, i32, i32, i32
  }
  func.func @transform_1(%arg0: i32) -> (i32, i32) {
    %c0_i32 = arith.constant 0 : i32
    %c0_i32_0 = arith.constant 0 : i32
    %c0_i32_1 = arith.constant 0 : i32
    return %c0_i32, %c0_i32_0 : i32, i32
  }
  func.func @transform_2(%arg0: i32) -> (i32, i32) {
    %c0_i32 = arith.constant 0 : i32
    %c0_i32_0 = arith.constant 0 : i32
    %c0_i32_1 = arith.constant 0 : i32
    return %c0_i32, %c0_i32_0 : i32, i32
  }
  func.func @transform_3(%arg0: i32) -> (i32, i32) {
    %c0_i32 = arith.constant 0 : i32
    %c0_i32_0 = arith.constant 0 : i32
    %c0_i32_1 = arith.constant 0 : i32
    return %c0_i32, %c0_i32_0 : i32, i32
  }
  func.func @transform_4(%arg0: i32) -> (i32, i32) {
    %c0_i32 = arith.constant 0 : i32
    %c0_i32_0 = arith.constant 0 : i32
    %c0_i32_1 = arith.constant 0 : i32
    return %c0_i32, %c0_i32_0 : i32, i32
  }
  func.func @transform_5(%arg0: i32) -> (i32, i32, i32, i32) {
    %c0_i32 = arith.constant 0 : i32
    %c0_i32_0 = arith.constant 0 : i32
    %c0_i32_1 = arith.constant 0 : i32
    %c0_i32_2 = arith.constant 0 : i32
    return %arg0, %c0_i32, %c0_i32_0, %c0_i32_1 : i32, i32, i32, i32
  }
}

</mosaic_0001>

<bundles_post_ra>
// kernel: conv_op_forward.1
= control target key start
LH: loop header
LB: loop body
LE: loop exit
PB: predicated region body
PF: predicated region fallthrough
CT: control target
= control target key end

     0   :  { %s5796_s18 = smov 0   ;;  %s10273_s0 = inlined_call_operand.vmem [shape: f32[2,16,16,8], index: 0, kind: input, shape index: {}]   ;;  %s10274_s1 = inlined_call_operand.vmem [shape: bf16[8,8], index: 1, kind: input, shape index: {}]   ;;  %s10275_s2 = inlined_call_operand.vmem [shape: f32[1,8], index: 2, kind: input, shape index: {}]   ;;  %s10276_s3 = inlined_call_operand.vmem [shape: bf16[72,72], index: 3, kind: input, shape index: {}]   ;;  %s10277_s4 = inlined_call_operand.vmem [shape: f32[1,72], index: 4, kind: input, shape index: {}]   ;;  %s10278_s5 = inlined_call_operand.vmem [shape: f32[2,16,16,8], index: 5, kind: output, shape index: {}]  }
   0x1 LB: > { %s4917_s19 = sadd.s32 4294967295, %s5748_s18   ;;  %p4921_p0 = scmp.ge.s32.totalorder %s5748_s18, 1  ;;  %s5748_s18 = sphi %s5796_s18, %s15_s18  }
   0x2   : > { %p187_p1 = scmp.lt.s32.totalorder %s5748_s18, 3 }
   0x4   : > { %p188_p2 = pnand %p4921_p0, %p187_p1 }
   0x6   : > { %191 = sbr.rel (%p188_p2) target bundleno = 1903 (0x76f), region = 40 }
   0xd   : > { %v274_v0 = vld [vmem:[%s10274_s1] sm:$0xf]  ;;  %vm331_vm0 = vcmask 1043456   ;;  %p215_p3 = scmp.lt.s32.totalorder %s4917_s19, 1  ;;  %v5750_v2 = vmov 0.0   ;;  %s5751_s22 = smov 48  }
   0xe   : > { %5093 = vmatprep.subr.msk.bf16.mxu0 %vm331_vm0, %v274_v0  ;;  %v333_v1 = vsel %vm331_vm0, %v274_v0, 0  ;;  %1740 = vrot.lane.b32.xlu1 %v5750_v2, %s5751_s22  ;;  %v5812_v3 = vrot.slane %v5750_v2, 1  ;;  %vm282_vm1 = vcmask 64512   ;;  %s5752_s27 = smov 56   ;;  %v5829_v7 = vrot.slane %v5750_v2, 2  ;;  %s5753_s28 = smov 64  }
   0xf   : > { %5008 = vmatpush3.bf16.msra.mxu0 %v333_v1  ;;  %s11517_s19 = smov (!%p215_p3, %s4917_s19), 1  ;;  %vm528_vm2 = vcmask 1040384   ;;  %vm846_vm3 = vcmask 1046528   ;;  %s5754_s29 = smov 8   ;;  %vm1029_vm4 = vcmask 1045504   ;;  %vm1990_vm5 = vcmask 130048  }
  0x10   : > { %s4967_s23 = sshll.u32 %s11517_s19, 8  ;;  %s5755_s7 = smov 24   ;;  %vm2022_vm6 = vcmask 195584   ;;  %vm2055_vm7 = vcmask 261120   ;;  %vm2088_vm8 = vcmask 326656   ;;  %vm2121_vm9 = vcmask 392192  }
  0x11   : > { %s5820_s26 = scalar_lea.vmem %s10273_s0, %s4967_s23  ;;  %s5756_s8 = smov 32   ;;  %vm2154_vm10 = vcmask 457728   ;;  %vm2187_vm11 = vcmask 523264   ;;  %vm2279_vm12 = vcmask 588800  }
  0x12   : > { %v226_v4 = vld [vmem:[%s5820_s26] sm:$0xff]  ;;  %v227_v5 = vld [vmem:[%s5820_s26 + $0x8] sm:$0xff]  ;;  %v5825_v6 = vld [vmem:[%s5820_s26 + $0x10] sm:$0xff]  ;;  %1833 = vrot.lane.b32.xlu1 %v5812_v3, %s5752_s27  ;;  %s5757_s9 = smov 40   ;;  %s5758_s10 = smov 16  }
  0x13   : > { %v258_v8 = vpack.c.bf16 %v227_v5, %v226_v4  ;;  %v5832_v9 = vld [vmem:[%s5820_s26 + $0x18] sm:$0xff]  ;;  %v5835_v10 = vld [vmem:[%s5820_s26 + $0x20] sm:$0xff]  ;;  %v5838_v11 = vld [vmem:[%s5820_s26 + $0x28] sm:$0xff]  ;;  %v688_v16 = vrot.slane %v226_v4, 7  ;;  %v689_v19 = vrot.slane %v227_v5, 7  ;;  %v691_v21 = vrot.slane %v5825_v6, 7 }
  0x14   : > { %v259_v12 = vpack.c.bf16 %v5832_v9, %v5825_v6  ;;  %v260_v13 = vpack.c.bf16 %v5838_v11, %v5835_v10  ;;  %v5850_v14 = vld [vmem:[%s5820_s26 + $0x30] sm:$0xff]  ;;  %v5853_v15 = vld [vmem:[%s5820_s26 + $0x38] sm:$0xff]  ;;  %v5856_v17 = vld [vmem:[%s5820_s26 + $0x40] sm:$0xff]  ;;  %v694_v26 = vrot.slane %v5835_v10, 7  ;;  %v692_v37 = vrot.slane %v5832_v9, 7  ;;  %s5760_s30 = smov 112  }
  0x15   : > { %5009 = vmatprep.mubr.msk.bf16.mxu0 %vm282_vm1, %v258_v8  ;;  %v5859_v18 = vld [vmem:[%s5820_s26 + $0x48] sm:$0xff]  ;;  %v5862_v20 = vld [vmem:[%s5820_s26 + $0x90] sm:$0xff]  ;;  %v261_v22 = vpack.c.bf16 %v5853_v15, %v5850_v14  ;;  %v5868_v23 = vld [vmem:[%s5820_s26 + $0x98] sm:$0xff]  ;;  %v5883_v31 = vsel %vm528_vm2, 0.0, %v688_v16  ;;  %v5900_v38 = vsel %vm528_vm2, %v688_v16, %v689_v19  ;;  %v5918_v44 = vsel %vm528_vm2, %v689_v19, 0.0  ;;  %s5761_s6 = smov 104  }
  0x16   : > { %5010 = vmatmul.mubr.msk.bf16.vlgmr.msra.gmra.mrb[0].mxu0 %vm282_vm1, %v259_v12  ;;  %1926 = vrot.lane.b32.xlu1 %v5829_v7, %s5753_s28  ;;  %10579 = vst [vmem:[#allocation2_spill] sm:$0xff] %v5862_v20  ;;  %10580 = vst [vmem:[#allocation3_spill] sm:$0xff] %v5868_v23  ;;  %v10287_v24 = vrot.slane %v5862_v20, 7  ;;  %v5872_v25 = vld [vmem:[%s5820_s26 + $0xa0] sm:$0xff]  ;;  %v262_v27 = vpack.c.bf16 %v5859_v18, %v5856_v17  ;;  %v10290_v28 = vrot.slane %v5868_v23, 7  ;;  %v5879_v29 = vld [vmem:[%s5820_s26 + $0xa8] sm:$0xff] }
  0x17   : > { %5013 = vmatprep.mubr.msk.bf16.mxu0 %vm282_vm1, %v260_v13  ;;  %10581 = vst [vmem:[#allocation4_spill] sm:$0xff] %v5872_v25  ;;  %10582 = vst [vmem:[#allocation5_spill] sm:$0xff] %v5879_v29  ;;  %v10285_v30 = vrot.slane %v5872_v25, 7  ;;  %v5886_v32 = vld [vmem:[%s5820_s26 + $0x50] sm:$0xff]  ;;  %v5889_v33 = vld [vmem:[%s5820_s26 + $0x58] sm:$0xff]  ;;  %v10289_v34 = vrot.slane %v5879_v29, 7  ;;  %v5991_v6 = vsel %vm528_vm2, %v691_v21, %v692_v37 }
  0x18   : > { %10583 = vst [vmem:[#allocation6_spill] sm:$0xff] %v5883_v31  ;;  %v5893_v35 = vld [vmem:[%s5820_s26 + $0xb0] sm:$0xff]  ;;  %v5896_v36 = vld [vmem:[%s5820_s26 + $0xb8] sm:$0xff]  ;;  %10586 = vst [vmem:[#allocation9_spill] sm:$0xff] %v5900_v38  ;;  %v5907_v39 = vsel %vm528_vm2, %v10287_v24, %v10290_v28  ;;  %v5940_v51 = vsel %vm528_vm2, 0.0, %v691_v21  ;;  %v5945_v52 = vsel %vm528_vm2, 0.0, %v694_v26  ;;  %v263_v60 = vpack.c.bf16 %v5889_v33, %v5886_v32 }
  0x19   : > { %10584 = vst [vmem:[#allocation7_spill] sm:$0xff] %v5893_v35  ;;  %10585 = vst [vmem:[#allocation8_spill] sm:$0xff] %v5896_v36  ;;  %v10283_v40 = vrot.slane %v5893_v35, 7  ;;  %v10288_v41 = vrot.slane %v5896_v36, 7  ;;  %v5912_v42 = vld [vmem:[%s5820_s26 + $0xc0] sm:$0xff]  ;;  %v5915_v43 = vld [vmem:[%s5820_s26 + $0xc8] sm:$0xff]  ;;  %v5932_v47 = vsel %vm528_vm2, %v10285_v30, %v10289_v34 }
  0x1a   : > { %10587 = vst [vmem:[#allocation10_spill] sm:$0xff] %v5907_v39  ;;  %10588 = vst [vmem:[#allocation11_spill] sm:$0xff] %v5912_v42  ;;  %v5922_v45 = vld [vmem:[%s5820_s26 + $0x60] sm:$0xff]  ;;  %v5925_v46 = vld [vmem:[%s5820_s26 + $0x68] sm:$0xff]  ;;  %v10281_v48 = vrot.slane %v5912_v42, 7  ;;  %v10286_v49 = vrot.slane %v5915_v43, 7 }
  0x1b   : > { %10589 = vst [vmem:[#allocation12_spill] sm:$0xff] %v5915_v43  ;;  %10590 = vst [vmem:[#allocation13_spill] sm:$0xff] %v5918_v44  ;;  %v5937_v50 = vld [vmem:[%s5820_s26 + $0xd0] sm:$0xff]  ;;  %v5953_v53 = vsel %vm528_vm2, %v10283_v40, %v10288_v41  ;;  %v5956_v54 = vld [vmem:[%s5820_s26 + $0xd8] sm:$0xff]  ;;  %v697_v56 = vrot.slane %v5850_v14, 7  ;;  %v955_v59 = vrot.slane %v5900_v38, 1  ;;  %v264_v61 = vpack.c.bf16 %v5925_v46, %v5922_v45 }
  0x1c   : > { %10591 = vst [vmem:[#allocation14_spill] sm:$0xff] %v5932_v47  ;;  %10592 = vst [vmem:[#allocation15_spill] sm:$0xff] %v5937_v50  ;;  %v10280_v55 = vrot.slane %v5937_v50, 7  ;;  %v5965_v57 = vsel %vm528_vm2, %v10281_v48, %v10286_v49  ;;  %v10284_v58 = vrot.slane %v5956_v54, 7  ;;  %v957_v62 = vrot.slane %v5918_v44, 1  ;;  %v5976_v0 = vld [vmem:[%s5820_s26 + $0xe0] sm:$0xff] }
  0x1d   : > { %10593 = vst [vmem:[#allocation16_spill] sm:$0xff] %v5940_v51  ;;  %10594 = vst [vmem:[#allocation17_spill] sm:$0xff] %v5945_v52  ;;  %v954_v63 = vrot.slane %v5883_v31, 1  ;;  %v5979_v1 = vld [vmem:[%s5820_s26 + $0xe8] sm:$0xff]  ;;  %v10279_v4 = vrot.slane %v5976_v0, 7  ;;  %v6000_v12 = vsel %vm528_vm2, %v692_v37, 0.0 }
  0x1e   : > { %5014 = vmatmul.mubr.msk.bf16.gmra.mrb[4].mxu0 %vm282_vm1, %v261_v22  ;;  %10595 = vst [vmem:[#allocation18_spill] sm:$0xff] %v5953_v53  ;;  %10596 = vst [vmem:[#allocation19_spill] sm:$0xff] %v5956_v54  ;;  %v5986_v2 = vsel %vm528_vm2, %v10280_v55, %v10284_v58  ;;  %v10282_v5 = vrot.slane %v5979_v1, 7  ;;  %v5994_v8 = vsel %vm846_vm3, %v955_v59, %v957_v62  ;;  %v960_v13 = vrot.slane %v5991_v6, 1  ;;  %v6028_v62 = vld [vmem:[%s5820_s26 + $0x78] sm:$0xff] }
  0x1f   : > { %5017 = vmatprep.mubr.msk.bf16.mxu0 %vm282_vm1, %v262_v27  ;;  %10597 = vst [vmem:[#allocation20_spill] sm:$0xff] %v5965_v57  ;;  %10598 = vst [vmem:[#allocation21_spill] sm:$0xff] %v5976_v0  ;;  %v5997_v9 = vsel %vm846_vm3, %v954_v63, %v955_v59  ;;  %v700_v14 = vrot.slane %v5856_v17, 7  ;;  %2558 = vrot.lane.b32.xlu1 %v5994_v8, %s5754_s29  ;;  %v962_v19 = vrot.slane %v6000_v12, 1  ;;  %v959_v21 = vrot.slane %v5940_v51, 1  ;;  %v6025_v59 = vld [vmem:[%s5820_s26 + $0x70] sm:$0xff] }
  0x20   : > { %10599 = vst [vmem:[#allocation22_spill] sm:$0xff] %v5979_v1  ;;  %10600 = vst [vmem:[#allocation23_spill] sm:$0xff] %v5986_v2  ;;  %2556 = vrot.lane.b32.xlu0 %v5997_v9, %s5754_s29  ;;  %v6013_v16 = vsel %vm528_vm2, %v10279_v4, %v10282_v5  ;;  %v6018_v17 = vsel %vm528_vm2, 0.0, %v697_v56  ;;  %v703_v22 = vrot.slane %v5886_v32, 7  ;;  %v695_v27 = vrot.slane %v5838_v11, 7 }
  0x21   : > { %10601 = vst [vmem:[#allocation24_spill] sm:$0xff] %v5991_v6  ;;  %10602 = vst [vmem:[#allocation25_spill] sm:$0xff] %v5994_v8  ;;  %v698_v37 = vrot.slane %v5853_v15, 7  ;;  %v6031_v63 = vsel %vm846_vm3, %v960_v13, %v962_v19  ;;  %v6034_v4 = vsel %vm846_vm3, %v959_v21, %v960_v13  ;;  %v964_v55 = vrot.slane %v5945_v52, 1  ;;  %v6054_v19 = vld [vmem:[%s5820_s26 + $0x80] sm:$0xff]  ;;  %v6057_v21 = vld [vmem:[%s5820_s26 + $0x88] sm:$0xff] }
  0x22   : > { %10603 = vst [vmem:[#allocation26_spill] sm:$0xff] %v5997_v9  ;;  %10604 = vst [vmem:[#allocation27_spill] sm:$0xff] %v6000_v12  ;;  %v701_v32 = vrot.slane %v5859_v18, 7  ;;  %v6042_v11 = vsel %vm528_vm2, %v694_v26, %v695_v27  ;;  %v6045_v15 = vsel %vm528_vm2, %v695_v27, 0.0  ;;  %v265_v27 = vpack.c.bf16 %v6028_v62, %v6025_v59  ;;  %v5735_v12 = vld [vmem:[%s10276_s3] sm:$0xff]  }
  0x23   : > { %10605 = vst [vmem:[#allocation28_spill] sm:$0xff] %v6013_v16  ;;  %10606 = vst [vmem:[#allocation29_spill] sm:$0xff] %v6018_v17  ;;  %v6051_v13 = vsel %vm528_vm2, %v698_v37, 0.0  ;;  %2562 = vrot.lane.b32.xlu1 %v6031_v63, %s5754_s29  ;;  %v965_v10 = vrot.slane %v6042_v11, 1  ;;  %v967_v18 = vrot.slane %v6045_v15, 1  ;;  %v704_v48 = vrot.slane %v5889_v33, 7  ;;  %5041 = vmatprep.subr.bf16.mxu0 %v5735_v12 }
  0x24   : > { %10607 = vst [vmem:[#allocation30_spill] sm:$0xff] %v6031_v63  ;;  %10608 = vst [vmem:[#allocation31_spill] sm:$0xff] %v6034_v4  ;;  %2560 = vrot.lane.b32.xlu0 %v6034_v4, %s5754_s29  ;;  %v6081_v58 = vsel %vm528_vm2, %v700_v14, %v701_v32  ;;  %v6084_v30 = vsel %vm528_vm2, %v701_v32, 0.0  ;;  %v266_v49 = vpack.c.bf16 %v6057_v21, %v6054_v19  ;;  %v706_v24 = vrot.slane %v5922_v45, 7 }
  0x25   : > { %10609 = vst [vmem:[#allocation32_spill] sm:$0xff] %v6042_v11  ;;  %10610 = vst [vmem:[#allocation33_spill] sm:$0xff] %v6045_v15  ;;  %v6075_v5 = vsel %vm846_vm3, %v965_v10, %v967_v18  ;;  %v6078_v40 = vsel %vm846_vm3, %v964_v55, %v965_v10  ;;  %v975_v32 = vrot.slane %v6081_v58, 1  ;;  %v977_v10 = vrot.slane %v6084_v30, 1  ;;  %5042 = vmatpush3.bf16.msra.mxu0 %v5735_v12 }
  0x26   : > { %5018 = vmatmul.mubr.msk.bf16.gmra.mrb[8].mxu0 %vm282_vm1, %v263_v60  ;;  %v6048_v60 = vsel %vm528_vm2, %v697_v56, %v698_v37  ;;  %10612 = vst [vmem:[#allocation35_spill] sm:$0xff] %v6051_v13  ;;  %v972_v56 = vrot.slane %v6051_v13, 1  ;;  %v969_v37 = vrot.slane %v6018_v17, 1  ;;  %10614 = vst [vmem:[#allocation37_spill] sm:$0xff] %v6075_v5  ;;  %v6103_v45 = vsel %vm528_vm2, %v703_v22, %v704_v48 }
  0x27   : > { %5021 = vmatprep.mubr.msk.bf16.mxu0 %vm282_vm1, %v264_v61  ;;  %10611 = vst [vmem:[#allocation34_spill] sm:$0xff] %v6048_v60  ;;  %v970_v26 = vrot.slane %v6048_v60, 1  ;;  %v6068_v61 = vsel %vm528_vm2, 0.0, %v700_v14  ;;  %10615 = vst [vmem:[#allocation38_spill] sm:$0xff] %v6078_v40  ;;  %2566 = vrot.lane.b32.xlu1 %v6075_v5, %s5754_s29  ;;  %v6106_v18 = vsel %vm528_vm2, 0.0, %v703_v22  ;;  %v707_v41 = vrot.slane %v5925_v46, 7 }
  0x28   : > { %10613 = vst [vmem:[#allocation36_spill] sm:$0xff] %v6068_v61  ;;  %10616 = vst [vmem:[#allocation39_spill] sm:$0xff] %v6081_v58  ;;  %2564 = vrot.lane.b32.xlu0 %v6078_v40, %s5754_s29  ;;  %v974_v55 = vrot.slane %v6068_v61, 1  ;;  %v980_v22 = vrot.slane %v6103_v45, 1  ;;  %5083 = vmatprep.subr.bf16.mxu1 %v5735_v12 }
  0x29   : > { %10617 = vst [vmem:[#allocation40_spill] sm:$0xff] %v6084_v30  ;;  %v6094_v33 = vsel %vm846_vm3, %v970_v26, %v972_v56  ;;  %v6098_v14 = vsel %vm846_vm3, %v969_v37, %v970_v26  ;;  %10620 = vst [vmem:[#allocation43_spill] sm:$0xff] %v6103_v45  ;;  %v6110_v56 = vsel %vm528_vm2, %v704_v48, 0.0  ;;  %v6115_v26 = vsel %vm528_vm2, 0.0, %v706_v24  ;;  %5088 = vmatpush3.bf16.msra.mxu1 %v5735_v12 }
  0x2a   : > { %10618 = vst [vmem:[#allocation41_spill] sm:$0xff] %v6094_v33  ;;  %10619 = vst [vmem:[#allocation42_spill] sm:$0xff] %v6098_v14  ;;  %v6126_v48 = vsel %vm846_vm3, %v974_v55, %v975_v32  ;;  %v982_v46 = vrot.slane %v6110_v56, 1  ;;  %v267_v37 = vpack.c.bf16 %v5868_v23, %v5862_v20  ;;  %v6133_v34 = vsel %vm528_vm2, %v706_v24, %v707_v41 }
  0x2b   : > { %10621 = vst [vmem:[#allocation44_spill] sm:$0xff] %v6106_v18  ;;  %10622 = vst [vmem:[#allocation45_spill] sm:$0xff] %v6110_v56  ;;  %2570 = vrot.lane.b32.xlu1 %v6094_v33, %s5754_s29  ;;  %v6136_v28 = vsel %vm528_vm2, %v707_v41, 0.0  ;;  %v984_v55 = vrot.slane %v6115_v26, 1  ;;  %v985_v41 = vrot.slane %v6133_v34, 1 }
  0x2c   : > { %10623 = vst [vmem:[#allocation46_spill] sm:$0xff] %v6115_v26  ;;  %2568 = vrot.lane.b32.xlu0 %v6098_v14, %s5754_s29  ;;  %10625 = vst [vmem:[#allocation48_spill] sm:$0xff] %v6126_v48  ;;  %v987_v14 = vrot.slane %v6136_v28, 1 }
  0x2d   : > { %10626 = vst [vmem:[#allocation49_spill] sm:$0xff] %v6133_v34  ;;  %10627 = vst [vmem:[#allocation50_spill] sm:$0xff] %v6136_v28 }
  0x2e   : > { %5022 = vmatmul.mubr.msk.bf16.gmra.mrb[12].mxu0 %vm282_vm1, %v265_v27  ;;  %v6123_v27 = vsel %vm846_vm3, %v975_v32, %v977_v10  ;;  %v268_v10 = vpack.c.bf16 %v5879_v29, %v5872_v25  ;;  %v6146_v32 = vsel %vm846_vm3, %v980_v22, %v982_v46  ;;  %v6160_v46 = vsel %vm846_vm3, %v985_v41, %v987_v14 }
  0x2f   : > { %5025 = vmatprep.mubr.msk.bf16.mxu0 %vm282_vm1, %v266_v49  ;;  %10624 = vst [vmem:[#allocation47_spill] sm:$0xff] %v6123_v27  ;;  %v979_v49 = vrot.slane %v6106_v18, 1  ;;  %2574 = vrot.lane.b32.xlu1 %v6123_v27, %s5754_s29  ;;  %10628 = vst [vmem:[#allocation51_spill] sm:$0xff] %v6146_v32  ;;  %v271_v14 = vpack.c.bf16 %v5956_v54, %v5937_v50 }
  0x30   : > { %2572 = vrot.lane.b32.xlu0 %v6126_v48, %s5754_s29  ;;  %10630 = vst [vmem:[#allocation53_spill] sm:$0xff] %v6160_v46  ;;  %v710_v48 = vrot.slane %v6028_v62, 7 }
  0x31   : > { %v6149_v24 = vsel %vm846_vm3, %v979_v49, %v980_v22  ;;  %v6163_v22 = vsel %vm846_vm3, %v984_v55, %v985_v41  ;;  %v269_v49 = vpack.c.bf16 %v5896_v36, %v5893_v35  ;;  %v256_v55 = vld [vmem:[%s5820_s26 + $0xf0] sm:$0xff]  ;;  %v257_v41 = vld [vmem:[%s5820_s26 + $0xf8] sm:$0xff] }
  0x32   : > { %10629 = vst [vmem:[#allocation52_spill] sm:$0xff] %v6149_v24  ;;  %10631 = vst [vmem:[#allocation54_spill] sm:$0xff] %v6163_v22 }
  0x33   : > { %2578 = vrot.lane.b32.xlu1 %v6146_v32, %s5754_s29 }
  0x34   : > { %2576 = vrot.lane.b32.xlu0 %v6149_v24, %s5754_s29  ;;  %v273_v24 = vpack.c.bf16 %v257_v41, %v256_v55  ;;  %v713_v41 = vrot.slane %v6057_v21, 7 }
  0x36   : > { %5026 = vmatmul.mubr.msk.bf16.gmra.mrb[16].mxu0 %vm282_vm1, %v267_v37  ;;  %v270_v37 = vpack.c.bf16 %v5915_v43, %v5912_v42 }
  0x37   : > { %5029 = vmatprep.mubr.msk.bf16.mxu0 %vm282_vm1, %v268_v10  ;;  %2582 = vrot.lane.b32.xlu1 %v6160_v46, %s5754_s29  ;;  %v272_v10 = vpack.c.bf16 %v5979_v1, %v5976_v0 }
  0x38   : > { %2580 = vrot.lane.b32.xlu0 %v6163_v22, %s5754_s29  ;;  %v709_v22 = vrot.slane %v6025_v59, 7 }
  0x3a   : > { %v6191_v46 = vsel %vm528_vm2, %v709_v22, %v710_v48 }
  0x3b   : > { %10633 = vst [vmem:[#allocation56_spill] sm:$0xff] %v6191_v46 }
  0x3e   : > { %5030 = vmatmul.mubr.msk.bf16.gmra.mrb[20].mxu0 %vm282_vm1, %v269_v49  ;;  %v6186_v49 = vsel %vm528_vm2, 0.0, %v709_v22  ;;  %v6217_v22 = vsel %vm528_vm2, %v713_v41, 0.0 }
  0x3f   : > { %5033 = vmatprep.mubr.msk.bf16.mxu0 %vm282_vm1, %v270_v37  ;;  %10632 = vst [vmem:[#allocation55_spill] sm:$0xff] %v6186_v49  ;;  %v712_v37 = vrot.slane %v6054_v19, 7  ;;  %10639 = vst [vmem:[#allocation62_spill] sm:$0xff] %v6217_v22 }
  0x41   : > { %v6200_v59 = vsel %vm528_vm2, 0.0, %v712_v37 }
  0x42   : > { %10635 = vst [vmem:[#allocation58_spill] sm:$0xff] %v6200_v59  ;;  %v994_v32 = vrot.slane %v6200_v59, 1 }
  0x46   : > { %5034 = vmatmul.mubr.msk.bf16.gmra.mrb[24].mxu0 %vm282_vm1, %v271_v14  ;;  %v6194_v14 = vsel %vm528_vm2, %v710_v48, 0.0  ;;  %v6214_v48 = vsel %vm528_vm2, %v712_v37, %v713_v41  ;;  %v6235_v37 = vld [vmem:[%s10275_s2] ss:$0 sm:$0xff] }
  0x47   : > { %5037 = vmatprep.mubr.msk.bf16.mxu0 %vm282_vm1, %v272_v10  ;;  %10634 = vst [vmem:[#allocation57_spill] sm:$0xff] %v6194_v14  ;;  %v990_v10 = vrot.slane %v6191_v46, 1  ;;  %v992_v55 = vrot.slane %v6194_v14, 1  ;;  %10638 = vst [vmem:[#allocation61_spill] sm:$0xff] %v6214_v48  ;;  %v995_v21 = vrot.slane %v6214_v48, 1 }
  0x49   : > { %v6204_v19 = vsel %vm846_vm3, %v990_v10, %v992_v55  ;;  %v997_v55 = vrot.slane %v6217_v22, 1 }
  0x4a   : > { %10636 = vst [vmem:[#allocation59_spill] sm:$0xff] %v6204_v19  ;;  %2586 = vrot.lane.b32.xlu1 %v6204_v19, %s5754_s29 }
  0x4e   : > { %5038 = vmatmul.mubr.msk.bf16.gmra.mrb[28].mxu0 %vm282_vm1, %v273_v24  ;;  %v989_v24 = vrot.slane %v6186_v49, 1 }
  0x50   : > { %v6207_v62 = vsel %vm846_vm3, %v989_v24, %v990_v10  ;;  %v6223_v10 = vsel %vm846_vm3, %v995_v21, %v997_v55  ;;  %v6226_v24 = vsel %vm846_vm3, %v994_v32, %v995_v21 }
  0x51   : > { %10637 = vst [vmem:[#allocation60_spill] sm:$0xff] %v6207_v62  ;;  %2584 = vrot.lane.b32.xlu0 %v6207_v62, %s5754_s29  ;;  %10640 = vst [vmem:[#allocation63_spill] sm:$0xff] %v6223_v10  ;;  %2590 = vrot.lane.b32.xlu1 %v6223_v10, %s5754_s29 }
  0x52   : > { %10641 = vst [vmem:[#allocation64_spill] sm:$0xff] %v6226_v24 }
  0x55   : > { %2588 = vrot.lane.b32.xlu0 %v6226_v24, %s5754_s29 }
  0x80   : > { %v6514_v35 = vpop.permute.xlu1 %1740 }
  0x81   : > { %10654 = vst [vmem:[#allocation71_spill] sm:$0xff] %v6514_v35 }
  0xe9   : > { %v5011_v41 = vpop.f32.mrb[0].mxu0 }
  0xea   : > { %v378_v62 = vadd.f32 %v5011_v41, %v6235_v37  ;;  %v369_v19 = vpop.f32.mrb[1].mxu0 }
  0xeb   : > { %v370_v55 = vadd.f32 %v6235_v37, %v369_v19  ;;  %v5012_v40 = vpop.f32.mrb[2].mxu0 }
  0xec   : > { %v532_v32 = vrot.slane %v378_v62, 7  ;;  %v381_v21 = vadd.f32 %v5012_v40, %v6235_v37  ;;  %v372_v27 = vpop.f32.mrb[3].mxu0 }
  0xed   : > { %v373_v10 = vadd.f32 %v6235_v37, %v372_v27  ;;  %v529_v33 = vrot.slane %v370_v55, 7 }
  0xee   : > { %v533_v4 = vrot.slane %v381_v21, 7  ;;  %v6242_v24 = vsel %vm528_vm2, 0.0, %v532_v32 }
  0xef   : > { %v530_v5 = vrot.slane %v373_v10, 7  ;;  %v854_v40 = vrot.slane %v6242_v24, 1  ;;  %v1037_v27 = vrot.slane %v6242_v24, 2  ;;  %v6257_v55 = vsel %vm528_vm2, 0.0, %v529_v33 }
  0xf0   : > { %v6245_v63 = vsel %vm528_vm2, %v532_v32, %v533_v4  ;;  %v641_v41 = vsel %vm528_vm2, %v533_v4, 0.0  ;;  %v849_v34 = vrot.slane %v6257_v55, 1 }
  0xf1   : > { %v857_v9 = vrot.slane %v641_v41, 1  ;;  %v6249_v19 = vsel %vm528_vm2, %v529_v33, %v530_v5  ;;  %v5015_v62 = vpop.f32.mrb[4].mxu0  ;;  %v5125_v10 = vpack.i.bf16 %v6245_v63, %v6242_v24  ;;  %v855_v59 = vrot.slane %v6245_v63, 1 }
  0xf2   : > { %v394_v21 = vadd.f32 %v5015_v62, %v6235_v37  ;;  %v385_v8 = vpop.f32.mrb[5].mxu0  ;;  %v6264_v49 = vsel %vm528_vm2, %v530_v5, 0.0  ;;  %v1038_v48 = vrot.slane %v6245_v63, 2 }
  0xf3   : > { %v6260_v4 = vadd.f32 %v6235_v37, %v385_v8  ;;  %v5016_v32 = vpop.f32.mrb[6].mxu0  ;;  %5126 = vrot.lane.b32.xlu0 %v5125_v10, %s5751_s22  ;;  %5121 = vrot.lane.b32.xlu1 %v5125_v10, %s5755_s7  ;;  %v6275_v18 = vsel %vm846_vm3, %v854_v40, %v855_v59  ;;  %v6278_v5 = vsel %vm846_vm3, %v855_v59, %v857_v9  ;;  %v1035_v10 = vrot.slane %v6264_v49, 2 }
  0xf4   : > { %v538_v26 = vrot.slane %v394_v21, 7  ;;  %v397_v62 = vadd.f32 %v5016_v32, %v6235_v37  ;;  %v388_v22 = vpop.f32.mrb[7].mxu0  ;;  %v1040_v21 = vrot.slane %v641_v41, 2  ;;  %v5135_v32 = vpack.i.bf16 %v6278_v5, %v6275_v18 }
  0xf5   : > { %v535_v33 = vrot.slane %v6260_v4, 7  ;;  %v6272_v8 = vadd.f32 %v6235_v37, %v388_v22  ;;  %v5130_v4 = vpack.i.bf16 %v6249_v19, %v6257_v55  ;;  %v1039_v9 = vsel %vm1029_vm4, %v1037_v27, %v1038_v48 }
  0xf6   : > { %v539_v61 = vrot.slane %v397_v62, 7  ;;  %v1033_v59 = vrot.slane %v6249_v19, 2  ;;  %v6299_v62 = vsel %vm1029_vm4, %v1038_v48, %v1040_v21  ;;  %v850_v48 = vrot.slane %v6249_v19, 1 }
  0xf7   : > { %v10344_v14 = vrot.slane %v6272_v8, 7  ;;  %5131 = vrot.lane.b32.xlu0 %v5130_v4, %s5755_s7  ;;  %5136 = vrot.lane.b32.xlu1 %v5135_v32, %s5756_s8  ;;  %v5140_v28 = vpack.i.bf16 %v6299_v62, %v1039_v9  ;;  %v852_v52 = vrot.slane %v6264_v49, 1  ;;  %v10646_v0 = vrot.slane %v6272_v8, 7  ;;  %v5736_v8 = vld [vmem:[%s10276_s3 + $0x8] sm:$0xff]  }
  0xf8   : > { %v6287_v22 = vsel %vm528_vm2, %v538_v26, %v539_v61  ;;  %v6330_v30 = vsel %vm846_vm3, %v849_v34, %v850_v48  ;;  %5043 = vmatprep.subr.bf16.mxu0 %v5736_v8  ;;  %5084 = vmatprep.subr.bf16.mxu1 %v5736_v8 }
  0xf9   : > { %v6295_v41 = vsel %vm528_vm2, %v535_v33, %v10344_v14  ;;  %v5019_v40 = vpop.f32.mrb[8].mxu0  ;;  %v6308_v14 = vsel %vm1029_vm4, %v1033_v59, %v1035_v10  ;;  %v6324_v10 = vsel %vm528_vm2, 0.0, %v538_v26  ;;  %v865_v51 = vrot.slane %v6287_v22, 1  ;;  %5044 = vmatpush3.bf16.msra.mxu0 %v5736_v8  ;;  %5089 = vmatpush3.bf16.msra.mxu1 %v5736_v8 }
  0xfa   : > { %v401_v46 = vpop.f32.mrb[9].mxu0  ;;  %v6303_v4 = vadd.f32 %v5019_v40, %v6235_v37  ;;  %v5170_v49 = vpack.i.bf16 %v1039_v9, %v6308_v14  ;;  %v853_v13 = vsel %vm846_vm3, %v850_v48, %v852_v52  ;;  %v1047_v15 = vrot.slane %v6324_v10, 2 }
  0xfb   : > { %v5020_v27 = vpop.f32.mrb[10].mxu0  ;;  %5146 = vrot.lane.b32.xlu0 %v5135_v32, %s5752_s27  ;;  %v6311_v17 = vadd.f32 %v6235_v37, %v401_v46  ;;  %5141 = vrot.lane.b32.xlu1 %v5140_v28, %s5757_s9  ;;  %v643_v46 = vsel %vm528_vm2, %v539_v61, 0.0  ;;  %v6339_v61 = vpack.i.bf16 %v6287_v22, %v6324_v10  ;;  %v5160_v52 = vpack.i.bf16 %v6275_v18, %v853_v13 }
  0xfc   : > { %v404_v21 = vpop.f32.mrb[11].mxu0  ;;  %v6318_v56 = vadd.f32 %v5020_v27, %v6235_v37  ;;  %v10642_v34 = vrot.slane %v6303_v4, 7  ;;  %v867_v45 = vrot.slane %v643_v46, 1  ;;  %v1050_v11 = vrot.slane %v643_v46, 2 }
  0xfd   : > { %v6321_v32 = vadd.f32 %v6235_v37, %v404_v21  ;;  %v864_v21 = vrot.slane %v6324_v10, 1 }
  0xfe   : > { %v10362_v40 = vrot.slane %v6318_v56, 7  ;;  %v6376_v48 = vsel %vm846_vm3, %v865_v51, %v867_v45 }
  0xff   : > { %v10366_v27 = vrot.slane %v6321_v32, 7  ;;  %5151 = vrot.lane.b32.xlu0 %v5140_v28, %s5753_s28  ;;  %5171 = vrot.lane.b32.xlu1 %v5170_v49, %s5758_s10  ;;  %v5155_v28 = vpack.i.bf16 %v6330_v30, %v5812_v3  ;;  %v10644_v49 = vrot.slane %v6311_v17, 7  ;;  %v1032_v3 = vrot.slane %v6257_v55, 2 }
 0x100   : > { %v6346_v26 = vsel %vm528_vm2, %v10642_v34, %v10362_v40  ;;  %v6360_v34 = vsel %vm528_vm2, 0.0, %v535_v33  ;;  %v6373_v33 = vsel %vm846_vm3, %v864_v21, %v865_v51 }
 0x101   : > { %10643 = vst [vmem:[#allocation65_spill] sm:$0xff] %v6346_v26  ;;  %v5023_v9 = vpop.f32.mrb[12].mxu0  ;;  %v6355_v58 = vsel %vm528_vm2, %v10644_v49, %v10366_v27  ;;  %v6369_v49 = vpack.i.bf16 %v6295_v41, %v6360_v34  ;;  %v1034_v27 = vsel %vm1029_vm4, %v1032_v3, %v1033_v59  ;;  %v6385_v46 = vpack.i.bf16 %v6376_v48, %v6373_v33 }
 0x102   : > { %10645 = vst [vmem:[#allocation66_spill] sm:$0xff] %v6355_v58  ;;  %v417_v31 = vpop.f32.mrb[13].mxu0  ;;  %v6388_v18 = vadd.f32 %v5023_v9, %v6235_v37  ;;  %v5165_v51 = vpack.i.bf16 %v1034_v27, %v5829_v7  ;;  %v642_v9 = vsel %vm528_vm2, %v10646_v0, 0.0  ;;  %v5180_v12 = vpack.i.bf16 %v6308_v14, %v1034_v27 }
 0x103   : > { %v5024_v60 = vpop.f32.mrb[14].mxu0  ;;  %5156 = vrot.lane.b32.xlu0 %v5155_v28, %s5754_s29  ;;  %5186 = vrot.lane.b32.xlu1 %v6339_v61, %s5755_s7  ;;  %v1048_v28 = vrot.slane %v6287_v22, 2  ;;  %v6398_v3 = vadd.f32 %v6235_v37, %v417_v31  ;;  %v860_v31 = vrot.slane %v6295_v41, 1  ;;  %v862_v44 = vrot.slane %v642_v9, 1 }
 0x104   : > { %v420_v40 = vpop.f32.mrb[15].mxu0  ;;  %v6405_v6 = vadd.f32 %v5024_v60, %v6235_v37  ;;  %v10647_v0 = vrot.slane %v6388_v18, 7  ;;  %v1043_v14 = vrot.slane %v6295_v41, 2  ;;  %v1058_v57 = vrot.slane %v6346_v26, 2 }
 0x105   : > { %v6392_v45 = vsel %vm1029_vm4, %v1047_v15, %v1048_v28  ;;  %v6395_v59 = vsel %vm1029_vm4, %v1048_v28, %v1050_v11  ;;  %v6408_v7 = vadd.f32 %v6235_v37, %v420_v40  ;;  %v859_v11 = vrot.slane %v6360_v34, 1 }
 0x106   : > { %v6421_v60 = vpack.i.bf16 %v6395_v59, %v6392_v45  ;;  %v10377_v40 = vrot.slane %v6405_v6, 7  ;;  %v5175_v28 = vpack.i.bf16 %v853_v13, %v6330_v30  ;;  %v10650_v13 = vrot.slane %v6398_v3, 7 }
 0x107   : > { %5161 = vrot.lane.b32.xlu0 %v5160_v52, %s5754_s29  ;;  %5201 = vrot.lane.b32.xlu1 %v6369_v49, %s5751_s22  ;;  %v10649_v30 = vrot.slane %v6408_v7, 7 }
 0x108   : > { %v6434_v50 = vsel %vm528_vm2, %v10647_v0, %v10377_v40  ;;  %v5737_v40 = vld [vmem:[%s10276_s3 + $0x10] sm:$0xff]  }
 0x109   : > { %v5027_v21 = vpop.f32.mrb[16].mxu0  ;;  %10648 = vst [vmem:[#allocation67_spill] sm:$0xff] %v6434_v50  ;;  %v6443_v16 = vsel %vm528_vm2, %v10650_v13, %v10649_v30  ;;  %v1045_v30 = vrot.slane %v642_v9, 2  ;;  %v863_v13 = vsel %vm846_vm3, %v860_v31, %v862_v44  ;;  %5045 = vmatprep.subr.bf16.mxu0 %v5737_v40  ;;  %5085 = vmatprep.subr.bf16.mxu1 %v5737_v40 }
 0x10a   : > { %v433_v52 = vpop.f32.mrb[17].mxu0  ;;  %10651 = vst [vmem:[#allocation68_spill] sm:$0xff] %v6443_v16  ;;  %v6455_v1 = vadd.f32 %v5027_v21, %v6235_v37  ;;  %v5230_v27 = vpack.i.bf16 %v6373_v33, %v863_v13  ;;  %5046 = vmatpush3.bf16.msra.mxu0 %v5737_v40  ;;  %5090 = vmatpush3.bf16.msra.mxu1 %v5737_v40  ;;  %v6497_v40 = vld [vmem:[%s10276_s3 + $0x20] ss:$0 sps:$4 sm:$0xff]  }
 0x10b   : > { %v5028_v15 = vpop.f32.mrb[18].mxu0  ;;  %5166 = vrot.lane.b32.xlu0 %v5165_v51, %s5758_s10  ;;  %5206 = vrot.lane.b32.xlu1 %v6385_v46, %s5756_s8  ;;  %v861_v51 = vsel %vm846_vm3, %v859_v11, %v860_v31  ;;  %v6465_v44 = vadd.f32 %v6235_v37, %v433_v52  ;;  %v1046_v31 = vsel %vm1029_vm4, %v1043_v14, %v1045_v30 }
 0x10c   : > { %v436_v38 = vpop.f32.mrb[19].mxu0  ;;  %v10381_v9 = vrot.slane %v6455_v1, 7  ;;  %v6468_v21 = vadd.f32 %v5028_v15, %v6235_v37 }
 0x10d   : > { %v6474_v8 = vadd.f32 %v6235_v37, %v436_v38  ;;  %v10384_v33 = vrot.slane %v6465_v44, 7 }
 0x10e   : > { %v10380_v52 = vrot.slane %v6468_v21, 7 }
 0x10f   : > { %5176 = vrot.lane.b32.xlu0 %v5175_v28, %s5756_s8  ;;  %5211 = vrot.lane.b32.xlu1 %v6421_v60, %s5757_s9  ;;  %v5225_v28 = vpack.i.bf16 %v861_v51, %v6278_v5  ;;  %v5738_v5 = vld [vmem:[%s10276_s3 + $0x18] sm:$0xff]   ;;  %v10383_v15 = vrot.slane %v6474_v8, 7 }
 0x110   : > { %5047 = vmatprep.subr.bf16.mxu0 %v5738_v5  ;;  %5086 = vmatprep.subr.bf16.mxu1 %v5738_v5  ;;  %v6490_v38 = vsel %vm528_vm2, %v10381_v9, %v10380_v52  ;;  %v1042_v52 = vrot.slane %v6360_v34, 2  ;;  %v5255_v9 = vpack.i.bf16 %v863_v13, %v861_v51  ;;  %v10657_v51 = vrot.slane %v6318_v56, 7 }
 0x111   : > { %v5031_v42 = vpop.f32.mrb[20].mxu0  ;;  %10652 = vst [vmem:[#allocation69_spill] sm:$0xff] %v6490_v38  ;;  %5048 = vmatpush3.bf16.msra.mxu0 %v5738_v5  ;;  %5091 = vmatpush3.bf16.msra.mxu1 %v5738_v5 }
 0x112   : > { %v449_v0 = vpop.f32.mrb[21].mxu0  ;;  %5094 = vmatprep.subr.msk.bf16.mxu0 %vm331_vm0, %v6497_v40  ;;  %5095 = vmatprep.subr.msk.bf16.mxu1 %vm331_vm0, %v6497_v40  ;;  %v645_v13 = vsel %vm528_vm2, %v10657_v51, 0.0  ;;  %v1044_v5 = vsel %vm1029_vm4, %v1042_v52, %v1043_v14  ;;  %v10659_v51 = vrot.slane %v6311_v17, 7 }
 0x113   : > { %v5032_v11 = vpop.f32.mrb[22].mxu0  ;;  %5181 = vrot.lane.b32.xlu0 %v5180_v12, %s5757_s9  ;;  %5226 = vrot.lane.b32.xlu1 %v5225_v28, %s5754_s29  ;;  %v6534_v35 = vadd.f32 %v6235_v37, %v449_v0  ;;  %v5235_v14 = vpack.i.bf16 %v1044_v5, %v6299_v62  ;;  %v1060_v54 = vrot.slane %v645_v13, 2 }
 0x114   : > { %v452_v2 = vpop.f32.mrb[23].mxu0 }
 0x115   : > { %v6595_v36 = vsel %vm1029_vm4, %v1058_v57, %v1060_v54 }
 0x117   : > { %5191 = vrot.lane.b32.xlu0 %v6339_v61, %s5751_s22  ;;  %5231 = vrot.lane.b32.xlu1 %v5230_v27, %s5754_s29  ;;  %v5240_v61 = vpack.i.bf16 %v6392_v45, %v1046_v31  ;;  %v6509_v45 = vsel %vm528_vm2, %v10384_v33, %v10383_v15  ;;  %v5260_v33 = vpack.i.bf16 %v1046_v31, %v1044_v5  ;;  %v6550_v31 = vpop.permute.xlu1 %1833 }
 0x118   : > { %10653 = vst [vmem:[#allocation70_spill] sm:$0xff] %v6509_v45  ;;  %10658 = vst [vmem:[#allocation73_spill] sm:$0xff] %v6550_v31 }
 0x119   : > { %v6479_v12 = vpop.f32.mrb[24].mxu0 }
 0x11a   : > { %v6482_v28 = vpop.f32.mrb[25].mxu0 }
 0x11b   : > { %v6492_v30 = vpop.f32.mrb[26].mxu0  ;;  %5196 = vrot.lane.b32.xlu0 %v6369_v49, %s5755_s7  ;;  %5241 = vrot.lane.b32.xlu1 %v5240_v61, %s5758_s10  ;;  %v6521_v49 = vadd.f32 %v5031_v42, %v6235_v37  ;;  %v10655_v61 = vrot.slane %v6303_v4, 7  ;;  %v6540_v4 = vadd.f32 %v5032_v11, %v6235_v37  ;;  %v6559_v42 = vsel %vm528_vm2, 0.0, %v10659_v51  ;;  %v6585_v43 = vpop.permute.xlu1 %1926 }
 0x11c   : > { %v6501_v27 = vpop.f32.mrb[27].mxu0  ;;  %10660 = vst [vmem:[#allocation74_spill] sm:$0xff] %v6559_v42  ;;  %v5280_v17 = vpack.i.bf16 %v6355_v58, %v6559_v42  ;;  %10664 = vst [vmem:[#allocation75_spill] sm:$0xff] %v6585_v43  ;;  %v6607_v43 = vadd.f32 %v6479_v12, %v6235_v37  ;;  %v6611_v54 = vadd.f32 %v6235_v37, %v6482_v28 }
 0x11d   : > { %v6527_v15 = vsel %vm528_vm2, 0.0, %v10655_v61  ;;  %v877_v61 = vrot.slane %v645_v13, 1  ;;  %v10389_v52 = vrot.slane %v6540_v4, 7  ;;  %v10661_v62 = vrot.slane %v6521_v49, 7 }
 0x11e   : > { %10656 = vst [vmem:[#allocation72_spill] sm:$0xff] %v6527_v15  ;;  %v874_v56 = vrot.slane %v6527_v15, 1  ;;  %v5265_v0 = vpack.i.bf16 %v6346_v26, %v6527_v15  ;;  %v1057_v11 = vrot.slane %v6527_v15, 2 }
 0x11f   : > { %5216 = vrot.lane.b32.xlu0 %v6385_v46, %s5752_s27  ;;  %5256 = vrot.lane.b32.xlu1 %v5255_v9, %s5752_s27  ;;  %v6543_v46 = vadd.f32 %v6235_v37, %v452_v2  ;;  %v6567_v5 = vsel %vm528_vm2, %v10661_v62, %v10389_v52  ;;  %v10663_v52 = vrot.slane %v6534_v35, 7 }
 0x120   : > { %v1059_v20 = vsel %vm1029_vm4, %v1057_v11, %v1058_v57  ;;  %v6615_v57 = vadd.f32 %v6492_v30, %v6235_v37  ;;  %v1053_v30 = vrot.slane %v6355_v58, 2 }
 0x121   : > { %v5039_v31 = vpop.f32.mrb[28].mxu0  ;;  %v10662_v62 = vrot.slane %v6543_v46, 7 }
 0x122   : > { %v481_v51 = vpop.f32.mrb[29].mxu0  ;;  %v10398_v28 = vrot.slane %v6615_v57, 7 }
 0x123   : > { %5221 = vrot.lane.b32.xlu0 %v6421_v60, %s5753_s28  ;;  %5261 = vrot.lane.b32.xlu1 %v5260_v33, %s5753_s28  ;;  %v875_v60 = vrot.slane %v6346_v26, 1  ;;  %v6583_v25 = vsel %vm528_vm2, %v10663_v52, %v10662_v62  ;;  %v5040_v13 = vpop.f32.mrb[30].mxu0  ;;  %v6598_v62 = vpop.permute.xlu0 %2556 }
 0x124   : > { %v484_v53 = vpop.f32.mrb[31].mxu0  ;;  %10666 = vst [vmem:[#allocation76_spill] sm:$0xff] %v6598_v62  ;;  %v10399_v62 = vrot.slane %v6607_v43, 7 }
 0x125   : > { %v876_v2 = vsel %vm846_vm3, %v874_v56, %v875_v60  ;;  %v10665_v56 = vrot.slane %v6321_v32, 7  ;;  %v5290_v32 = vpack.i.bf16 %v6595_v36, %v1059_v20 }
 0x127   : > { %5236 = vrot.lane.b32.xlu0 %v5235_v14, %s5758_s10  ;;  %5266 = vrot.lane.b32.xlu1 %v5265_v0, %s5755_s7  ;;  %v6575_v14 = vsel %vm846_vm3, %v875_v60, %v877_v61  ;;  %v644_v61 = vsel %vm528_vm2, %v10665_v56, 0.0  ;;  %v870_v56 = vrot.slane %v6355_v58, 1  ;;  %v6628_v47 = vpop.permute.xlu0 %2560 }
 0x128   : > { %v5285_v60 = vpack.i.bf16 %v6575_v14, %v876_v2  ;;  %v872_v52 = vrot.slane %v644_v61, 1  ;;  %10668 = vst [vmem:[#allocation78_spill] sm:$0xff] %v6628_v47  ;;  %v10671_v47 = vrot.slane %v6611_v54, 7 }
 0x12a   : > { %v873_v11 = vsel %vm846_vm3, %v870_v56, %v872_v52 }
 0x12b   : > { %5246 = vrot.lane.b32.xlu0 %v5255_v9, %s5756_s8  ;;  %5281 = vrot.lane.b32.xlu1 %v5280_v17, %s5751_s22  ;;  %v6602_v9 = vpop.permute.xlu1 %2558 }
 0x12c   : > { %10667 = vst [vmem:[#allocation77_spill] sm:$0xff] %v6602_v9  ;;  %v6622_v9 = vadd.f32 %v6235_v37, %v6501_v27  ;;  %v6638_v27 = vsel %vm528_vm2, %v10399_v62, %v10398_v28  ;;  %v6652_v28 = vpop.permute.xlu0 %2564  ;;  %v2329_v62 = vsel %vm331_vm0, %v6497_v40, 0  ;;  %v493_v40 = vadd.f32 %v5040_v13, %v6235_v37 }
 0x12d   : > { %10670 = vst [vmem:[#allocation80_spill] sm:$0xff] %v6638_v27  ;;  %10673 = vst [vmem:[#allocation82_spill] sm:$0xff] %v6652_v28  ;;  %5050 = vmatpush3.bf16.msra.mxu0 %v2329_v62  ;;  %v10677_v28 = vrot.slane %v6405_v6, 7  ;;  %5092 = vmatpush3.bf16.msra.mxu1 %v2329_v62  ;;  %v885_v62 = vrot.slane %v6434_v50, 1 }
 0x12f   : > { %5251 = vrot.lane.b32.xlu0 %v5260_v33, %s5757_s9  ;;  %5286 = vrot.lane.b32.xlu1 %v5285_v60, %s5756_s8  ;;  %v1055_v33 = vrot.slane %v644_v61, 2  ;;  %v5310_v61 = vpack.i.bf16 %v876_v2, %v873_v11  ;;  %v6631_v52 = vpop.permute.xlu1 %2562 }
 0x130   : > { %10669 = vst [vmem:[#allocation79_spill] sm:$0xff] %v6631_v52  ;;  %v869_v52 = vrot.slane %v6559_v42, 1 }
 0x131   : > { %v1056_v12 = vsel %vm1029_vm4, %v1053_v30, %v1055_v33  ;;  %v1052_v33 = vrot.slane %v6559_v42, 2 }
 0x132   : > { %v5320_v15 = vpack.i.bf16 %v1059_v20, %v1056_v12  ;;  %v490_v20 = vadd.f32 %v5039_v31, %v6235_v37 }
 0x133   : > { %5271 = vrot.lane.b32.xlu0 %v5265_v0, %s5751_s22  ;;  %5291 = vrot.lane.b32.xlu1 %v5290_v32, %s5757_s9  ;;  %v10400_v0 = vrot.slane %v6622_v9, 7  ;;  %v1054_v31 = vsel %vm1029_vm4, %v1052_v33, %v1053_v30  ;;  %v10682_v33 = vrot.slane %v6398_v3, 7 }
 0x134   : > { %v5340_v6 = vpack.i.bf16 %v1056_v12, %v1054_v31  ;;  %v5315_v13 = vpack.i.bf16 %v1054_v31, %v6395_v59 }
 0x135   : > { %v6648_v2 = vsel %vm528_vm2, %v10671_v47, %v10400_v0 }
 0x136   : > { %10672 = vst [vmem:[#allocation81_spill] sm:$0xff] %v6648_v2 }
 0x137   : > { %5276 = vrot.lane.b32.xlu0 %v5280_v17, %s5755_s7  ;;  %5311 = vrot.lane.b32.xlu1 %v5310_v61, %s5754_s29  ;;  %v6655_v17 = vpop.permute.xlu1 %2566  ;;  %v871_v61 = vsel %vm846_vm3, %v869_v52, %v870_v56  ;;  %v647_v56 = vsel %vm528_vm2, %v10677_v28, 0.0  ;;  %v575_v28 = vrot.slane %v493_v40, 7 }
 0x138   : > { %10674 = vst [vmem:[#allocation83_spill] sm:$0xff] %v6655_v17  ;;  %v5335_v47 = vpack.i.bf16 %v873_v11, %v871_v61  ;;  %v6681_v11 = vpop.permute.xlu0 %2568  ;;  %v1070_v31 = vrot.slane %v647_v56, 2 }
 0x139   : > { %10679 = vst [vmem:[#allocation86_spill] sm:$0xff] %v6681_v11 }
 0x13b   : > { %5296 = vrot.lane.b32.xlu0 %v5285_v60, %s5752_s27  ;;  %5321 = vrot.lane.b32.xlu1 %v5320_v15, %s5758_s10  ;;  %v6664_v60 = vadd.f32 %v6235_v37, %v481_v51  ;;  %v10675_v15 = vrot.slane %v6388_v18, 7  ;;  %v5305_v51 = vpack.i.bf16 %v871_v61, %v6376_v48  ;;  %v574_v18 = vrot.slane %v490_v20, 7 }
 0x13c   : > { %v6705_v61 = vsel %vm528_vm2, 0.0, %v10682_v33  ;;  %v6708_v20 = vpop.permute.xlu0 %2572 }
 0x13d   : > { %v6669_v0 = vsel %vm528_vm2, 0.0, %v10675_v15  ;;  %v10402_v52 = vrot.slane %v6664_v60, 7  ;;  %v6684_v15 = vpop.permute.xlu1 %2570  ;;  %v576_v12 = vsel %vm528_vm2, %v574_v18, %v575_v28  ;;  %10683 = vst [vmem:[#allocation89_spill] sm:$0xff] %v6705_v61  ;;  %10684 = vst [vmem:[#allocation90_spill] sm:$0xff] %v6708_v20  ;;  %v639_v59 = vsel %vm528_vm2, 0.0, %v574_v18 }
 0x13e   : > { %10676 = vst [vmem:[#allocation84_spill] sm:$0xff] %v6669_v0  ;;  %10680 = vst [vmem:[#allocation87_spill] sm:$0xff] %v6684_v15  ;;  %v5345_v48 = vpack.i.bf16 %v6434_v50, %v6669_v0  ;;  %v1067_v40 = vrot.slane %v6669_v0, 2  ;;  %v10686_v18 = vrot.slane %v6408_v7, 7 }
 0x13f   : > { %5301 = vrot.lane.b32.xlu0 %v5290_v32, %s5753_s28  ;;  %5336 = vrot.lane.b32.xlu1 %v5335_v47, %s5752_s27  ;;  %v6677_v32 = vadd.f32 %v6235_v37, %v484_v53  ;;  %v884_v53 = vrot.slane %v6669_v0, 1  ;;  %v887_v37 = vrot.slane %v647_v56, 1  ;;  %v655_v56 = vsel %vm528_vm2, %v575_v28, 0.0 }
 0x140   : > { %v646_v11 = vsel %vm528_vm2, %v10686_v18, 0.0  ;;  %v1187_v28 = vrot.slane %v655_v56, 1  ;;  %v880_v18 = vrot.slane %v6443_v16, 1 }
 0x141   : > { %10678 = vst [vmem:[#allocation85_spill] sm:$0xff] %v6677_v32  ;;  %v10401_v17 = vrot.slane %v6677_v32, 7  ;;  %v886_v3 = vsel %vm846_vm3, %v884_v53, %v885_v62  ;;  %v6719_v33 = vsel %vm846_vm3, %v885_v62, %v887_v37  ;;  %v6735_v62 = vpop.permute.xlu0 %2576  ;;  %v882_v0 = vrot.slane %v646_v11, 1 }
 0x142   : > { %v5365_v15 = vpack.i.bf16 %v6719_v33, %v886_v3  ;;  %10687 = vst [vmem:[#allocation92_spill] sm:$0xff] %v6735_v62 }
 0x143   : > { %5306 = vrot.lane.b32.xlu0 %v5305_v51, %s5754_s29  ;;  %5341 = vrot.lane.b32.xlu1 %v5340_v6, %s5753_s28  ;;  %v6700_v30 = vsel %vm528_vm2, %v10402_v52, %v10401_v17  ;;  %v5360_v51 = vpack.i.bf16 %v6443_v16, %v6705_v61  ;;  %v6715_v17 = vpop.permute.xlu1 %2574  ;;  %v6722_v52 = vpack.i.bf16 %v576_v12, %v639_v59 }
 0x144   : > { %10681 = vst [vmem:[#allocation88_spill] sm:$0xff] %v6700_v30  ;;  %10685 = vst [vmem:[#allocation91_spill] sm:$0xff] %v6715_v17  ;;  %v1185_v17 = vrot.slane %v576_v12, 1  ;;  %v883_v29 = vsel %vm846_vm3, %v880_v18, %v882_v0 }
 0x145   : > { %v6747_v26 = vpop.permute.xlu0 %2580 }
 0x146   : > { %v1188_v62 = vsel %vm846_vm3, %v1185_v17, %v1187_v28  ;;  %10689 = vst [vmem:[#allocation94_spill] sm:$0xff] %v6747_v26 }
 0x147   : > { %5316 = vrot.lane.b32.xlu0 %v5315_v13, %s5758_s10  ;;  %5346 = vrot.lane.b32.xlu1 %v5345_v48, %s5755_s7  ;;  %v1068_v13 = vrot.slane %v6434_v50, 2  ;;  %v6737_v20 = vpop.permute.xlu1 %2578  ;;  %v1197_v50 = vrot.slane %v576_v12, 2  ;;  %v1063_v12 = vrot.slane %v6443_v16, 2 }
 0x148   : > { %10688 = vst [vmem:[#allocation93_spill] sm:$0xff] %v6737_v20  ;;  %v1065_v20 = vrot.slane %v646_v11, 2 }
 0x149   : > { %v1069_v53 = vsel %vm1029_vm4, %v1067_v40, %v1068_v13  ;;  %v6733_v37 = vsel %vm1029_vm4, %v1068_v13, %v1070_v31  ;;  %v1196_v40 = vrot.slane %v639_v59, 2  ;;  %v1199_v31 = vrot.slane %v655_v56, 2 }
 0x14a   : > { %v5370_v7 = vpack.i.bf16 %v6733_v37, %v1069_v53  ;;  %v1066_v0 = vsel %vm1029_vm4, %v1063_v12, %v1065_v20 }
 0x14b   : > { %5326 = vrot.lane.b32.xlu0 %v5335_v47, %s5756_s8  ;;  %5361 = vrot.lane.b32.xlu1 %v5360_v51, %s5751_s22  ;;  %v1184_v47 = vrot.slane %v639_v59, 1  ;;  %v6752_v39 = vpop.permute.xlu1 %2582  ;;  %v1198_v59 = vsel %vm1029_vm4, %v1196_v40, %v1197_v50  ;;  %v1200_v56 = vsel %vm1029_vm4, %v1197_v50, %v1199_v31  ;;  %v1062_v50 = vrot.slane %v6705_v61, 2 }
 0x14c   : > { %10691 = vst [vmem:[#allocation96_spill] sm:$0xff] %v6752_v39  ;;  %v6757_v11 = vpack.i.bf16 %v1200_v56, %v1198_v59  ;;  %v10703_v39 = vrot.slane %v6540_v4, 7  ;;  %v905_v4 = vrot.slane %v6567_v5, 1 }
 0x14d   : > { %v1186_v13 = vsel %vm846_vm3, %v1184_v47, %v1185_v17  ;;  %v5390_v17 = vpack.i.bf16 %v886_v3, %v883_v29  ;;  %v5400_v47 = vpack.i.bf16 %v1069_v53, %v1066_v0  ;;  %v10697_v53 = vrot.slane %v6455_v1, 7 }
 0x14e   : > { %10692 = vst [vmem:[#allocation97_spill] sm:$0xff] %v6757_v11 }
 0x14f   : > { %5331 = vrot.lane.b32.xlu0 %v5340_v6, %s5757_s9  ;;  %5366 = vrot.lane.b32.xlu1 %v5365_v15, %s5756_s8  ;;  %v6749_v6 = vpack.i.bf16 %v1188_v62, %v1186_v13  ;;  %v6763_v62 = vpop.permute.xlu0 %2584  ;;  %v6765_v28 = vpop.permute.xlu1 %2586  ;;  %v6780_v31 = vsel %vm528_vm2, 0.0, %v10697_v53 }
 0x150   : > { %10693 = vst [vmem:[#allocation98_spill] sm:$0xff] %v6763_v62  ;;  %10694 = vst [vmem:[#allocation99_spill] sm:$0xff] %v6765_v28  ;;  %v5425_v59 = vpack.i.bf16 %v6490_v38, %v6780_v31  ;;  %v894_v1 = vrot.slane %v6780_v31, 1 }
 0x151   : > { %10690 = vst [vmem:[#allocation95_spill] sm:$0xff] %v6749_v6  ;;  %10698 = vst [vmem:[#allocation102_spill] sm:$0xff] %v6780_v31 }
 0x153   : > { %5351 = vrot.lane.b32.xlu0 %v5345_v48, %s5751_s22  ;;  %5371 = vrot.lane.b32.xlu1 %v5370_v7, %s5757_s9  ;;  %v879_v48 = vrot.slane %v6705_v61, 1  ;;  %v6772_v20 = vpop.permute.xlu0 %2588  ;;  %v6775_v40 = vpop.permute.xlu1 %2590 }
 0x154   : > { %10695 = vst [vmem:[#allocation100_spill] sm:$0xff] %v6772_v20  ;;  %10696 = vst [vmem:[#allocation101_spill] sm:$0xff] %v6775_v40 }
 0x155   : > { %v881_v3 = vsel %vm846_vm3, %v879_v48, %v880_v18  ;;  %v10699_v18 = vrot.slane %v6468_v21, 7 }
 0x156   : > { %v5385_v13 = vpack.i.bf16 %v881_v3, %v6575_v14  ;;  %v895_v14 = vrot.slane %v6490_v38, 1 }
 0x157   : > { %5356 = vrot.lane.b32.xlu0 %v5360_v51, %s5755_s7  ;;  %5391 = vrot.lane.b32.xlu1 %v5390_v17, %s5754_s29  ;;  %v5415_v51 = vpack.i.bf16 %v883_v29, %v881_v3  ;;  %v649_v29 = vsel %vm528_vm2, %v10699_v18, 0.0  ;;  %v10702_v18 = vrot.slane %v6474_v8, 7 }
 0x158   : > { %v897_v56 = vrot.slane %v649_v29, 1  ;;  %v896_v53 = vsel %vm846_vm3, %v894_v1, %v895_v14 }
 0x15b   : > { %5376 = vrot.lane.b32.xlu0 %v5365_v15, %s5752_s27  ;;  %5401 = vrot.lane.b32.xlu1 %v5400_v47, %s5758_s10  ;;  %v1064_v15 = vsel %vm1029_vm4, %v1062_v50, %v1063_v12  ;;  %v1077_v47 = vrot.slane %v6780_v31, 2  ;;  %v1080_v50 = vrot.slane %v649_v29, 2  ;;  %v648_v29 = vsel %vm528_vm2, %v10702_v18, 0.0 }
 0x15c   : > { %v5395_v12 = vpack.i.bf16 %v1064_v15, %v6595_v36  ;;  %v892_v62 = vrot.slane %v648_v29, 1  ;;  %v890_v18 = vrot.slane %v6509_v45, 1  ;;  %v1075_v20 = vrot.slane %v648_v29, 2 }
 0x15d   : > { %v6852_v29 = vsel %vm528_vm2, %v10703_v39, 0.0 }
 0x15e   : > { %v907_v39 = vrot.slane %v6852_v29, 1 }
 0x15f   : > { %5381 = vrot.lane.b32.xlu0 %v5370_v7, %s5753_s28  ;;  %5416 = vrot.lane.b32.xlu1 %v5415_v51, %s5752_s27  ;;  %v5420_v7 = vpack.i.bf16 %v1066_v0, %v1064_v15  ;;  %v10700_v0 = vrot.slane %v6465_v44, 7  ;;  %v6812_v15 = vsel %vm846_vm3, %v895_v14, %v897_v56  ;;  %v1078_v44 = vrot.slane %v6490_v38, 2 }
 0x161   : > { %v6801_v48 = vsel %vm528_vm2, 0.0, %v10700_v0  ;;  %v1079_v1 = vsel %vm1029_vm4, %v1077_v47, %v1078_v44  ;;  %v6827_v56 = vsel %vm1029_vm4, %v1078_v44, %v1080_v50  ;;  %v893_v47 = vsel %vm846_vm3, %v890_v18, %v892_v62 }
 0x162   : > { %10701 = vst [vmem:[#allocation103_spill] sm:$0xff] %v6801_v48  ;;  %v5440_v3 = vpack.i.bf16 %v6509_v45, %v6801_v48  ;;  %v5450_v8 = vpack.i.bf16 %v6827_v56, %v1079_v1  ;;  %v5470_v40 = vpack.i.bf16 %v896_v53, %v893_v47  ;;  %v889_v62 = vrot.slane %v6801_v48, 1 }
 0x163   : > { %5386 = vrot.lane.b32.xlu0 %v5385_v13, %s5754_s29  ;;  %5421 = vrot.lane.b32.xlu1 %v5420_v7, %s5753_s28  ;;  %v1072_v31 = vrot.slane %v6801_v48, 2  ;;  %v10705_v48 = vrot.slane %v6534_v35, 7 }
 0x164   : > { %v891_v16 = vsel %vm846_vm3, %v889_v62, %v890_v18 }
 0x165   : > { %v6792_v17 = vpop.permute.xlu0 %5126  ;;  %v6796_v21 = vpop.permute.xlu1 %5121 }
 0x166   : > { %v5129_v11 = vunpack.i.h.bf16 %v6792_v17 }
 0x167   : > { %5396 = vrot.lane.b32.xlu0 %v5395_v12, %s5758_s10  ;;  %5426 = vrot.lane.b32.xlu1 %v5425_v59, %s5755_s7  ;;  %v5445_v12 = vpack.i.bf16 %v6812_v15, %v896_v53 }
 0x169   : > { %v6808_v36 = vpop.permute.xlu0 %5131  ;;  %v6815_v13 = vpop.permute.xlu1 %5136 }
 0x16b   : > { %5406 = vrot.lane.b32.xlu0 %v5415_v51, %s5756_s8  ;;  %5441 = vrot.lane.b32.xlu1 %v5440_v3, %s5751_s22 }
 0x16d   : > { %v6823_v0 = vpop.permute.xlu0 %5146  ;;  %v6829_v14 = vpop.permute.xlu1 %5141 }
 0x16f   : > { %5411 = vrot.lane.b32.xlu0 %v5420_v7, %s5757_s9  ;;  %5446 = vrot.lane.b32.xlu1 %v5445_v12, %s5756_s8  ;;  %v1073_v7 = vrot.slane %v6509_v45, 2  ;;  %v6887_v45 = vpack.i.bf16 %v893_v47, %v891_v16 }
 0x171   : > { %v6834_v51 = vpop.permute.xlu0 %5151  ;;  %v6837_v28 = vpop.permute.xlu1 %5171  ;;  %v1076_v26 = vsel %vm1029_vm4, %v1073_v7, %v1075_v20  ;;  %v1074_v35 = vsel %vm1029_vm4, %v1072_v31, %v1073_v7  ;;  %v5465_v31 = vpack.i.bf16 %v891_v16, %v6719_v33 }
 0x172   : > { %v5480_v53 = vpack.i.bf16 %v1079_v1, %v1076_v26  ;;  %v6875_v1 = vsel %vm528_vm2, 0.0, %v10705_v48  ;;  %v6891_v48 = vsel %vm846_vm3, %v905_v4, %v907_v39  ;;  %v6905_v7 = vpack.i.bf16 %v1076_v26, %v1074_v35 }
 0x173   : > { %5431 = vrot.lane.b32.xlu0 %v5425_v59, %s5751_s22  ;;  %5451 = vrot.lane.b32.xlu1 %v5450_v8, %s5757_s9  ;;  %v5475_v62 = vpack.i.bf16 %v1074_v35, %v6733_v37  ;;  %v5134_v37 = vunpack.i.h.bf16 %v6808_v36  ;;  %v5133_v35 = vunpack.i.l.bf16 %v6808_v36 }
 0x175   : > { %v6842_v50 = vpop.permute.xlu0 %5156  ;;  %v6845_v44 = vpop.permute.xlu1 %5186 }
 0x177   : > { %5436 = vrot.lane.b32.xlu0 %v5440_v3, %s5755_s7  ;;  %5471 = vrot.lane.b32.xlu1 %v5470_v40, %s5754_s29  ;;  %v10704_v3 = vrot.slane %v6521_v49, 7 }
 0x179   : > { %v6856_v59 = vpop.permute.xlu0 %5161  ;;  %v6859_v38 = vpop.permute.xlu1 %5201  ;;  %v6864_v20 = vsel %vm528_vm2, 0.0, %v10704_v3 }
 0x17a   : > { %v904_v40 = vrot.slane %v6864_v20, 1  ;;  %v5163_v61 = vunpack.i.l.bf16 %v6856_v59 }
 0x17b   : > { %5456 = vrot.lane.b32.xlu0 %v5445_v12, %s5752_s27  ;;  %5481 = vrot.lane.b32.xlu1 %v5480_v53, %s5758_s10  ;;  %v6883_v12 = vunpack.i.l.bf16 %v6842_v50  ;;  %v10707_v53 = vrot.slane %v6543_v46, 7  ;;  %v6909_v46 = vpack.i.bf16 %v6567_v5, %v6864_v20 }
 0x17d   : > { %v6878_v3 = vpop.permute.xlu0 %5166  ;;  %10706 = vst [vmem:[#allocation104_spill] sm:$0xff] %v6883_v12  ;;  %v6885_v23 = vpop.permute.xlu1 %5206  ;;  %v6896_v49 = vsel %vm528_vm2, %v10707_v53, 0.0  ;;  %v6918_v53 = vpack.i.bf16 %v6583_v25, %v6875_v1 }
 0x17e   : > { %v6899_v18 = vunpack.i.l.bf16 %v6878_v3 }
 0x17f   : > { %5461 = vrot.lane.b32.xlu0 %v5450_v8, %s5753_s28  ;;  %5496 = vrot.lane.b32.xlu1 %v6887_v45, %s5752_s27  ;;  %v1959_v8 = vsel %vm282_vm1, 0.0, %v6883_v12  ;;  %v6929_v12 = vsel %vm846_vm3, %v904_v40, %v905_v4  ;;  %v5148_v4 = vunpack.i.l.bf16 %v6823_v0  ;;  %v5169_v40 = vunpack.i.h.bf16 %v6878_v3 }
 0x180   : > { %10708 = vst [vmem:[#allocation105_spill] sm:$0xff] %v6899_v18  ;;  %v1991_v16 = vsel %vm1990_vm5, %v1959_v8, %v6899_v18  ;;  %v5128_v8 = vunpack.i.l.bf16 %v6792_v17 }
 0x181   : > { %v5177_v47 = vpop.permute.xlu0 %5176  ;;  %v6914_v39 = vpop.permute.xlu1 %5211  ;;  %v2023_v6 = vsel %vm2022_vm6, %v1991_v16, %v5133_v35  ;;  %v2024_v36 = vsel %vm2022_vm6, %v1991_v16, %v5134_v37  ;;  %v1961_v35 = vsel %vm282_vm1, %v6249_v19, %v5163_v61 }
 0x182   : > { %v5179_v26 = vunpack.i.h.bf16 %v5177_v47  ;;  %v5178_v33 = vunpack.i.l.bf16 %v5177_v47  ;;  %v5149_v47 = vunpack.i.h.bf16 %v6823_v0  ;;  %v5153_v0 = vunpack.i.l.bf16 %v6834_v51 }
 0x183   : > { %5466 = vrot.lane.b32.xlu0 %v5465_v31, %s5754_s29  ;;  %5501 = vrot.lane.b32.xlu1 %v6905_v7, %s5753_s28  ;;  %v5159_v31 = vunpack.i.h.bf16 %v6842_v50  ;;  %v5154_v50 = vunpack.i.h.bf16 %v6834_v51 }
 0x184   : > { %v2056_v30 = vsel %vm2055_vm7, %v2023_v6, %v5178_v33  ;;  %v2057_v17 = vsel %vm2055_vm7, %v2024_v36, %v5179_v26  ;;  %v5173_v6 = vunpack.i.l.bf16 %v6837_v28  ;;  %v5123_v33 = vunpack.i.l.bf16 %v6796_v21 }
 0x185   : > { %v5182_v18 = vpop.permute.xlu0 %5181  ;;  %v6937_v32 = vpop.permute.xlu1 %5226  ;;  %v1960_v19 = vsel %vm282_vm1, %v6257_v55, %v5159_v31  ;;  %v5124_v55 = vunpack.i.h.bf16 %v6796_v21  ;;  %v10709_v31 = vrot.slane %v6852_v29, 2  ;;  %v10710_v36 = vrot.slane %v6567_v5, 2 }
 0x186   : > { %v5184_v58 = vunpack.i.h.bf16 %v5182_v18  ;;  %v5183_v42 = vunpack.i.l.bf16 %v5182_v18  ;;  %v1992_v51 = vsel %vm1990_vm5, %v1960_v19, %v5169_v40  ;;  %v10712_v21 = vrot.slane %v6864_v20, 2 }
 0x187   : > { %5476 = vrot.lane.b32.xlu0 %v5475_v62, %s5758_s10  ;;  %5506 = vrot.lane.b32.xlu1 %v6909_v46, %s5755_s7  ;;  %v10711_v40 = vmov %v10710_v36  ;;  %v5139_v29 = vunpack.i.h.bf16 %v6815_v13 }
 0x188   : > { %v2089_v16 = vsel %vm2088_vm8, %v2056_v30, %v5183_v42  ;;  %v2090_v37 = vsel %vm2088_vm8, %v2057_v17, %v5184_v58  ;;  %v1993_v30 = vsel %vm1990_vm5, %v1961_v35, %v5173_v6  ;;  %v1089_v17 = vsel %vm1029_vm4, %v10712_v21, %v10711_v40 }
 0x189   : > { %v2122_v3 = vsel %vm2121_vm9, %v2089_v16, %v5128_v8  ;;  %v2123_v18 = vsel %vm2121_vm9, %v2090_v37, %v5129_v11  ;;  %v6955_v62 = vpop.permute.xlu0 %5191  ;;  %v6959_v61 = vpop.permute.xlu1 %5231  ;;  %v2025_v35 = vsel %vm2022_vm6, %v1992_v51, %v5123_v33  ;;  %v5138_v37 = vunpack.i.l.bf16 %v6815_v13 }
 0x18a   : > { %v2155_v58 = vsel %vm2154_vm10, %v2122_v3, %v5148_v4  ;;  %v2156_v42 = vsel %vm2154_vm10, %v2123_v18, %v5149_v47  ;;  %v5525_v47 = vpack.i.bf16 %v6891_v48, %v6929_v12  ;;  %v900_v3 = vrot.slane %v6583_v25, 1 }
 0x18b   : > { %5486 = vrot.lane.b32.xlu0 %v6887_v45, %s5756_s8  ;;  %v2188_v11 = vsel %vm2187_vm11, %v2155_v58, %v5153_v0  ;;  %v2189_v26 = vsel %vm2187_vm11, %v2156_v42, %v5154_v50  ;;  %5521 = vrot.lane.b32.xlu1 %v6918_v53, %s5751_s22  ;;  %v6980_v45 = vsel %vm1029_vm4, %v10710_v36, %v10709_v31  ;;  %v902_v0 = vrot.slane %v6896_v49, 1 }
 0x18c   : > { %v2220_v8 = vpack.c.bf16 %v2189_v26, %v2188_v11  ;;  %v2026_v50 = vsel %vm2022_vm6, %v1993_v30, %v5124_v55  ;;  %v5530_v6 = vpack.i.bf16 %v6980_v45, %v1089_v17  ;;  %v2058_v18 = vsel %vm2055_vm7, %v2025_v35, %v5138_v37 }
 0x18d   : > { %v6982_v4 = vpop.permute.xlu0 %5196  ;;  %v6991_v16 = vpop.permute.xlu1 %5241  ;;  %v2059_v19 = vsel %vm2055_vm7, %v2026_v50, %v5139_v29  ;;  %v1085_v42 = vrot.slane %v6896_v49, 2  ;;  %v5144_v13 = vunpack.i.h.bf16 %v6829_v14  ;;  %v5143_v30 = vunpack.i.l.bf16 %v6829_v14 }
 0x18e   : > { %5051 = vmatprep.mubr.msk.bf16.mxu0 %vm2279_vm12, %v2220_v8  ;;  %v1083_v11 = vrot.slane %v6583_v25, 2  ;;  %v5204_v26 = vunpack.i.h.bf16 %v6859_v38  ;;  %v5203_v14 = vunpack.i.l.bf16 %v6859_v38  ;;  %v899_v37 = vrot.slane %v6875_v1, 1 }
 0x18f   : > { %5491 = vrot.lane.b32.xlu0 %v6905_v7, %s5757_s9  ;;  %5526 = vrot.lane.b32.xlu1 %v5525_v47, %s5756_s8  ;;  %v903_v7 = vsel %vm846_vm3, %v900_v3, %v902_v0  ;;  %v2091_v8 = vsel %vm2088_vm8, %v2058_v18, %v5143_v30  ;;  %v2092_v49 = vsel %vm2088_vm8, %v2059_v19, %v5144_v13  ;;  %v1082_v18 = vrot.slane %v6875_v1, 2 }
 0x190   : > { %v1086_v36 = vsel %vm1029_vm4, %v1083_v11, %v1085_v42  ;;  %v5550_v21 = vpack.i.bf16 %v6929_v12, %v903_v7  ;;  %v2124_v50 = vsel %vm2121_vm9, %v2091_v8, %v5203_v14  ;;  %v5164_v13 = vunpack.i.h.bf16 %v6856_v59 }
 0x191   : > { %v7004_v58 = vpop.permute.xlu0 %5216  ;;  %v5257_v51 = vpop.permute.xlu1 %5256  ;;  %v901_v59 = vsel %vm846_vm3, %v899_v37, %v900_v3  ;;  %v1084_v3 = vsel %vm1029_vm4, %v1082_v18, %v1083_v11 }
 0x192   : > { %v5259_v55 = vunpack.i.h.bf16 %v5257_v51  ;;  %v5258_v33 = vunpack.i.l.bf16 %v5257_v51  ;;  %v5580_v18 = vpack.i.bf16 %v1086_v36, %v1084_v3 }
 0x193   : > { %5511 = vrot.lane.b32.xlu0 %v6909_v46, %s5751_s22  ;;  %5531 = vrot.lane.b32.xlu1 %v5530_v6, %s5757_s9  ;;  %v2125_v46 = vsel %vm2121_vm9, %v2092_v49, %v5204_v26  ;;  %v5560_v26 = vpack.i.bf16 %v1089_v17, %v1086_v36  ;;  %v10715_v17 = vrot.slane %v6615_v57, 7  ;;  %v5174_v57 = vunpack.i.h.bf16 %v6837_v28 }
 0x194   : > { %v2157_v38 = vsel %vm2154_vm10, %v2124_v50, %v5258_v33  ;;  %v2158_v0 = vsel %vm2154_vm10, %v2125_v46, %v5259_v55  ;;  %v10713_v55 = vrot.slane %v6607_v43, 7  ;;  %v5198_v46 = vunpack.i.l.bf16 %v6982_v4 }
 0x195   : > { %v7018_v31 = vpop.permute.xlu0 %5221  ;;  %v5262_v40 = vpop.permute.xlu1 %5261  ;;  %v7054_v43 = vsel %vm528_vm2, %v10715_v17, 0.0 }
 0x196   : > { %v5264_v35 = vunpack.i.h.bf16 %v5262_v40  ;;  %v5263_v29 = vunpack.i.l.bf16 %v5262_v40  ;;  %v7042_v33 = vsel %vm528_vm2, 0.0, %v10713_v55 }
 0x197   : > { %5516 = vrot.lane.b32.xlu0 %v6918_v53, %s5755_s7  ;;  %5551 = vrot.lane.b32.xlu1 %v5550_v21, %s5754_s29  ;;  %v5228_v53 = vunpack.i.l.bf16 %v6937_v32  ;;  %10714 = vst [vmem:[#allocation106_spill] sm:$0xff] %v7042_v33  ;;  %v914_v49 = vrot.slane %v7042_v33, 1  ;;  %v1097_v14 = vrot.slane %v7042_v33, 2  ;;  %v7056_v21 = vpack.i.bf16 %v903_v7, %v901_v59 }
 0x198   : > { %v2190_v12 = vsel %vm2187_vm11, %v2157_v38, %v5263_v29  ;;  %v2191_v19 = vsel %vm2187_vm11, %v2158_v0, %v5264_v35  ;;  %v915_v7 = vrot.slane %v6638_v27, 1  ;;  %v5545_v0 = vpack.i.bf16 %v901_v59, %v6812_v15 }
 0x199   : > { %v7033_v42 = vpop.permute.xlu0 %5236  ;;  %v2221_v30 = vpack.c.bf16 %v2191_v19, %v2190_v12  ;;  %v7037_v51 = vpop.permute.xlu1 %5266  ;;  %v1963_v50 = vsel %vm282_vm1, %v6245_v63, %v5228_v53  ;;  %v5199_v63 = vunpack.i.h.bf16 %v6982_v4  ;;  %v7078_v12 = vpack.i.bf16 %v6638_v27, %v7042_v33 }
 0x19a   : > { %v5238_v8 = vunpack.i.l.bf16 %v7033_v42  ;;  %v5194_v15 = vunpack.i.h.bf16 %v6955_v62 }
 0x19b   : > { %5536 = vrot.lane.b32.xlu0 %v5525_v47, %s5752_s27  ;;  %5561 = vrot.lane.b32.xlu1 %v5560_v26, %s5758_s10  ;;  %v1962_v47 = vsel %vm282_vm1, %v6242_v24, %v5164_v13  ;;  %v917_v24 = vrot.slane %v7054_v43, 1  ;;  %v5193_v26 = vunpack.i.l.bf16 %v6955_v62  ;;  %v5223_v62 = vunpack.i.l.bf16 %v7018_v31 }
 0x19c   : > { %5052 = vmatmul.mubr.msk.bf16.vlgmr.msra.gmra.mrb[32].mxu0 %vm2279_vm12, %v2221_v30  ;;  %v1995_v29 = vsel %vm1990_vm5, %v1963_v50, %v5238_v8  ;;  %v1994_v11 = vsel %vm1990_vm5, %v1962_v47, %v5174_v57  ;;  %v5218_v8 = vunpack.i.l.bf16 %v7004_v58 }
 0x19d   : > { %v5247_v40 = vpop.permute.xlu0 %5246  ;;  %v7063_v35 = vpop.permute.xlu1 %5281  ;;  %v2027_v19 = vsel %vm2022_vm6, %v1994_v11, %v5198_v46  ;;  %v2028_v13 = vsel %vm2022_vm6, %v1995_v29, %v5199_v63  ;;  %v5239_v63 = vunpack.i.h.bf16 %v7033_v42  ;;  %v5233_v11 = vunpack.i.l.bf16 %v6959_v61 }
 0x19e   : > { %v5249_v37 = vunpack.i.h.bf16 %v5247_v40  ;;  %v5248_v38 = vunpack.i.l.bf16 %v5247_v40  ;;  %v5224_v40 = vunpack.i.h.bf16 %v7018_v31  ;;  %v1098_v31 = vrot.slane %v6638_v27, 2 }
 0x19f   : > { %5541 = vrot.lane.b32.xlu0 %v5530_v6, %s5753_s28  ;;  %5576 = vrot.lane.b32.xlu1 %v7056_v21, %s5752_s27  ;;  %v5555_v6 = vpack.i.bf16 %v1084_v3, %v6827_v56  ;;  %v5219_v56 = vunpack.i.h.bf16 %v7004_v58  ;;  %v5229_v3 = vunpack.i.h.bf16 %v6937_v32  ;;  %v10716_v58 = vrot.slane %v6611_v54, 7 }
 0x1a0   : > { %v2060_v36 = vsel %vm2055_vm7, %v2027_v19, %v5248_v38  ;;  %v2061_v55 = vsel %vm2055_vm7, %v2028_v13, %v5249_v37  ;;  %v1100_v54 = vrot.slane %v7054_v43, 2  ;;  %v7123_v13 = vsel %vm846_vm3, %v915_v7, %v917_v24 }
 0x1a1   : > { %v5252_v28 = vpop.permute.xlu0 %5251  ;;  %v7083_v4 = vpop.permute.xlu1 %5286  ;;  %v7105_v57 = vsel %vm528_vm2, 0.0, %v10716_v58  ;;  %v5243_v42 = vunpack.i.l.bf16 %v6991_v16  ;;  %v916_v43 = vsel %vm846_vm3, %v914_v49, %v915_v7  ;;  %v5188_v24 = vunpack.i.l.bf16 %v6845_v44 }
 0x1a2   : > { %v5254_v53 = vunpack.i.h.bf16 %v5252_v28  ;;  %v5253_v30 = vunpack.i.l.bf16 %v5252_v28  ;;  %10717 = vst [vmem:[#allocation107_spill] sm:$0xff] %v7105_v57  ;;  %v5600_v19 = vpack.i.bf16 %v6648_v2, %v7105_v57  ;;  %v1965_v49 = vsel %vm282_vm1, %v6295_v41, %v5233_v11 }
 0x1a3   : > { %5546 = vrot.lane.b32.xlu0 %v5545_v0, %s5754_s29  ;;  %5581 = vrot.lane.b32.xlu1 %v5580_v18, %s5753_s28  ;;  %v7148_v7 = vsel %vm1029_vm4, %v1098_v31, %v1100_v54  ;;  %v1093_v58 = vrot.slane %v6648_v2, 2 }
 0x1a4   : > { %v2093_v59 = vsel %vm2088_vm8, %v2060_v36, %v5253_v30  ;;  %v2094_v17 = vsel %vm2088_vm8, %v2061_v55, %v5254_v53  ;;  %v1964_v53 = vsel %vm282_vm1, %v6360_v34, %v5229_v3  ;;  %v5605_v34 = vpack.i.bf16 %v7123_v13, %v916_v43 }
 0x1a5   : > { %v7097_v47 = vpop.permute.xlu0 %5271  ;;  %v2126_v50 = vsel %vm2121_vm9, %v2093_v59, %v5193_v26  ;;  %v2127_v46 = vsel %vm2121_vm9, %v2094_v17, %v5194_v15  ;;  %v7107_v29 = vpop.permute.xlu1 %5291  ;;  %v1996_v15 = vsel %vm1990_vm5, %v1964_v53, %v5239_v63  ;;  %v10718_v26 = vrot.slane %v6622_v9, 7 }
 0x1a6   : > { %v2159_v37 = vsel %vm2154_vm10, %v2126_v50, %v5218_v8  ;;  %v2160_v38 = vsel %vm2154_vm10, %v2127_v46, %v5219_v56  ;;  %v1997_v55 = vsel %vm1990_vm5, %v1965_v49, %v5243_v42  ;;  %v1099_v9 = vsel %vm1029_vm4, %v1097_v14, %v1098_v31 }
 0x1a7   : > { %5556 = vrot.lane.b32.xlu0 %v5555_v6, %s5758_s10  ;;  %v2192_v0 = vsel %vm2187_vm11, %v2159_v37, %v5223_v62  ;;  %v2193_v32 = vsel %vm2187_vm11, %v2160_v38, %v5224_v40  ;;  %5586 = vrot.lane.b32.xlu1 %v7078_v12, %s5755_s7  ;;  %v652_v36 = vsel %vm528_vm2, %v10718_v26, 0.0  ;;  %v2029_v8 = vsel %vm2022_vm6, %v1996_v15, %v5188_v24 }
 0x1a8   : > { %v2222_v28 = vpack.c.bf16 %v2193_v32, %v2192_v0  ;;  %v5208_v59 = vunpack.i.l.bf16 %v6885_v23  ;;  %v912_v17 = vrot.slane %v652_v36, 1  ;;  %v5610_v62 = vpack.i.bf16 %v7148_v7, %v1099_v9 }
 0x1a9   : > { %v7126_v6 = vpop.permute.xlu0 %5276  ;;  %v7133_v30 = vpop.permute.xlu1 %5311  ;;  %v5209_v50 = vunpack.i.h.bf16 %v6885_v23  ;;  %v910_v14 = vrot.slane %v6648_v2, 1  ;;  %v5213_v3 = vunpack.i.l.bf16 %v6914_v39  ;;  %v1095_v37 = vrot.slane %v652_v36, 2 }
 0x1aa   : > { %5055 = vmatprep.mubr.msk.bf16.mxu1 %vm2279_vm12, %v2222_v28  ;;  %v5284_v31 = vunpack.i.h.bf16 %v7063_v35  ;;  %v5283_v63 = vunpack.i.l.bf16 %v7063_v35  ;;  %v5214_v0 = vunpack.i.h.bf16 %v6914_v39 }
 0x1ab   : > { %5566 = vrot.lane.b32.xlu0 %v7056_v21, %s5756_s8  ;;  %5601 = vrot.lane.b32.xlu1 %v5600_v19, %s5751_s22  ;;  %v5189_v21 = vunpack.i.h.bf16 %v6845_v44  ;;  %v2062_v44 = vsel %vm2055_vm7, %v2029_v8, %v5208_v59  ;;  %v913_v38 = vsel %vm846_vm3, %v910_v14, %v912_v17  ;;  %v1096_v42 = vsel %vm1029_vm4, %v1093_v58, %v1095_v37 }
 0x1ac   : > { %v2095_v32 = vsel %vm2088_vm8, %v2062_v44, %v5213_v3  ;;  %v5630_v15 = vpack.i.bf16 %v916_v43, %v913_v38  ;;  %v1092_v59 = vrot.slane %v7105_v57, 2  ;;  %v5234_v3 = vunpack.i.h.bf16 %v6959_v61 }
 0x1ad   : > { %v7151_v56 = vpop.permute.xlu0 %5296  ;;  %v7158_v41 = vpop.permute.xlu1 %5321  ;;  %v2030_v40 = vsel %vm2022_vm6, %v1997_v55, %v5189_v21  ;;  %v2128_v24 = vsel %vm2121_vm9, %v2095_v32, %v5283_v63  ;;  %v909_v55 = vrot.slane %v7105_v57, 1  ;;  %v5244_v37 = vunpack.i.h.bf16 %v6991_v16 }
 0x1ae   : > { %v2063_v23 = vsel %vm2055_vm7, %v2030_v40, %v5209_v50  ;;  %v5278_v63 = vunpack.i.l.bf16 %v7126_v6  ;;  %v1966_v16 = vsel %vm282_vm1, %v6324_v10, %v5234_v3 }
 0x1af   : > { %5571 = vrot.lane.b32.xlu0 %v5580_v18, %s5757_s9  ;;  %5606 = vrot.lane.b32.xlu1 %v5605_v34, %s5756_s8  ;;  %v2096_v53 = vsel %vm2088_vm8, %v2063_v23, %v5214_v0 }
 0x1b1   : > { %v7168_v46 = vpop.permute.xlu0 %5301  ;;  %v5337_v18 = vpop.permute.xlu1 %5336 }
 0x1b2   : > { %v5339_v54 = vunpack.i.h.bf16 %v5337_v18  ;;  %v5338_v11 = vunpack.i.l.bf16 %v5337_v18 }
 0x1b3   : > { %5591 = vrot.lane.b32.xlu0 %v7078_v12, %s5751_s22  ;;  %5611 = vrot.lane.b32.xlu1 %v5610_v62, %s5757_s9  ;;  %v2129_v12 = vsel %vm2121_vm9, %v2096_v53, %v5284_v31  ;;  %v911_v31 = vsel %vm846_vm3, %v909_v55, %v910_v14  ;;  %v5279_v14 = vunpack.i.h.bf16 %v7126_v6  ;;  %v5274_v6 = vunpack.i.h.bf16 %v7097_v47 }
 0x1b4   : > { %v2161_v36 = vsel %vm2154_vm10, %v2128_v24, %v5338_v11  ;;  %v2162_v49 = vsel %vm2154_vm10, %v2129_v12, %v5339_v54  ;;  %v5655_v0 = vpack.i.bf16 %v913_v38, %v911_v31  ;;  %v5625_v38 = vpack.i.bf16 %v911_v31, %v6891_v48  ;;  %v10721_v31 = vld [vmem:[#allocation88_spill] sm:$0xff] }
 0x1b5   : > { %v7181_v28 = vpop.permute.xlu0 %5306  ;;  %v5342_v35 = vpop.permute.xlu1 %5341  ;;  %v5273_v12 = vunpack.i.l.bf16 %v7097_v47  ;;  %v5299_v48 = vunpack.i.h.bf16 %v7151_v56  ;;  %v5303_v47 = vunpack.i.l.bf16 %v7168_v46 }
 0x1b6   : > { %v5344_v26 = vunpack.i.h.bf16 %v5342_v35  ;;  %v5343_v39 = vunpack.i.l.bf16 %v5342_v35  ;;  %v5308_v17 = vunpack.i.l.bf16 %v7181_v28 }
 0x1b7   : > { %5596 = vrot.lane.b32.xlu0 %v5600_v19, %s5755_s7  ;;  %5631 = vrot.lane.b32.xlu1 %v5630_v15, %s5754_s29  ;;  %v5640_v19 = vpack.i.bf16 %v1099_v9, %v1096_v42 }
 0x1b8   : > { %v2194_v21 = vsel %vm2187_vm11, %v2161_v36, %v5343_v39  ;;  %v2195_v43 = vsel %vm2187_vm11, %v2162_v49, %v5344_v26  ;;  %v1967_v9 = vsel %vm282_vm1, %v6287_v22, %v5308_v17  ;;  %v1998_v22 = vsel %vm1990_vm5, %v1966_v16, %v5244_v37  ;;  %v10723_v16 = vld [vmem:[#allocation66_spill] sm:$0xff] }
 0x1b9   : > { %v7194_v8 = vpop.permute.xlu0 %5316  ;;  %v7198_v40 = vpop.permute.xlu1 %5346  ;;  %v2223_v50 = vpack.c.bf16 %v2195_v43, %v2194_v21  ;;  %v2031_v35 = vsel %vm2022_vm6, %v1998_v22, %v5278_v63  ;;  %v5304_v49 = vunpack.i.h.bf16 %v7168_v46  ;;  %v5323_v63 = vunpack.i.l.bf16 %v7158_v41 }
 0x1ba   : > { %v5318_v44 = vunpack.i.l.bf16 %v7194_v8  ;;  %v5319_v46 = vunpack.i.h.bf16 %v7194_v8  ;;  %v10722_v8 = vld [vmem:[#allocation74_spill] sm:$0xff] }
 0x1bb   : > { %5616 = vrot.lane.b32.xlu0 %v5605_v34, %s5752_s27  ;;  %5641 = vrot.lane.b32.xlu1 %v5640_v19, %s5758_s10  ;;  %v1094_v34 = vsel %vm1029_vm4, %v1092_v59, %v1093_v58  ;;  %v5309_v59 = vunpack.i.h.bf16 %v7181_v28  ;;  %v5313_v28 = vunpack.i.l.bf16 %v7133_v30 }
 0x1bc   : > { %5056 = vmatmul.mubr.msk.bf16.vlgmr.msra.gmra.mrb[0].mxu1 %vm2279_vm12, %v2223_v50  ;;  %v1999_v61 = vsel %vm1990_vm5, %v1967_v9, %v5318_v44  ;;  %v5660_v53 = vpack.i.bf16 %v1096_v42, %v1094_v34  ;;  %v5635_v58 = vpack.i.bf16 %v1094_v34, %v6980_v45  ;;  %v5298_v45 = vunpack.i.l.bf16 %v7151_v56 }
 0x1bd   : > { %v5327_v18 = vpop.permute.xlu0 %5326  ;;  %v7210_v23 = vpop.permute.xlu1 %5361  ;;  %v2032_v15 = vsel %vm2022_vm6, %v1999_v61, %v5279_v14  ;;  %v10719_v50 = vrot.slane %v6664_v60, 7  ;;  %v1968_v34 = vsel %vm282_vm1, %v10722_v8, %v5309_v59  ;;  %v1969_v14 = vsel %vm282_vm1, %v10723_v16, %v5313_v28 }
 0x1be   : > { %v5329_v32 = vunpack.i.h.bf16 %v5327_v18  ;;  %v5328_v54 = vunpack.i.l.bf16 %v5327_v18  ;;  %v2001_v22 = vsel %vm1990_vm5, %v1969_v14, %v5323_v63  ;;  %v1103_v14 = vrot.slane %v10721_v31, 2 }
 0x1bf   : > { %5621 = vrot.lane.b32.xlu0 %v5610_v62, %s5753_s28  ;;  %5656 = vrot.lane.b32.xlu1 %v5655_v0, %s5752_s27  ;;  %v7250_v44 = vsel %vm528_vm2, 0.0, %v10719_v50 }
 0x1c0   : > { %v2064_v26 = vsel %vm2055_vm7, %v2031_v35, %v5328_v54  ;;  %v2065_v42 = vsel %vm2055_vm7, %v2032_v15, %v5329_v32  ;;  %10720 = vst [vmem:[#allocation108_spill] sm:$0xff] %v7250_v44  ;;  %v5680_v60 = vpack.i.bf16 %v10721_v31, %v7250_v44  ;;  %v2000_v32 = vsel %vm1990_vm5, %v1968_v34, %v5319_v46 }
 0x1c1   : > { %v5332_v11 = vpop.permute.xlu0 %5331  ;;  %v7224_v62 = vpop.permute.xlu1 %5366  ;;  %v5268_v54 = vunpack.i.l.bf16 %v7037_v51  ;;  %v5288_v15 = vunpack.i.l.bf16 %v7083_v4  ;;  %v1102_v34 = vrot.slane %v7250_v44, 2 }
 0x1c2   : > { %v5334_v24 = vunpack.i.h.bf16 %v5332_v11  ;;  %v5333_v10 = vunpack.i.l.bf16 %v5332_v11 }
 0x1c3   : > { %5626 = vrot.lane.b32.xlu0 %v5625_v38, %s5754_s29  ;;  %5661 = vrot.lane.b32.xlu1 %v5660_v53, %s5753_s28  ;;  %v5269_v38 = vunpack.i.h.bf16 %v7037_v51 }
 0x1c4   : > { %v2097_v39 = vsel %vm2088_vm8, %v2064_v26, %v5333_v10  ;;  %v2098_v36 = vsel %vm2088_vm8, %v2065_v42, %v5334_v24  ;;  %v5289_v26 = vunpack.i.h.bf16 %v7083_v4  ;;  %v5294_v4 = vunpack.i.h.bf16 %v7107_v29 }
 0x1c5   : > { %v2130_v55 = vsel %vm2121_vm9, %v2097_v39, %v5273_v12  ;;  %v2131_v21 = vsel %vm2121_vm9, %v2098_v36, %v5274_v6  ;;  %v7240_v43 = vpop.permute.xlu0 %5351  ;;  %v7243_v17 = vpop.permute.xlu1 %5371  ;;  %v2034_v6 = vsel %vm2022_vm6, %v2001_v22, %v5269_v38  ;;  %v10726_v12 = vld [vmem:[#allocation95_spill] sm:$0xff]  ;;  %v5364_v36 = vunpack.i.h.bf16 %v7210_v23 }
 0x1c6   : > { %v2163_v56 = vsel %vm2154_vm10, %v2130_v55, %v5298_v45  ;;  %v2164_v19 = vsel %vm2154_vm10, %v2131_v21, %v5299_v48  ;;  %v5293_v48 = vunpack.i.l.bf16 %v7107_v29 }
 0x1c7   : > { %5636 = vrot.lane.b32.xlu0 %v5635_v58, %s5758_s10  ;;  %v2196_v3 = vsel %vm2187_vm11, %v2163_v56, %v5303_v47  ;;  %v2197_v37 = vsel %vm2187_vm11, %v2164_v19, %v5304_v49  ;;  %5666 = vrot.lane.b32.xlu1 %v6722_v52, %s5755_s7  ;;  %v2033_v58 = vsel %vm2022_vm6, %v2000_v32, %v5268_v54  ;;  %v5363_v49 = vunpack.i.l.bf16 %v7210_v23  ;;  %v10727_v56 = vld [vmem:[#allocation97_spill] sm:$0xff] }
 0x1c8   : > { %v2224_v18 = vpack.c.bf16 %v2197_v37, %v2196_v3  ;;  %v2066_v51 = vsel %vm2055_vm7, %v2033_v58, %v5288_v15  ;;  %v920_v47 = vrot.slane %v10721_v31, 1  ;;  %v10728_v58 = vld [vmem:[#allocation3_spill] sm:$0xff] }
 0x1c9   : > { %v7262_v9 = vpop.permute.xlu0 %5356  ;;  %v7266_v61 = vpop.permute.xlu1 %5391  ;;  %v2099_v55 = vsel %vm2088_vm8, %v2066_v51, %v5293_v48  ;;  %v10729_v15 = vrot.slane %v10728_v58, 7  ;;  %v5324_v51 = vunpack.i.h.bf16 %v7158_v41  ;;  %v1104_v48 = vsel %vm1029_vm4, %v1102_v34, %v1103_v14 }
 0x1ca   : > { %5059 = vmatprep.mubr.msk.bf16.mxu1 %vm2279_vm12, %v2224_v18  ;;  %v919_v18 = vrot.slane %v7250_v44, 1 }
 0x1cb   : > { %5646 = vrot.lane.b32.xlu0 %v5655_v0, %s5756_s8  ;;  %5681 = vrot.lane.b32.xlu1 %v5680_v60, %s5751_s22  ;;  %v10724_v0 = vld [vmem:[#allocation85_spill] sm:$0xff] }
 0x1cc   : > { %v10725_v24 = vrot.slane %v10724_v0, 7  ;;  %v7328_v0 = vsel %vm528_vm2, %v10729_v15, 0.0 }
 0x1cd   : > { %v7276_v11 = vpop.permute.xlu0 %5376  ;;  %v7280_v35 = vpop.permute.xlu1 %5401 }
 0x1ce   : > { %v654_v10 = vsel %vm528_vm2, %v10725_v24, 0.0 }
 0x1cf   : > { %5651 = vrot.lane.b32.xlu0 %v5660_v53, %s5757_s9  ;;  %5686 = vrot.lane.b32.xlu1 %v10726_v12, %s5756_s8  ;;  %v922_v45 = vrot.slane %v654_v10, 1  ;;  %v2067_v53 = vsel %vm2055_vm7, %v2034_v6, %v5289_v26  ;;  %v1105_v50 = vrot.slane %v654_v10, 2  ;;  %v5314_v6 = vunpack.i.h.bf16 %v7133_v30 }
 0x1d0   : > { %v2100_v23 = vsel %vm2088_vm8, %v2067_v53, %v5294_v4  ;;  %v921_v26 = vsel %vm846_vm3, %v919_v18, %v920_v47  ;;  %v5358_v53 = vunpack.i.l.bf16 %v7262_v9 }
 0x1d1   : > { %v7292_v42 = vpop.permute.xlu0 %5381  ;;  %v5417_v39 = vpop.permute.xlu1 %5416  ;;  %v923_v3 = vsel %vm846_vm3, %v920_v47, %v922_v45  ;;  %v2133_v37 = vsel %vm2121_vm9, %v2100_v23, %v5364_v36  ;;  %v1106_v10 = vsel %vm1029_vm4, %v1103_v14, %v1105_v50 }
 0x1d2   : > { %v5419_v21 = vunpack.i.h.bf16 %v5417_v39  ;;  %v5418_v59 = vunpack.i.l.bf16 %v5417_v39  ;;  %v10730_v39 = vld [vmem:[#allocation10_spill] sm:$0xff]  ;;  %v7345_v4 = vpack.i.bf16 %v923_v3, %v921_v26 }
 0x1d3   : > { %5671 = vrot.lane.b32.xlu0 %v6722_v52, %s5751_s22  ;;  %5691 = vrot.lane.b32.xlu1 %v10727_v56, %s5757_s9  ;;  %v2132_v52 = vsel %vm2121_vm9, %v2099_v55, %v5363_v49  ;;  %v1000_v36 = vrot.slane %v10730_v39, 1  ;;  %v1002_v49 = vrot.slane %v7328_v0, 1  ;;  %v10732_v55 = vld [vmem:[#allocation5_spill] sm:$0xff] }
 0x1d4   : > { %v2165_v63 = vsel %vm2154_vm10, %v2132_v52, %v5418_v59  ;;  %v2166_v8 = vsel %vm2154_vm10, %v2133_v37, %v5419_v21  ;;  %v10733_v21 = vrot.slane %v10732_v55, 7  ;;  %v10734_v52 = vld [vmem:[#allocation72_spill] sm:$0xff]  ;;  %v5359_v37 = vunpack.i.h.bf16 %v7262_v9 }
 0x1d5   : > { %v7305_v19 = vpop.permute.xlu0 %5386  ;;  %v5422_v46 = vpop.permute.xlu1 %5421  ;;  %v10737_v55 = vld [vmem:[#allocation8_spill] sm:$0xff] }
 0x1d6   : > { %v5424_v29 = vunpack.i.h.bf16 %v5422_v46  ;;  %v5423_v28 = vunpack.i.l.bf16 %v5422_v46  ;;  %v7352_v41 = vsel %vm528_vm2, %v10733_v21, 0.0  ;;  %v5705_v46 = vpack.i.bf16 %v921_v26, %v7123_v13  ;;  %v10736_v13 = vld [vmem:[#allocation14_spill] sm:$0xff] }
 0x1d7   : > { %5676 = vrot.lane.b32.xlu0 %v5680_v60, %s5755_s7  ;;  %1266 = vrot.lane.b32.xlu1 %v923_v3, %s5754_s29  ;;  %v5388_v60 = vunpack.i.l.bf16 %v7305_v19  ;;  %v1970_v3 = vsel %vm282_vm1, %v10734_v52, %v5314_v6  ;;  %v1007_v34 = vrot.slane %v7352_v41, 1  ;;  %v10738_v21 = vrot.slane %v10737_v55, 7 }
 0x1d8   : > { %v2198_v32 = vsel %vm2187_vm11, %v2165_v63, %v5423_v28  ;;  %v2199_v54 = vsel %vm2187_vm11, %v2166_v8, %v5424_v29  ;;  %v7361_v29 = vpack.i.bf16 %v1106_v10, %v1104_v48  ;;  %v5710_v28 = vpack.i.bf16 %v1104_v48, %v7148_v7 }
 0x1d9   : > { %v7319_v16 = vpop.permute.xlu0 %5396  ;;  %v7323_v22 = vpop.permute.xlu1 %5426  ;;  %v2225_v38 = vpack.c.bf16 %v2199_v54, %v2198_v32  ;;  %v2002_v18 = vsel %vm1990_vm5, %v1970_v3, %v5324_v51  ;;  %v1005_v8 = vrot.slane %v10736_v13, 1  ;;  %v5384_v51 = vunpack.i.h.bf16 %v7292_v42 }
 0x1da   : > { %v5398_v24 = vunpack.i.l.bf16 %v7319_v16  ;;  %v2035_v9 = vsel %vm2022_vm6, %v2002_v18, %v5358_v53  ;;  %v5389_v53 = vunpack.i.h.bf16 %v7305_v19  ;;  %v5393_v3 = vunpack.i.l.bf16 %v7266_v61 }
 0x1db   : > { %5696 = vrot.lane.b32.xlu0 %v10726_v12, %s5752_s27  ;;  %1359 = vrot.lane.b32.xlu1 %v1106_v10, %s5758_s10  ;;  %v10731_v12 = vld [vmem:[#allocation65_spill] sm:$0xff]  ;;  %v5378_v10 = vunpack.i.l.bf16 %v7276_v11  ;;  %v7420_v18 = vsel %vm846_vm3, %v1005_v8, %v1007_v34  ;;  %v10747_v34 = vld [vmem:[#allocation4_spill] sm:$0xff] }
 0x1dc   : > { %5060 = vmatmul.mubr.msk.bf16.gmra.mrb[4].mxu1 %vm2279_vm12, %v2225_v38  ;;  %v1971_v30 = vsel %vm282_vm1, %v10731_v12, %v5388_v60  ;;  %v5354_v60 = vunpack.i.h.bf16 %v7240_v43  ;;  %v5353_v38 = vunpack.i.l.bf16 %v7240_v43  ;;  %v5383_v43 = vunpack.i.l.bf16 %v7292_v42  ;;  %v10739_v42 = vld [vmem:[#allocation2_spill] sm:$0xff]  ;;  %10742 = vst [vmem:[#allocation85_spill] sm:$0xff] %v7420_v18 }
 0x1dd   : > { %v5407_v45 = vpop.permute.xlu0 %5406  ;;  %v7347_v47 = vpop.permute.xlu1 %5441  ;;  %v2003_v59 = vsel %vm1990_vm5, %v1971_v30, %v5398_v24  ;;  %v5379_v24 = vunpack.i.h.bf16 %v7276_v11 }
 0x1de   : > { %v5409_v50 = vunpack.i.h.bf16 %v5407_v45  ;;  %v5408_v23 = vunpack.i.l.bf16 %v5407_v45  ;;  %v2036_v32 = vsel %vm2022_vm6, %v2003_v59, %v5359_v37  ;;  %v7403_v59 = vsel %vm528_vm2, %v10738_v21, 0.0 }
 0x1df   : > { %5701 = vrot.lane.b32.xlu0 %v10727_v56, %s5753_s28  ;;  %5726 = vrot.lane.b32.xlu1 %v7345_v4, %s5752_s27  ;;  %v7370_v56 = vsel %vm846_vm3, %v1000_v36, %v1002_v49  ;;  %v5349_v21 = vunpack.i.h.bf16 %v7198_v40 }
 0x1e0   : > { %10735 = vst [vmem:[#allocation74_spill] sm:$0xff] %v7370_v56  ;;  %v2068_v58 = vsel %vm2055_vm7, %v2035_v9, %v5408_v23  ;;  %v2069_v15 = vsel %vm2055_vm7, %v2036_v32, %v5409_v50  ;;  %v10740_v50 = vrot.slane %v10739_v42, 7  ;;  %v1012_v32 = vrot.slane %v7403_v59, 1 }
 0x1e1   : > { %v5412_v63 = vpop.permute.xlu0 %5411  ;;  %v7376_v54 = vpop.permute.xlu1 %5446 }
 0x1e2   : > { %v5414_v14 = vunpack.i.h.bf16 %v5412_v63  ;;  %v5413_v7 = vunpack.i.l.bf16 %v5412_v63  ;;  %v7408_v23 = vsel %vm528_vm2, 0.0, %v10740_v50  ;;  %v5403_v63 = vunpack.i.l.bf16 %v7280_v35 }
 0x1e3   : > { %5706 = vrot.lane.b32.xlu0 %v5705_v46, %s5754_s29  ;;  %5731 = vrot.lane.b32.xlu1 %v7361_v29, %s5753_s28  ;;  %10741 = vst [vmem:[#allocation66_spill] sm:$0xff] %v7408_v23  ;;  %v5399_v46 = vunpack.i.h.bf16 %v7319_v16 }
 0x1e4   : > { %v2101_v6 = vsel %vm2088_vm8, %v2068_v58, %v5413_v7  ;;  %v2102_v26 = vsel %vm2088_vm8, %v2069_v15, %v5414_v14  ;;  %v10744_v14 = vld [vmem:[#allocation12_spill] sm:$0xff] }
 0x1e5   : > { %v2134_v48 = vsel %vm2121_vm9, %v2101_v6, %v5353_v38  ;;  %v2135_v45 = vsel %vm2121_vm9, %v2102_v26, %v5354_v60  ;;  %v7393_v49 = vpop.permute.xlu0 %5431  ;;  %v7396_v11 = vpop.permute.xlu1 %5451  ;;  %v10745_v7 = vrot.slane %v10744_v14, 7  ;;  %v10746_v38 = vld [vmem:[#allocation89_spill] sm:$0xff]  ;;  %v10750_v26 = vld [vmem:[#allocation20_spill] sm:$0xff] }
 0x1e6   : > { %v2167_v12 = vsel %vm2154_vm10, %v2134_v48, %v5378_v10  ;;  %v2168_v30 = vsel %vm2154_vm10, %v2135_v45, %v5379_v24  ;;  %v1972_v58 = vsel %vm282_vm1, %v10746_v38, %v5389_v53  ;;  %v10748_v24 = vrot.slane %v10747_v34, 7  ;;  %v10751_v48 = vld [vmem:[#allocation68_spill] sm:$0xff] }
 0x1e7   : > { %5711 = vrot.lane.b32.xlu0 %v5710_v28, %s5758_s10  ;;  %v2200_v19 = vsel %vm2187_vm11, %v2167_v12, %v5383_v43  ;;  %v2201_v52 = vsel %vm2187_vm11, %v2168_v30, %v5384_v51  ;;  %2594 = vrot.lane.b32.xlu1 %v7370_v56, %s5754_s29  ;;  %v10743_v28 = vld [vmem:[#allocation18_spill] sm:$0xff]  ;;  %v7430_v60 = vsel %vm528_vm2, %v10745_v7, 0.0  ;;  %v2004_v6 = vsel %vm1990_vm5, %v1972_v58, %v5399_v46  ;;  %v10753_v46 = vld [vmem:[#allocation19_spill] sm:$0xff] }
 0x1e8   : > { %v2226_v37 = vpack.c.bf16 %v2201_v52, %v2200_v19  ;;  %v10426_v9 = vrot.slane %v10743_v28, 1  ;;  %v7440_v10 = vsel %vm528_vm2, 0.0, %v10748_v24  ;;  %v10425_v51 = vrot.slane %v10750_v26, 1  ;;  %v10760_v24 = vld [vmem:[#allocation23_spill] sm:$0xff] }
 0x1e9   : > { %v7423_v16 = vpop.permute.xlu0 %5436  ;;  %v7434_v15 = vpop.permute.xlu1 %5471  ;;  %10749 = vst [vmem:[#allocation95_spill] sm:$0xff] %v7440_v10  ;;  %v5348_v43 = vunpack.i.l.bf16 %v7198_v40  ;;  %v1973_v45 = vsel %vm282_vm1, %v10751_v48, %v5393_v3  ;;  %v1017_v53 = vrot.slane %v7430_v60, 1  ;;  %v999_v12 = vrot.slane %v7408_v23, 1 }
 0x1ea   : > { %5063 = vmatprep.mubr.msk.bf16.mxu1 %vm2279_vm12, %v2226_v37  ;;  %v2005_v30 = vsel %vm1990_vm5, %v1973_v45, %v5403_v63  ;;  %v10754_v19 = vrot.slane %v10753_v46, 7  ;;  %v1004_v3 = vrot.slane %v7440_v10, 1  ;;  %v5368_v37 = vunpack.i.l.bf16 %v7224_v62  ;;  %v10755_v63 = vld [vmem:[#allocation7_spill] sm:$0xff] }
 0x1eb   : > { %5716 = vrot.lane.b32.xlu0 %v7345_v4, %s5756_s8  ;;  %2598 = vrot.lane.b32.xlu1 %v7420_v18, %s5754_s29  ;;  %v7459_v4 = vsel %vm846_vm3, %v10426_v9, %v1012_v32  ;;  %v2037_v42 = vsel %vm2022_vm6, %v2004_v6, %v5348_v43  ;;  %v10756_v32 = vrot.slane %v10755_v63, 7  ;;  %v2038_v14 = vsel %vm2022_vm6, %v2005_v30, %v5349_v21  ;;  %v10764_v63 = vld [vmem:[#allocation11_spill] sm:$0xff] }
 0x1ec   : > { %10752 = vst [vmem:[#allocation97_spill] sm:$0xff] %v7459_v4  ;;  %v7468_v52 = vsel %vm528_vm2, %v10754_v19, 0.0  ;;  %v7485_v7 = vsel %vm846_vm3, %v10425_v51, %v1017_v53  ;;  %v7490_v38 = vsel %vm846_vm3, %v999_v12, %v1000_v36  ;;  %v2070_v58 = vsel %vm2055_vm7, %v2037_v42, %v5368_v37  ;;  %v10762_v36 = vld [vmem:[#allocation22_spill] sm:$0xff] }
 0x1ed   : > { %v7454_v55 = vpop.permute.xlu0 %5456  ;;  %v7463_v50 = vpop.permute.xlu1 %5481  ;;  %v7477_v40 = vsel %vm528_vm2, 0.0, %v10756_v32  ;;  %10758 = vst [vmem:[#allocation65_spill] sm:$0xff] %v7485_v7  ;;  %10759 = vst [vmem:[#allocation5_spill] sm:$0xff] %v7490_v38  ;;  %v10431_v6 = vrot.slane %v10760_v24, 1  ;;  %v1022_v43 = vrot.slane %v7468_v52, 1  ;;  %v5373_v48 = vunpack.i.l.bf16 %v7243_v17 }
 0x1ee   : > { %10757 = vst [vmem:[#allocation3_spill] sm:$0xff] %v7477_v40  ;;  %v7502_v53 = vsel %vm846_vm3, %v1004_v3, %v1005_v8  ;;  %v10763_v12 = vrot.slane %v10762_v36, 7  ;;  %v5444_v30 = vunpack.i.h.bf16 %v7347_v47  ;;  %v5443_v21 = vunpack.i.l.bf16 %v7347_v47 }
 0x1ef   : > { %5721 = vrot.lane.b32.xlu0 %v7361_v29, %s5757_s9  ;;  %2602 = vrot.lane.b32.xlu1 %v7459_v4, %s5754_s29  ;;  %v5369_v29 = vunpack.i.h.bf16 %v7224_v62  ;;  %10761 = vst [vmem:[#allocation72_spill] sm:$0xff] %v7502_v53  ;;  %v1009_v46 = vrot.slane %v7477_v40, 1  ;;  %v5374_v19 = vunpack.i.h.bf16 %v7243_v17  ;;  %v2103_v8 = vsel %vm2088_vm8, %v2070_v58, %v5373_v48  ;;  %v10768_v17 = vld [vmem:[#allocation28_spill] sm:$0xff]  ;;  %v10769_v48 = vld [vmem:[#allocation13_spill] sm:$0xff] }
 0x1f0   : > { %v7507_v62 = vsel %vm528_vm2, %v10763_v12, 0.0  ;;  %v10765_v32 = vrot.slane %v10764_v63, 7  ;;  %v1025_v36 = vrot.slane %v10768_v17, 1  ;;  %v10770_v12 = vld [vmem:[#allocation15_spill] sm:$0xff]  ;;  %v5439_v44 = vunpack.i.h.bf16 %v7423_v16 }
 0x1f1   : > { %v7494_v34 = vpop.permute.xlu0 %5461  ;;  %v5497_v45 = vpop.permute.xlu1 %5496  ;;  %v2071_v42 = vsel %vm2055_vm7, %v2038_v14, %v5369_v29  ;;  %v7529_v29 = vsel %vm846_vm3, %v10431_v6, %v1022_v43  ;;  %v1027_v58 = vrot.slane %v7507_v62, 1  ;;  %v10771_v51 = vrot.slane %v10770_v12, 7 }
 0x1f2   : > { %v5499_v3 = vunpack.i.h.bf16 %v5497_v45  ;;  %v5498_v37 = vunpack.i.l.bf16 %v5497_v45  ;;  %v7522_v47 = vsel %vm528_vm2, 0.0, %v10765_v32  ;;  %10767 = vst [vmem:[#allocation2_spill] sm:$0xff] %v7529_v29  ;;  %v1110_v45 = vrot.slane %v10769_v48, 2  ;;  %v10773_v32 = vld [vmem:[#allocation21_spill] sm:$0xff] }
 0x1f3   : > { %2592 = vrot.lane.b32.xlu0 %v7490_v38, %s5754_s29  ;;  %2606 = vrot.lane.b32.xlu1 %v7485_v7, %s5754_s29  ;;  %10766 = vst [vmem:[#allocation8_spill] sm:$0xff] %v7522_v47  ;;  %v7537_v63 = vsel %vm528_vm2, 0.0, %v10771_v51  ;;  %v10774_v9 = vrot.slane %v10773_v32, 7  ;;  %v2104_v38 = vsel %vm2088_vm8, %v2071_v42, %v5374_v19  ;;  %v2136_v6 = vsel %vm2121_vm9, %v2103_v8, %v5443_v21 }
 0x1f4   : > { %10772 = vst [vmem:[#allocation12_spill] sm:$0xff] %v7537_v63  ;;  %v2137_v4 = vsel %vm2121_vm9, %v2104_v38, %v5444_v30  ;;  %v2169_v51 = vsel %vm2154_vm10, %v2136_v6, %v5498_v37  ;;  %v1014_v21 = vrot.slane %v7522_v47, 1  ;;  %v7564_v6 = vsel %vm846_vm3, %v1025_v36, %v1027_v58 }
 0x1f5   : > { %v7524_v14 = vpop.permute.xlu0 %5466  ;;  %v7542_v7 = vsel %vm528_vm2, 0.0, %v10774_v9  ;;  %v5502_v43 = vpop.permute.xlu1 %5501  ;;  %v2170_v48 = vsel %vm2154_vm10, %v2137_v4, %v5499_v3  ;;  %v10776_v9 = vrot.slane %v10743_v28, 1  ;;  %10778 = vst [vmem:[#allocation68_spill] sm:$0xff] %v7564_v6  ;;  %v10779_v4 = vld [vmem:[#allocation9_spill] sm:$0xff]  ;;  %v5394_v58 = vunpack.i.h.bf16 %v7266_v61 }
 0x1f6   : > { %10775 = vst [vmem:[#allocation89_spill] sm:$0xff] %v7542_v7  ;;  %v5504_v18 = vunpack.i.h.bf16 %v5502_v43  ;;  %v5503_v56 = vunpack.i.l.bf16 %v5502_v43  ;;  %v5468_v3 = vunpack.i.l.bf16 %v7524_v14  ;;  %v10781_v43 = vld [vmem:[#allocation27_spill] sm:$0xff]  ;;  %v5404_v8 = vunpack.i.h.bf16 %v7280_v35 }
 0x1f7   : > { %2596 = vrot.lane.b32.xlu0 %v7502_v53, %s5754_s29  ;;  %2610 = vrot.lane.b32.xlu1 %v7529_v29, %s5754_s29  ;;  %v7556_v42 = vsel %vm846_vm3, %v1009_v46, %v10776_v9  ;;  %v10780_v46 = vld [vmem:[#allocation24_spill] sm:$0xff]  ;;  %v1115_v9 = vrot.slane %v10781_v43, 2  ;;  %v10785_v43 = vld [vmem:[#allocation33_spill] sm:$0xff]  ;;  %v10786_v29 = vrot.slane %v10779_v4, 2  ;;  %v10788_v53 = vld [vmem:[#allocation67_spill] sm:$0xff]  ;;  %v5454_v57 = vunpack.i.h.bf16 %v7396_v11 }
 0x1f8   : > { %10777 = vst [vmem:[#allocation4_spill] sm:$0xff] %v7556_v42  ;;  %v2202_v38 = vsel %vm2187_vm11, %v2169_v51, %v5503_v56  ;;  %v2203_v30 = vsel %vm2187_vm11, %v2170_v48, %v5504_v18  ;;  %v1019_v18 = vrot.slane %v7537_v63, 1  ;;  %v10782_v51 = vrot.slane %v10750_v26, 1 }
 0x1f9   : > { %v7561_v19 = vpop.permute.xlu0 %5476  ;;  %v7568_v37 = vpop.permute.xlu1 %5506  ;;  %v2227_v12 = vpack.c.bf16 %v2203_v30, %v2202_v38  ;;  %v10784_v38 = vld [vmem:[#allocation32_spill] sm:$0xff]  ;;  %v1120_v32 = vrot.slane %v10785_v43, 2  ;;  %v7591_v61 = vsel %vm1029_vm4, %v10786_v29, %v1110_v45  ;;  %v10789_v30 = vrot.slane %v10780_v46, 2 }
 0x1fa   : > { %v5478_v56 = vunpack.i.l.bf16 %v7561_v19  ;;  %v7583_v48 = vsel %vm846_vm3, %v1014_v21, %v10782_v51  ;;  %10787 = vst [vmem:[#allocation7_spill] sm:$0xff] %v7591_v61  ;;  %v1975_v21 = vsel %vm282_vm1, %v10788_v53, %v5468_v3  ;;  %v10791_v29 = vrot.slane %v10760_v24, 1  ;;  %v10793_v53 = vld [vmem:[#allocation84_spill] sm:$0xff] }
 0x1fb   : > { %2600 = vrot.lane.b32.xlu0 %v7556_v42, %s5754_s29  ;;  %2614 = vrot.lane.b32.xlu1 %v7564_v6, %s5754_s29  ;;  %10783 = vst [vmem:[#allocation19_spill] sm:$0xff] %v7583_v48  ;;  %v1024_v6 = vrot.slane %v7542_v7, 1  ;;  %v7602_v43 = vsel %vm1029_vm4, %v10789_v30, %v1115_v9  ;;  %v1974_v3 = vsel %vm282_vm1, %v10793_v53, %v5394_v58  ;;  %v10794_v9 = vrot.slane %v10784_v38, 2  ;;  %v10799_v53 = vld [vmem:[#allocation6_spill] sm:$0xff] }
 0x1fc   : > { %5064 = vmatmul.mubr.msk.bf16.gmra.mrb[8].mxu1 %vm2279_vm12, %v2227_v12  ;;  %v5438_v12 = vunpack.i.l.bf16 %v7423_v16  ;;  %10790 = vst [vmem:[#allocation22_spill] sm:$0xff] %v7602_v43  ;;  %v2007_v35 = vsel %vm1990_vm5, %v1975_v21, %v5478_v56  ;;  %v7610_v45 = vsel %vm846_vm3, %v1019_v18, %v10791_v29  ;;  %v10796_v56 = vld [vmem:[#allocation34_spill] sm:$0xff]  ;;  %v2006_v21 = vsel %vm1990_vm5, %v1974_v3, %v5404_v8  ;;  %v10798_v29 = vld [vmem:[#allocation35_spill] sm:$0xff] }
 0x1fd   : > { %v5487_v42 = vpop.permute.xlu0 %5486  ;;  %v7597_v51 = vpop.permute.xlu1 %5521  ;;  %10792 = vst [vmem:[#allocation11_spill] sm:$0xff] %v7610_v45  ;;  %v7625_v18 = vsel %vm846_vm3, %v1024_v6, %v1025_v36  ;;  %v1125_v58 = vrot.slane %v10798_v29, 2  ;;  %v1107_v16 = vrot.slane %v10799_v53, 2  ;;  %v5434_v30 = vunpack.i.h.bf16 %v7393_v49 }
 0x1fe   : > { %v5489_v27 = vunpack.i.h.bf16 %v5487_v42  ;;  %v5488_v33 = vunpack.i.l.bf16 %v5487_v42  ;;  %v7620_v42 = vsel %vm1029_vm4, %v10794_v9, %v1120_v32  ;;  %10797 = vst [vmem:[#allocation15_spill] sm:$0xff] %v7625_v18  ;;  %v2039_v31 = vsel %vm2022_vm6, %v2006_v21, %v5438_v12 }
 0x1ff   : > { %2604 = vrot.lane.b32.xlu0 %v7583_v48, %s5754_s29  ;;  %2840 = vrot.lane.b32.xlu1 %v7591_v61, %s5758_s10  ;;  %10795 = vst [vmem:[#allocation13_spill] sm:$0xff] %v7620_v42  ;;  %v2040_v61 = vsel %vm2022_vm6, %v2007_v35, %v5439_v44  ;;  %v5433_v8 = vunpack.i.l.bf16 %v7393_v49  ;;  %v5459_v6 = vunpack.i.h.bf16 %v7454_v55  ;;  %v5458_v12 = vunpack.i.l.bf16 %v7454_v55 }
 0x200   : > { %v2072_v3 = vsel %vm2055_vm7, %v2039_v31, %v5488_v33  ;;  %v2073_v36 = vsel %vm2055_vm7, %v2040_v61, %v5489_v27  ;;  %v5464_v49 = vunpack.i.h.bf16 %v7494_v34  ;;  %v5463_v33 = vunpack.i.l.bf16 %v7494_v34 }
 0x201   : > { %v5492_v48 = vpop.permute.xlu0 %5491  ;;  %v7631_v2 = vpop.permute.xlu1 %5526  ;;  %v5469_v61 = vunpack.i.h.bf16 %v7524_v14 }
 0x202   : > { %v5494_v32 = vunpack.i.h.bf16 %v5492_v48  ;;  %v5493_v9 = vunpack.i.l.bf16 %v5492_v48 }
 0x203   : > { %2608 = vrot.lane.b32.xlu0 %v7610_v45, %s5754_s29  ;;  %2844 = vrot.lane.b32.xlu1 %v7602_v43, %s5758_s10  ;;  %v10821_v45 = vld [vmem:[#allocation50_spill] sm:$0xff] }
 0x204   : > { %v2105_v44 = vsel %vm2088_vm8, %v2072_v3, %v5493_v9  ;;  %v2106_v35 = vsel %vm2088_vm8, %v2073_v36, %v5494_v32  ;;  %v5479_v32 = vunpack.i.h.bf16 %v7561_v19  ;;  %v5473_v3 = vunpack.i.l.bf16 %v7434_v15 }
 0x205   : > { %v2138_v27 = vsel %vm2121_vm9, %v2105_v44, %v5433_v8  ;;  %v2139_v31 = vsel %vm2121_vm9, %v2106_v35, %v5434_v30  ;;  %v7649_v48 = vpop.permute.xlu0 %5511  ;;  %v7652_v55 = vpop.permute.xlu1 %5531  ;;  %v10800_v30 = vld [vmem:[#allocation16_spill] sm:$0xff]  ;;  %v10801_v36 = vrot.slane %v10779_v4, 2  ;;  %v5483_v19 = vunpack.i.l.bf16 %v7463_v50 }
 0x206   : > { %v2171_v21 = vsel %vm2154_vm10, %v2138_v27, %v5458_v12  ;;  %v2172_v29 = vsel %vm2154_vm10, %v2139_v31, %v5459_v6  ;;  %v1112_v8 = vrot.slane %v10800_v30, 2  ;;  %v10803_v44 = vrot.slane %v10796_v56, 2  ;;  %v10806_v27 = vld [vmem:[#allocation40_spill] sm:$0xff] }
 0x207   : > { %2612 = vrot.lane.b32.xlu0 %v7625_v18, %s5754_s29  ;;  %v2204_v34 = vsel %vm2187_vm11, %v2171_v21, %v5463_v33  ;;  %v2205_v9 = vsel %vm2187_vm11, %v2172_v29, %v5464_v49  ;;  %2848 = vrot.lane.b32.xlu1 %v7620_v42, %s5758_s10  ;;  %v7668_v6 = vsel %vm1029_vm4, %v1107_v16, %v10801_v36  ;;  %v10805_v49 = vld [vmem:[#allocation39_spill] sm:$0xff]  ;;  %v1130_v31 = vrot.slane %v10806_v27, 2  ;;  %v10811_v42 = vld [vmem:[#allocation70_spill] sm:$0xff]  ;;  %s5759_s29 = smov 120  }
 0x208   : > { %v2228_v14 = vpack.c.bf16 %v2205_v9, %v2204_v34  ;;  %10802 = vst [vmem:[#allocation21_spill] sm:$0xff] %v7668_v6  ;;  %v7676_v35 = vsel %vm1029_vm4, %v10803_v44, %v1125_v58  ;;  %v1128_v33 = vrot.slane %v10805_v49, 2  ;;  %v10807_v21 = vld [vmem:[#allocation103_spill] sm:$0xff]  ;;  %v10808_v9 = vrot.slane %v10780_v46, 2  ;;  %v10825_v49 = vld [vmem:[#allocation57_spill] sm:$0xff] }
 0x209   : > { %v7671_v12 = vpop.permute.xlu0 %5516  ;;  %10804 = vst [vmem:[#allocation27_spill] sm:$0xff] %v7676_v35  ;;  %v1976_v29 = vsel %vm282_vm1, %v10807_v21, %v5469_v61  ;;  %v7682_v34 = vpop.permute.xlu1 %5551  ;;  %v10810_v36 = vld [vmem:[#allocation43_spill] sm:$0xff]  ;;  %v5428_v27 = vunpack.i.l.bf16 %v7323_v22  ;;  %v1977_v61 = vsel %vm282_vm1, %v10811_v42, %v5473_v3  ;;  %v10813_v21 = vld [vmem:[#allocation17_spill] sm:$0xff] }
 0x20a   : > { %5067 = vmatprep.mubr.msk.bf16.mxu1 %vm2279_vm12, %v2228_v14  ;;  %v2008_v16 = vsel %vm1990_vm5, %v1976_v29, %v5479_v32  ;;  %v7691_v58 = vsel %vm1029_vm4, %v1112_v8, %v10808_v9  ;;  %v10812_v14 = vld [vmem:[#allocation45_spill] sm:$0xff]  ;;  %v1117_v29 = vrot.slane %v10813_v21, 2  ;;  %v7705_v8 = vsel %vm1029_vm4, %v1128_v33, %v1130_v31 }
 0x20b   : > { %2838 = vrot.lane.b32.xlu0 %v7668_v6, %s5758_s10  ;;  %10809 = vst [vmem:[#allocation33_spill] sm:$0xff] %v7691_v58  ;;  %2852 = vrot.lane.b32.xlu1 %v7676_v35, %s5758_s10  ;;  %v1135_v32 = vrot.slane %v10812_v14, 2  ;;  %v2009_v6 = vsel %vm1990_vm5, %v1977_v61, %v5483_v19  ;;  %10814 = vst [vmem:[#allocation67_spill] sm:$0xff] %v7705_v8  ;;  %v5429_v9 = vunpack.i.h.bf16 %v7323_v22  ;;  %v10815_v42 = vld [vmem:[#allocation29_spill] sm:$0xff]  ;;  %v5448_v35 = vunpack.i.l.bf16 %v7376_v54 }
 0x20c   : > { %v2041_v44 = vsel %vm2022_vm6, %v2008_v16, %v5428_v27  ;;  %v1122_v3 = vrot.slane %v10815_v42, 2  ;;  %v10816_v31 = vrot.slane %v10810_v36, 2  ;;  %v10818_v16 = vrot.slane %v10784_v38, 2 }
 0x20d   : > { %v7702_v43 = vpop.permute.xlu0 %5536  ;;  %v7709_v18 = vpop.permute.xlu1 %5561  ;;  %v2042_v19 = vsel %vm2022_vm6, %v2009_v6, %v5429_v9  ;;  %v5449_v61 = vunpack.i.h.bf16 %v7376_v54  ;;  %v2074_v14 = vsel %vm2055_vm7, %v2041_v44, %v5448_v35  ;;  %v10820_v6 = vld [vmem:[#allocation49_spill] sm:$0xff]  ;;  %v5453_v42 = vunpack.i.l.bf16 %v7396_v11 }
 0x20e   : > { %v7721_v22 = vsel %vm1029_vm4, %v10816_v31, %v1135_v32  ;;  %v7726_v27 = vsel %vm1029_vm4, %v1117_v29, %v10818_v16  ;;  %v10822_v32 = vrot.slane %v10796_v56, 2  ;;  %v10824_v29 = vld [vmem:[#allocation56_spill] sm:$0xff]  ;;  %v1145_v54 = vrot.slane %v10825_v49, 2 }
 0x20f   : > { %2842 = vrot.lane.b32.xlu0 %v7691_v58, %s5758_s10  ;;  %2856 = vrot.lane.b32.xlu1 %v7705_v8, %s5758_s10  ;;  %10817 = vst [vmem:[#allocation84_spill] sm:$0xff] %v7721_v22  ;;  %10819 = vst [vmem:[#allocation35_spill] sm:$0xff] %v7726_v27  ;;  %v1140_v8 = vrot.slane %v10821_v45, 2  ;;  %v5524_v35 = vunpack.i.h.bf16 %v7597_v51  ;;  %v5523_v44 = vunpack.i.l.bf16 %v7597_v51  ;;  %v2075_v9 = vsel %vm2055_vm7, %v2042_v19, %v5449_v61  ;;  %v10826_v45 = vld [vmem:[#allocation36_spill] sm:$0xff] }
 0x210   : > { %v7738_v31 = vsel %vm1029_vm4, %v1122_v3, %v10822_v32  ;;  %v1127_v30 = vrot.slane %v10826_v45, 2  ;;  %v2107_v3 = vsel %vm2088_vm8, %v2074_v14, %v5453_v42  ;;  %v10827_v51 = vrot.slane %v10820_v6, 2 }
 0x211   : > { %v7730_v58 = vpop.permute.xlu0 %5541  ;;  %v5577_v21 = vpop.permute.xlu1 %5576  ;;  %10823 = vst [vmem:[#allocation40_spill] sm:$0xff] %v7738_v31  ;;  %v2108_v61 = vsel %vm2088_vm8, %v2075_v9, %v5454_v57  ;;  %v2140_v11 = vsel %vm2121_vm9, %v2107_v3, %v5523_v44  ;;  %v10830_v57 = vrot.slane %v10824_v29, 2 }
 0x212   : > { %v5579_v32 = vunpack.i.h.bf16 %v5577_v21  ;;  %v5578_v56 = vunpack.i.l.bf16 %v5577_v21  ;;  %v7757_v19 = vsel %vm1029_vm4, %v10827_v51, %v1140_v8  ;;  %v2141_v42 = vsel %vm2121_vm9, %v2108_v61, %v5524_v35 }
 0x213   : > { %2846 = vrot.lane.b32.xlu0 %v7726_v27, %s5758_s10  ;;  %2860 = vrot.lane.b32.xlu1 %v7721_v22, %s5758_s10  ;;  %10828 = vst [vmem:[#allocation103_spill] sm:$0xff] %v7757_v19  ;;  %v10829_v27 = vld [vmem:[#allocation44_spill] sm:$0xff]  ;;  %v7772_v8 = vsel %vm1029_vm4, %v10830_v57, %v1145_v54  ;;  %v7775_v9 = vsel %vm1029_vm4, %v1127_v30, %v1128_v33  ;;  %v1155_v30 = vrot.slane %v7328_v0, 2  ;;  %v5474_v57 = vunpack.i.h.bf16 %v7434_v15 }
 0x214   : > { %v1132_v45 = vrot.slane %v10829_v27, 2  ;;  %v2173_v22 = vsel %vm2154_vm10, %v2140_v11, %v5578_v56  ;;  %v2174_v53 = vsel %vm2154_vm10, %v2141_v42, %v5579_v32  ;;  %10831 = vst [vmem:[#allocation70_spill] sm:$0xff] %v7772_v8  ;;  %10832 = vst [vmem:[#allocation45_spill] sm:$0xff] %v7775_v9  ;;  %v10833_v56 = vld [vmem:[#allocation61_spill] sm:$0xff]  ;;  %v10834_v32 = vld [vmem:[#allocation62_spill] sm:$0xff]  ;;  %v5484_v54 = vunpack.i.h.bf16 %v7463_v50 }
 0x215   : > { %v7752_v49 = vpop.permute.xlu0 %5546  ;;  %v5582_v16 = vpop.permute.xlu1 %5581  ;;  %v1150_v51 = vrot.slane %v10834_v32, 2  ;;  %v5518_v15 = vunpack.i.l.bf16 %v7671_v12  ;;  %v10842_v0 = vrot.slane %v10730_v39, 2 }
 0x216   : > { %v5584_v21 = vunpack.i.h.bf16 %v5582_v16  ;;  %v5583_v14 = vunpack.i.l.bf16 %v5582_v16  ;;  %v5548_v61 = vunpack.i.l.bf16 %v7752_v49 }
 0x217   : > { %2850 = vrot.lane.b32.xlu0 %v7738_v31, %s5758_s10  ;;  %2864 = vrot.lane.b32.xlu1 %v7757_v19, %s5758_s10 }
 0x218   : > { %v2206_v16 = vsel %vm2187_vm11, %v2173_v22, %v5583_v14  ;;  %v2207_v35 = vsel %vm2187_vm11, %v2174_v53, %v5584_v21  ;;  %v10835_v53 = vrot.slane %v10810_v36, 2  ;;  %v10837_v21 = vld [vmem:[#allocation46_spill] sm:$0xff] }
 0x219   : > { %v7779_v44 = vpop.permute.xlu0 %5556  ;;  %v7784_v11 = vpop.permute.xlu1 %5586  ;;  %v2229_v42 = vpack.c.bf16 %v2207_v35, %v2206_v16  ;;  %v1137_v14 = vrot.slane %v10837_v21, 2  ;;  %v1160_v16 = vrot.slane %v7352_v41, 2  ;;  %v10838_v35 = vld [vmem:[#allocation55_spill] sm:$0xff]  ;;  %v7818_v41 = vsel %vm1029_vm4, %v10842_v0, %v1155_v30 }
 0x21a   : > { %v5558_v33 = vunpack.i.l.bf16 %v7779_v44  ;;  %v7794_v22 = vsel %vm1029_vm4, %v1132_v45, %v10835_v53  ;;  %v1142_v32 = vrot.slane %v10838_v35, 2  ;;  %v10839_v45 = vrot.slane %v10833_v56, 2  ;;  %10843 = vst [vmem:[#allocation62_spill] sm:$0xff] %v7818_v41 }
 0x21b   : > { %2854 = vrot.lane.b32.xlu0 %v7775_v9, %s5758_s10  ;;  %10836 = vst [vmem:[#allocation50_spill] sm:$0xff] %v7794_v22  ;;  %2868 = vrot.lane.b32.xlu1 %v7772_v8, %s5758_s10  ;;  %v10841_v9 = vld [vmem:[#allocation69_spill] sm:$0xff]  ;;  %v5519_v35 = vunpack.i.h.bf16 %v7671_v12  ;;  %v10849_v30 = vrot.slane %v10824_v29, 2  ;;  %v1165_v12 = vrot.slane %v7403_v59, 2  ;;  %v5539_v59 = vunpack.i.h.bf16 %v7702_v43 }
 0x21c   : > { %5068 = vmatmul.mubr.msk.bf16.gmra.mrb[12].mxu1 %vm2279_vm12, %v2229_v42  ;;  %v7808_v53 = vsel %vm1029_vm4, %v10839_v45, %v1150_v51  ;;  %v1979_v8 = vsel %vm282_vm1, %v10841_v9, %v5548_v61  ;;  %v10844_v51 = vrot.slane %v10820_v6, 2  ;;  %v10846_v9 = vld [vmem:[#allocation102_spill] sm:$0xff] }
 0x21d   : > { %v5567_v3 = vpop.permute.xlu0 %5566  ;;  %10840 = vst [vmem:[#allocation57_spill] sm:$0xff] %v7808_v53  ;;  %v7813_v42 = vpop.permute.xlu1 %5601  ;;  %v2011_v50 = vsel %vm1990_vm5, %v1979_v8, %v5558_v33  ;;  %v1978_v61 = vsel %vm282_vm1, %v10846_v9, %v5474_v57  ;;  %v10847_v8 = vrot.slane %v10736_v13, 2  ;;  %v7841_v33 = vsel %vm1029_vm4, %v1142_v32, %v10849_v30 }
 0x21e   : > { %v5569_v19 = vunpack.i.h.bf16 %v5567_v3  ;;  %v5568_v31 = vunpack.i.l.bf16 %v5567_v3  ;;  %v7826_v45 = vsel %vm1029_vm4, %v1137_v14, %v10844_v51  ;;  %10850 = vst [vmem:[#allocation109_spill] sm:$0xff] %v7841_v33  ;;  %v2010_v14 = vsel %vm1990_vm5, %v1978_v61, %v5484_v54  ;;  %v10851_v51 = vld [vmem:[#allocation58_spill] sm:$0xff] }
 0x21f   : > { %2858 = vrot.lane.b32.xlu0 %v7794_v22, %s5758_s10  ;;  %10845 = vst [vmem:[#allocation69_spill] sm:$0xff] %v7826_v45  ;;  %2872 = vrot.lane.b32.xlu1 %v7808_v53, %s5758_s10  ;;  %v7836_v3 = vsel %vm1029_vm4, %v10847_v8, %v1160_v16  ;;  %v1163_v57 = vrot.slane %v10743_v28, 2  ;;  %v1147_v9 = vrot.slane %v10851_v51, 2  ;;  %v2043_v53 = vsel %vm2022_vm6, %v2010_v14, %v5518_v15 }
 0x220   : > { %10848 = vst [vmem:[#allocation102_spill] sm:$0xff] %v7836_v3  ;;  %v2044_v22 = vsel %vm2022_vm6, %v2011_v50, %v5519_v35  ;;  %v5514_v32 = vunpack.i.h.bf16 %v7649_v48  ;;  %v5513_v30 = vunpack.i.l.bf16 %v7649_v48  ;;  %v2076_v54 = vsel %vm2055_vm7, %v2043_v53, %v5568_v31 }
 0x221   : > { %v5572_v0 = vpop.permute.xlu0 %5571  ;;  %v7849_v16 = vpop.permute.xlu1 %5606  ;;  %v2077_v61 = vsel %vm2055_vm7, %v2044_v22, %v5569_v19  ;;  %v5538_v15 = vunpack.i.l.bf16 %v7702_v43  ;;  %v5544_v48 = vunpack.i.h.bf16 %v7730_v58  ;;  %v5543_v31 = vunpack.i.l.bf16 %v7730_v58 }
 0x222   : > { %v5574_v8 = vunpack.i.h.bf16 %v5572_v0  ;;  %v5573_v21 = vunpack.i.l.bf16 %v5572_v0  ;;  %v5549_v14 = vunpack.i.h.bf16 %v7752_v49 }
 0x223   : > { %2862 = vrot.lane.b32.xlu0 %v7826_v45, %s5758_s10  ;;  %2876 = vrot.lane.b32.xlu1 %v7818_v41, %s5758_s10  ;;  %v10896_v45 = vld [vmem:[#allocation105_spill] sm:$0xff] }
 0x224   : > { %v2109_v35 = vsel %vm2088_vm8, %v2076_v54, %v5573_v21  ;;  %v2110_v50 = vsel %vm2088_vm8, %v2077_v61, %v5574_v8  ;;  %v5559_v8 = vunpack.i.h.bf16 %v7779_v44  ;;  %v5553_v54 = vunpack.i.l.bf16 %v7682_v34 }
 0x225   : > { %v2142_v19 = vsel %vm2121_vm9, %v2109_v35, %v5513_v30  ;;  %v2143_v22 = vsel %vm2121_vm9, %v2110_v50, %v5514_v32  ;;  %v7867_v53 = vpop.permute.xlu0 %5591  ;;  %v7870_v43 = vpop.permute.xlu1 %5611  ;;  %v1152_v32 = vrot.slane %v7408_v23, 2  ;;  %v10852_v61 = vrot.slane %v10833_v56, 2 }
 0x226   : > { %v2175_v21 = vsel %vm2154_vm10, %v2142_v19, %v5538_v15  ;;  %v2176_v0 = vsel %vm2154_vm10, %v2143_v22, %v5539_v59  ;;  %v5563_v44 = vunpack.i.l.bf16 %v7709_v18  ;;  %v7894_v35 = vsel %vm1029_vm4, %v1163_v57, %v1165_v12 }
 0x227   : > { %2866 = vrot.lane.b32.xlu0 %v7841_v33, %s5758_s10  ;;  %v2208_v58 = vsel %vm2187_vm11, %v2175_v21, %v5543_v31  ;;  %v2209_v30 = vsel %vm2187_vm11, %v2176_v0, %v5544_v48  ;;  %2880 = vrot.lane.b32.xlu1 %v7836_v3, %s5758_s10  ;;  %v7886_v59 = vsel %vm1029_vm4, %v1147_v9, %v10852_v61  ;;  %v1168_v50 = vrot.slane %v10750_v26, 2  ;;  %v10895_v3 = vld [vmem:[#allocation104_spill] sm:$0xff] }
 0x228   : > { %v2230_v49 = vpack.c.bf16 %v2209_v30, %v2208_v58  ;;  %10853 = vst [vmem:[#allocation110_spill] sm:$0xff] %v7886_v59  ;;  %10854 = vst [vmem:[#allocation111_spill] sm:$0xff] %v7894_v35  ;;  %v1170_v48 = vrot.slane %v7430_v60, 2  ;;  %v1980_v31 = vsel %vm282_vm1, %v6875_v1, %v5549_v14  ;;  %v10855_v22 = vrot.slane %v10730_v39, 2 }
 0x229   : > { %v7889_v15 = vpop.permute.xlu0 %5596  ;;  %v7900_v19 = vpop.permute.xlu1 %5631  ;;  %v2012_v9 = vsel %vm1990_vm5, %v1980_v31, %v5559_v8  ;;  %v10487_v21 = vrot.slane %v10760_v24, 2  ;;  %v5508_v60 = vunpack.i.l.bf16 %v7568_v37  ;;  %v1981_v1 = vsel %vm282_vm1, %v6583_v25, %v5553_v54 }
 0x22a   : > { %5071 = vmatprep.mubr.msk.bf16.mxu1 %vm2279_vm12, %v2230_v49  ;;  %v7909_v12 = vsel %vm1029_vm4, %v1152_v32, %v10855_v22  ;;  %v1175_v14 = vrot.slane %v7468_v52, 2  ;;  %v1157_v0 = vrot.slane %v7440_v10, 2  ;;  %v2013_v8 = vsel %vm1990_vm5, %v1981_v1, %v5563_v44 }
 0x22b   : > { %2870 = vrot.lane.b32.xlu0 %v7886_v59, %s5758_s10  ;;  %10856 = vst [vmem:[#allocation112_spill] sm:$0xff] %v7909_v12  ;;  %2884 = vrot.lane.b32.xlu1 %v7894_v35, %s5758_s10  ;;  %v7923_v30 = vsel %vm1029_vm4, %v1168_v50, %v1170_v48  ;;  %v5509_v32 = vunpack.i.h.bf16 %v7568_v37  ;;  %v2045_v49 = vsel %vm2022_vm6, %v2012_v9, %v5508_v60  ;;  %v1162_v25 = vrot.slane %v7477_v40, 2 }
 0x22c   : > { %10857 = vst [vmem:[#allocation113_spill] sm:$0xff] %v7923_v30  ;;  %v5528_v54 = vunpack.i.l.bf16 %v7631_v2  ;;  %v7939_v37 = vsel %vm1029_vm4, %v10487_v21, %v1175_v14  ;;  %v10859_v44 = vrot.slane %v10736_v13, 2  ;;  %v5529_v31 = vunpack.i.h.bf16 %v7631_v2 }
 0x22d   : > { %v7920_v58 = vpop.permute.xlu0 %5616  ;;  %v7927_v61 = vpop.permute.xlu1 %5641  ;;  %v2046_v52 = vsel %vm2022_vm6, %v2013_v8, %v5509_v32  ;;  %10858 = vst [vmem:[#allocation114_spill] sm:$0xff] %v7939_v37  ;;  %v1178_v60 = vrot.slane %v10768_v17, 2  ;;  %v1180_v1 = vrot.slane %v7507_v62, 2  ;;  %v5533_v8 = vunpack.i.l.bf16 %v7652_v55 }
 0x22e   : > { %v7944_v48 = vsel %vm1029_vm4, %v1157_v0, %v10859_v44  ;;  %v2078_v9 = vsel %vm2055_vm7, %v2045_v49, %v5528_v54  ;;  %v7956_v14 = vsel %vm1029_vm4, %v1162_v25, %v1163_v57  ;;  %v5604_v0 = vunpack.i.h.bf16 %v7813_v42 }
 0x22f   : > { %2874 = vrot.lane.b32.xlu0 %v7909_v12, %s5758_s10  ;;  %2888 = vrot.lane.b32.xlu1 %v7923_v30, %s5758_s10  ;;  %10860 = vst [vmem:[#allocation115_spill] sm:$0xff] %v7944_v48  ;;  %10861 = vst [vmem:[#allocation116_spill] sm:$0xff] %v7956_v14  ;;  %v5603_v2 = vunpack.i.l.bf16 %v7813_v42  ;;  %v2079_v49 = vsel %vm2055_vm7, %v2046_v52, %v5529_v31  ;;  %v1167_v54 = vrot.slane %v7522_v47, 2  ;;  %v5534_v62 = vunpack.i.h.bf16 %v7652_v55 }
 0x230   : > { %v2111_v44 = vsel %vm2088_vm8, %v2078_v9, %v5533_v8  ;;  %v7971_v42 = vsel %vm1029_vm4, %v1178_v60, %v1180_v1 }
 0x231   : > { %v7948_v22 = vpop.permute.xlu0 %5621  ;;  %v5657_v32 = vpop.permute.xlu1 %5656  ;;  %10862 = vst [vmem:[#allocation117_spill] sm:$0xff] %v7971_v42  ;;  %v2112_v25 = vsel %vm2088_vm8, %v2079_v49, %v5534_v62  ;;  %v2144_v31 = vsel %vm2121_vm9, %v2111_v44, %v5603_v2  ;;  %v7983_v1 = vsel %vm1029_vm4, %v1167_v54, %v1168_v50  ;;  %v10864_v50 = vrot.slane %v10760_v24, 2 }
 0x232   : > { %v5659_v21 = vunpack.i.h.bf16 %v5657_v32  ;;  %v5658_v30 = vunpack.i.l.bf16 %v5657_v32  ;;  %10863 = vst [vmem:[#allocation118_spill] sm:$0xff] %v7983_v1  ;;  %v1172_v32 = vrot.slane %v7537_v63, 2  ;;  %v5564_v54 = vunpack.i.h.bf16 %v7709_v18 }
 0x233   : > { %2878 = vrot.lane.b32.xlu0 %v7944_v48, %s5758_s10  ;;  %2892 = vrot.lane.b32.xlu1 %v7939_v37, %s5758_s10  ;;  %v2145_v48 = vsel %vm2121_vm9, %v2112_v25, %v5604_v0  ;;  %v5599_v18 = vunpack.i.h.bf16 %v7889_v15 }
 0x234   : > { %v2177_v9 = vsel %vm2154_vm10, %v2144_v31, %v5658_v30  ;;  %v2178_v8 = vsel %vm2154_vm10, %v2145_v48, %v5659_v21  ;;  %v5554_v21 = vunpack.i.h.bf16 %v7682_v34  ;;  %v1177_v48 = vrot.slane %v7542_v7, 2 }
 0x235   : > { %v7968_v57 = vpop.permute.xlu0 %5626  ;;  %v5662_v52 = vpop.permute.xlu1 %5661  ;;  %v5598_v31 = vunpack.i.l.bf16 %v7889_v15  ;;  %v5593_v15 = vunpack.i.l.bf16 %v7867_v53 }
 0x236   : > { %v5664_v55 = vunpack.i.h.bf16 %v5662_v52  ;;  %v5663_v12 = vunpack.i.l.bf16 %v5662_v52  ;;  %v5628_v62 = vunpack.i.l.bf16 %v7968_v57 }
 0x237   : > { %2882 = vrot.lane.b32.xlu0 %v7956_v14, %s5758_s10  ;;  %2896 = vrot.lane.b32.xlu1 %v7971_v42, %s5758_s10 }
 0x238   : > { %v2210_v2 = vsel %vm2187_vm11, %v2177_v9, %v5663_v12  ;;  %v2211_v0 = vsel %vm2187_vm11, %v2178_v8, %v5664_v55  ;;  %v8000_v12 = vsel %vm1029_vm4, %v1172_v32, %v10864_v50  ;;  %v1983_v34 = vsel %vm282_vm1, %v6567_v5, %v5628_v62 }
 0x239   : > { %v5637_v49 = vpop.permute.xlu0 %5636  ;;  %v7989_v44 = vpop.permute.xlu1 %5666  ;;  %v2231_v30 = vpack.c.bf16 %v2211_v0, %v2210_v2  ;;  %10865 = vst [vmem:[#allocation119_spill] sm:$0xff] %v8000_v12  ;;  %v1982_v32 = vsel %vm282_vm1, %v6864_v20, %v5554_v21  ;;  %v8018_v0 = vsel %vm1029_vm4, %v1177_v48, %v1178_v60  ;;  %v5594_v62 = vunpack.i.h.bf16 %v7867_v53 }
 0x23a   : > { %v5638_v25 = vunpack.i.l.bf16 %v5637_v49  ;;  %10866 = vst [vmem:[#allocation120_spill] sm:$0xff] %v8018_v0  ;;  %v2014_v5 = vsel %vm1990_vm5, %v1982_v32, %v5564_v54  ;;  %v5618_v54 = vunpack.i.l.bf16 %v7920_v58  ;;  %v5623_v53 = vunpack.i.l.bf16 %v7948_v22 }
 0x23b   : > { %2886 = vrot.lane.b32.xlu0 %v7983_v1, %s5758_s10  ;;  %3122 = vrot.lane.b32.xlu1 %v10779_v4, %s5755_s7 }
 0x23c   : > { %5072 = vmatmul.mubr.msk.bf16.gmra.mrb[16].mxu1 %vm2279_vm12, %v2231_v30  ;;  %v2015_v9 = vsel %vm1990_vm5, %v1983_v34, %v5638_v25  ;;  %v2047_v25 = vsel %vm2022_vm6, %v2014_v5, %v5598_v31  ;;  %v5619_v34 = vunpack.i.h.bf16 %v7920_v58  ;;  %v5624_v31 = vunpack.i.h.bf16 %v7948_v22 }
 0x23d   : > { %v5647_v52 = vpop.permute.xlu0 %5646  ;;  %v8007_v55 = vpop.permute.xlu1 %5681  ;;  %v2048_v50 = vsel %vm2022_vm6, %v2015_v9, %v5599_v18  ;;  %v5639_v58 = vunpack.i.h.bf16 %v5637_v49  ;;  %v5643_v49 = vunpack.i.l.bf16 %v7927_v61 }
 0x23e   : > { %v5649_v8 = vunpack.i.h.bf16 %v5647_v52  ;;  %v5648_v2 = vunpack.i.l.bf16 %v5647_v52 }
 0x23f   : > { %2890 = vrot.lane.b32.xlu0 %v8000_v12, %s5758_s10  ;;  %3126 = vrot.lane.b32.xlu1 %v10780_v46, %s5755_s7 }
 0x240   : > { %v2080_v60 = vsel %vm2055_vm7, %v2047_v25, %v5648_v2  ;;  %v2081_v48 = vsel %vm2055_vm7, %v2048_v50, %v5649_v8  ;;  %v5629_v2 = vunpack.i.h.bf16 %v7968_v57 }
 0x241   : > { %v5652_v30 = vpop.permute.xlu0 %5651  ;;  %v8024_v52 = vpop.permute.xlu1 %5686 }
 0x242   : > { %v5654_v20 = vunpack.i.h.bf16 %v5652_v30  ;;  %v5653_v21 = vunpack.i.l.bf16 %v5652_v30 }
 0x243   : > { %2894 = vrot.lane.b32.xlu0 %v8018_v0, %s5758_s10  ;;  %3130 = vrot.lane.b32.xlu1 %v10784_v38, %s5755_s7  ;;  %s9934_s10 = scalar_lea.vmem %s10278_s5, %s4967_s23 }
 0x244   : > { %v2113_v9 = vsel %vm2088_vm8, %v2080_v60, %v5653_v21  ;;  %v2114_v32 = vsel %vm2088_vm8, %v2081_v48, %v5654_v20  ;;  %v10867_v20 = vld [vmem:[#allocation6_spill] sm:$0xff]  ;;  %v5633_v21 = vunpack.i.l.bf16 %v7900_v19  ;;  %v10869_v60 = vld [vmem:[#allocation107_spill] sm:$0xff] }
 0x245   : > { %v2146_v8 = vsel %vm2121_vm9, %v2113_v9, %v5593_v15  ;;  %v2147_v18 = vsel %vm2121_vm9, %v2114_v32, %v5594_v62  ;;  %v8042_v5 = vpop.permute.xlu0 %5671  ;;  %v8044_v30 = vpop.permute.xlu1 %5691  ;;  %v10868_v62 = vld [vmem:[#allocation34_spill] sm:$0xff]  ;;  %v1984_v48 = vsel %vm282_vm1, %v10869_v60, %v5629_v2  ;;  %v10870_v32 = vld [vmem:[#allocation16_spill] sm:$0xff] }
 0x246   : > { %v2179_v25 = vsel %vm2154_vm10, %v2146_v8, %v5618_v54  ;;  %v2180_v50 = vsel %vm2154_vm10, %v2147_v18, %v5619_v34  ;;  %v2016_v34 = vsel %vm1990_vm5, %v1984_v48, %v5639_v58  ;;  %v10872_v18 = vld [vmem:[#allocation39_spill] sm:$0xff]  ;;  %v5589_v58 = vunpack.i.h.bf16 %v7784_v11 }
 0x247   : > { %3120 = vrot.lane.b32.xlu0 %v10867_v20, %s5755_s7  ;;  %v2212_v22 = vsel %vm2187_vm11, %v2179_v25, %v5623_v53  ;;  %v2213_v57 = vsel %vm2187_vm11, %v2180_v50, %v5624_v31  ;;  %3134 = vrot.lane.b32.xlu1 %v10868_v62, %s5755_s7  ;;  %v5588_v31 = vunpack.i.l.bf16 %v7784_v11  ;;  %v10871_v53 = vld [vmem:[#allocation81_spill] sm:$0xff]  ;;  %v5613_v48 = vunpack.i.l.bf16 %v7870_v43 }
 0x248   : > { %v2232_v15 = vpack.c.bf16 %v2213_v57, %v2212_v22  ;;  %v1985_v8 = vsel %vm282_vm1, %v10871_v53, %v5633_v21  ;;  %v5608_v22 = vunpack.i.l.bf16 %v7849_v16  ;;  %v5683_v11 = vunpack.i.l.bf16 %v8007_v55 }
 0x249   : > { %v8058_v54 = vpop.permute.xlu0 %5676  ;;  %v1267_v9 = vpop.permute.xlu1 %1266  ;;  %v2017_v2 = vsel %vm1990_vm5, %v1985_v8, %v5643_v49  ;;  %v2049_v25 = vsel %vm2022_vm6, %v2016_v34, %v5588_v31  ;;  %v5609_v49 = vunpack.i.h.bf16 %v7849_v16  ;;  %v5684_v53 = vunpack.i.h.bf16 %v8007_v55 }
 0x24a   : > { %5075 = vmatprep.mubr.msk.bf16.mxu1 %vm2279_vm12, %v2232_v15  ;;  %v10873_v15 = vld [vmem:[#allocation17_spill] sm:$0xff]  ;;  %v2050_v60 = vsel %vm2022_vm6, %v2017_v2, %v5589_v58  ;;  %v2082_v21 = vsel %vm2055_vm7, %v2049_v25, %v5608_v22  ;;  %v5614_v58 = vunpack.i.h.bf16 %v7870_v43  ;;  %v10875_v22 = vld [vmem:[#allocation88_spill] sm:$0xff] }
 0x24b   : > { %3124 = vrot.lane.b32.xlu0 %v10870_v32, %s5755_s7  ;;  %3138 = vrot.lane.b32.xlu1 %v10872_v18, %s5755_s7  ;;  %v2083_v8 = vsel %vm2055_vm7, %v2050_v60, %v5609_v49  ;;  %v2115_v2 = vsel %vm2088_vm8, %v2082_v21, %v5613_v48  ;;  %v10874_v25 = vld [vmem:[#allocation29_spill] sm:$0xff]  ;;  %v1989_v16 = vsel %vm282_vm1, %v10875_v22, %v1267_v9  ;;  %v5669_v60 = vunpack.i.h.bf16 %v7989_v44 }
 0x24c   : > { %v2116_v21 = vsel %vm2088_vm8, %v2083_v8, %v5614_v58  ;;  %v2148_v49 = vsel %vm2121_vm9, %v2115_v2, %v5683_v11  ;;  %v5689_v11 = vunpack.i.h.bf16 %v8024_v52  ;;  %v5634_v58 = vunpack.i.h.bf16 %v7900_v19 }
 0x24d   : > { %v8071_v50 = vpop.permute.xlu0 %5696  ;;  %v1360_v57 = vpop.permute.xlu1 %1359  ;;  %v2149_v43 = vsel %vm2121_vm9, %v2116_v21, %v5684_v53  ;;  %v5688_v19 = vunpack.i.l.bf16 %v8024_v52 }
 0x24f   : > { %3128 = vrot.lane.b32.xlu0 %v10873_v15, %s5755_s7  ;;  %3142 = vrot.lane.b32.xlu1 %v10810_v36, %s5755_s7  ;;  %v2021_v36 = vsel %vm1990_vm5, %v1989_v16, %v1360_v57 }
 0x250   : > { %v2054_v22 = vsel %vm2022_vm6, %v2021_v36, %v5669_v60 }
 0x251   : > { %v8083_v34 = vpop.permute.xlu0 %5701  ;;  %v5727_v31 = vpop.permute.xlu1 %5726 }
 0x252   : > { %v5729_v20 = vunpack.i.h.bf16 %v5727_v31  ;;  %v5728_v4 = vunpack.i.l.bf16 %v5727_v31  ;;  %v10876_v31 = vld [vmem:[#allocation36_spill] sm:$0xff] }
 0x253   : > { %3132 = vrot.lane.b32.xlu0 %v10874_v25, %s5755_s7  ;;  %3146 = vrot.lane.b32.xlu1 %v10820_v6, %s5755_s7 }
 0x254   : > { %v2181_v57 = vsel %vm2154_vm10, %v2148_v49, %v5728_v4  ;;  %v2182_v16 = vsel %vm2154_vm10, %v2149_v43, %v5729_v20  ;;  %v5668_v4 = vunpack.i.l.bf16 %v7989_v44  ;;  %v2087_v20 = vsel %vm2055_vm7, %v2054_v22, %v5689_v11  ;;  %v10877_v49 = vld [vmem:[#allocation108_spill] sm:$0xff] }
 0x255   : > { %v5707_v55 = vpop.permute.xlu0 %5706  ;;  %v5732_v48 = vpop.permute.xlu1 %5731  ;;  %v5693_v44 = vunpack.i.l.bf16 %v8044_v30  ;;  %v10879_v11 = vld [vmem:[#allocation80_spill] sm:$0xff] }
 0x256   : > { %v5734_v25 = vunpack.i.h.bf16 %v5732_v48  ;;  %v5733_v15 = vunpack.i.l.bf16 %v5732_v48  ;;  %v5709_v9 = vunpack.i.h.bf16 %v5707_v55  ;;  %v5708_v21 = vunpack.i.l.bf16 %v5707_v55 }
 0x257   : > { %3136 = vrot.lane.b32.xlu0 %v10876_v31, %s5755_s7  ;;  %3150 = vrot.lane.b32.xlu1 %v10824_v29, %s5755_s7 }
 0x258   : > { %v2214_v8 = vsel %vm2187_vm11, %v2181_v57, %v5733_v15  ;;  %v2215_v53 = vsel %vm2187_vm11, %v2182_v16, %v5734_v25  ;;  %v1988_v43 = vsel %vm282_vm1, %v10877_v49, %v5709_v9  ;;  %v5644_v15 = vunpack.i.h.bf16 %v7927_v61  ;;  %v10878_v16 = vld [vmem:[#allocation106_spill] sm:$0xff] }
 0x259   : > { %v5712_v2 = vpop.permute.xlu0 %5711  ;;  %v8112_v48 = vpop.permute.xlu1 %2594  ;;  %v2233_v60 = vpack.c.bf16 %v2215_v53, %v2214_v8  ;;  %v5694_v25 = vunpack.i.h.bf16 %v8044_v30  ;;  %v5678_v9 = vunpack.i.l.bf16 %v8058_v54  ;;  %v1986_v61 = vsel %vm282_vm1, %v10878_v16, %v5634_v58 }
 0x25a   : > { %v5714_v36 = vunpack.i.h.bf16 %v5712_v2  ;;  %v5713_v29 = vunpack.i.l.bf16 %v5712_v2  ;;  %v1987_v8 = vsel %vm282_vm1, %v10879_v11, %v5708_v21  ;;  %v2018_v58 = vsel %vm1990_vm5, %v1986_v61, %v5644_v15  ;;  %v10881_v21 = vld [vmem:[#allocation71_spill] sm:$0xff] }
 0x25b   : > { %3140 = vrot.lane.b32.xlu0 %v10829_v27, %s5755_s7  ;;  %3154 = vrot.lane.b32.xlu1 %v10833_v56, %s5755_s7  ;;  %v2120_v52 = vsel %vm2088_vm8, %v2087_v20, %v5694_v25  ;;  %v5679_v20 = vunpack.i.h.bf16 %v8058_v54  ;;  %v2051_v25 = vsel %vm2022_vm6, %v2018_v58, %v5678_v9  ;;  %v5699_v16 = vunpack.i.h.bf16 %v8071_v50  ;;  %v10883_v9 = vld [vmem:[#allocation73_spill] sm:$0xff] }
 0x25c   : > { %v2020_v55 = vsel %vm1990_vm5, %v1988_v43, %v5714_v36  ;;  %5076 = vmatmul.mubr.msk.bf16.gmra.mrb[20].mxu1 %vm2279_vm12, %v2233_v60  ;;  %v2019_v36 = vsel %vm1990_vm5, %v1987_v8, %v5713_v29  ;;  %v5673_v29 = vunpack.i.l.bf16 %v8042_v5 }
 0x25d   : > { %v2053_v22 = vsel %vm2022_vm6, %v2020_v55, %v5668_v4  ;;  %v5717_v57 = vpop.permute.xlu0 %5716  ;;  %v8136_v2 = vpop.permute.xlu1 %2598  ;;  %v10880_v4 = vld [vmem:[#allocation46_spill] sm:$0xff]  ;;  %v2052_v15 = vsel %vm2022_vm6, %v2019_v36, %v5679_v20 }
 0x25e   : > { %v2086_v53 = vsel %vm2055_vm7, %v2053_v22, %v5688_v19  ;;  %v5719_v60 = vunpack.i.h.bf16 %v5717_v57  ;;  %v5718_v49 = vunpack.i.l.bf16 %v5717_v57  ;;  %v5674_v19 = vunpack.i.h.bf16 %v8042_v5  ;;  %v10882_v5 = vld [vmem:[#allocation55_spill] sm:$0xff] }
 0x25f   : > { %v2119_v30 = vsel %vm2088_vm8, %v2086_v53, %v5693_v44  ;;  %3144 = vrot.lane.b32.xlu0 %v10880_v4, %s5755_s7  ;;  %3158 = vrot.lane.b32.xlu1 %v10730_v39, %s5755_s7  ;;  %v2153_v44 = vsel %vm2121_vm9, %v2120_v52, %v10881_v21  ;;  %v5698_v52 = vunpack.i.l.bf16 %v8071_v50  ;;  %v5704_v53 = vunpack.i.h.bf16 %v8083_v34 }
 0x260   : > { %v2152_v43 = vsel %vm2121_vm9, %v2119_v30, %v10881_v21  ;;  %v2084_v61 = vsel %vm2055_vm7, %v2051_v25, %v5718_v49  ;;  %v2085_v11 = vsel %vm2055_vm7, %v2052_v15, %v5719_v60  ;;  %v5703_v49 = vunpack.i.l.bf16 %v8083_v34  ;;  %v10884_v15 = vld [vmem:[#allocation75_spill] sm:$0xff]  ;;  %v10889_v21 = vld [vmem:[#allocation77_spill] sm:$0xff] }
 0x261   : > { %v5722_v55 = vpop.permute.xlu0 %5721  ;;  %v8154_v22 = vpop.permute.xlu1 %2602  ;;  %v2185_v8 = vsel %vm2154_vm10, %v2152_v43, %v10883_v9  ;;  %v2186_v50 = vsel %vm2154_vm10, %v2153_v44, %v10883_v9 }
 0x262   : > { %v5724_v54 = vunpack.i.h.bf16 %v5722_v55  ;;  %v5723_v57 = vunpack.i.l.bf16 %v5722_v55  ;;  %v2219_v44 = vsel %vm2187_vm11, %v2186_v50, %v10884_v15 }
 0x263   : > { %3148 = vrot.lane.b32.xlu0 %v10882_v5, %s5755_s7  ;;  %3162 = vrot.lane.b32.xlu1 %v10736_v13, %s5755_s7 }
 0x264   : > { %v2117_v36 = vsel %vm2088_vm8, %v2084_v61, %v5723_v57  ;;  %v2118_v30 = vsel %vm2088_vm8, %v2085_v11, %v5724_v54  ;;  %v2218_v54 = vsel %vm2187_vm11, %v2185_v8, %v10884_v15 }
 0x265   : > { %v2150_v60 = vsel %vm2121_vm9, %v2117_v36, %v5673_v29  ;;  %v2151_v58 = vsel %vm2121_vm9, %v2118_v30, %v5674_v19  ;;  %v8172_v20 = vpop.permute.xlu0 %2592  ;;  %v8176_v43 = vpop.permute.xlu1 %2606 }
 0x266   : > { %v2183_v25 = vsel %vm2154_vm10, %v2150_v60, %v5698_v52  ;;  %v2184_v55 = vsel %vm2154_vm10, %v2151_v58, %v5699_v16  ;;  %v2235_v16 = vpack.c.bf16 %v2219_v44, %v2218_v54  ;;  %v8214_v58 = vld [vmem:[%s5820_s26 + $0xf8] sm:$0xff] }
 0x267   : > { %3152 = vrot.lane.b32.xlu0 %v10851_v51, %s5755_s7  ;;  %v2216_v34 = vsel %vm2187_vm11, %v2183_v25, %v5703_v49  ;;  %v2217_v19 = vsel %vm2187_vm11, %v2184_v55, %v5704_v53  ;;  %3166 = vrot.lane.b32.xlu1 %v10743_v28, %s5755_s7  ;;  %v5740_v49 = vld [vmem:[%s5820_s26 + $0xf0] sm:$0xff]  ;;  %10885 = vst [vmem:[#allocation107_spill] sm:$0xff] %v8214_v58  ;;  %v10497_v50 = vrot.slane %v8214_v58, 7  ;;  %v10898_v58 = vld [vmem:[#allocation83_spill] sm:$0xff] }
 0x268   : > { %v2234_v29 = vpack.c.bf16 %v2217_v19, %v2216_v34  ;;  %v733_v60 = vrot.slane %v5740_v49, 7 }
 0x269   : > { %v8190_v57 = vpop.permute.xlu0 %2596  ;;  %v8192_v61 = vpop.permute.xlu1 %2610 }
 0x26a   : > { %5079 = vmatprep.mubr.msk.bf16.mxu1 %vm2279_vm12, %v2234_v29  ;;  %v8228_v34 = vsel %vm528_vm2, %v733_v60, %v10497_v50  ;;  %v8239_v29 = vld [vmem:[%s10277_s4] ss:$0 sm:$0xff]  ;;  %v10888_v50 = vld [vmem:[#allocation25_spill] sm:$0xff] }
 0x26b   : > { %3156 = vrot.lane.b32.xlu0 %v7408_v23, %s5755_s7  ;;  %5080 = vmatmul.mubr.msk.bf16.gmra.mrb[24].mxu1 %vm2279_vm12, %v2235_v16  ;;  %10886 = vst [vmem:[#allocation81_spill] sm:$0xff] %v8228_v34 }
 0x26c   : > { %3170 = vrot.lane.b32.xlu1 %v10750_v26, %s5755_s7 }
 0x26d   : > { %v8200_v11 = vpop.permute.xlu0 %2600  ;;  %v8202_v8 = vpop.permute.xlu1 %2614 }
 0x26f   : > { %v5053_v52 = vpop.f32.mrb[32].mxu0  ;;  %3160 = vrot.lane.b32.xlu0 %v7440_v10, %s5755_s7 }
 0x270   : > { %3174 = vrot.lane.b32.xlu1 %v10760_v24, %s5755_s7  ;;  %v8208_v53 = vpop.f32.mrb[33].mxu0 }
 0x271   : > { %v5054_v36 = vpop.f32.mrb[34].mxu0  ;;  %v8210_v30 = vpop.permute.xlu0 %2604 }
 0x272   : > { %v2841_v25 = vpop.permute.xlu1 %2840  ;;  %v8217_v55 = vpop.f32.mrb[35].mxu0  ;;  %v8244_v16 = vadd.f32 %v5054_v36, %v8239_v29  ;;  %v8260_v36 = vsel %vm528_vm2, 0.0, %v733_v60  ;;  %v10892_v60 = vld [vmem:[#allocation26_spill] sm:$0xff] }
 0x273   : > { %3164 = vrot.lane.b32.xlu0 %v7477_v40, %s5755_s7  ;;  %10890 = vst [vmem:[#allocation108_spill] sm:$0xff] %v8260_v36  ;;  %v8334_v37 = vadd.f32 %v8239_v29, %v8217_v55 }
 0x274   : > { %3178 = vrot.lane.b32.xlu1 %v10768_v17, %s5755_s7  ;;  %10887 = vst [vmem:[#allocation88_spill] sm:$0xff] %v8244_v16 }
 0x275   : > { %v8223_v54 = vpop.permute.xlu0 %2608  ;;  %v2647_v33 = vmul.f32 %v10895_v3, %v8334_v37 }
 0x276   : > { %v8230_v19 = vpop.permute.xlu1 %2844 }
 0x277   : > { %3168 = vrot.lane.b32.xlu0 %v7522_v47, %s5755_s7  ;;  %v2649_v47 = vmul.f32 %v10889_v21, %v8244_v16  ;;  %v8271_v21 = vadd.f32 %v5053_v52, %v8239_v29 }
 0x278   : > { %3182 = vrot.lane.b32.xlu1 %v8228_v34, %s5755_s7 }
 0x279   : > { %v8241_v44 = vpop.permute.xlu0 %2612  ;;  %10891 = vst [vmem:[#allocation106_spill] sm:$0xff] %v8271_v21 }
 0x27a   : > { %v8246_v49 = vpop.permute.xlu1 %2848 }
 0x27b   : > { %3172 = vrot.lane.b32.xlu0 %v7537_v63, %s5755_s7  ;;  %v2931_v63 = vmul.f32 %v2841_v25, %v8244_v16  ;;  %v10893_v25 = vld [vmem:[#allocation76_spill] sm:$0xff] }
 0x27c   : > { %3410 = vrot.lane.b32.xlu1 %v10888_v50, %s5756_s8  ;;  %v2648_v24 = vmul.f32 %v10893_v25, %v8271_v21 }
 0x27d   : > { %v2839_v15 = vpop.permute.xlu0 %2838 }
 0x27e   : > { %v8252_v9 = vpop.permute.xlu1 %2852 }
 0x27f   : > { %3176 = vrot.lane.b32.xlu0 %v7542_v7, %s5755_s7 }
 0x280   : > { %2716 = vrot.lane.b32.xlu1 %v2649_v47, %s5759_s29 }
 0x281   : > { %v8262_v17 = vpop.permute.xlu0 %2842 }
 0x282   : > { %v8265_v50 = vpop.permute.xlu1 %2856 }
 0x283   : > { %3180 = vrot.lane.b32.xlu0 %v8260_v36, %s5755_s7  ;;  %v2929_v36 = vmul.f32 %v10896_v45, %v8334_v37  ;;  %s5762_s7 = smov 96  }
 0x284   : > { %2998 = vrot.lane.b32.xlu1 %v2931_v63, %s5760_s30  ;;  %v2930_v63 = vmul.f32 %v2839_v15, %v8271_v21 }
 0x285   : > { %v8273_v7 = vpop.permute.xlu0 %2846 }
 0x286   : > { %v8275_v47 = vpop.permute.xlu1 %2860 }
 0x287   : > { %3408 = vrot.lane.b32.xlu0 %v10892_v60, %s5756_s8 }
 0x289   : > { %v8279_v40 = vpop.permute.xlu0 %2850 }
 0x28a   : > { %v8283_v10 = vpop.permute.xlu1 %2864 }
 0x28b   : > { %2714 = vrot.lane.b32.xlu0 %v2648_v24, %s5759_s29 }
 0x28d   : > { %v8287_v52 = vpop.permute.xlu0 %2854 }
 0x28e   : > { %v8289_v26 = vpop.permute.xlu1 %2868 }
 0x28f   : > { %v5057_v23 = vpop.f32.mrb[0].mxu1  ;;  %2996 = vrot.lane.b32.xlu0 %v2930_v63, %s5760_s30 }
 0x290   : > { %v8292_v28 = vpop.f32.mrb[1].mxu1 }
 0x291   : > { %v5058_v60 = vpop.f32.mrb[2].mxu1  ;;  %v8294_v51 = vpop.permute.xlu0 %2858 }
 0x292   : > { %v8296_v13 = vpop.permute.xlu1 %2872  ;;  %v2384_v25 = vpop.f32.mrb[3].mxu1 }
 0x295   : > { %v8298_v5 = vpop.permute.xlu0 %2862 }
 0x296   : > { %v8300_v24 = vpop.permute.xlu1 %2876 }
 0x299   : > { %v8302_v15 = vpop.permute.xlu0 %2866 }
 0x29a   : > { %v8304_v39 = vpop.permute.xlu1 %2880 }
 0x29d   : > { %v8306_v4 = vpop.permute.xlu0 %2870 }
 0x29e   : > { %v8308_v56 = vpop.permute.xlu1 %2884 }
 0x2a1   : > { %v8310_v63 = vpop.permute.xlu0 %2874 }
 0x2a2   : > { %v8312_v27 = vpop.permute.xlu1 %2888 }
 0x2a5   : > { %v8314_v31 = vpop.permute.xlu0 %2878 }
 0x2a6   : > { %v8316_v6 = vpop.permute.xlu1 %2892 }
 0x2a9   : > { %v8318_v18 = vpop.permute.xlu0 %2882 }
 0x2aa   : > { %v8320_v32 = vpop.permute.xlu1 %2896 }
 0x2ad   : > { %v8322_v62 = vpop.permute.xlu0 %2886 }
 0x2ae   : > { %v3123_v38 = vpop.permute.xlu1 %3122 }
 0x2af   : > { %v8324_v46 = vpop.f32.mrb[4].mxu1  ;;  %v3217_v34 = vmul.f32 %v3123_v38, %v8334_v37 }
 0x2b0   : > { %v8326_v0 = vpop.f32.mrb[5].mxu1 }
 0x2b1   : > { %v5062_v12 = vpop.f32.mrb[6].mxu1  ;;  %v8328_v1 = vpop.permute.xlu0 %2890 }
 0x2b2   : > { %10894 = vst [vmem:[#allocation80_spill] sm:$0xff] %v8328_v1  ;;  %v3127_v42 = vpop.permute.xlu1 %3126  ;;  %v8330_v14 = vpop.f32.mrb[7].mxu1 }
 0x2b3   : > { %v3219_v35 = vmul.f32 %v3127_v42, %v8244_v16  ;;  %v8348_v42 = vadd.f32 %v8239_v29, %v8208_v53  ;;  %v8352_v16 = vadd.f32 %v5058_v60, %v8239_v29 }
 0x2b5   : > { %3286 = vrot.lane.b32.xlu1 %v3219_v35, %s5761_s6  ;;  %v8338_v59 = vpop.permute.xlu0 %2894  ;;  %10897 = vst [vmem:[#allocation25_spill] sm:$0xff] %v8352_v16  ;;  %v2653_v1 = vmul.f32 %v10898_v58, %v8352_v16  ;;  %v2928_v53 = vmul.f32 %v10896_v45, %v8348_v42  ;;  %v2935_v38 = vmul.f32 %v8246_v49, %v8352_v16  ;;  %v10900_v49 = vld [vmem:[#allocation82_spill] sm:$0xff] }
 0x2b9   : > { %2712 = vrot.lane.b32.xlu1 %v2647_v33, %s5759_s29  ;;  %v3121_v41 = vpop.permute.xlu0 %3120  ;;  %v3131_v33 = vpop.permute.xlu1 %3130 }
 0x2ba   : > { %v3216_v58 = vmul.f32 %v3121_v41, %v8348_v42 }
 0x2bd   : > { %2994 = vrot.lane.b32.xlu1 %v2929_v36, %s5760_s30  ;;  %v3125_v55 = vpop.permute.xlu0 %3124  ;;  %v2646_v36 = vmul.f32 %v10895_v3, %v8348_v42  ;;  %v3135_v60 = vpop.permute.xlu1 %3134  ;;  %v8370_v3 = vadd.f32 %v5057_v23, %v8239_v29  ;;  %v10901_v23 = vld [vmem:[#allocation79_spill] sm:$0xff] }
 0x2be   : > { %v3218_v35 = vmul.f32 %v3125_v55, %v8271_v21 }
 0x2bf   : > { %10899 = vst [vmem:[#allocation77_spill] sm:$0xff] %v8370_v3  ;;  %v2652_v55 = vmul.f32 %v10900_v49, %v8370_v3 }
 0x2c0   : > { %3284 = vrot.lane.b32.xlu0 %v3218_v35, %s5761_s6 }
 0x2c1   : > { %3282 = vrot.lane.b32.xlu1 %v3217_v34, %s5761_s6  ;;  %v8374_v34 = vadd.f32 %v8239_v29, %v2384_v25  ;;  %v3129_v45 = vpop.permute.xlu0 %3128  ;;  %v3139_v35 = vpop.permute.xlu1 %3138 }
 0x2c4   : > { %2710 = vrot.lane.b32.xlu0 %v2646_v36, %s5759_s29 }
 0x2c5   : > { %2724 = vrot.lane.b32.xlu1 %v2653_v1, %s5759_s29  ;;  %v3223_v1 = vmul.f32 %v3135_v60, %v8352_v16  ;;  %v2934_v60 = vmul.f32 %v8273_v7, %v8370_v3  ;;  %v3143_v49 = vpop.permute.xlu1 %3142  ;;  %v3221_v7 = vmul.f32 %v3131_v33, %v8374_v34 }
 0x2c8   : > { %2992 = vrot.lane.b32.xlu0 %v2928_v53, %s5760_s30  ;;  %v2651_v53 = vmul.f32 %v10901_v23, %v8374_v34 }
 0x2c9   : > { %3006 = vrot.lane.b32.xlu1 %v2935_v38, %s5760_s30 }
 0x2cc   : > { %3280 = vrot.lane.b32.xlu0 %v3216_v58, %s5761_s6  ;;  %v3133_v58 = vpop.permute.xlu0 %3132 }
 0x2cd   : > { %3294 = vrot.lane.b32.xlu1 %v3223_v1, %s5761_s6  ;;  %v2933_v1 = vmul.f32 %v8230_v19, %v8374_v34  ;;  %v3222_v23 = vmul.f32 %v3133_v58, %v8370_v3 }
 0x2cf   : > { %v8381_v36 = vpop.f32.mrb[8].mxu1 }
 0x2d0   : > { %v8385_v41 = vpop.f32.mrb[9].mxu1  ;;  %2722 = vrot.lane.b32.xlu0 %v2652_v55, %s5759_s29  ;;  %v8399_v55 = vadd.f32 %v8239_v29, %v8292_v28  ;;  %v3137_v19 = vpop.permute.xlu0 %3136  ;;  %v10903_v28 = vld [vmem:[#allocation91_spill] sm:$0xff] }
 0x2d1   : > { %v5066_v25 = vpop.f32.mrb[10].mxu1  ;;  %2720 = vrot.lane.b32.xlu1 %v2651_v53, %s5759_s29  ;;  %v8403_v53 = vadd.f32 %v5062_v12, %v8239_v29 }
 0x2d2   : > { %v8389_v38 = vpop.f32.mrb[11].mxu1  ;;  %v2932_v12 = vmul.f32 %v8262_v17, %v8399_v55 }
 0x2d3   : > { %v2657_v16 = vmul.f32 %v10903_v28, %v8403_v53  ;;  %v2939_v33 = vmul.f32 %v8265_v50, %v8403_v53  ;;  %v3227_v17 = vmul.f32 %v3143_v49, %v8403_v53 }
 0x2d4   : > { %3004 = vrot.lane.b32.xlu0 %v2934_v60, %s5760_s30  ;;  %v10902_v60 = vld [vmem:[#allocation78_spill] sm:$0xff]  ;;  %v3141_v58 = vpop.permute.xlu0 %3140 }
 0x2d5   : > { %3002 = vrot.lane.b32.xlu1 %v2933_v1, %s5760_s30  ;;  %v2650_v21 = vmul.f32 %v10902_v60, %v8399_v55  ;;  %v8410_v1 = vpop.permute.xlu1 %3146  ;;  %v10905_v60 = vld [vmem:[#allocation90_spill] sm:$0xff] }
 0x2d8   : > { %3292 = vrot.lane.b32.xlu0 %v3222_v23, %s5761_s6  ;;  %v8434_v50 = vpop.permute.xlu0 %3144 }
 0x2d9   : > { %3290 = vrot.lane.b32.xlu1 %v3221_v7, %s5761_s6  ;;  %v3151_v23 = vpop.permute.xlu1 %3150  ;;  %v8424_v7 = vadd.f32 %v8324_v46, %v8239_v29  ;;  %v10906_v46 = vld [vmem:[#allocation87_spill] sm:$0xff] }
 0x2db   : > { %10904 = vst [vmem:[#allocation26_spill] sm:$0xff] %v8424_v7  ;;  %v2656_v28 = vmul.f32 %v10905_v60, %v8424_v7  ;;  %v3226_v60 = vmul.f32 %v3141_v58, %v8424_v7 }
 0x2dc   : > { %2718 = vrot.lane.b32.xlu0 %v2650_v21, %s5759_s29  ;;  %v3220_v21 = vmul.f32 %v3129_v45, %v8399_v55 }
 0x2dd   : > { %2732 = vrot.lane.b32.xlu1 %v2657_v16, %s5759_s29  ;;  %v8429_v16 = vadd.f32 %v8239_v29, %v8330_v14  ;;  %v2938_v14 = vmul.f32 %v8287_v52, %v8424_v7  ;;  %v8459_v52 = vadd.f32 %v5066_v25, %v8239_v29 }
 0x2df   : > { %v2655_v45 = vmul.f32 %v10906_v46, %v8429_v16  ;;  %v2937_v49 = vmul.f32 %v8252_v9, %v8429_v16  ;;  %10908 = vst [vmem:[#allocation104_spill] sm:$0xff] %v8459_v52 }
 0x2e0   : > { %3000 = vrot.lane.b32.xlu0 %v2932_v12, %s5760_s30  ;;  %v8438_v12 = vpop.permute.xlu1 %3154 }
 0x2e1   : > { %3014 = vrot.lane.b32.xlu1 %v2939_v33, %s5760_s30  ;;  %v3149_v33 = vpop.permute.xlu0 %3148 }
 0x2e4   : > { %3288 = vrot.lane.b32.xlu0 %v3220_v21, %s5761_s6  ;;  %v8449_v21 = vpop.permute.xlu1 %3158 }
 0x2e5   : > { %3302 = vrot.lane.b32.xlu1 %v3227_v17, %s5761_s6  ;;  %v8454_v17 = vadd.f32 %v8239_v29, %v8326_v0  ;;  %v10909_v0 = vld [vmem:[#allocation86_spill] sm:$0xff] }
 0x2e7   : > { %10907 = vst [vmem:[#allocation76_spill] sm:$0xff] %v8454_v17  ;;  %v2654_v3 = vmul.f32 %v10909_v0, %v8454_v17 }
 0x2e8   : > { %2730 = vrot.lane.b32.xlu0 %v2656_v28, %s5759_s29  ;;  %v3225_v28 = vmul.f32 %v3139_v35, %v8429_v16  ;;  %v8469_v58 = vpop.permute.xlu1 %3162  ;;  %v10910_v35 = vld [vmem:[#allocation96_spill] sm:$0xff] }
 0x2e9   : > { %2728 = vrot.lane.b32.xlu1 %v2655_v45, %s5759_s29  ;;  %v2661_v25 = vmul.f32 %v10910_v35, %v8459_v52  ;;  %v3224_v35 = vmul.f32 %v3137_v19, %v8454_v17 }
 0x2ec   : > { %3012 = vrot.lane.b32.xlu0 %v2938_v14, %s5760_s30  ;;  %v8465_v14 = vpop.permute.xlu0 %3152  ;;  %v8482_v0 = vpop.permute.xlu1 %3166 }
 0x2ed   : > { %3010 = vrot.lane.b32.xlu1 %v2937_v49, %s5760_s30 }
 0x2ef   : > { %v5069_v46 = vpop.f32.mrb[12].mxu1 }
 0x2f0   : > { %v8461_v9 = vpop.f32.mrb[13].mxu1  ;;  %3300 = vrot.lane.b32.xlu0 %v3226_v60, %s5761_s6  ;;  %v2936_v60 = vmul.f32 %v8279_v40, %v8454_v17  ;;  %v8479_v7 = vpop.permute.xlu0 %3156  ;;  %v8492_v40 = vadd.f32 %v8239_v29, %v8389_v38 }
 0x2f1   : > { %v5070_v45 = vpop.f32.mrb[14].mxu1  ;;  %3298 = vrot.lane.b32.xlu1 %v3225_v28, %s5761_s6  ;;  %v2943_v28 = vmul.f32 %v8283_v10, %v8459_v52  ;;  %v3231_v10 = vmul.f32 %v3151_v23, %v8459_v52  ;;  %v8501_v19 = vpop.permute.xlu1 %3170 }
 0x2f2   : > { %v2432_v49 = vpop.f32.mrb[15].mxu1  ;;  %10912 = vst [vmem:[#allocation83_spill] sm:$0xff] %v8492_v40  ;;  %v2941_v23 = vmul.f32 %v8275_v47, %v8492_v40 }
 0x2f4   : > { %2726 = vrot.lane.b32.xlu0 %v2654_v3, %s5759_s29  ;;  %v8488_v3 = vadd.f32 %v8381_v36, %v8239_v29  ;;  %v10914_v36 = vld [vmem:[#allocation93_spill] sm:$0xff] }
 0x2f5   : > { %2740 = vrot.lane.b32.xlu1 %v2661_v25, %s5759_s29  ;;  %v8497_v25 = vpop.permute.xlu0 %3160  ;;  %v2659_v17 = vmul.f32 %v10914_v36, %v8492_v40  ;;  %v10916_v36 = vld [vmem:[#allocation92_spill] sm:$0xff] }
 0x2f6   : > { %10911 = vst [vmem:[#allocation105_spill] sm:$0xff] %v8488_v3  ;;  %v2942_v38 = vmul.f32 %v8298_v5, %v8488_v3  ;;  %v3229_v5 = vmul.f32 %v8410_v1, %v8492_v40 }
 0x2f8   : > { %3008 = vrot.lane.b32.xlu0 %v2936_v60, %s5760_s30  ;;  %v10913_v60 = vld [vmem:[#allocation94_spill] sm:$0xff] }
 0x2f9   : > { %3022 = vrot.lane.b32.xlu1 %v2943_v28, %s5760_s30  ;;  %v2660_v28 = vmul.f32 %v10913_v60, %v8488_v3  ;;  %v8519_v60 = vadd.f32 %v8239_v29, %v8385_v41  ;;  %v10917_v41 = vld [vmem:[#allocation101_spill] sm:$0xff] }
 0x2fb   : > { %10915 = vst [vmem:[#allocation82_spill] sm:$0xff] %v8519_v60  ;;  %v2940_v1 = vmul.f32 %v8294_v51, %v8519_v60  ;;  %v8554_v51 = vadd.f32 %v5069_v46, %v8239_v29  ;;  %v10919_v46 = vld [vmem:[#allocation99_spill] sm:$0xff] }
 0x2fc   : > { %3296 = vrot.lane.b32.xlu0 %v3224_v35, %s5761_s6  ;;  %v8511_v35 = vpop.permute.xlu0 %3164 }
 0x2fd   : > { %3310 = vrot.lane.b32.xlu1 %v3231_v10, %s5761_s6  ;;  %v8514_v10 = vpop.permute.xlu1 %3174 }
 0x300   : > { %2738 = vrot.lane.b32.xlu0 %v2660_v28, %s5759_s29  ;;  %v8523_v28 = vadd.f32 %v5070_v45, %v8239_v29  ;;  %v8529_v47 = vpop.permute.xlu0 %3168 }
 0x301   : > { %2736 = vrot.lane.b32.xlu1 %v2659_v17, %s5759_s29  ;;  %v3230_v17 = vmul.f32 %v3149_v33, %v8488_v3 }
 0x302   : > { %v2665_v33 = vmul.f32 %v10917_v41, %v8523_v28  ;;  %v3235_v52 = vmul.f32 %v8449_v21, %v8523_v28  ;;  %v2946_v21 = vmul.f32 %v8306_v4, %v8554_v51 }
 0x304   : > { %3020 = vrot.lane.b32.xlu0 %v2942_v38, %s5760_s30  ;;  %v2658_v38 = vmul.f32 %v10916_v36, %v8519_v60 }
 0x305   : > { %3018 = vrot.lane.b32.xlu1 %v2941_v23, %s5760_s30  ;;  %v8533_v23 = vpop.permute.xlu1 %3178 }
 0x308   : > { %3308 = vrot.lane.b32.xlu0 %v3230_v17, %s5761_s6  ;;  %v2947_v17 = vmul.f32 %v8296_v13, %v8523_v28  ;;  %v8557_v13 = vadd.f32 %v8239_v29, %v2432_v49 }
 0x309   : > { %3306 = vrot.lane.b32.xlu1 %v3229_v5, %s5761_s6  ;;  %v8543_v5 = vpop.permute.xlu0 %3172  ;;  %v8548_v36 = vpop.permute.xlu1 %3182 }
 0x30c   : > { %2734 = vrot.lane.b32.xlu0 %v2658_v38, %s5759_s29  ;;  %v3228_v38 = vmul.f32 %v8434_v50, %v8519_v60  ;;  %v2663_v60 = vmul.f32 %v10919_v46, %v8557_v13  ;;  %v10921_v46 = vld [vmem:[#allocation98_spill] sm:$0xff] }
 0x30d   : > { %2748 = vrot.lane.b32.xlu1 %v2665_v33, %s5759_s29  ;;  %v8567_v50 = vpop.permute.xlu1 %3410 }
 0x30f   : > { %v5073_v45 = vpop.f32.mrb[16].mxu1 }
 0x310   : > { %v8545_v3 = vpop.f32.mrb[17].mxu1  ;;  %3016 = vrot.lane.b32.xlu0 %v2940_v1, %s5760_s30  ;;  %v8563_v1 = vpop.permute.xlu0 %3176 }
 0x311   : > { %v5074_v41 = vpop.f32.mrb[18].mxu1  ;;  %3030 = vrot.lane.b32.xlu1 %v2947_v17, %s5760_s30  ;;  %v10918_v17 = vld [vmem:[#allocation100_spill] sm:$0xff] }
 0x312   : > { %v2448_v33 = vpop.f32.mrb[19].mxu1  ;;  %v2664_v40 = vmul.f32 %v10918_v17, %v8554_v51  ;;  %v8585_v17 = vadd.f32 %v8239_v29, %v8461_v9  ;;  %v8590_v4 = vadd.f32 %v5074_v41, %v8239_v29 }
 0x314   : > { %3304 = vrot.lane.b32.xlu0 %v3228_v38, %s5761_s6  ;;  %v8577_v49 = vpop.permute.xlu0 %3180  ;;  %v8580_v38 = vpop.permute.xlu1 %2716 }
 0x315   : > { %3318 = vrot.lane.b32.xlu1 %v3235_v52, %s5761_s6  ;;  %v2945_v52 = vmul.f32 %v8289_v26, %v8557_v13  ;;  %10920 = vst [vmem:[#allocation79_spill] sm:$0xff] %v8580_v38  ;;  %v3233_v26 = vmul.f32 %v8438_v12, %v8557_v13  ;;  %v2944_v12 = vmul.f32 %v8302_v15, %v8585_v17 }
 0x318   : > { %2746 = vrot.lane.b32.xlu0 %v2664_v40, %s5759_s29  ;;  %v3234_v40 = vmul.f32 %v8479_v7, %v8554_v51  ;;  %v8600_v9 = vpop.permute.xlu1 %2998  ;;  %v2669_v7 = vmul.f32 %v8136_v2, %v8590_v4  ;;  %v8617_v2 = vadd.f32 %v5073_v45, %v8239_v29 }
 0x319   : > { %2744 = vrot.lane.b32.xlu1 %v2663_v60, %s5759_s29  ;;  %v8596_v60 = vpop.permute.xlu0 %3408  ;;  %10922 = vst [vmem:[#allocation78_spill] sm:$0xff] %v8600_v9 }
 0x31a   : > { %v2668_v45 = vmul.f32 %v8190_v57, %v8617_v2 }
 0x31c   : > { %3028 = vrot.lane.b32.xlu0 %v2946_v21, %s5760_s30  ;;  %v2662_v21 = vmul.f32 %v10921_v46, %v8585_v17  ;;  %v8622_v46 = vadd.f32 %v8239_v29, %v2448_v33 }
 0x31d   : > { %3026 = vrot.lane.b32.xlu1 %v2945_v52, %s5760_s30  ;;  %v2951_v52 = vmul.f32 %v8304_v39, %v8590_v4  ;;  %v3239_v39 = vmul.f32 %v8482_v0, %v8590_v4 }
 0x31e   : > { %v2949_v57 = vmul.f32 %v8300_v24, %v8622_v46  ;;  %v3237_v24 = vmul.f32 %v8469_v58, %v8622_v46 }
 0x320   : > { %3316 = vrot.lane.b32.xlu0 %v3234_v40, %s5761_s6  ;;  %v8612_v40 = vpop.permute.xlu0 %2714 }
 0x321   : > { %3314 = vrot.lane.b32.xlu1 %v3233_v26, %s5761_s6  ;;  %10924 = vst [vmem:[#allocation90_spill] sm:$0xff] %v8612_v40  ;;  %v3232_v26 = vmul.f32 %v8465_v14, %v8585_v17  ;;  %v2667_v14 = vmul.f32 %v8112_v48, %v8622_v46  ;;  %v8652_v48 = vadd.f32 %v8239_v29, %v8545_v3 }
 0x323   : > { %v2666_v3 = vmul.f32 %v8172_v20, %v8652_v48 }
 0x324   : > { %2742 = vrot.lane.b32.xlu0 %v2662_v21, %s5759_s29  ;;  %v8630_v21 = vpop.permute.xlu0 %2996 }
 0x325   : > { %2756 = vrot.lane.b32.xlu1 %v2669_v7, %s5759_s29  ;;  %10926 = vst [vmem:[#allocation86_spill] sm:$0xff] %v8630_v21 }
 0x327   : > { %v8608_v41 = vpop.permute.xlu1 %3286 }
 0x328   : > { %10923 = vst [vmem:[#allocation91_spill] sm:$0xff] %v8608_v41  ;;  %3024 = vrot.lane.b32.xlu0 %v2944_v12, %s5760_s30  ;;  %v11017_v41 = vld [vmem:[#allocation19_spill] sm:$0xff] }
 0x329   : > { %3038 = vrot.lane.b32.xlu1 %v2951_v52, %s5760_s30 }
 0x32b   : > { %v8624_v15 = vpop.permute.xlu1 %2712 }
 0x32c   : > { %10925 = vst [vmem:[#allocation87_spill] sm:$0xff] %v8624_v15  ;;  %3312 = vrot.lane.b32.xlu0 %v3232_v26, %s5761_s6 }
 0x32d   : > { %3326 = vrot.lane.b32.xlu1 %v3239_v39, %s5761_s6  ;;  %v2950_v39 = vmul.f32 %v8314_v31, %v8617_v2 }
 0x32f   : > { %v5077_v7 = vpop.f32.mrb[20].mxu1  ;;  %v8634_v12 = vpop.permute.xlu1 %2994 }
 0x330   : > { %10927 = vst [vmem:[#allocation96_spill] sm:$0xff] %v8634_v12  ;;  %v2461_v33 = vpop.f32.mrb[21].mxu1  ;;  %2754 = vrot.lane.b32.xlu0 %v2668_v45, %s5759_s29  ;;  %v11024_v12 = vld [vmem:[#allocation15_spill] sm:$0xff] }
 0x331   : > { %v5078_v52 = vpop.f32.mrb[22].mxu1  ;;  %2752 = vrot.lane.b32.xlu1 %v2667_v14, %s5759_s29  ;;  %v3238_v14 = vmul.f32 %v8511_v35, %v8617_v2 }
 0x332   : > { %v2464_v0 = vpop.f32.mrb[23].mxu1  ;;  %v8640_v26 = vpop.permute.xlu0 %3284  ;;  %v8659_v31 = vadd.f32 %v5078_v52, %v8239_v29 }
 0x333   : > { %10928 = vst [vmem:[#allocation94_spill] sm:$0xff] %v8640_v26  ;;  %v8644_v21 = vpop.permute.xlu1 %3282 }
 0x334   : > { %10929 = vst [vmem:[#allocation93_spill] sm:$0xff] %v8644_v21  ;;  %3036 = vrot.lane.b32.xlu0 %v2950_v39, %s5760_s30  ;;  %v2673_v35 = vmul.f32 %v8176_v43, %v8659_v31  ;;  %v2955_v20 = vmul.f32 %v8312_v27, %v8659_v31  ;;  %v3243_v27 = vmul.f32 %v8514_v10, %v8659_v31 }
 0x335   : > { %3034 = vrot.lane.b32.xlu1 %v2949_v57, %s5760_s30 }
 0x336   : > { %v8654_v45 = vpop.permute.xlu0 %2710 }
 0x337   : > { %10930 = vst [vmem:[#allocation92_spill] sm:$0xff] %v8654_v45  ;;  %v8661_v26 = vpop.permute.xlu1 %2724 }
 0x338   : > { %10931 = vst [vmem:[#allocation101_spill] sm:$0xff] %v8661_v26  ;;  %3324 = vrot.lane.b32.xlu0 %v3238_v14, %s5761_s6  ;;  %v2948_v14 = vmul.f32 %v8310_v63, %v8652_v48  ;;  %v3236_v63 = vmul.f32 %v8497_v25, %v8652_v48 }
 0x339   : > { %3322 = vrot.lane.b32.xlu1 %v3237_v24, %s5761_s6 }
 0x33a   : > { %v8667_v39 = vpop.permute.xlu0 %2992 }
 0x33b   : > { %10932 = vst [vmem:[#allocation100_spill] sm:$0xff] %v8667_v39  ;;  %v8671_v57 = vpop.permute.xlu1 %3006 }
 0x33c   : > { %10933 = vst [vmem:[#allocation99_spill] sm:$0xff] %v8671_v57  ;;  %2750 = vrot.lane.b32.xlu0 %v2666_v3, %s5759_s29  ;;  %v8690_v3 = vadd.f32 %v5077_v7, %v8239_v29 }
 0x33d   : > { %2764 = vrot.lane.b32.xlu1 %v2673_v35, %s5759_s29 }
 0x33e   : > { %v5081_v52 = vpop.f32.mrb[24].mxu1  ;;  %v8677_v58 = vpop.permute.xlu0 %3280  ;;  %v2672_v7 = vmul.f32 %v8210_v30, %v8690_v3  ;;  %v2954_v10 = vmul.f32 %v8322_v62, %v8690_v3 }
 0x33f   : > { %10934 = vst [vmem:[#allocation98_spill] sm:$0xff] %v8677_v58  ;;  %v8681_v24 = vpop.permute.xlu1 %3294  ;;  %v8683_v39 = vpop.f32.mrb[25].mxu1 }
 0x340   : > { %10935 = vst [vmem:[#allocation121_spill] sm:$0xff] %v8681_v24  ;;  %v5082_v57 = vpop.f32.mrb[26].mxu1  ;;  %3032 = vrot.lane.b32.xlu0 %v2948_v14, %s5760_s30  ;;  %v8697_v24 = vadd.f32 %v8239_v29, %v2464_v0 }
 0x341   : > { %3046 = vrot.lane.b32.xlu1 %v2955_v20, %s5760_s30  ;;  %v2480_v43 = vpop.f32.mrb[27].mxu1 }
 0x342   : > { %v8692_v35 = vpop.permute.xlu0 %2722  ;;  %v2671_v25 = vmul.f32 %v8154_v22, %v8697_v24  ;;  %v8726_v22 = vadd.f32 %v8239_v29, %v2461_v33 }
 0x343   : > { %10936 = vst [vmem:[#allocation122_spill] sm:$0xff] %v8692_v35  ;;  %v8699_v58 = vpop.permute.xlu1 %2720 }
 0x344   : > { %10937 = vst [vmem:[#allocation123_spill] sm:$0xff] %v8699_v58  ;;  %3320 = vrot.lane.b32.xlu0 %v3236_v63, %s5761_s6  ;;  %v2670_v33 = vmul.f32 %v8200_v11, %v8726_v22  ;;  %v8762_v11 = vadd.f32 %v5081_v52, %v8239_v29 }
 0x345   : > { %3334 = vrot.lane.b32.xlu1 %v3243_v27, %s5761_s6  ;;  %v2953_v27 = vmul.f32 %v8308_v56, %v8697_v24  ;;  %v3241_v56 = vmul.f32 %v8501_v19, %v8697_v24  ;;  %v2952_v19 = vmul.f32 %v8318_v18, %v8726_v22 }
 0x346   : > { %v8705_v14 = vpop.permute.xlu0 %3004  ;;  %v2676_v52 = vmul.f32 %v8241_v44, %v8762_v11 }
 0x347   : > { %10938 = vst [vmem:[#allocation124_spill] sm:$0xff] %v8705_v14  ;;  %v8709_v20 = vpop.permute.xlu1 %3002  ;;  %v10986_v14 = vld [vmem:[#allocation63_spill] sm:$0xff] }
 0x348   : > { %10939 = vst [vmem:[#allocation125_spill] sm:$0xff] %v8709_v20  ;;  %2762 = vrot.lane.b32.xlu0 %v2672_v7, %s5759_s29  ;;  %v3242_v7 = vmul.f32 %v8543_v5, %v8690_v3 }
 0x349   : > { %2760 = vrot.lane.b32.xlu1 %v2671_v25, %s5759_s29  ;;  %v8733_v25 = vadd.f32 %v5082_v57, %v8239_v29 }
 0x34a   : > { %v8715_v0 = vpop.permute.xlu0 %3292 }
 0x34b   : > { %10940 = vst [vmem:[#allocation126_spill] sm:$0xff] %v8715_v0  ;;  %v8719_v63 = vpop.permute.xlu1 %3290  ;;  %v2677_v5 = vmul.f32 %v8202_v8, %v8733_v25  ;;  %v10982_v0 = vld [vmem:[#allocation59_spill] sm:$0xff] }
 0x34c   : > { %10941 = vst [vmem:[#allocation127_spill] sm:$0xff] %v8719_v63  ;;  %3044 = vrot.lane.b32.xlu0 %v2954_v10, %s5760_s30  ;;  %v11007_v63 = vld [vmem:[#allocation72_spill] sm:$0xff] }
 0x34d   : > { %3042 = vrot.lane.b32.xlu1 %v2953_v27, %s5760_s30 }
 0x34e   : > { %v8728_v30 = vpop.permute.xlu0 %2718 }
 0x34f   : > { %10942 = vst [vmem:[#allocation128_spill] sm:$0xff] %v8728_v30  ;;  %v8735_v62 = vpop.permute.xlu1 %2732  ;;  %v11002_v30 = vld [vmem:[#allocation65_spill] sm:$0xff] }
 0x350   : > { %10943 = vst [vmem:[#allocation129_spill] sm:$0xff] %v8735_v62  ;;  %3332 = vrot.lane.b32.xlu0 %v3242_v7, %s5761_s6 }
 0x351   : > { %3330 = vrot.lane.b32.xlu1 %v3241_v56, %s5761_s6  ;;  %v2959_v56 = vmul.f32 %v8320_v32, %v8733_v25  ;;  %v3247_v32 = vmul.f32 %v8548_v36, %v8733_v25  ;;  %v2958_v36 = vmul.f32 %v8338_v59, %v8762_v11 }
 0x352   : > { %v8741_v10 = vpop.permute.xlu0 %3000 }
 0x353   : > { %10944 = vst [vmem:[#allocation130_spill] sm:$0xff] %v8741_v10  ;;  %v8745_v27 = vpop.permute.xlu1 %3014 }
 0x354   : > { %10945 = vst [vmem:[#allocation131_spill] sm:$0xff] %v8745_v27  ;;  %2758 = vrot.lane.b32.xlu0 %v2670_v33, %s5759_s29  ;;  %v3240_v33 = vmul.f32 %v8529_v47, %v8726_v22  ;;  %v10994_v27 = vld [vmem:[#allocation85_spill] sm:$0xff] }
 0x355   : > { %2772 = vrot.lane.b32.xlu1 %v2677_v5, %s5759_s29  ;;  %v8769_v5 = vadd.f32 %v8239_v29, %v2480_v43 }
 0x356   : > { %v8751_v57 = vpop.permute.xlu0 %3288 }
 0x357   : > { %10946 = vst [vmem:[#allocation132_spill] sm:$0xff] %v8751_v57  ;;  %v8755_v7 = vpop.permute.xlu1 %3302  ;;  %v2675_v47 = vmul.f32 %v8192_v61, %v8769_v5  ;;  %v8799_v61 = vadd.f32 %v8239_v29, %v8683_v39  ;;  %v3245_v59 = vmul.f32 %v8533_v23, %v8769_v5  ;;  %v10961_v23 = vld [vmem:[#allocation80_spill] sm:$0xff] }
 0x358   : > { %10947 = vst [vmem:[#allocation133_spill] sm:$0xff] %v8755_v7  ;;  %3040 = vrot.lane.b32.xlu0 %v2952_v19, %s5760_s30  ;;  %v10990_v7 = vld [vmem:[#allocation74_spill] sm:$0xff] }
 0x359   : > { %3054 = vrot.lane.b32.xlu1 %v2959_v56, %s5760_s30  ;;  %10954 = vst [vmem:[#allocation140_spill] sm:$0xff] %v8799_v61  ;;  %v2674_v29 = vmul.f32 %v8223_v54, %v8799_v61 }
 0x35a   : > { %v8764_v8 = vpop.permute.xlu0 %2730 }
 0x35b   : > { %10948 = vst [vmem:[#allocation134_spill] sm:$0xff] %v8764_v8  ;;  %v8771_v18 = vpop.permute.xlu1 %2728  ;;  %v10973_v8 = vld [vmem:[#allocation38_spill] sm:$0xff] }
 0x35c   : > { %10949 = vst [vmem:[#allocation135_spill] sm:$0xff] %v8771_v18  ;;  %3328 = vrot.lane.b32.xlu0 %v3240_v33, %s5761_s6 }
 0x35d   : > { %3342 = vrot.lane.b32.xlu1 %v3247_v32, %s5761_s6  ;;  %v2957_v32 = vmul.f32 %v8316_v6, %v8769_v5 }
 0x35e   : > { %v8777_v19 = vpop.permute.xlu0 %3012 }
 0x35f   : > { %10950 = vst [vmem:[#allocation136_spill] sm:$0xff] %v8777_v19  ;;  %v8781_v56 = vpop.permute.xlu1 %3010  ;;  %v10966_v19 = vld [vmem:[#allocation41_spill] sm:$0xff] }
 0x360   : > { %10951 = vst [vmem:[#allocation137_spill] sm:$0xff] %v8781_v56  ;;  %2770 = vrot.lane.b32.xlu0 %v2676_v52, %s5759_s29  ;;  %v3246_v52 = vmul.f32 %v8577_v49, %v8762_v11  ;;  %v10959_v49 = vld [vmem:[#allocation30_spill] sm:$0xff] }
 0x361   : > { %2768 = vrot.lane.b32.xlu1 %v2675_v47, %s5759_s29 }
 0x362   : > { %v8787_v43 = vpop.permute.xlu0 %3300 }
 0x363   : > { %10952 = vst [vmem:[#allocation138_spill] sm:$0xff] %v8787_v43  ;;  %v8791_v33 = vpop.permute.xlu1 %3298 }
 0x364   : > { %10953 = vst [vmem:[#allocation139_spill] sm:$0xff] %v8791_v33  ;;  %3052 = vrot.lane.b32.xlu0 %v2958_v36, %s5760_s30  ;;  %v10998_v33 = vld [vmem:[#allocation97_spill] sm:$0xff] }
 0x365   : > { %3050 = vrot.lane.b32.xlu1 %v2957_v32, %s5760_s30  ;;  %v2956_v32 = vmul.f32 %v10961_v23, %v8799_v61 }
 0x366   : > { %v8801_v44 = vpop.permute.xlu0 %2726 }
 0x367   : > { %10955 = vst [vmem:[#allocation141_spill] sm:$0xff] %v8801_v44  ;;  %v8805_v47 = vpop.permute.xlu1 %2740 }
 0x368   : > { %10956 = vst [vmem:[#allocation142_spill] sm:$0xff] %v8805_v47  ;;  %3340 = vrot.lane.b32.xlu0 %v3246_v52, %s5761_s6  ;;  %v10978_v47 = vld [vmem:[#allocation53_spill] sm:$0xff] }
 0x369   : > { %3338 = vrot.lane.b32.xlu1 %v3245_v59, %s5761_s6  ;;  %v10963_v59 = vld [vmem:[#allocation37_spill] sm:$0xff] }
 0x36a   : > { %v8811_v6 = vpop.permute.xlu0 %3008 }
 0x36b   : > { %10957 = vst [vmem:[#allocation143_spill] sm:$0xff] %v8811_v6  ;;  %v8815_v39 = vpop.permute.xlu1 %3022  ;;  %v10977_v6 = vld [vmem:[#allocation42_spill] sm:$0xff] }
 0x36c   : > { %10958 = vst [vmem:[#allocation144_spill] sm:$0xff] %v8815_v39  ;;  %2766 = vrot.lane.b32.xlu0 %v2674_v29, %s5759_s29  ;;  %v3244_v29 = vmul.f32 %v8563_v1, %v8799_v61 }
 0x36d   : > { %3414 = vrot.lane.b32.xlu1 %v10959_v49, %s5756_s8 }
 0x36e   : > { %v8820_v36 = vpop.permute.xlu0 %3296 }
 0x36f   : > { %10960 = vst [vmem:[#allocation30_spill] sm:$0xff] %v8820_v36  ;;  %v8824_v52 = vpop.permute.xlu1 %3310  ;;  %v10970_v36 = vld [vmem:[#allocation47_spill] sm:$0xff] }
 0x370   : > { %10962 = vst [vmem:[#allocation80_spill] sm:$0xff] %v8824_v52  ;;  %3048 = vrot.lane.b32.xlu0 %v2956_v32, %s5760_s30  ;;  %v10969_v32 = vld [vmem:[#allocation31_spill] sm:$0xff] }
 0x371   : > { %3418 = vrot.lane.b32.xlu1 %v10963_v59, %s5756_s8 }
 0x372   : > { %v8829_v54 = vpop.permute.xlu0 %2738 }
 0x373   : > { %10964 = vst [vmem:[#allocation37_spill] sm:$0xff] %v8829_v54  ;;  %v8833_v43 = vpop.permute.xlu1 %2736 }
 0x374   : > { %10965 = vst [vmem:[#allocation145_spill] sm:$0xff] %v8833_v43  ;;  %3336 = vrot.lane.b32.xlu0 %v3244_v29, %s5761_s6  ;;  %v10974_v29 = vld [vmem:[#allocation51_spill] sm:$0xff] }
 0x375   : > { %3422 = vrot.lane.b32.xlu1 %v10966_v19, %s5756_s8 }
 0x376   : > { %v8838_v23 = vpop.permute.xlu0 %3020 }
 0x377   : > { %10967 = vst [vmem:[#allocation41_spill] sm:$0xff] %v8838_v23  ;;  %v8840_v52 = vpop.permute.xlu1 %3018 }
 0x378   : > { %10968 = vst [vmem:[#allocation146_spill] sm:$0xff] %v8840_v52  ;;  %3412 = vrot.lane.b32.xlu0 %v10969_v32, %s5756_s8 }
 0x379   : > { %3426 = vrot.lane.b32.xlu1 %v10970_v36, %s5756_s8 }
 0x37a   : > { %v8846_v54 = vpop.permute.xlu0 %3308 }
 0x37b   : > { %10971 = vst [vmem:[#allocation31_spill] sm:$0xff] %v8846_v54  ;;  %v8848_v1 = vpop.permute.xlu1 %3306 }
 0x37c   : > { %10972 = vst [vmem:[#allocation47_spill] sm:$0xff] %v8848_v1  ;;  %3416 = vrot.lane.b32.xlu0 %v10973_v8, %s5756_s8  ;;  %v10981_v1 = vld [vmem:[#allocation48_spill] sm:$0xff] }
 0x37d   : > { %3430 = vrot.lane.b32.xlu1 %v10974_v29, %s5756_s8 }
 0x37e   : > { %v8854_v39 = vpop.permute.xlu0 %2734 }
 0x37f   : > { %10975 = vst [vmem:[#allocation38_spill] sm:$0xff] %v8854_v39  ;;  %v8856_v23 = vpop.permute.xlu1 %2748 }
 0x380   : > { %10976 = vst [vmem:[#allocation51_spill] sm:$0xff] %v8856_v23  ;;  %3420 = vrot.lane.b32.xlu0 %v10977_v6, %s5756_s8  ;;  %v10985_v23 = vld [vmem:[#allocation52_spill] sm:$0xff] }
 0x381   : > { %3434 = vrot.lane.b32.xlu1 %v10978_v47, %s5756_s8 }
 0x382   : > { %v8862_v44 = vpop.permute.xlu0 %3016 }
 0x383   : > { %10979 = vst [vmem:[#allocation42_spill] sm:$0xff] %v8862_v44  ;;  %v8864_v54 = vpop.permute.xlu1 %3030 }
 0x384   : > { %10980 = vst [vmem:[#allocation53_spill] sm:$0xff] %v8864_v54  ;;  %3424 = vrot.lane.b32.xlu0 %v10981_v1, %s5756_s8  ;;  %v10989_v54 = vld [vmem:[#allocation54_spill] sm:$0xff] }
 0x385   : > { %3438 = vrot.lane.b32.xlu1 %v10982_v0, %s5756_s8 }
 0x386   : > { %v8870_v52 = vpop.permute.xlu0 %3304 }
 0x387   : > { %10983 = vst [vmem:[#allocation48_spill] sm:$0xff] %v8870_v52  ;;  %v8872_v39 = vpop.permute.xlu1 %3318 }
 0x388   : > { %10984 = vst [vmem:[#allocation59_spill] sm:$0xff] %v8872_v39  ;;  %3428 = vrot.lane.b32.xlu0 %v10985_v23, %s5756_s8  ;;  %v10993_v39 = vld [vmem:[#allocation60_spill] sm:$0xff] }
 0x389   : > { %3442 = vrot.lane.b32.xlu1 %v10986_v14, %s5756_s8 }
 0x38a   : > { %v8878_v43 = vpop.permute.xlu0 %2746 }
 0x38b   : > { %10987 = vst [vmem:[#allocation52_spill] sm:$0xff] %v8878_v43  ;;  %v8880_v44 = vpop.permute.xlu1 %2744 }
 0x38c   : > { %10988 = vst [vmem:[#allocation63_spill] sm:$0xff] %v8880_v44  ;;  %3432 = vrot.lane.b32.xlu0 %v10989_v54, %s5756_s8  ;;  %v10997_v44 = vld [vmem:[#allocation64_spill] sm:$0xff] }
 0x38d   : > { %3446 = vrot.lane.b32.xlu1 %v10990_v7, %s5756_s8 }
 0x38e   : > { %v8886_v57 = vpop.permute.xlu0 %3028 }
 0x38f   : > { %10991 = vst [vmem:[#allocation54_spill] sm:$0xff] %v8886_v57  ;;  %v8888_v52 = vpop.permute.xlu1 %3026 }
 0x390   : > { %10992 = vst [vmem:[#allocation74_spill] sm:$0xff] %v8888_v52  ;;  %3436 = vrot.lane.b32.xlu0 %v10993_v39, %s5756_s8  ;;  %v11001_v52 = vld [vmem:[#allocation5_spill] sm:$0xff] }
 0x391   : > { %3450 = vrot.lane.b32.xlu1 %v10994_v27, %s5756_s8 }
 0x392   : > { %v8894_v10 = vpop.permute.xlu0 %3316 }
 0x393   : > { %10995 = vst [vmem:[#allocation60_spill] sm:$0xff] %v8894_v10  ;;  %v8896_v43 = vpop.permute.xlu1 %3314 }
 0x394   : > { %10996 = vst [vmem:[#allocation85_spill] sm:$0xff] %v8896_v43  ;;  %3440 = vrot.lane.b32.xlu0 %v10997_v44, %s5756_s8  ;;  %v11005_v43 = vld [vmem:[#allocation107_spill] sm:$0xff] }
 0x395   : > { %3454 = vrot.lane.b32.xlu1 %v10998_v33, %s5756_s8  ;;  %v11006_v56 = vrot.slane %v11005_v43, 7 }
 0x396   : > { %v8902_v62 = vpop.permute.xlu0 %2742 }
 0x397   : > { %10999 = vst [vmem:[#allocation64_spill] sm:$0xff] %v8902_v62  ;;  %v8904_v57 = vpop.permute.xlu1 %2756  ;;  %v8917_v18 = vsel %vm528_vm2, %v11006_v56, 0.0  ;;  %v11009_v62 = vld [vmem:[#allocation81_spill] sm:$0xff]  ;;  %v11013_v56 = vld [vmem:[#allocation68_spill] sm:$0xff] }
 0x398   : > { %11000 = vst [vmem:[#allocation97_spill] sm:$0xff] %v8904_v57  ;;  %3444 = vrot.lane.b32.xlu0 %v11001_v52, %s5756_s8  ;;  %v11008_v57 = vld [vmem:[#allocation2_spill] sm:$0xff]  ;;  %v1192_v26 = vrot.slane %v11009_v62, 1  ;;  %v1194_v40 = vrot.slane %v8917_v18, 1  ;;  %v11062_v52 = vld [vmem:[#allocation105_spill] sm:$0xff] }
 0x399   : > { %3458 = vrot.lane.b32.xlu1 %v11002_v30, %s5756_s8  ;;  %v11061_v30 = vld [vmem:[#allocation82_spill] sm:$0xff] }
 0x39a   : > { %v8910_v35 = vpop.permute.xlu0 %3024  ;;  %v8936_v20 = vsel %vm846_vm3, %v1192_v26, %v1194_v40  ;;  %v11021_v40 = vld [vmem:[#allocation108_spill] sm:$0xff] }
 0x39b   : > { %11003 = vst [vmem:[#allocation147_spill] sm:$0xff] %v8910_v35  ;;  %v8912_v10 = vpop.permute.xlu1 %3038  ;;  %11015 = vst [vmem:[#allocation150_spill] sm:$0xff] %v8936_v20  ;;  %v1191_v21 = vrot.slane %v11021_v40, 1 }
 0x39c   : > { %11004 = vst [vmem:[#allocation148_spill] sm:$0xff] %v8912_v10  ;;  %3448 = vrot.lane.b32.xlu0 %v11007_v63, %s5756_s8  ;;  %v11012_v10 = vld [vmem:[#allocation4_spill] sm:$0xff]  ;;  %v11060_v63 = vld [vmem:[#allocation26_spill] sm:$0xff] }
 0x39d   : > { %3462 = vrot.lane.b32.xlu1 %v11008_v57, %s5756_s8  ;;  %v11059_v57 = vld [vmem:[#allocation104_spill] sm:$0xff] }
 0x39e   : > { %v8924_v45 = vpop.permute.xlu0 %3312 }
 0x39f   : > { %11010 = vst [vmem:[#allocation107_spill] sm:$0xff] %v8924_v45  ;;  %v8927_v35 = vpop.permute.xlu1 %3326  ;;  %v3505_v45 = vmul.f32 %v8567_v50, %v8334_v37 }
 0x3a0   : > { %11011 = vst [vmem:[#allocation81_spill] sm:$0xff] %v8927_v35  ;;  %3452 = vrot.lane.b32.xlu0 %v11012_v10, %s5756_s8  ;;  %v11058_v10 = vld [vmem:[#allocation76_spill] sm:$0xff] }
 0x3a1   : > { %3466 = vrot.lane.b32.xlu1 %v11013_v56, %s5756_s8  ;;  %v11057_v56 = vld [vmem:[#allocation83_spill] sm:$0xff] }
 0x3a2   : > { %v8933_v43 = vpop.permute.xlu0 %2754 }
 0x3a3   : > { %11014 = vst [vmem:[#allocation149_spill] sm:$0xff] %v8933_v43  ;;  %v8938_v58 = vpop.permute.xlu1 %2752  ;;  %v11020_v43 = vld [vmem:[#allocation11_spill] sm:$0xff] }
 0x3a4   : > { %11016 = vst [vmem:[#allocation151_spill] sm:$0xff] %v8938_v58  ;;  %3456 = vrot.lane.b32.xlu0 %v11017_v41, %s5756_s8  ;;  %v11056_v41 = vld [vmem:[#allocation77_spill] sm:$0xff] }
 0x3a5   : > { %3470 = vrot.lane.b32.xlu1 %v8936_v20, %s5756_s8  ;;  %v11055_v20 = vld [vmem:[#allocation106_spill] sm:$0xff] }
 0x3a6   : > { %v8944_v35 = vpop.permute.xlu0 %3036 }
 0x3a7   : > { %11018 = vst [vmem:[#allocation152_spill] sm:$0xff] %v8944_v35  ;;  %v8948_v9 = vpop.permute.xlu1 %3034  ;;  %v8961_v35 = vsel %vm846_vm3, %v1191_v21, %v1192_v26 }
 0x3a8   : > { %11019 = vst [vmem:[#allocation153_spill] sm:$0xff] %v8948_v9  ;;  %3460 = vrot.lane.b32.xlu0 %v11020_v43, %s5756_s8  ;;  %11025 = vst [vmem:[#allocation155_spill] sm:$0xff] %v8961_v35 }
 0x3a9   : > { %3570 = vrot.lane.b32.xlu1 %v3505_v45, %s5762_s7  ;;  %v3504_v45 = vmul.f32 %v8596_v60, %v8348_v42 }
 0x3aa   : > { %v8954_v58 = vpop.permute.xlu0 %3324 }
 0x3ab   : > { %11022 = vst [vmem:[#allocation108_spill] sm:$0xff] %v8954_v58  ;;  %v8956_v38 = vpop.permute.xlu1 %3322 }
 0x3ac   : > { %11023 = vst [vmem:[#allocation154_spill] sm:$0xff] %v8956_v38  ;;  %3464 = vrot.lane.b32.xlu0 %v11024_v12, %s5756_s8 }
 0x3ae   : > { %v8963_v50 = vpop.permute.xlu0 %2750 }
 0x3af   : > { %11026 = vst [vmem:[#allocation156_spill] sm:$0xff] %v8963_v50  ;;  %v8965_v9 = vpop.permute.xlu1 %2764 }
 0x3b0   : > { %11027 = vst [vmem:[#allocation157_spill] sm:$0xff] %v8965_v9  ;;  %3468 = vrot.lane.b32.xlu0 %v8961_v35, %s5756_s8  ;;  %s5763_s8 = smov 88  }
 0x3b2   : > { %v8971_v15 = vpop.permute.xlu0 %3032 }
 0x3b3   : > { %11028 = vst [vmem:[#allocation158_spill] sm:$0xff] %v8971_v15  ;;  %v8973_v58 = vpop.permute.xlu1 %3046 }
 0x3b4   : > { %11029 = vst [vmem:[#allocation159_spill] sm:$0xff] %v8973_v58  ;;  %3568 = vrot.lane.b32.xlu0 %v3504_v45, %s5762_s7 }
 0x3b6   : > { %v8976_v38 = vpop.permute.xlu0 %3320 }
 0x3b7   : > { %11030 = vst [vmem:[#allocation160_spill] sm:$0xff] %v8976_v38  ;;  %v8978_v21 = vpop.permute.xlu1 %3334 }
 0x3b8   : > { %11031 = vst [vmem:[#allocation161_spill] sm:$0xff] %v8978_v21 }
 0x3ba   : > { %v8980_v26 = vpop.permute.xlu0 %2762 }
 0x3bb   : > { %11032 = vst [vmem:[#allocation162_spill] sm:$0xff] %v8980_v26  ;;  %v8982_v50 = vpop.permute.xlu1 %2760 }
 0x3bc   : > { %11033 = vst [vmem:[#allocation163_spill] sm:$0xff] %v8982_v50 }
 0x3be   : > { %v8984_v9 = vpop.permute.xlu0 %3044 }
 0x3bf   : > { %11034 = vst [vmem:[#allocation164_spill] sm:$0xff] %v8984_v9  ;;  %v8986_v35 = vpop.permute.xlu1 %3042 }
 0x3c0   : > { %11035 = vst [vmem:[#allocation165_spill] sm:$0xff] %v8986_v35 }
 0x3c2   : > { %v8988_v12 = vpop.permute.xlu0 %3332 }
 0x3c3   : > { %11036 = vst [vmem:[#allocation166_spill] sm:$0xff] %v8988_v12  ;;  %v8990_v60 = vpop.permute.xlu1 %3330 }
 0x3c4   : > { %11037 = vst [vmem:[#allocation167_spill] sm:$0xff] %v8990_v60 }
 0x3c6   : > { %v8992_v15 = vpop.permute.xlu0 %2758 }
 0x3c7   : > { %11038 = vst [vmem:[#allocation168_spill] sm:$0xff] %v8992_v15  ;;  %v8994_v58 = vpop.permute.xlu1 %2772 }
 0x3c8   : > { %11039 = vst [vmem:[#allocation169_spill] sm:$0xff] %v8994_v58 }
 0x3ca   : > { %v8996_v45 = vpop.permute.xlu0 %3040 }
 0x3cb   : > { %11040 = vst [vmem:[#allocation170_spill] sm:$0xff] %v8996_v45  ;;  %v8998_v38 = vpop.permute.xlu1 %3054 }
 0x3cc   : > { %11041 = vst [vmem:[#allocation171_spill] sm:$0xff] %v8998_v38  ;;  %v11051_v38 = vld [vmem:[#allocation88_spill] sm:$0xff] }
 0x3ce   : > { %v9000_v21 = vpop.permute.xlu0 %3328 }
 0x3cf   : > { %11042 = vst [vmem:[#allocation172_spill] sm:$0xff] %v9000_v21  ;;  %v9002_v26 = vpop.permute.xlu1 %3342 }
 0x3d0   : > { %11043 = vst [vmem:[#allocation173_spill] sm:$0xff] %v9002_v26 }
 0x3d2   : > { %v9004_v50 = vpop.permute.xlu0 %2770 }
 0x3d3   : > { %11044 = vst [vmem:[#allocation174_spill] sm:$0xff] %v9004_v50  ;;  %v9006_v9 = vpop.permute.xlu1 %2768 }
 0x3d4   : > { %11045 = vst [vmem:[#allocation175_spill] sm:$0xff] %v9006_v9 }
 0x3d6   : > { %v9008_v35 = vpop.permute.xlu0 %3052 }
 0x3d7   : > { %11046 = vst [vmem:[#allocation176_spill] sm:$0xff] %v9008_v35  ;;  %v9010_v12 = vpop.permute.xlu1 %3050 }
 0x3d8   : > { %11047 = vst [vmem:[#allocation177_spill] sm:$0xff] %v9010_v12 }
 0x3da   : > { %v9012_v60 = vpop.permute.xlu0 %3340 }
 0x3db   : > { %11048 = vst [vmem:[#allocation178_spill] sm:$0xff] %v9012_v60  ;;  %v9014_v15 = vpop.permute.xlu1 %3338  ;;  %v11054_v60 = vld [vmem:[#allocation25_spill] sm:$0xff] }
 0x3dc   : > { %11049 = vst [vmem:[#allocation179_spill] sm:$0xff] %v9014_v15 }
 0x3de   : > { %v9016_v58 = vpop.permute.xlu0 %2766 }
 0x3df   : > { %11050 = vst [vmem:[#allocation180_spill] sm:$0xff] %v9016_v58  ;;  %v3415_v45 = vpop.permute.xlu1 %3414 }
 0x3e0   : > { %v3507_v43 = vmul.f32 %v3415_v45, %v11051_v38 }
 0x3e2   : > { %3574 = vrot.lane.b32.xlu1 %v3507_v43, %s5762_s7  ;;  %v9020_v26 = vpop.permute.xlu0 %3048 }
 0x3e3   : > { %11052 = vst [vmem:[#allocation88_spill] sm:$0xff] %v9020_v26  ;;  %v3419_v50 = vpop.permute.xlu1 %3418 }
 0x3e4   : > { %v3509_v21 = vmul.f32 %v3419_v50, %v8374_v34 }
 0x3e6   : > { %3578 = vrot.lane.b32.xlu1 %v3509_v21, %s5762_s7  ;;  %v9024_v35 = vpop.permute.xlu0 %3336 }
 0x3e7   : > { %11053 = vst [vmem:[#allocation181_spill] sm:$0xff] %v9024_v35  ;;  %v3423_v12 = vpop.permute.xlu1 %3422 }
 0x3e8   : > { %v3511_v9 = vmul.f32 %v3423_v12, %v11054_v60 }
 0x3ea   : > { %3582 = vrot.lane.b32.xlu1 %v3511_v9, %s5762_s7  ;;  %v3413_v58 = vpop.permute.xlu0 %3412 }
 0x3eb   : > { %v3427_v15 = vpop.permute.xlu1 %3426  ;;  %v3506_v45 = vmul.f32 %v3413_v58, %v11055_v20 }
 0x3ec   : > { %v3513_v43 = vmul.f32 %v3427_v15, %v8429_v16 }
 0x3ed   : > { %3572 = vrot.lane.b32.xlu0 %v3506_v45, %s5762_s7 }
 0x3ee   : > { %3586 = vrot.lane.b32.xlu1 %v3513_v43, %s5762_s7  ;;  %v3417_v50 = vpop.permute.xlu0 %3416 }
 0x3ef   : > { %v3431_v26 = vpop.permute.xlu1 %3430  ;;  %v3508_v21 = vmul.f32 %v3417_v50, %v8399_v55 }
 0x3f0   : > { %v3515_v35 = vmul.f32 %v3431_v26, %v8403_v53 }
 0x3f1   : > { %3576 = vrot.lane.b32.xlu0 %v3508_v21, %s5762_s7 }
 0x3f2   : > { %3590 = vrot.lane.b32.xlu1 %v3515_v35, %s5762_s7  ;;  %v3421_v9 = vpop.permute.xlu0 %3420 }
 0x3f3   : > { %v3435_v12 = vpop.permute.xlu1 %3434  ;;  %v3510_v58 = vmul.f32 %v3421_v9, %v11056_v41 }
 0x3f4   : > { %v3517_v15 = vmul.f32 %v3435_v12, %v11057_v56 }
 0x3f5   : > { %3580 = vrot.lane.b32.xlu0 %v3510_v58, %s5762_s7 }
 0x3f6   : > { %3594 = vrot.lane.b32.xlu1 %v3517_v15, %s5762_s7  ;;  %v3425_v45 = vpop.permute.xlu0 %3424 }
 0x3f7   : > { %v3439_v43 = vpop.permute.xlu1 %3438  ;;  %v3512_v50 = vmul.f32 %v3425_v45, %v11058_v10 }
 0x3f8   : > { %v3519_v26 = vmul.f32 %v3439_v43, %v11059_v57 }
 0x3f9   : > { %3584 = vrot.lane.b32.xlu0 %v3512_v50, %s5762_s7 }
 0x3fa   : > { %3598 = vrot.lane.b32.xlu1 %v3519_v26, %s5762_s7  ;;  %v3429_v35 = vpop.permute.xlu0 %3428 }
 0x3fb   : > { %v3443_v21 = vpop.permute.xlu1 %3442  ;;  %v3514_v9 = vmul.f32 %v3429_v35, %v11060_v63 }
 0x3fc   : > { %v3521_v12 = vmul.f32 %v3443_v21, %v8557_v13 }
 0x3fd   : > { %3588 = vrot.lane.b32.xlu0 %v3514_v9, %s5762_s7 }
 0x3fe   : > { %3602 = vrot.lane.b32.xlu1 %v3521_v12, %s5762_s7  ;;  %v3433_v58 = vpop.permute.xlu0 %3432 }
 0x3ff   : > { %v3447_v15 = vpop.permute.xlu1 %3446  ;;  %v3516_v45 = vmul.f32 %v3433_v58, %v11061_v30 }
 0x400   : > { %v3523_v43 = vmul.f32 %v3447_v15, %v8523_v28 }
 0x401   : > { %3592 = vrot.lane.b32.xlu0 %v3516_v45, %s5762_s7 }
 0x402   : > { %3606 = vrot.lane.b32.xlu1 %v3523_v43, %s5762_s7  ;;  %v3437_v50 = vpop.permute.xlu0 %3436 }
 0x403   : > { %v3451_v26 = vpop.permute.xlu1 %3450  ;;  %v3518_v35 = vmul.f32 %v3437_v50, %v11062_v52 }
 0x404   : > { %v3525_v21 = vmul.f32 %v3451_v26, %v8622_v46 }
 0x405   : > { %3596 = vrot.lane.b32.xlu0 %v3518_v35, %s5762_s7 }
 0x406   : > { %3610 = vrot.lane.b32.xlu1 %v3525_v21, %s5762_s7  ;;  %v3441_v9 = vpop.permute.xlu0 %3440 }
 0x407   : > { %v3455_v12 = vpop.permute.xlu1 %3454  ;;  %v3520_v58 = vmul.f32 %v3441_v9, %v8585_v17 }
 0x408   : > { %v3527_v15 = vmul.f32 %v3455_v12, %v8590_v4 }
 0x409   : > { %3600 = vrot.lane.b32.xlu0 %v3520_v58, %s5762_s7 }
 0x40a   : > { %3614 = vrot.lane.b32.xlu1 %v3527_v15, %s5762_s7  ;;  %v3445_v45 = vpop.permute.xlu0 %3444 }
 0x40b   : > { %v3459_v43 = vpop.permute.xlu1 %3458  ;;  %v3522_v50 = vmul.f32 %v3445_v45, %v8554_v51 }
 0x40c   : > { %v3529_v26 = vmul.f32 %v3459_v43, %v8697_v24 }
 0x40d   : > { %3604 = vrot.lane.b32.xlu0 %v3522_v50, %s5762_s7 }
 0x40e   : > { %3618 = vrot.lane.b32.xlu1 %v3529_v26, %s5762_s7  ;;  %v3449_v35 = vpop.permute.xlu0 %3448 }
 0x40f   : > { %v3463_v21 = vpop.permute.xlu1 %3462  ;;  %v3524_v9 = vmul.f32 %v3449_v35, %v8652_v48 }
 0x410   : > { %v3531_v12 = vmul.f32 %v3463_v21, %v8659_v31 }
 0x411   : > { %3608 = vrot.lane.b32.xlu0 %v3524_v9, %s5762_s7 }
 0x412   : > { %3622 = vrot.lane.b32.xlu1 %v3531_v12, %s5762_s7  ;;  %v3453_v58 = vpop.permute.xlu0 %3452 }
 0x413   : > { %v3467_v15 = vpop.permute.xlu1 %3466  ;;  %v3526_v45 = vmul.f32 %v3453_v58, %v8617_v2  ;;  %v11063_v58 = vld [vmem:[#allocation7_spill] sm:$0xff] }
 0x414   : > { %v3533_v43 = vmul.f32 %v3467_v15, %v8769_v5 }
 0x415   : > { %3612 = vrot.lane.b32.xlu0 %v3526_v45, %s5762_s7 }
 0x416   : > { %3626 = vrot.lane.b32.xlu1 %v3533_v43, %s5762_s7  ;;  %v3457_v50 = vpop.permute.xlu0 %3456  ;;  %v11064_v43 = vld [vmem:[#allocation22_spill] sm:$0xff] }
 0x417   : > { %v3471_v26 = vpop.permute.xlu1 %3470  ;;  %v3528_v35 = vmul.f32 %v3457_v50, %v8726_v22 }
 0x418   : > { %v3535_v21 = vmul.f32 %v3471_v26, %v8733_v25 }
 0x419   : > { %3616 = vrot.lane.b32.xlu0 %v3528_v35, %s5762_s7  ;;  %v11065_v35 = vld [vmem:[#allocation13_spill] sm:$0xff] }
 0x41a   : > { %3630 = vrot.lane.b32.xlu1 %v3535_v21, %s5762_s7  ;;  %v3461_v9 = vpop.permute.xlu0 %3460  ;;  %v11066_v21 = vld [vmem:[#allocation21_spill] sm:$0xff] }
 0x41b   : > { %v3530_v12 = vmul.f32 %v3461_v9, %v8690_v3  ;;  %v11067_v9 = vld [vmem:[#allocation27_spill] sm:$0xff] }
 0x41d   : > { %3620 = vrot.lane.b32.xlu0 %v3530_v12, %s5762_s7  ;;  %v11068_v12 = vld [vmem:[#allocation33_spill] sm:$0xff] }
 0x41e   : > { %3698 = vrot.lane.b32.xlu1 %v11063_v58, %s5757_s9  ;;  %v3465_v15 = vpop.permute.xlu0 %3464  ;;  %v11069_v58 = vld [vmem:[#allocation67_spill] sm:$0xff] }
 0x41f   : > { %v3532_v45 = vmul.f32 %v3465_v15, %v8799_v61  ;;  %v11070_v15 = vld [vmem:[#allocation35_spill] sm:$0xff] }
 0x421   : > { %3624 = vrot.lane.b32.xlu0 %v3532_v45, %s5762_s7  ;;  %v11071_v45 = vld [vmem:[#allocation84_spill] sm:$0xff] }
 0x422   : > { %3702 = vrot.lane.b32.xlu1 %v11064_v43, %s5757_s9  ;;  %v3469_v50 = vpop.permute.xlu0 %3468 }
 0x423   : > { %v3534_v26 = vmul.f32 %v3469_v50, %v8762_v11  ;;  %v11072_v50 = vld [vmem:[#allocation40_spill] sm:$0xff] }
 0x425   : > { %3628 = vrot.lane.b32.xlu0 %v3534_v26, %s5762_s7  ;;  %v11073_v26 = vld [vmem:[#allocation103_spill] sm:$0xff] }
 0x426   : > { %3706 = vrot.lane.b32.xlu1 %v11065_v35, %s5757_s9 }
 0x429   : > { %3696 = vrot.lane.b32.xlu0 %v11066_v21, %s5757_s9  ;;  %v11074_v21 = vld [vmem:[#allocation45_spill] sm:$0xff] }
 0x42a   : > { %3710 = vrot.lane.b32.xlu1 %v11067_v9, %s5757_s9  ;;  %v9128_v9 = vpop.permute.xlu1 %3570 }
 0x42b   : > { %11086 = vst [vmem:[#allocation25_spill] sm:$0xff] %v9128_v9 }
 0x42d   : > { %3700 = vrot.lane.b32.xlu0 %v11068_v12, %s5757_s9  ;;  %v11075_v12 = vld [vmem:[#allocation70_spill] sm:$0xff] }
 0x42e   : > { %3714 = vrot.lane.b32.xlu1 %v11069_v58, %s5757_s9  ;;  %v11076_v58 = vld [vmem:[#allocation50_spill] sm:$0xff] }
 0x431   : > { %3704 = vrot.lane.b32.xlu0 %v11070_v15, %s5757_s9  ;;  %v11077_v15 = vld [vmem:[#allocation57_spill] sm:$0xff] }
 0x432   : > { %3718 = vrot.lane.b32.xlu1 %v11071_v45, %s5757_s9  ;;  %v11078_v45 = vld [vmem:[#allocation69_spill] sm:$0xff] }
 0x435   : > { %3708 = vrot.lane.b32.xlu0 %v11072_v50, %s5757_s9  ;;  %v11079_v50 = vld [vmem:[#allocation62_spill] sm:$0xff] }
 0x436   : > { %3722 = vrot.lane.b32.xlu1 %v11073_v26, %s5757_s9  ;;  %v11080_v26 = vld [vmem:[#allocation109_spill] sm:$0xff] }
 0x439   : > { %3712 = vrot.lane.b32.xlu0 %v11074_v21, %s5757_s9  ;;  %v11081_v21 = vld [vmem:[#allocation102_spill] sm:$0xff] }
 0x43a   : > { %3726 = vrot.lane.b32.xlu1 %v11075_v12, %s5757_s9  ;;  %v11082_v12 = vld [vmem:[#allocation110_spill] sm:$0xff] }
 0x43d   : > { %3716 = vrot.lane.b32.xlu0 %v11076_v58, %s5757_s9  ;;  %v11083_v58 = vld [vmem:[#allocation111_spill] sm:$0xff] }
 0x43e   : > { %3730 = vrot.lane.b32.xlu1 %v11077_v15, %s5757_s9  ;;  %v11084_v15 = vld [vmem:[#allocation112_spill] sm:$0xff] }
 0x441   : > { %3720 = vrot.lane.b32.xlu0 %v11078_v45, %s5757_s9  ;;  %v11085_v45 = vld [vmem:[#allocation113_spill] sm:$0xff] }
 0x442   : > { %3734 = vrot.lane.b32.xlu1 %v11079_v50, %s5757_s9  ;;  %v11087_v50 = vld [vmem:[#allocation115_spill] sm:$0xff] }
 0x445   : > { %3724 = vrot.lane.b32.xlu0 %v11080_v26, %s5757_s9  ;;  %v11088_v26 = vld [vmem:[#allocation114_spill] sm:$0xff] }
 0x446   : > { %3738 = vrot.lane.b32.xlu1 %v11081_v21, %s5757_s9  ;;  %v1202_v21 = vrot.slane %v11009_v62, 2 }
 0x449   : > { %3728 = vrot.lane.b32.xlu0 %v11082_v12, %s5757_s9  ;;  %v1204_v12 = vrot.slane %v8917_v18, 2  ;;  %v9151_v18 = vpop.permute.xlu0 %3568 }
 0x44a   : > { %3742 = vrot.lane.b32.xlu1 %v11083_v58, %s5757_s9  ;;  %v11090_v58 = vld [vmem:[#allocation116_spill] sm:$0xff]  ;;  %11095 = vst [vmem:[#allocation76_spill] sm:$0xff] %v9151_v18 }
 0x44b   : > { %v9143_v9 = vsel %vm1029_vm4, %v1202_v21, %v1204_v12 }
 0x44c   : > { %11092 = vst [vmem:[#allocation77_spill] sm:$0xff] %v9143_v9 }
 0x44d   : > { %3732 = vrot.lane.b32.xlu0 %v11084_v15, %s5757_s9  ;;  %v11091_v15 = vld [vmem:[#allocation117_spill] sm:$0xff] }
 0x44e   : > { %3746 = vrot.lane.b32.xlu1 %v11085_v45, %s5757_s9 }
 0x451   : > { %3736 = vrot.lane.b32.xlu0 %v11087_v50, %s5757_s9  ;;  %v11094_v50 = vld [vmem:[#allocation118_spill] sm:$0xff] }
 0x452   : > { %3750 = vrot.lane.b32.xlu1 %v11088_v26, %s5757_s9 }
 0x454   : > { %v9136_v35 = vpop.permute.xlu1 %3574 }
 0x455   : > { %11089 = vst [vmem:[#allocation106_spill] sm:$0xff] %v9136_v35  ;;  %3740 = vrot.lane.b32.xlu0 %v11090_v58, %s5757_s9  ;;  %v11097_v58 = vld [vmem:[#allocation119_spill] sm:$0xff] }
 0x456   : > { %3754 = vrot.lane.b32.xlu1 %v11091_v15, %s5757_s9  ;;  %v1201_v15 = vrot.slane %v11021_v40, 2 }
 0x458   : > { %v9145_v45 = vpop.permute.xlu1 %3578 }
 0x459   : > { %11093 = vst [vmem:[#allocation83_spill] sm:$0xff] %v9145_v45  ;;  %3744 = vrot.lane.b32.xlu0 %v11094_v50, %s5757_s9  ;;  %v11100_v45 = vld [vmem:[#allocation120_spill] sm:$0xff]  ;;  %v9165_v50 = vsel %vm1029_vm4, %v1201_v15, %v1202_v21 }
 0x45a   : > { %3758 = vrot.lane.b32.xlu1 %v9143_v9, %s5757_s9  ;;  %11101 = vst [vmem:[#allocation105_spill] sm:$0xff] %v9165_v50 }
 0x45c   : > { %v9153_v35 = vpop.permute.xlu1 %3582 }
 0x45d   : > { %11096 = vst [vmem:[#allocation104_spill] sm:$0xff] %v9153_v35  ;;  %3748 = vrot.lane.b32.xlu0 %v11097_v58, %s5757_s9 }
 0x45f   : > { %v9158_v26 = vpop.permute.xlu0 %3572 }
 0x460   : > { %11098 = vst [vmem:[#allocation26_spill] sm:$0xff] %v9158_v26  ;;  %v9160_v12 = vpop.permute.xlu1 %3586 }
 0x461   : > { %11099 = vst [vmem:[#allocation82_spill] sm:$0xff] %v9160_v12  ;;  %3752 = vrot.lane.b32.xlu0 %v11100_v45, %s5757_s9 }
 0x463   : > { %v9167_v9 = vpop.permute.xlu0 %3576 }
 0x464   : > { %11102 = vst [vmem:[#allocation7_spill] sm:$0xff] %v9167_v9  ;;  %v9169_v18 = vpop.permute.xlu1 %3590 }
 0x465   : > { %11103 = vst [vmem:[#allocation21_spill] sm:$0xff] %v9169_v18  ;;  %3756 = vrot.lane.b32.xlu0 %v9165_v50, %s5757_s9 }
 0x467   : > { %v9173_v35 = vpop.permute.xlu0 %3580 }
 0x468   : > { %11104 = vst [vmem:[#allocation182_spill] sm:$0xff] %v9173_v35  ;;  %v9175_v58 = vpop.permute.xlu1 %3594 }
 0x469   : > { %11105 = vst [vmem:[#allocation183_spill] sm:$0xff] %v9175_v58 }
 0x46b   : > { %v9177_v26 = vpop.permute.xlu0 %3584 }
 0x46c   : > { %11106 = vst [vmem:[#allocation184_spill] sm:$0xff] %v9177_v26  ;;  %v9179_v12 = vpop.permute.xlu1 %3598 }
 0x46d   : > { %11107 = vst [vmem:[#allocation185_spill] sm:$0xff] %v9179_v12 }
 0x46f   : > { %v9181_v43 = vpop.permute.xlu0 %3588 }
 0x470   : > { %11108 = vst [vmem:[#allocation186_spill] sm:$0xff] %v9181_v43  ;;  %v9183_v45 = vpop.permute.xlu1 %3602 }
 0x471   : > { %11109 = vst [vmem:[#allocation187_spill] sm:$0xff] %v9183_v45 }
 0x473   : > { %v9185_v15 = vpop.permute.xlu0 %3592 }
 0x474   : > { %11110 = vst [vmem:[#allocation188_spill] sm:$0xff] %v9185_v15  ;;  %v9187_v21 = vpop.permute.xlu1 %3606 }
 0x475   : > { %11111 = vst [vmem:[#allocation189_spill] sm:$0xff] %v9187_v21 }
 0x477   : > { %v9189_v18 = vpop.permute.xlu0 %3596 }
 0x478   : > { %11112 = vst [vmem:[#allocation190_spill] sm:$0xff] %v9189_v18  ;;  %v9191_v9 = vpop.permute.xlu1 %3610 }
 0x479   : > { %11113 = vst [vmem:[#allocation191_spill] sm:$0xff] %v9191_v9 }
 0x47b   : > { %v9193_v50 = vpop.permute.xlu0 %3600 }
 0x47c   : > { %11114 = vst [vmem:[#allocation192_spill] sm:$0xff] %v9193_v50  ;;  %v9195_v35 = vpop.permute.xlu1 %3614 }
 0x47d   : > { %11115 = vst [vmem:[#allocation193_spill] sm:$0xff] %v9195_v35 }
 0x47f   : > { %v9197_v58 = vpop.permute.xlu0 %3604 }
 0x480   : > { %11116 = vst [vmem:[#allocation194_spill] sm:$0xff] %v9197_v58  ;;  %v9199_v26 = vpop.permute.xlu1 %3618  ;;  %v11137_v58 = vld [vmem:[#allocation56_spill] sm:$0xff] }
 0x481   : > { %11117 = vst [vmem:[#allocation195_spill] sm:$0xff] %v9199_v26 }
 0x483   : > { %v9201_v12 = vpop.permute.xlu0 %3608 }
 0x484   : > { %11118 = vst [vmem:[#allocation196_spill] sm:$0xff] %v9201_v12  ;;  %v9203_v43 = vpop.permute.xlu1 %3622 }
 0x485   : > { %11119 = vst [vmem:[#allocation197_spill] sm:$0xff] %v9203_v43 }
 0x487   : > { %v9205_v45 = vpop.permute.xlu0 %3612 }
 0x488   : > { %11120 = vst [vmem:[#allocation198_spill] sm:$0xff] %v9205_v45  ;;  %v9207_v15 = vpop.permute.xlu1 %3626 }
 0x489   : > { %11121 = vst [vmem:[#allocation199_spill] sm:$0xff] %v9207_v15 }
 0x48b   : > { %v9209_v21 = vpop.permute.xlu0 %3616 }
 0x48c   : > { %11122 = vst [vmem:[#allocation200_spill] sm:$0xff] %v9209_v21  ;;  %v9211_v18 = vpop.permute.xlu1 %3630 }
 0x48d   : > { %11123 = vst [vmem:[#allocation201_spill] sm:$0xff] %v9211_v18 }
 0x48f   : > { %v9213_v9 = vpop.permute.xlu0 %3620 }
 0x490   : > { %11124 = vst [vmem:[#allocation202_spill] sm:$0xff] %v9213_v9  ;;  %v3699_v50 = vpop.permute.xlu1 %3698 }
 0x491   : > { %v3793_v35 = vmul.f32 %v3699_v50, %v8334_v37 }
 0x493   : > { %3858 = vrot.lane.b32.xlu1 %v3793_v35, %s5763_s8  ;;  %v9217_v26 = vpop.permute.xlu0 %3624 }
 0x494   : > { %11125 = vst [vmem:[#allocation203_spill] sm:$0xff] %v9217_v26  ;;  %v3703_v12 = vpop.permute.xlu1 %3702 }
 0x495   : > { %v3795_v43 = vmul.f32 %v3703_v12, %v11051_v38 }
 0x497   : > { %3862 = vrot.lane.b32.xlu1 %v3795_v43, %s5763_s8  ;;  %v9221_v15 = vpop.permute.xlu0 %3628 }
 0x498   : > { %11126 = vst [vmem:[#allocation204_spill] sm:$0xff] %v9221_v15  ;;  %v3707_v21 = vpop.permute.xlu1 %3706 }
 0x499   : > { %v3797_v18 = vmul.f32 %v3707_v21, %v8374_v34 }
 0x49b   : > { %3866 = vrot.lane.b32.xlu1 %v3797_v18, %s5763_s8  ;;  %v3697_v9 = vpop.permute.xlu0 %3696 }
 0x49c   : > { %v3711_v45 = vpop.permute.xlu1 %3710  ;;  %v3792_v50 = vmul.f32 %v3697_v9, %v8348_v42 }
 0x49d   : > { %v3799_v35 = vmul.f32 %v3711_v45, %v11054_v60 }
 0x49e   : > { %3856 = vrot.lane.b32.xlu0 %v3792_v50, %s5763_s8 }
 0x49f   : > { %3870 = vrot.lane.b32.xlu1 %v3799_v35, %s5763_s8  ;;  %v3701_v12 = vpop.permute.xlu0 %3700 }
 0x4a0   : > { %v3715_v26 = vpop.permute.xlu1 %3714  ;;  %v3794_v43 = vmul.f32 %v3701_v12, %v11055_v20 }
 0x4a1   : > { %v3801_v15 = vmul.f32 %v3715_v26, %v8429_v16 }
 0x4a2   : > { %3860 = vrot.lane.b32.xlu0 %v3794_v43, %s5763_s8 }
 0x4a3   : > { %3874 = vrot.lane.b32.xlu1 %v3801_v15, %s5763_s8  ;;  %v3705_v18 = vpop.permute.xlu0 %3704 }
 0x4a4   : > { %v3719_v21 = vpop.permute.xlu1 %3718  ;;  %v3796_v9 = vmul.f32 %v3705_v18, %v8399_v55 }
 0x4a5   : > { %v3803_v45 = vmul.f32 %v3719_v21, %v8403_v53 }
 0x4a6   : > { %3864 = vrot.lane.b32.xlu0 %v3796_v9, %s5763_s8 }
 0x4a7   : > { %3878 = vrot.lane.b32.xlu1 %v3803_v45, %s5763_s8  ;;  %v3709_v50 = vpop.permute.xlu0 %3708 }
 0x4a8   : > { %v3723_v35 = vpop.permute.xlu1 %3722  ;;  %v3798_v12 = vmul.f32 %v3709_v50, %v11056_v41 }
 0x4a9   : > { %v3805_v26 = vmul.f32 %v3723_v35, %v11057_v56 }
 0x4aa   : > { %3868 = vrot.lane.b32.xlu0 %v3798_v12, %s5763_s8 }
 0x4ab   : > { %3882 = vrot.lane.b32.xlu1 %v3805_v26, %s5763_s8  ;;  %v3713_v15 = vpop.permute.xlu0 %3712 }
 0x4ac   : > { %v3727_v43 = vpop.permute.xlu1 %3726  ;;  %v3800_v18 = vmul.f32 %v3713_v15, %v11058_v10 }
 0x4ad   : > { %v3807_v21 = vmul.f32 %v3727_v43, %v11059_v57 }
 0x4ae   : > { %3872 = vrot.lane.b32.xlu0 %v3800_v18, %s5763_s8 }
 0x4af   : > { %3886 = vrot.lane.b32.xlu1 %v3807_v21, %s5763_s8  ;;  %v3717_v9 = vpop.permute.xlu0 %3716 }
 0x4b0   : > { %v3731_v45 = vpop.permute.xlu1 %3730  ;;  %v3802_v50 = vmul.f32 %v3717_v9, %v11060_v63 }
 0x4b1   : > { %v3809_v35 = vmul.f32 %v3731_v45, %v8557_v13 }
 0x4b2   : > { %3876 = vrot.lane.b32.xlu0 %v3802_v50, %s5763_s8 }
 0x4b3   : > { %3890 = vrot.lane.b32.xlu1 %v3809_v35, %s5763_s8  ;;  %v3721_v12 = vpop.permute.xlu0 %3720 }
 0x4b4   : > { %v3735_v26 = vpop.permute.xlu1 %3734  ;;  %v3804_v15 = vmul.f32 %v3721_v12, %v11061_v30 }
 0x4b5   : > { %v3811_v43 = vmul.f32 %v3735_v26, %v8523_v28 }
 0x4b6   : > { %3880 = vrot.lane.b32.xlu0 %v3804_v15, %s5763_s8 }
 0x4b7   : > { %3894 = vrot.lane.b32.xlu1 %v3811_v43, %s5763_s8  ;;  %v3725_v18 = vpop.permute.xlu0 %3724 }
 0x4b8   : > { %v3739_v21 = vpop.permute.xlu1 %3738  ;;  %v3806_v9 = vmul.f32 %v3725_v18, %v11062_v52 }
 0x4b9   : > { %v3813_v45 = vmul.f32 %v3739_v21, %v8622_v46 }
 0x4ba   : > { %3884 = vrot.lane.b32.xlu0 %v3806_v9, %s5763_s8 }
 0x4bb   : > { %3898 = vrot.lane.b32.xlu1 %v3813_v45, %s5763_s8  ;;  %v3729_v50 = vpop.permute.xlu0 %3728 }
 0x4bc   : > { %v3743_v35 = vpop.permute.xlu1 %3742  ;;  %v3808_v12 = vmul.f32 %v3729_v50, %v8585_v17 }
 0x4bd   : > { %v3815_v26 = vmul.f32 %v3743_v35, %v8590_v4 }
 0x4be   : > { %3888 = vrot.lane.b32.xlu0 %v3808_v12, %s5763_s8 }
 0x4bf   : > { %3902 = vrot.lane.b32.xlu1 %v3815_v26, %s5763_s8  ;;  %v3733_v15 = vpop.permute.xlu0 %3732 }
 0x4c0   : > { %v3747_v43 = vpop.permute.xlu1 %3746  ;;  %v3810_v18 = vmul.f32 %v3733_v15, %v8554_v51 }
 0x4c1   : > { %v3817_v21 = vmul.f32 %v3747_v43, %v8697_v24 }
 0x4c2   : > { %3892 = vrot.lane.b32.xlu0 %v3810_v18, %s5763_s8 }
 0x4c3   : > { %3906 = vrot.lane.b32.xlu1 %v3817_v21, %s5763_s8  ;;  %v3737_v9 = vpop.permute.xlu0 %3736 }
 0x4c4   : > { %v3751_v45 = vpop.permute.xlu1 %3750  ;;  %v3812_v50 = vmul.f32 %v3737_v9, %v8652_v48 }
 0x4c5   : > { %v3819_v35 = vmul.f32 %v3751_v45, %v8659_v31 }
 0x4c6   : > { %3896 = vrot.lane.b32.xlu0 %v3812_v50, %s5763_s8 }
 0x4c7   : > { %3910 = vrot.lane.b32.xlu1 %v3819_v35, %s5763_s8  ;;  %v3741_v12 = vpop.permute.xlu0 %3740 }
 0x4c8   : > { %v3755_v26 = vpop.permute.xlu1 %3754  ;;  %v3814_v15 = vmul.f32 %v3741_v12, %v8617_v2  ;;  %v11127_v12 = vld [vmem:[#allocation24_spill] sm:$0xff] }
 0x4c9   : > { %v3821_v43 = vmul.f32 %v3755_v26, %v8769_v5 }
 0x4ca   : > { %3900 = vrot.lane.b32.xlu0 %v3814_v15, %s5763_s8 }
 0x4cb   : > { %3914 = vrot.lane.b32.xlu1 %v3821_v43, %s5763_s8  ;;  %v3745_v18 = vpop.permute.xlu0 %3744  ;;  %v11128_v43 = vld [vmem:[#allocation32_spill] sm:$0xff] }
 0x4cc   : > { %v3759_v21 = vpop.permute.xlu1 %3758  ;;  %v3816_v9 = vmul.f32 %v3745_v18, %v8726_v22 }
 0x4cd   : > { %v3823_v45 = vmul.f32 %v3759_v21, %v8733_v25 }
 0x4ce   : > { %3904 = vrot.lane.b32.xlu0 %v3816_v9, %s5763_s8  ;;  %v11129_v9 = vld [vmem:[#allocation34_spill] sm:$0xff] }
 0x4cf   : > { %3918 = vrot.lane.b32.xlu1 %v3823_v45, %s5763_s8  ;;  %v3749_v50 = vpop.permute.xlu0 %3748  ;;  %v11130_v45 = vld [vmem:[#allocation16_spill] sm:$0xff] }
 0x4d0   : > { %v3818_v35 = vmul.f32 %v3749_v50, %v8690_v3  ;;  %v11131_v50 = vld [vmem:[#allocation39_spill] sm:$0xff] }
 0x4d2   : > { %3908 = vrot.lane.b32.xlu0 %v3818_v35, %s5763_s8  ;;  %v11132_v35 = vld [vmem:[#allocation17_spill] sm:$0xff] }
 0x4d3   : > { %3986 = vrot.lane.b32.xlu1 %v11127_v12, %s5751_s22  ;;  %v3753_v26 = vpop.permute.xlu0 %3752 }
 0x4d4   : > { %v3820_v15 = vmul.f32 %v3753_v26, %v8799_v61  ;;  %v11133_v26 = vld [vmem:[#allocation43_spill] sm:$0xff] }
 0x4d6   : > { %3912 = vrot.lane.b32.xlu0 %v3820_v15, %s5763_s8  ;;  %v11134_v15 = vld [vmem:[#allocation29_spill] sm:$0xff] }
 0x4d7   : > { %3990 = vrot.lane.b32.xlu1 %v11128_v43, %s5751_s22  ;;  %v3757_v18 = vpop.permute.xlu0 %3756 }
 0x4d8   : > { %v3822_v21 = vmul.f32 %v3757_v18, %v8762_v11  ;;  %v11135_v18 = vld [vmem:[#allocation49_spill] sm:$0xff] }
 0x4da   : > { %3916 = vrot.lane.b32.xlu0 %v3822_v21, %s5763_s8  ;;  %v11136_v21 = vld [vmem:[#allocation36_spill] sm:$0xff] }
 0x4db   : > { %3994 = vrot.lane.b32.xlu1 %v11129_v9, %s5751_s22  ;;  %v11138_v9 = vld [vmem:[#allocation44_spill] sm:$0xff] }
 0x4de   : > { %3984 = vrot.lane.b32.xlu0 %v11130_v45, %s5751_s22 }
 0x4df   : > { %3998 = vrot.lane.b32.xlu1 %v11131_v50, %s5751_s22  ;;  %v11139_v50 = vld [vmem:[#allocation61_spill] sm:$0xff] }
 0x4e2   : > { %3988 = vrot.lane.b32.xlu0 %v11132_v35, %s5751_s22 }
 0x4e3   : > { %4002 = vrot.lane.b32.xlu1 %v11133_v26, %s5751_s22  ;;  %v11140_v26 = vld [vmem:[#allocation46_spill] sm:$0xff] }
 0x4e6   : > { %3992 = vrot.lane.b32.xlu0 %v11134_v15, %s5751_s22  ;;  %v11141_v15 = vld [vmem:[#allocation10_spill] sm:$0xff] }
 0x4e7   : > { %4006 = vrot.lane.b32.xlu1 %v11135_v18, %s5751_s22  ;;  %v11142_v18 = vld [vmem:[#allocation55_spill] sm:$0xff] }
 0x4ea   : > { %3996 = vrot.lane.b32.xlu0 %v11136_v21, %s5751_s22  ;;  %v11143_v21 = vld [vmem:[#allocation14_spill] sm:$0xff] }
 0x4eb   : > { %4010 = vrot.lane.b32.xlu1 %v11137_v58, %s5751_s22  ;;  %v11144_v58 = vld [vmem:[#allocation58_spill] sm:$0xff] }
 0x4ee   : > { %4000 = vrot.lane.b32.xlu0 %v11138_v9, %s5751_s22  ;;  %v11145_v9 = vld [vmem:[#allocation18_spill] sm:$0xff] }
 0x4ef   : > { %4014 = vrot.lane.b32.xlu1 %v11139_v50, %s5751_s22  ;;  %v11146_v50 = vld [vmem:[#allocation66_spill] sm:$0xff] }
 0x4f2   : > { %4004 = vrot.lane.b32.xlu0 %v11140_v26, %s5751_s22  ;;  %v11147_v26 = vld [vmem:[#allocation20_spill] sm:$0xff] }
 0x4f3   : > { %4018 = vrot.lane.b32.xlu1 %v11141_v15, %s5751_s22  ;;  %v11148_v15 = vld [vmem:[#allocation95_spill] sm:$0xff] }
 0x4f6   : > { %4008 = vrot.lane.b32.xlu0 %v11142_v18, %s5751_s22  ;;  %v11149_v18 = vld [vmem:[#allocation23_spill] sm:$0xff] }
 0x4f7   : > { %4022 = vrot.lane.b32.xlu1 %v11143_v21, %s5751_s22  ;;  %v11151_v21 = vld [vmem:[#allocation3_spill] sm:$0xff] }
 0x4fa   : > { %4012 = vrot.lane.b32.xlu0 %v11144_v58, %s5751_s22  ;;  %v11152_v58 = vld [vmem:[#allocation28_spill] sm:$0xff] }
 0x4fb   : > { %4026 = vrot.lane.b32.xlu1 %v11145_v9, %s5751_s22 }
 0x4fe   : > { %4016 = vrot.lane.b32.xlu0 %v11146_v50, %s5751_s22  ;;  %v11154_v50 = vld [vmem:[#allocation8_spill] sm:$0xff] }
 0x4ff   : > { %4030 = vrot.lane.b32.xlu1 %v11147_v26, %s5751_s22 }
 0x502   : > { %4020 = vrot.lane.b32.xlu0 %v11148_v15, %s5751_s22 }
 0x503   : > { %4034 = vrot.lane.b32.xlu1 %v11149_v18, %s5751_s22  ;;  %v11156_v18 = vld [vmem:[#allocation12_spill] sm:$0xff] }
 0x505   : > { %v9329_v12 = vpop.permute.xlu1 %3858 }
 0x506   : > { %11150 = vst [vmem:[#allocation16_spill] sm:$0xff] %v9329_v12  ;;  %4024 = vrot.lane.b32.xlu0 %v11151_v21, %s5751_s22  ;;  %v11159_v21 = vld [vmem:[#allocation89_spill] sm:$0xff] }
 0x507   : > { %4038 = vrot.lane.b32.xlu1 %v11152_v58, %s5751_s22 }
 0x509   : > { %v9335_v9 = vpop.permute.xlu1 %3862 }
 0x50a   : > { %11153 = vst [vmem:[#allocation17_spill] sm:$0xff] %v9335_v9  ;;  %4028 = vrot.lane.b32.xlu0 %v11154_v50, %s5751_s22 }
 0x50b   : > { %4042 = vrot.lane.b32.xlu1 %v11009_v62, %s5751_s22 }
 0x50d   : > { %v9341_v26 = vpop.permute.xlu1 %3866 }
 0x50e   : > { %11155 = vst [vmem:[#allocation205_spill] sm:$0xff] %v9341_v26  ;;  %4032 = vrot.lane.b32.xlu0 %v11156_v18, %s5751_s22 }
 0x510   : > { %v9345_v15 = vpop.permute.xlu0 %3856 }
 0x511   : > { %11157 = vst [vmem:[#allocation206_spill] sm:$0xff] %v9345_v15  ;;  %v9347_v12 = vpop.permute.xlu1 %3870 }
 0x512   : > { %11158 = vst [vmem:[#allocation207_spill] sm:$0xff] %v9347_v12  ;;  %4036 = vrot.lane.b32.xlu0 %v11159_v21, %s5751_s22 }
 0x514   : > { %v9351_v58 = vpop.permute.xlu0 %3860 }
 0x515   : > { %11160 = vst [vmem:[#allocation208_spill] sm:$0xff] %v9351_v58  ;;  %v9353_v9 = vpop.permute.xlu1 %3874 }
 0x516   : > { %11161 = vst [vmem:[#allocation209_spill] sm:$0xff] %v9353_v9  ;;  %4040 = vrot.lane.b32.xlu0 %v11021_v40, %s5751_s22  ;;  %s5764_s22 = smov 80  }
 0x518   : > { %v9357_v62 = vpop.permute.xlu0 %3864 }
 0x519   : > { %11162 = vst [vmem:[#allocation210_spill] sm:$0xff] %v9357_v62  ;;  %v9359_v50 = vpop.permute.xlu1 %3878 }
 0x51a   : > { %11163 = vst [vmem:[#allocation211_spill] sm:$0xff] %v9359_v50 }
 0x51c   : > { %v9361_v26 = vpop.permute.xlu0 %3868 }
 0x51d   : > { %11164 = vst [vmem:[#allocation212_spill] sm:$0xff] %v9361_v26  ;;  %v9363_v18 = vpop.permute.xlu1 %3882 }
 0x51e   : > { %11165 = vst [vmem:[#allocation213_spill] sm:$0xff] %v9363_v18 }
 0x520   : > { %v9365_v15 = vpop.permute.xlu0 %3872 }
 0x521   : > { %11166 = vst [vmem:[#allocation214_spill] sm:$0xff] %v9365_v15  ;;  %v9367_v12 = vpop.permute.xlu1 %3886 }
 0x522   : > { %11167 = vst [vmem:[#allocation215_spill] sm:$0xff] %v9367_v12 }
 0x524   : > { %v9369_v21 = vpop.permute.xlu0 %3876 }
 0x525   : > { %11168 = vst [vmem:[#allocation216_spill] sm:$0xff] %v9369_v21  ;;  %v9371_v58 = vpop.permute.xlu1 %3890 }
 0x526   : > { %11169 = vst [vmem:[#allocation217_spill] sm:$0xff] %v9371_v58 }
 0x528   : > { %v9373_v9 = vpop.permute.xlu0 %3880 }
 0x529   : > { %11170 = vst [vmem:[#allocation218_spill] sm:$0xff] %v9373_v9  ;;  %v9375_v43 = vpop.permute.xlu1 %3894 }
 0x52a   : > { %11171 = vst [vmem:[#allocation219_spill] sm:$0xff] %v9375_v43 }
 0x52c   : > { %v9377_v40 = vpop.permute.xlu0 %3884 }
 0x52d   : > { %11172 = vst [vmem:[#allocation220_spill] sm:$0xff] %v9377_v40  ;;  %v9379_v62 = vpop.permute.xlu1 %3898 }
 0x52e   : > { %11173 = vst [vmem:[#allocation221_spill] sm:$0xff] %v9379_v62 }
 0x530   : > { %v9381_v50 = vpop.permute.xlu0 %3888 }
 0x531   : > { %11174 = vst [vmem:[#allocation222_spill] sm:$0xff] %v9381_v50  ;;  %v9383_v26 = vpop.permute.xlu1 %3902 }
 0x532   : > { %11175 = vst [vmem:[#allocation223_spill] sm:$0xff] %v9383_v26 }
 0x534   : > { %v9385_v18 = vpop.permute.xlu0 %3892 }
 0x535   : > { %11176 = vst [vmem:[#allocation224_spill] sm:$0xff] %v9385_v18  ;;  %v9387_v15 = vpop.permute.xlu1 %3906 }
 0x536   : > { %11177 = vst [vmem:[#allocation225_spill] sm:$0xff] %v9387_v15 }
 0x538   : > { %v9389_v12 = vpop.permute.xlu0 %3896 }
 0x539   : > { %11178 = vst [vmem:[#allocation226_spill] sm:$0xff] %v9389_v12  ;;  %v9391_v21 = vpop.permute.xlu1 %3910 }
 0x53a   : > { %11179 = vst [vmem:[#allocation227_spill] sm:$0xff] %v9391_v21 }
 0x53c   : > { %v9393_v58 = vpop.permute.xlu0 %3900 }
 0x53d   : > { %11180 = vst [vmem:[#allocation228_spill] sm:$0xff] %v9393_v58  ;;  %v9395_v9 = vpop.permute.xlu1 %3914 }
 0x53e   : > { %11181 = vst [vmem:[#allocation229_spill] sm:$0xff] %v9395_v9 }
 0x540   : > { %v9397_v43 = vpop.permute.xlu0 %3904 }
 0x541   : > { %11182 = vst [vmem:[#allocation230_spill] sm:$0xff] %v9397_v43  ;;  %v9399_v40 = vpop.permute.xlu1 %3918 }
 0x542   : > { %11183 = vst [vmem:[#allocation231_spill] sm:$0xff] %v9399_v40 }
 0x544   : > { %v9401_v62 = vpop.permute.xlu0 %3908 }
 0x545   : > { %11184 = vst [vmem:[#allocation232_spill] sm:$0xff] %v9401_v62  ;;  %v3987_v50 = vpop.permute.xlu1 %3986 }
 0x546   : > { %v4075_v26 = vmul.f32 %v3987_v50, %v8334_v37 }
 0x548   : > { %4140 = vrot.lane.b32.xlu1 %v4075_v26, %s5764_s22  ;;  %v9405_v15 = vpop.permute.xlu0 %3912 }
 0x549   : > { %11185 = vst [vmem:[#allocation233_spill] sm:$0xff] %v9405_v15  ;;  %v3991_v12 = vpop.permute.xlu1 %3990 }
 0x54a   : > { %v4077_v21 = vmul.f32 %v3991_v12, %v11051_v38 }
 0x54c   : > { %4144 = vrot.lane.b32.xlu1 %v4077_v21, %s5764_s22  ;;  %v9409_v9 = vpop.permute.xlu0 %3916 }
 0x54d   : > { %11186 = vst [vmem:[#allocation234_spill] sm:$0xff] %v9409_v9  ;;  %v3995_v43 = vpop.permute.xlu1 %3994 }
 0x54e   : > { %v4079_v40 = vmul.f32 %v3995_v43, %v8374_v34 }
 0x550   : > { %4148 = vrot.lane.b32.xlu1 %v4079_v40, %s5764_s22  ;;  %v3985_v62 = vpop.permute.xlu0 %3984 }
 0x551   : > { %v3999_v58 = vpop.permute.xlu1 %3998  ;;  %v4074_v50 = vmul.f32 %v3985_v62, %v8348_v42 }
 0x552   : > { %v4081_v26 = vmul.f32 %v3999_v58, %v11054_v60 }
 0x553   : > { %4138 = vrot.lane.b32.xlu0 %v4074_v50, %s5764_s22 }
 0x554   : > { %4152 = vrot.lane.b32.xlu1 %v4081_v26, %s5764_s22  ;;  %v3989_v12 = vpop.permute.xlu0 %3988 }
 0x555   : > { %v4003_v15 = vpop.permute.xlu1 %4002  ;;  %v4076_v21 = vmul.f32 %v3989_v12, %v11055_v20 }
 0x556   : > { %v4083_v9 = vmul.f32 %v4003_v15, %v8429_v16 }
 0x557   : > { %4142 = vrot.lane.b32.xlu0 %v4076_v21, %s5764_s22 }
 0x558   : > { %4156 = vrot.lane.b32.xlu1 %v4083_v9, %s5764_s22  ;;  %v3993_v43 = vpop.permute.xlu0 %3992 }
 0x559   : > { %v4007_v40 = vpop.permute.xlu1 %4006  ;;  %v4078_v62 = vmul.f32 %v3993_v43, %v8399_v55 }
 0x55a   : > { %v4085_v58 = vmul.f32 %v4007_v40, %v8403_v53 }
 0x55b   : > { %4146 = vrot.lane.b32.xlu0 %v4078_v62, %s5764_s22 }
 0x55c   : > { %4160 = vrot.lane.b32.xlu1 %v4085_v58, %s5764_s22  ;;  %v3997_v50 = vpop.permute.xlu0 %3996 }
 0x55d   : > { %v4011_v26 = vpop.permute.xlu1 %4010  ;;  %v4080_v12 = vmul.f32 %v3997_v50, %v11056_v41 }
 0x55e   : > { %v4087_v15 = vmul.f32 %v4011_v26, %v11057_v56 }
 0x55f   : > { %4150 = vrot.lane.b32.xlu0 %v4080_v12, %s5764_s22 }
 0x560   : > { %4164 = vrot.lane.b32.xlu1 %v4087_v15, %s5764_s22  ;;  %v4001_v9 = vpop.permute.xlu0 %4000 }
 0x561   : > { %v4015_v21 = vpop.permute.xlu1 %4014  ;;  %v4082_v43 = vmul.f32 %v4001_v9, %v11058_v10 }
 0x562   : > { %v4089_v40 = vmul.f32 %v4015_v21, %v11059_v57 }
 0x563   : > { %4154 = vrot.lane.b32.xlu0 %v4082_v43, %s5764_s22 }
 0x564   : > { %4168 = vrot.lane.b32.xlu1 %v4089_v40, %s5764_s22  ;;  %v4005_v62 = vpop.permute.xlu0 %4004 }
 0x565   : > { %v4019_v58 = vpop.permute.xlu1 %4018  ;;  %v4084_v50 = vmul.f32 %v4005_v62, %v11060_v63 }
 0x566   : > { %v4091_v26 = vmul.f32 %v4019_v58, %v8557_v13 }
 0x567   : > { %4158 = vrot.lane.b32.xlu0 %v4084_v50, %s5764_s22 }
 0x568   : > { %4172 = vrot.lane.b32.xlu1 %v4091_v26, %s5764_s22  ;;  %v4009_v12 = vpop.permute.xlu0 %4008 }
 0x569   : > { %v4023_v15 = vpop.permute.xlu1 %4022  ;;  %v4086_v9 = vmul.f32 %v4009_v12, %v11061_v30 }
 0x56a   : > { %v4093_v21 = vmul.f32 %v4023_v15, %v8523_v28 }
 0x56b   : > { %4162 = vrot.lane.b32.xlu0 %v4086_v9, %s5764_s22 }
 0x56c   : > { %4176 = vrot.lane.b32.xlu1 %v4093_v21, %s5764_s22  ;;  %v4013_v43 = vpop.permute.xlu0 %4012 }
 0x56d   : > { %v4027_v40 = vpop.permute.xlu1 %4026  ;;  %v4088_v62 = vmul.f32 %v4013_v43, %v11062_v52 }
 0x56e   : > { %v4095_v58 = vmul.f32 %v4027_v40, %v8622_v46 }
 0x56f   : > { %4166 = vrot.lane.b32.xlu0 %v4088_v62, %s5764_s22 }
 0x570   : > { %4180 = vrot.lane.b32.xlu1 %v4095_v58, %s5764_s22  ;;  %v4017_v50 = vpop.permute.xlu0 %4016 }
 0x571   : > { %v4031_v26 = vpop.permute.xlu1 %4030  ;;  %v4090_v12 = vmul.f32 %v4017_v50, %v8585_v17 }
 0x572   : > { %v4097_v15 = vmul.f32 %v4031_v26, %v8590_v4 }
 0x573   : > { %4170 = vrot.lane.b32.xlu0 %v4090_v12, %s5764_s22 }
 0x574   : > { %4184 = vrot.lane.b32.xlu1 %v4097_v15, %s5764_s22  ;;  %v4021_v9 = vpop.permute.xlu0 %4020 }
 0x575   : > { %v4035_v21 = vpop.permute.xlu1 %4034  ;;  %v4092_v43 = vmul.f32 %v4021_v9, %v8554_v51 }
 0x576   : > { %v4099_v40 = vmul.f32 %v4035_v21, %v8697_v24 }
 0x577   : > { %4174 = vrot.lane.b32.xlu0 %v4092_v43, %s5764_s22 }
 0x578   : > { %4188 = vrot.lane.b32.xlu1 %v4099_v40, %s5764_s22  ;;  %v4025_v62 = vpop.permute.xlu0 %4024 }
 0x579   : > { %v4039_v58 = vpop.permute.xlu1 %4038  ;;  %v4094_v50 = vmul.f32 %v4025_v62, %v8652_v48  ;;  %v11187_v62 = vld [vmem:[#allocation71_spill] sm:$0xff] }
 0x57a   : > { %v4101_v26 = vmul.f32 %v4039_v58, %v8659_v31  ;;  %v4105_v58 = vmul.f32 %v8733_v25, %v11187_v62 }
 0x57b   : > { %4178 = vrot.lane.b32.xlu0 %v4094_v50, %s5764_s22 }
 0x57c   : > { %4192 = vrot.lane.b32.xlu1 %v4101_v26, %s5764_s22  ;;  %v4029_v12 = vpop.permute.xlu0 %4028 }
 0x57d   : > { %v4043_v15 = vpop.permute.xlu1 %4042  ;;  %v4096_v9 = vmul.f32 %v4029_v12, %v8617_v2 }
 0x57e   : > { %v4103_v21 = vmul.f32 %v4043_v15, %v8769_v5 }
 0x57f   : > { %4182 = vrot.lane.b32.xlu0 %v4096_v9, %s5764_s22  ;;  %v4104_v9 = vmul.f32 %v8762_v11, %v11187_v62 }
 0x580   : > { %4196 = vrot.lane.b32.xlu1 %v4103_v21, %s5764_s22  ;;  %v4033_v43 = vpop.permute.xlu0 %4032 }
 0x581   : > { %v4098_v40 = vmul.f32 %v4033_v43, %v8726_v22 }
 0x583   : > { %4186 = vrot.lane.b32.xlu0 %v4098_v40, %s5764_s22 }
 0x584   : > { %4200 = vrot.lane.b32.xlu1 %v4105_v58, %s5764_s22  ;;  %v4037_v50 = vpop.permute.xlu0 %4036 }
 0x585   : > { %v4100_v26 = vmul.f32 %v4037_v50, %v8690_v3 }
 0x587   : > { %4190 = vrot.lane.b32.xlu0 %v4100_v26, %s5764_s22 }
 0x588   : > { %4268 = vrot.lane.b32.xlu1 %v10959_v49, %s5752_s27  ;;  %v4041_v12 = vpop.permute.xlu0 %4040  ;;  %v11196_v49 = vld [vmem:[#allocation11_spill] sm:$0xff] }
 0x589   : > { %v4102_v15 = vmul.f32 %v4041_v12, %v8799_v61 }
 0x58b   : > { %4194 = vrot.lane.b32.xlu0 %v4102_v15, %s5764_s22 }
 0x58c   : > { %4272 = vrot.lane.b32.xlu1 %v10963_v59, %s5752_s27 }
 0x58f   : > { %4198 = vrot.lane.b32.xlu0 %v4104_v9, %s5764_s22 }
 0x590   : > { %4276 = vrot.lane.b32.xlu1 %v10966_v19, %s5752_s27 }
 0x593   : > { %4266 = vrot.lane.b32.xlu0 %v10969_v32, %s5752_s27 }
 0x594   : > { %4280 = vrot.lane.b32.xlu1 %v10970_v36, %s5752_s27 }
 0x597   : > { %4270 = vrot.lane.b32.xlu0 %v10973_v8, %s5752_s27  ;;  %v11191_v8 = vld [vmem:[#allocation2_spill] sm:$0xff] }
 0x598   : > { %4284 = vrot.lane.b32.xlu1 %v10974_v29, %s5752_s27 }
 0x59b   : > { %4274 = vrot.lane.b32.xlu0 %v10977_v6, %s5752_s27  ;;  %v11195_v6 = vld [vmem:[#allocation150_spill] sm:$0xff] }
 0x59c   : > { %4288 = vrot.lane.b32.xlu1 %v10978_v47, %s5752_s27  ;;  %v11194_v47 = vld [vmem:[#allocation19_spill] sm:$0xff] }
 0x59f   : > { %4278 = vrot.lane.b32.xlu0 %v10981_v1, %s5752_s27  ;;  %v11198_v1 = vld [vmem:[#allocation155_spill] sm:$0xff] }
 0x5a0   : > { %4292 = vrot.lane.b32.xlu1 %v10982_v0, %s5752_s27  ;;  %v11189_v0 = vld [vmem:[#allocation65_spill] sm:$0xff] }
 0x5a3   : > { %4282 = vrot.lane.b32.xlu0 %v10985_v23, %s5752_s27 }
 0x5a4   : > { %4296 = vrot.lane.b32.xlu1 %v10986_v14, %s5752_s27  ;;  %v11188_v14 = vld [vmem:[#allocation5_spill] sm:$0xff] }
 0x5a7   : > { %4286 = vrot.lane.b32.xlu0 %v10989_v54, %s5752_s27  ;;  %v11197_v54 = vld [vmem:[#allocation15_spill] sm:$0xff] }
 0x5a8   : > { %4300 = vrot.lane.b32.xlu1 %v10990_v7, %s5752_s27  ;;  %v11190_v7 = vld [vmem:[#allocation72_spill] sm:$0xff] }
 0x5ab   : > { %4290 = vrot.lane.b32.xlu0 %v10993_v39, %s5752_s27 }
 0x5ac   : > { %4304 = vrot.lane.b32.xlu1 %v10994_v27, %s5752_s27  ;;  %v11192_v27 = vld [vmem:[#allocation4_spill] sm:$0xff] }
 0x5af   : > { %4294 = vrot.lane.b32.xlu0 %v10997_v44, %s5752_s27  ;;  %v11193_v44 = vld [vmem:[#allocation68_spill] sm:$0xff] }
 0x5b0   : > { %4308 = vrot.lane.b32.xlu1 %v10998_v33, %s5752_s27 }
 0x5b3   : > { %4298 = vrot.lane.b32.xlu0 %v11188_v14, %s5752_s27 }
 0x5b4   : > { %4312 = vrot.lane.b32.xlu1 %v11189_v0, %s5752_s27 }
 0x5b7   : > { %4302 = vrot.lane.b32.xlu0 %v11190_v7, %s5752_s27 }
 0x5b8   : > { %4316 = vrot.lane.b32.xlu1 %v11191_v8, %s5752_s27 }
 0x5ba   : > { %v9519_v19 = vpop.permute.xlu1 %4140 }
 0x5bb   : > { %4306 = vrot.lane.b32.xlu0 %v11192_v27, %s5752_s27 }
 0x5bc   : > { %4320 = vrot.lane.b32.xlu1 %v11193_v44, %s5752_s27 }
 0x5be   : > { %v9525_v33 = vpop.permute.xlu1 %4144 }
 0x5bf   : > { %4310 = vrot.lane.b32.xlu0 %v11194_v47, %s5752_s27 }
 0x5c0   : > { %4324 = vrot.lane.b32.xlu1 %v11195_v6, %s5752_s27 }
 0x5c2   : > { %v9531_v39 = vpop.permute.xlu1 %4148 }
 0x5c3   : > { %4314 = vrot.lane.b32.xlu0 %v11196_v49, %s5752_s27 }
 0x5c5   : > { %v9535_v36 = vpop.permute.xlu0 %4138 }
 0x5c6   : > { %v9537_v59 = vpop.permute.xlu1 %4152 }
 0x5c7   : > { %4318 = vrot.lane.b32.xlu0 %v11197_v54, %s5752_s27 }
 0x5c9   : > { %v9541_v23 = vpop.permute.xlu0 %4142 }
 0x5ca   : > { %v9543_v32 = vpop.permute.xlu1 %4156 }
 0x5cb   : > { %4322 = vrot.lane.b32.xlu0 %v11198_v1, %s5752_s27  ;;  %s5765_s27 = smov 72  }
 0x5cd   : > { %v9547_v29 = vpop.permute.xlu0 %4146 }
 0x5ce   : > { %v9549_v21 = vpop.permute.xlu1 %4160 }
 0x5d1   : > { %v9551_v43 = vpop.permute.xlu0 %4150 }
 0x5d2   : > { %11199 = vst [vmem:[#allocation71_spill] sm:$0xff] %v9551_v43  ;;  %v9553_v40 = vpop.permute.xlu1 %4164 }
 0x5d3   : > { %11200 = vst [vmem:[#allocation5_spill] sm:$0xff] %v9553_v40 }
 0x5d5   : > { %v9555_v62 = vpop.permute.xlu0 %4154 }
 0x5d6   : > { %11201 = vst [vmem:[#allocation65_spill] sm:$0xff] %v9555_v62  ;;  %v9557_v58 = vpop.permute.xlu1 %4168 }
 0x5d7   : > { %11202 = vst [vmem:[#allocation72_spill] sm:$0xff] %v9557_v58 }
 0x5d9   : > { %v9559_v50 = vpop.permute.xlu0 %4158 }
 0x5da   : > { %11203 = vst [vmem:[#allocation2_spill] sm:$0xff] %v9559_v50  ;;  %v9561_v26 = vpop.permute.xlu1 %4172 }
 0x5db   : > { %11204 = vst [vmem:[#allocation4_spill] sm:$0xff] %v9561_v26 }
 0x5dd   : > { %v9563_v12 = vpop.permute.xlu0 %4162 }
 0x5de   : > { %11205 = vst [vmem:[#allocation68_spill] sm:$0xff] %v9563_v12  ;;  %v9565_v15 = vpop.permute.xlu1 %4176 }
 0x5df   : > { %11206 = vst [vmem:[#allocation19_spill] sm:$0xff] %v9565_v15 }
 0x5e1   : > { %v9567_v9 = vpop.permute.xlu0 %4166 }
 0x5e2   : > { %11207 = vst [vmem:[#allocation150_spill] sm:$0xff] %v9567_v9  ;;  %v9569_v14 = vpop.permute.xlu1 %4180 }
 0x5e3   : > { %11208 = vst [vmem:[#allocation11_spill] sm:$0xff] %v9569_v14 }
 0x5e5   : > { %v9571_v0 = vpop.permute.xlu0 %4170 }
 0x5e6   : > { %11209 = vst [vmem:[#allocation15_spill] sm:$0xff] %v9571_v0  ;;  %v9573_v7 = vpop.permute.xlu1 %4184 }
 0x5e7   : > { %11210 = vst [vmem:[#allocation155_spill] sm:$0xff] %v9573_v7 }
 0x5e9   : > { %v9575_v8 = vpop.permute.xlu0 %4174 }
 0x5ea   : > { %11211 = vst [vmem:[#allocation235_spill] sm:$0xff] %v9575_v8  ;;  %v9577_v27 = vpop.permute.xlu1 %4188 }
 0x5eb   : > { %11212 = vst [vmem:[#allocation236_spill] sm:$0xff] %v9577_v27 }
 0x5ed   : > { %v9579_v44 = vpop.permute.xlu0 %4178 }
 0x5ee   : > { %11213 = vst [vmem:[#allocation237_spill] sm:$0xff] %v9579_v44  ;;  %v9581_v47 = vpop.permute.xlu1 %4192 }
 0x5ef   : > { %11214 = vst [vmem:[#allocation238_spill] sm:$0xff] %v9581_v47 }
 0x5f1   : > { %v9583_v6 = vpop.permute.xlu0 %4182 }
 0x5f2   : > { %11215 = vst [vmem:[#allocation239_spill] sm:$0xff] %v9583_v6  ;;  %v9585_v49 = vpop.permute.xlu1 %4196 }
 0x5f3   : > { %11216 = vst [vmem:[#allocation240_spill] sm:$0xff] %v9585_v49 }
 0x5f5   : > { %v9587_v54 = vpop.permute.xlu0 %4186 }
 0x5f6   : > { %11217 = vst [vmem:[#allocation241_spill] sm:$0xff] %v9587_v54  ;;  %v9589_v1 = vpop.permute.xlu1 %4200 }
 0x5f7   : > { %11218 = vst [vmem:[#allocation242_spill] sm:$0xff] %v9589_v1 }
 0x5f9   : > { %v9591_v18 = vpop.permute.xlu0 %4190 }
 0x5fa   : > { %11219 = vst [vmem:[#allocation243_spill] sm:$0xff] %v9591_v18  ;;  %v4269_v0 = vpop.permute.xlu1 %4268 }
 0x5fb   : > { %v4357_v7 = vmul.f32 %v4269_v0, %v8334_v37 }
 0x5fd   : > { %4422 = vrot.lane.b32.xlu1 %v4357_v7, %s5765_s27  ;;  %v9595_v27 = vpop.permute.xlu0 %4194 }
 0x5fe   : > { %11220 = vst [vmem:[#allocation244_spill] sm:$0xff] %v9595_v27  ;;  %v4273_v44 = vpop.permute.xlu1 %4272 }
 0x5ff   : > { %v4359_v47 = vmul.f32 %v4273_v44, %v11051_v38 }
 0x601   : > { %4426 = vrot.lane.b32.xlu1 %v4359_v47, %s5765_s27  ;;  %v9599_v49 = vpop.permute.xlu0 %4198 }
 0x602   : > { %11221 = vst [vmem:[#allocation245_spill] sm:$0xff] %v9599_v49  ;;  %v4277_v54 = vpop.permute.xlu1 %4276 }
 0x603   : > { %v4361_v1 = vmul.f32 %v4277_v54, %v8374_v34 }
 0x605   : > { %4430 = vrot.lane.b32.xlu1 %v4361_v1, %s5765_s27  ;;  %v4267_v18 = vpop.permute.xlu0 %4266 }
 0x606   : > { %v4281_v6 = vpop.permute.xlu1 %4280  ;;  %v4356_v0 = vmul.f32 %v4267_v18, %v8348_v42 }
 0x607   : > { %v4363_v7 = vmul.f32 %v4281_v6, %v11054_v60 }
 0x608   : > { %4420 = vrot.lane.b32.xlu0 %v4356_v0, %s5765_s27 }
 0x609   : > { %4434 = vrot.lane.b32.xlu1 %v4363_v7, %s5765_s27  ;;  %v4271_v44 = vpop.permute.xlu0 %4270 }
 0x60a   : > { %v4285_v27 = vpop.permute.xlu1 %4284  ;;  %v4358_v47 = vmul.f32 %v4271_v44, %v11055_v20 }
 0x60b   : > { %v4365_v49 = vmul.f32 %v4285_v27, %v8429_v16 }
 0x60c   : > { %4424 = vrot.lane.b32.xlu0 %v4358_v47, %s5765_s27 }
 0x60d   : > { %4438 = vrot.lane.b32.xlu1 %v4365_v49, %s5765_s27  ;;  %v4275_v54 = vpop.permute.xlu0 %4274 }
 0x60e   : > { %v4289_v1 = vpop.permute.xlu1 %4288  ;;  %v4360_v18 = vmul.f32 %v4275_v54, %v8399_v55 }
 0x60f   : > { %v4367_v6 = vmul.f32 %v4289_v1, %v8403_v53 }
 0x610   : > { %4428 = vrot.lane.b32.xlu0 %v4360_v18, %s5765_s27 }
 0x611   : > { %4442 = vrot.lane.b32.xlu1 %v4367_v6, %s5765_s27  ;;  %v4279_v0 = vpop.permute.xlu0 %4278 }
 0x612   : > { %v4293_v7 = vpop.permute.xlu1 %4292  ;;  %v4362_v44 = vmul.f32 %v4279_v0, %v11056_v41 }
 0x613   : > { %v4369_v27 = vmul.f32 %v4293_v7, %v11057_v56 }
 0x614   : > { %4432 = vrot.lane.b32.xlu0 %v4362_v44, %s5765_s27 }
 0x615   : > { %4446 = vrot.lane.b32.xlu1 %v4369_v27, %s5765_s27  ;;  %v4283_v49 = vpop.permute.xlu0 %4282 }
 0x616   : > { %v4297_v47 = vpop.permute.xlu1 %4296  ;;  %v4364_v54 = vmul.f32 %v4283_v49, %v11058_v10 }
 0x617   : > { %v4371_v1 = vmul.f32 %v4297_v47, %v11059_v57 }
 0x618   : > { %4436 = vrot.lane.b32.xlu0 %v4364_v54, %s5765_s27 }
 0x619   : > { %4450 = vrot.lane.b32.xlu1 %v4371_v1, %s5765_s27  ;;  %v4287_v18 = vpop.permute.xlu0 %4286 }
 0x61a   : > { %v4301_v6 = vpop.permute.xlu1 %4300  ;;  %v4366_v0 = vmul.f32 %v4287_v18, %v11060_v63 }
 0x61b   : > { %v4373_v7 = vmul.f32 %v4301_v6, %v8557_v13 }
 0x61c   : > { %4440 = vrot.lane.b32.xlu0 %v4366_v0, %s5765_s27 }
 0x61d   : > { %4454 = vrot.lane.b32.xlu1 %v4373_v7, %s5765_s27  ;;  %v4291_v44 = vpop.permute.xlu0 %4290 }
 0x61e   : > { %v4305_v27 = vpop.permute.xlu1 %4304  ;;  %v4368_v49 = vmul.f32 %v4291_v44, %v11061_v30 }
 0x61f   : > { %v4375_v47 = vmul.f32 %v4305_v27, %v8523_v28 }
 0x620   : > { %4444 = vrot.lane.b32.xlu0 %v4368_v49, %s5765_s27 }
 0x621   : > { %4458 = vrot.lane.b32.xlu1 %v4375_v47, %s5765_s27  ;;  %v4295_v54 = vpop.permute.xlu0 %4294 }
 0x622   : > { %v4309_v1 = vpop.permute.xlu1 %4308  ;;  %v4370_v18 = vmul.f32 %v4295_v54, %v11062_v52 }
 0x623   : > { %v4377_v6 = vmul.f32 %v4309_v1, %v8622_v46 }
 0x624   : > { %4448 = vrot.lane.b32.xlu0 %v4370_v18, %s5765_s27 }
 0x625   : > { %4462 = vrot.lane.b32.xlu1 %v4377_v6, %s5765_s27  ;;  %v4299_v0 = vpop.permute.xlu0 %4298 }
 0x626   : > { %v4313_v7 = vpop.permute.xlu1 %4312  ;;  %v4372_v44 = vmul.f32 %v4299_v0, %v8585_v17 }
 0x627   : > { %v4379_v27 = vmul.f32 %v4313_v7, %v8590_v4 }
 0x628   : > { %4452 = vrot.lane.b32.xlu0 %v4372_v44, %s5765_s27 }
 0x629   : > { %4466 = vrot.lane.b32.xlu1 %v4379_v27, %s5765_s27  ;;  %v4303_v49 = vpop.permute.xlu0 %4302 }
 0x62a   : > { %v4317_v47 = vpop.permute.xlu1 %4316  ;;  %v4374_v54 = vmul.f32 %v4303_v49, %v8554_v51 }
 0x62b   : > { %v4381_v1 = vmul.f32 %v4317_v47, %v8697_v24 }
 0x62c   : > { %4456 = vrot.lane.b32.xlu0 %v4374_v54, %s5765_s27 }
 0x62d   : > { %4470 = vrot.lane.b32.xlu1 %v4381_v1, %s5765_s27  ;;  %v4307_v18 = vpop.permute.xlu0 %4306 }
 0x62e   : > { %v4321_v6 = vpop.permute.xlu1 %4320  ;;  %v4376_v0 = vmul.f32 %v4307_v18, %v8652_v48  ;;  %v11222_v18 = vld [vmem:[#allocation73_spill] sm:$0xff] }
 0x62f   : > { %v4383_v7 = vmul.f32 %v4321_v6, %v8659_v31  ;;  %v4387_v6 = vmul.f32 %v8733_v25, %v11222_v18 }
 0x630   : > { %4460 = vrot.lane.b32.xlu0 %v4376_v0, %s5765_s27 }
 0x631   : > { %4474 = vrot.lane.b32.xlu1 %v4383_v7, %s5765_s27  ;;  %v4311_v44 = vpop.permute.xlu0 %4310 }
 0x632   : > { %v4325_v27 = vpop.permute.xlu1 %4324  ;;  %v4378_v49 = vmul.f32 %v4311_v44, %v8617_v2  ;;  %v11223_v44 = vld [vmem:[#allocation22_spill] sm:$0xff] }
 0x633   : > { %v4385_v47 = vmul.f32 %v4325_v27, %v8769_v5 }
 0x634   : > { %4464 = vrot.lane.b32.xlu0 %v4378_v49, %s5765_s27 }
 0x635   : > { %4478 = vrot.lane.b32.xlu1 %v4385_v47, %s5765_s27  ;;  %v4315_v54 = vpop.permute.xlu0 %4314  ;;  %v11224_v47 = vld [vmem:[#allocation13_spill] sm:$0xff] }
 0x636   : > { %v4380_v1 = vmul.f32 %v4315_v54, %v8726_v22  ;;  %v4386_v54 = vmul.f32 %v8762_v11, %v11222_v18  ;;  %v11231_v18 = vld [vmem:[#allocation103_spill] sm:$0xff] }
 0x638   : > { %4468 = vrot.lane.b32.xlu0 %v4380_v1, %s5765_s27  ;;  %v11225_v1 = vld [vmem:[#allocation27_spill] sm:$0xff] }
 0x639   : > { %4482 = vrot.lane.b32.xlu1 %v4387_v6, %s5765_s27  ;;  %v4319_v0 = vpop.permute.xlu0 %4318  ;;  %v11226_v6 = vld [vmem:[#allocation33_spill] sm:$0xff] }
 0x63a   : > { %v4382_v7 = vmul.f32 %v4319_v0, %v8690_v3  ;;  %v11227_v0 = vld [vmem:[#allocation67_spill] sm:$0xff] }
 0x63c   : > { %4472 = vrot.lane.b32.xlu0 %v4382_v7, %s5765_s27  ;;  %v11228_v7 = vld [vmem:[#allocation35_spill] sm:$0xff] }
 0x63d   : > { %4550 = vrot.lane.b32.xlu1 %v11223_v44, %s5753_s28  ;;  %v4323_v27 = vpop.permute.xlu0 %4322  ;;  %v11229_v44 = vld [vmem:[#allocation84_spill] sm:$0xff] }
 0x63e   : > { %v4384_v49 = vmul.f32 %v4323_v27, %v8799_v61  ;;  %v11230_v27 = vld [vmem:[#allocation40_spill] sm:$0xff] }
 0x640   : > { %4476 = vrot.lane.b32.xlu0 %v4384_v49, %s5765_s27  ;;  %v11232_v49 = vld [vmem:[#allocation45_spill] sm:$0xff] }
 0x641   : > { %4554 = vrot.lane.b32.xlu1 %v11224_v47, %s5753_s28  ;;  %v11233_v47 = vld [vmem:[#allocation70_spill] sm:$0xff] }
 0x644   : > { %4480 = vrot.lane.b32.xlu0 %v4386_v54, %s5765_s27  ;;  %v11234_v54 = vld [vmem:[#allocation50_spill] sm:$0xff] }
 0x645   : > { %4558 = vrot.lane.b32.xlu1 %v11225_v1, %s5753_s28  ;;  %v11235_v1 = vld [vmem:[#allocation57_spill] sm:$0xff] }
 0x648   : > { %4548 = vrot.lane.b32.xlu0 %v11226_v6, %s5753_s28  ;;  %v11236_v6 = vld [vmem:[#allocation69_spill] sm:$0xff] }
 0x649   : > { %4562 = vrot.lane.b32.xlu1 %v11227_v0, %s5753_s28  ;;  %v11237_v0 = vld [vmem:[#allocation62_spill] sm:$0xff] }
 0x64c   : > { %4552 = vrot.lane.b32.xlu0 %v11228_v7, %s5753_s28  ;;  %v11238_v7 = vld [vmem:[#allocation109_spill] sm:$0xff] }
 0x64d   : > { %4566 = vrot.lane.b32.xlu1 %v11229_v44, %s5753_s28  ;;  %v11239_v44 = vld [vmem:[#allocation102_spill] sm:$0xff] }
 0x650   : > { %4556 = vrot.lane.b32.xlu0 %v11230_v27, %s5753_s28  ;;  %v11240_v27 = vld [vmem:[#allocation110_spill] sm:$0xff] }
 0x651   : > { %4570 = vrot.lane.b32.xlu1 %v11231_v18, %s5753_s28  ;;  %v11241_v18 = vld [vmem:[#allocation111_spill] sm:$0xff] }
 0x654   : > { %4560 = vrot.lane.b32.xlu0 %v11232_v49, %s5753_s28  ;;  %v11242_v49 = vld [vmem:[#allocation112_spill] sm:$0xff] }
 0x655   : > { %4574 = vrot.lane.b32.xlu1 %v11233_v47, %s5753_s28  ;;  %v11243_v47 = vld [vmem:[#allocation113_spill] sm:$0xff] }
 0x658   : > { %4564 = vrot.lane.b32.xlu0 %v11234_v54, %s5753_s28  ;;  %v11244_v54 = vld [vmem:[#allocation115_spill] sm:$0xff] }
 0x659   : > { %4578 = vrot.lane.b32.xlu1 %v11235_v1, %s5753_s28  ;;  %v11245_v1 = vld [vmem:[#allocation114_spill] sm:$0xff] }
 0x65c   : > { %4568 = vrot.lane.b32.xlu0 %v11236_v6, %s5753_s28 }
 0x65d   : > { %4582 = vrot.lane.b32.xlu1 %v11237_v0, %s5753_s28  ;;  %v11246_v0 = vld [vmem:[#allocation116_spill] sm:$0xff] }
 0x660   : > { %4572 = vrot.lane.b32.xlu0 %v11238_v7, %s5753_s28  ;;  %v11247_v7 = vld [vmem:[#allocation117_spill] sm:$0xff] }
 0x661   : > { %4586 = vrot.lane.b32.xlu1 %v11239_v44, %s5753_s28 }
 0x664   : > { %4576 = vrot.lane.b32.xlu0 %v11240_v27, %s5753_s28  ;;  %v11248_v27 = vld [vmem:[#allocation118_spill] sm:$0xff] }
 0x665   : > { %4590 = vrot.lane.b32.xlu1 %v11241_v18, %s5753_s28  ;;  %v11249_v18 = vld [vmem:[#allocation77_spill] sm:$0xff] }
 0x668   : > { %4580 = vrot.lane.b32.xlu0 %v11242_v49, %s5753_s28 }
 0x669   : > { %4594 = vrot.lane.b32.xlu1 %v11243_v47, %s5753_s28  ;;  %v11250_v47 = vld [vmem:[#allocation119_spill] sm:$0xff] }
 0x66c   : > { %4584 = vrot.lane.b32.xlu0 %v11244_v54, %s5753_s28 }
 0x66d   : > { %4598 = vrot.lane.b32.xlu1 %v11245_v1, %s5753_s28 }
 0x66f   : > { %v9709_v6 = vpop.permute.xlu1 %4422 }
 0x670   : > { %4588 = vrot.lane.b32.xlu0 %v11246_v0, %s5753_s28  ;;  %v11251_v0 = vld [vmem:[#allocation120_spill] sm:$0xff] }
 0x671   : > { %4602 = vrot.lane.b32.xlu1 %v11247_v7, %s5753_s28 }
 0x673   : > { %v9715_v44 = vpop.permute.xlu1 %4426 }
 0x674   : > { %4592 = vrot.lane.b32.xlu0 %v11248_v27, %s5753_s28  ;;  %v11252_v27 = vld [vmem:[#allocation105_spill] sm:$0xff] }
 0x675   : > { %4606 = vrot.lane.b32.xlu1 %v11249_v18, %s5753_s28 }
 0x677   : > { %v9721_v49 = vpop.permute.xlu1 %4430 }
 0x678   : > { %4596 = vrot.lane.b32.xlu0 %v11250_v47, %s5753_s28 }
 0x67a   : > { %v9725_v54 = vpop.permute.xlu0 %4420 }
 0x67b   : > { %v9727_v1 = vpop.permute.xlu1 %4434 }
 0x67c   : > { %4600 = vrot.lane.b32.xlu0 %v11251_v0, %s5753_s28 }
 0x67e   : > { %v9731_v7 = vpop.permute.xlu0 %4424 }
 0x67f   : > { %v9733_v8 = vpop.permute.xlu1 %4438 }
 0x680   : > { %4604 = vrot.lane.b32.xlu0 %v11252_v27, %s5753_s28 }
 0x682   : > { %v9737_v18 = vpop.permute.xlu0 %4428 }
 0x683   : > { %11253 = vst [vmem:[#allocation73_spill] sm:$0xff] %v9737_v18  ;;  %v9739_v14 = vpop.permute.xlu1 %4442  ;;  %v11283_v18 = vld [vmem:[#allocation93_spill] sm:$0xff] }
 0x684   : > { %11254 = vst [vmem:[#allocation22_spill] sm:$0xff] %v9739_v14 }
 0x686   : > { %v9741_v9 = vpop.permute.xlu0 %4432 }
 0x687   : > { %11255 = vst [vmem:[#allocation13_spill] sm:$0xff] %v9741_v9  ;;  %v9743_v47 = vpop.permute.xlu1 %4446 }
 0x688   : > { %11256 = vst [vmem:[#allocation27_spill] sm:$0xff] %v9743_v47 }
 0x68a   : > { %v9745_v15 = vpop.permute.xlu0 %4436 }
 0x68b   : > { %11257 = vst [vmem:[#allocation33_spill] sm:$0xff] %v9745_v15  ;;  %v9747_v12 = vpop.permute.xlu1 %4450 }
 0x68c   : > { %11258 = vst [vmem:[#allocation67_spill] sm:$0xff] %v9747_v12 }
 0x68e   : > { %v9749_v0 = vpop.permute.xlu0 %4440 }
 0x68f   : > { %11259 = vst [vmem:[#allocation35_spill] sm:$0xff] %v9749_v0  ;;  %v9751_v26 = vpop.permute.xlu1 %4454 }
 0x690   : > { %11260 = vst [vmem:[#allocation84_spill] sm:$0xff] %v9751_v26 }
 0x692   : > { %v9753_v50 = vpop.permute.xlu0 %4444 }
 0x693   : > { %11261 = vst [vmem:[#allocation40_spill] sm:$0xff] %v9753_v50  ;;  %v9755_v58 = vpop.permute.xlu1 %4458 }
 0x694   : > { %11262 = vst [vmem:[#allocation103_spill] sm:$0xff] %v9755_v58 }
 0x696   : > { %v9757_v27 = vpop.permute.xlu0 %4448 }
 0x697   : > { %11263 = vst [vmem:[#allocation45_spill] sm:$0xff] %v9757_v27  ;;  %v9759_v62 = vpop.permute.xlu1 %4462 }
 0x698   : > { %11264 = vst [vmem:[#allocation70_spill] sm:$0xff] %v9759_v62 }
 0x69a   : > { %v9761_v40 = vpop.permute.xlu0 %4452 }
 0x69b   : > { %11265 = vst [vmem:[#allocation50_spill] sm:$0xff] %v9761_v40  ;;  %v9763_v9 = vpop.permute.xlu1 %4466 }
 0x69c   : > { %11266 = vst [vmem:[#allocation57_spill] sm:$0xff] %v9763_v9 }
 0x69e   : > { %v9765_v47 = vpop.permute.xlu0 %4456 }
 0x69f   : > { %11267 = vst [vmem:[#allocation69_spill] sm:$0xff] %v9765_v47  ;;  %v9767_v15 = vpop.permute.xlu1 %4470 }
 0x6a0   : > { %11268 = vst [vmem:[#allocation62_spill] sm:$0xff] %v9767_v15 }
 0x6a2   : > { %v9769_v12 = vpop.permute.xlu0 %4460 }
 0x6a3   : > { %11269 = vst [vmem:[#allocation109_spill] sm:$0xff] %v9769_v12  ;;  %v9771_v0 = vpop.permute.xlu1 %4474 }
 0x6a4   : > { %11270 = vst [vmem:[#allocation102_spill] sm:$0xff] %v9771_v0 }
 0x6a6   : > { %v9773_v26 = vpop.permute.xlu0 %4464 }
 0x6a7   : > { %11271 = vst [vmem:[#allocation110_spill] sm:$0xff] %v9773_v26  ;;  %v9775_v50 = vpop.permute.xlu1 %4478 }
 0x6a8   : > { %11272 = vst [vmem:[#allocation111_spill] sm:$0xff] %v9775_v50 }
 0x6aa   : > { %v9777_v58 = vpop.permute.xlu0 %4468 }
 0x6ab   : > { %11273 = vst [vmem:[#allocation112_spill] sm:$0xff] %v9777_v58  ;;  %v9779_v27 = vpop.permute.xlu1 %4482 }
 0x6ac   : > { %11274 = vst [vmem:[#allocation113_spill] sm:$0xff] %v9779_v27 }
 0x6ae   : > { %v9781_v62 = vpop.permute.xlu0 %4472 }
 0x6af   : > { %11275 = vst [vmem:[#allocation115_spill] sm:$0xff] %v9781_v62  ;;  %v4551_v40 = vpop.permute.xlu1 %4550 }
 0x6b0   : > { %v4639_v9 = vmul.f32 %v4551_v40, %v8334_v37 }
 0x6b2   : > { %4704 = vrot.lane.b32.xlu1 %v4639_v9, %s5753_s28  ;;  %v9785_v15 = vpop.permute.xlu0 %4476 }
 0x6b3   : > { %11276 = vst [vmem:[#allocation114_spill] sm:$0xff] %v9785_v15  ;;  %v4555_v12 = vpop.permute.xlu1 %4554 }
 0x6b4   : > { %v4641_v0 = vmul.f32 %v4555_v12, %v11051_v38 }
 0x6b6   : > { %4708 = vrot.lane.b32.xlu1 %v4641_v0, %s5753_s28  ;;  %v9789_v26 = vpop.permute.xlu0 %4480 }
 0x6b7   : > { %11277 = vst [vmem:[#allocation116_spill] sm:$0xff] %v9789_v26  ;;  %v4559_v50 = vpop.permute.xlu1 %4558 }
 0x6b8   : > { %v4643_v58 = vmul.f32 %v4559_v50, %v8374_v34 }
 0x6ba   : > { %4712 = vrot.lane.b32.xlu1 %v4643_v58, %s5753_s28  ;;  %v4549_v62 = vpop.permute.xlu0 %4548 }
 0x6bb   : > { %v4563_v27 = vpop.permute.xlu1 %4562  ;;  %v4638_v40 = vmul.f32 %v4549_v62, %v8348_v42 }
 0x6bc   : > { %v4645_v9 = vmul.f32 %v4563_v27, %v11054_v60 }
 0x6bd   : > { %4702 = vrot.lane.b32.xlu0 %v4638_v40, %s5753_s28 }
 0x6be   : > { %4716 = vrot.lane.b32.xlu1 %v4645_v9, %s5753_s28  ;;  %v4553_v12 = vpop.permute.xlu0 %4552 }
 0x6bf   : > { %v4567_v15 = vpop.permute.xlu1 %4566  ;;  %v4640_v0 = vmul.f32 %v4553_v12, %v11055_v20 }
 0x6c0   : > { %v4647_v26 = vmul.f32 %v4567_v15, %v8429_v16 }
 0x6c1   : > { %4706 = vrot.lane.b32.xlu0 %v4640_v0, %s5753_s28 }
 0x6c2   : > { %4720 = vrot.lane.b32.xlu1 %v4647_v26, %s5753_s28  ;;  %v4557_v58 = vpop.permute.xlu0 %4556 }
 0x6c3   : > { %v4571_v50 = vpop.permute.xlu1 %4570  ;;  %v4642_v62 = vmul.f32 %v4557_v58, %v8399_v55 }
 0x6c4   : > { %v4649_v27 = vmul.f32 %v4571_v50, %v8403_v53 }
 0x6c5   : > { %4710 = vrot.lane.b32.xlu0 %v4642_v62, %s5753_s28 }
 0x6c6   : > { %4724 = vrot.lane.b32.xlu1 %v4649_v27, %s5753_s28  ;;  %v4561_v40 = vpop.permute.xlu0 %4560 }
 0x6c7   : > { %v4575_v9 = vpop.permute.xlu1 %4574  ;;  %v4644_v12 = vmul.f32 %v4561_v40, %v11056_v41 }
 0x6c8   : > { %v4651_v15 = vmul.f32 %v4575_v9, %v11057_v56 }
 0x6c9   : > { %4714 = vrot.lane.b32.xlu0 %v4644_v12, %s5753_s28 }
 0x6ca   : > { %4728 = vrot.lane.b32.xlu1 %v4651_v15, %s5753_s28  ;;  %v4565_v26 = vpop.permute.xlu0 %4564 }
 0x6cb   : > { %v4579_v0 = vpop.permute.xlu1 %4578  ;;  %v4646_v58 = vmul.f32 %v4565_v26, %v11058_v10 }
 0x6cc   : > { %v4653_v50 = vmul.f32 %v4579_v0, %v11059_v57 }
 0x6cd   : > { %4718 = vrot.lane.b32.xlu0 %v4646_v58, %s5753_s28 }
 0x6ce   : > { %4732 = vrot.lane.b32.xlu1 %v4653_v50, %s5753_s28  ;;  %v4569_v62 = vpop.permute.xlu0 %4568 }
 0x6cf   : > { %v4583_v27 = vpop.permute.xlu1 %4582  ;;  %v4648_v40 = vmul.f32 %v4569_v62, %v11060_v63 }
 0x6d0   : > { %v4655_v9 = vmul.f32 %v4583_v27, %v8557_v13 }
 0x6d1   : > { %4722 = vrot.lane.b32.xlu0 %v4648_v40, %s5753_s28 }
 0x6d2   : > { %4736 = vrot.lane.b32.xlu1 %v4655_v9, %s5753_s28  ;;  %v4573_v12 = vpop.permute.xlu0 %4572 }
 0x6d3   : > { %v4587_v15 = vpop.permute.xlu1 %4586  ;;  %v4650_v26 = vmul.f32 %v4573_v12, %v11061_v30 }
 0x6d4   : > { %v4657_v0 = vmul.f32 %v4587_v15, %v8523_v28 }
 0x6d5   : > { %4726 = vrot.lane.b32.xlu0 %v4650_v26, %s5753_s28 }
 0x6d6   : > { %4740 = vrot.lane.b32.xlu1 %v4657_v0, %s5753_s28  ;;  %v4577_v58 = vpop.permute.xlu0 %4576 }
 0x6d7   : > { %v4591_v50 = vpop.permute.xlu1 %4590  ;;  %v4652_v62 = vmul.f32 %v4577_v58, %v11062_v52 }
 0x6d8   : > { %v4659_v27 = vmul.f32 %v4591_v50, %v8622_v46 }
 0x6d9   : > { %4730 = vrot.lane.b32.xlu0 %v4652_v62, %s5753_s28 }
 0x6da   : > { %4744 = vrot.lane.b32.xlu1 %v4659_v27, %s5753_s28  ;;  %v4581_v40 = vpop.permute.xlu0 %4580 }
 0x6db   : > { %v4595_v9 = vpop.permute.xlu1 %4594  ;;  %v4654_v12 = vmul.f32 %v4581_v40, %v8585_v17 }
 0x6dc   : > { %v4661_v15 = vmul.f32 %v4595_v9, %v8590_v4 }
 0x6dd   : > { %4734 = vrot.lane.b32.xlu0 %v4654_v12, %s5753_s28 }
 0x6de   : > { %4748 = vrot.lane.b32.xlu1 %v4661_v15, %s5753_s28  ;;  %v4585_v26 = vpop.permute.xlu0 %4584 }
 0x6df   : > { %v4599_v0 = vpop.permute.xlu1 %4598  ;;  %v4656_v58 = vmul.f32 %v4585_v26, %v8554_v51 }
 0x6e0   : > { %v4663_v50 = vmul.f32 %v4599_v0, %v8697_v24 }
 0x6e1   : > { %4738 = vrot.lane.b32.xlu0 %v4656_v58, %s5753_s28 }
 0x6e2   : > { %4752 = vrot.lane.b32.xlu1 %v4663_v50, %s5753_s28  ;;  %v4589_v62 = vpop.permute.xlu0 %4588 }
 0x6e3   : > { %v4603_v27 = vpop.permute.xlu1 %4602  ;;  %v4658_v40 = vmul.f32 %v4589_v62, %v8652_v48  ;;  %v11278_v62 = vld [vmem:[#allocation75_spill] sm:$0xff] }
 0x6e4   : > { %v4665_v9 = vmul.f32 %v4603_v27, %v8659_v31  ;;  %v4669_v27 = vmul.f32 %v8733_v25, %v11278_v62 }
 0x6e5   : > { %4742 = vrot.lane.b32.xlu0 %v4658_v40, %s5753_s28 }
 0x6e6   : > { %4756 = vrot.lane.b32.xlu1 %v4665_v9, %s5753_s28  ;;  %v4593_v12 = vpop.permute.xlu0 %4592 }
 0x6e7   : > { %v4607_v15 = vpop.permute.xlu1 %4606  ;;  %v4660_v26 = vmul.f32 %v4593_v12, %v8617_v2 }
 0x6e8   : > { %v4667_v0 = vmul.f32 %v4607_v15, %v8769_v5 }
 0x6e9   : > { %4746 = vrot.lane.b32.xlu0 %v4660_v26, %s5753_s28  ;;  %v4668_v26 = vmul.f32 %v8762_v11, %v11278_v62  ;;  %v2492_v62 = vmul.f32 0.0, %v8348_v42  ;;  %v11290_v42 = vld [vmem:[#allocation34_spill] sm:$0xff] }
 0x6ea   : > { %4760 = vrot.lane.b32.xlu1 %v4667_v0, %s5753_s28  ;;  %v4597_v58 = vpop.permute.xlu0 %4596  ;;  %v2493_v0 = vmul.f32 0.0, %v8334_v37  ;;  %v2496_v37 = vmul.f32 %v8399_v55, %v11130_v45  ;;  %v11292_v55 = vld [vmem:[#allocation29_spill] sm:$0xff] }
 0x6eb   : > { %v4662_v50 = vmul.f32 %v4597_v58, %v8726_v22  ;;  %v11279_v58 = vld [vmem:[#allocation87_spill] sm:$0xff]  ;;  %v9883_v45 = vmul.f32 %v11058_v10, %v11292_v55  ;;  %v11299_v10 = vld [vmem:[#allocation61_spill] sm:$0xff] }
 0x6ed   : > { %4750 = vrot.lane.b32.xlu0 %v4662_v50, %s5753_s28  ;;  %v2807_v50 = vadd.f32 %v11279_v58, %v2493_v0  ;;  %v11285_v0 = vld [vmem:[#allocation78_spill] sm:$0xff] }
 0x6ee   : > { %4764 = vrot.lane.b32.xlu1 %v4669_v27, %s5753_s28  ;;  %v4601_v40 = vpop.permute.xlu0 %4600  ;;  %v11280_v27 = vld [vmem:[#allocation9_spill] sm:$0xff] }
 0x6ef   : > { %v4664_v9 = vmul.f32 %v4601_v40, %v8690_v3  ;;  %v2495_v47 = vmul.f32 %v11051_v38, %v11280_v27  ;;  %v11281_v40 = vld [vmem:[#allocation96_spill] sm:$0xff] }
 0x6f0   : > { %v3089_v43 = vadd.f32 %v11281_v40, %v2807_v50  ;;  %v11286_v38 = vld [vmem:[#allocation32_spill] sm:$0xff]  ;;  %v11289_v40 = vld [vmem:[#allocation39_spill] sm:$0xff] }
 0x6f1   : > { %4754 = vrot.lane.b32.xlu0 %v4664_v9, %s5753_s28  ;;  %v11282_v9 = vld [vmem:[#allocation79_spill] sm:$0xff]  ;;  %v2499_v50 = vmul.f32 %v11054_v60, %v11286_v38  ;;  %v11287_v27 = vld [vmem:[#allocation24_spill] sm:$0xff] }
 0x6f2   : > { %v4605_v12 = vpop.permute.xlu0 %4604  ;;  %v2809_v14 = vadd.f32 %v11282_v9, %v2495_v47  ;;  %v2497_v47 = vmul.f32 %v8374_v34, %v11287_v27  ;;  %v11293_v60 = vld [vmem:[#allocation91_spill] sm:$0xff]  ;;  %v11297_v27 = vld [vmem:[#allocation49_spill] sm:$0xff] }
 0x6f3   : > { %v4666_v15 = vmul.f32 %v4605_v12, %v8799_v61  ;;  %v3377_v12 = vadd.f32 %v11283_v18, %v3089_v43  ;;  %v11284_v61 = vld [vmem:[#allocation6_spill] sm:$0xff]  ;;  %v11288_v43 = vld [vmem:[#allocation25_spill] sm:$0xff]  ;;  %v11294_v9 = vld [vmem:[#allocation123_spill] sm:$0xff] }
 0x6f4   : > { %v3091_v58 = vadd.f32 %v11285_v0, %v2809_v14  ;;  %v2811_v34 = vadd.f32 %v11294_v9, %v2497_v47  ;;  %v11295_v0 = vld [vmem:[#allocation46_spill] sm:$0xff]  ;;  %v11300_v47 = vld [vmem:[#allocation44_spill] sm:$0xff] }
 0x6f5   : > { %4758 = vrot.lane.b32.xlu0 %v4666_v15, %s5753_s28  ;;  %v2494_v15 = vmul.f32 %v11055_v20, %v11284_v61  ;;  %v3665_v18 = vadd.f32 %v11288_v43, %v3377_v12  ;;  %v2503_v20 = vmul.f32 %v8403_v53, %v11289_v40  ;;  %v2501_v61 = vmul.f32 %v8429_v16, %v11290_v42  ;;  %v11296_v53 = vld [vmem:[#allocation16_spill] sm:$0xff] }
 0x6f6   : > { %v3379_v14 = vadd.f32 %v11293_v60, %v3091_v58  ;;  %v9889_v12 = vmul.f32 %v11062_v52, %v11295_v0  ;;  %v9894_v16 = vmul.f32 %v11059_v57, %v11297_v27  ;;  %v9902_v58 = vmul.f32 %v8523_v28, %v11299_v10  ;;  %v11301_v52 = vld [vmem:[#allocation125_spill] sm:$0xff]  ;;  %v11303_v57 = vld [vmem:[#allocation106_spill] sm:$0xff]  ;;  %v11305_v0 = vld [vmem:[#allocation92_spill] sm:$0xff] }
 0x6f7   : > { %v3953_v38 = vadd.f32 %v11296_v53, %v3665_v18  ;;  %v9906_v40 = vmul.f32 %v11061_v30, %v11300_v47  ;;  %v3093_v42 = vadd.f32 %v11301_v52, %v2811_v34  ;;  %v11302_v18 = vld [vmem:[#allocation56_spill] sm:$0xff]  ;;  %v2806_v53 = vadd.f32 %v11305_v0, %v2492_v62  ;;  %v11306_v28 = vld [vmem:[#allocation58_spill] sm:$0xff]  ;;  %v11307_v30 = vld [vmem:[#allocation55_spill] sm:$0xff] }
 0x6f8   : > { %v3667_v55 = vadd.f32 %v11303_v57, %v3379_v14  ;;  %v9919_v27 = vmul.f32 %v8554_v51, %v11306_v28  ;;  %v11308_v34 = vld [vmem:[#allocation101_spill] sm:$0xff]  ;;  %v11311_v51 = vld [vmem:[#allocation86_spill] sm:$0xff]  ;;  %v11312_v62 = vld [vmem:[#allocation100_spill] sm:$0xff] }
 0x6f9   : > { %4762 = vrot.lane.b32.xlu0 %v4668_v26, %s5753_s28  ;;  %v2498_v26 = vmul.f32 %v11056_v41, %v11132_v35  ;;  %v11291_v41 = vld [vmem:[#allocation36_spill] sm:$0xff]  ;;  %v4235_v60 = vadd.f32 %v9519_v19, %v3953_v38  ;;  %v2813_v10 = vadd.f32 %v11308_v34, %v2499_v50  ;;  %v11310_v52 = vld [vmem:[#allocation17_spill] sm:$0xff]  ;;  %v3088_v38 = vadd.f32 %v11312_v62, %v2806_v53  ;;  %v11315_v57 = vld [vmem:[#allocation99_spill] sm:$0xff] }
 0x6fa   : > { %v9879_v35 = vmul.f32 %v11060_v63, %v11291_v41  ;;  %v11298_v63 = vld [vmem:[#allocation43_spill] sm:$0xff]  ;;  %v9911_v41 = vmul.f32 %v8557_v13, %v11302_v18  ;;  %v3955_v14 = vadd.f32 %v11310_v52, %v3667_v55  ;;  %v11318_v53 = vld [vmem:[#allocation98_spill] sm:$0xff] }
 0x6fb   : > { %v9898_v43 = vmul.f32 %v11057_v56, %v11298_v63  ;;  %v11304_v56 = vld [vmem:[#allocation90_spill] sm:$0xff]  ;;  %v9923_v63 = vmul.f32 %v8585_v17, %v11307_v30  ;;  %v11309_v13 = vld [vmem:[#allocation127_spill] sm:$0xff]  ;;  %v4517_v19 = vadd.f32 %v9709_v6, %v4235_v60  ;;  %v3095_v55 = vadd.f32 %v11315_v57, %v2813_v10 }
 0x6fc   : > { %v2808_v9 = vadd.f32 %v11304_v56, %v2494_v15  ;;  %v3381_v47 = vadd.f32 %v11309_v13, %v3093_v42  ;;  %v11313_v17 = vld [vmem:[#allocation14_spill] sm:$0xff]  ;;  %v11316_v60 = vld [vmem:[#allocation83_spill] sm:$0xff]  ;;  %v4237_v0 = vadd.f32 %v9525_v33, %v3955_v14  ;;  %v3376_v34 = vadd.f32 %v11318_v53, %v3088_v38  ;;  %v11324_v14 = vld [vmem:[#allocation20_spill] sm:$0xff] }
 0x6fd   : > { %v9940_v50 = vmul.f32 %v8590_v4, %v11313_v17  ;;  %v11314_v42 = vld [vmem:[#allocation10_spill] sm:$0xff]  ;;  %v11319_v13 = vld [vmem:[#allocation95_spill] sm:$0xff]  ;;  %v11331_v53 = vld [vmem:[#allocation128_spill] sm:$0xff] }
 0x6fe   : > { %v3090_v15 = vadd.f32 %v11311_v51, %v2808_v9  ;;  %v9944_v18 = vmul.f32 %v8622_v46, %v11314_v42  ;;  %v3669_v56 = vadd.f32 %v11316_v60, %v3381_v47  ;;  %v11317_v9 = vld [vmem:[#allocation94_spill] sm:$0xff]  ;;  %v9953_v4 = vmul.f32 %v8617_v2, %v11319_v13  ;;  %v11321_v51 = vld [vmem:[#allocation121_spill] sm:$0xff]  ;;  %v11322_v10 = vld [vmem:[#allocation135_spill] sm:$0xff] }
 0x6ff   : > { %v11320_v52 = vld [vmem:[#allocation66_spill] sm:$0xff]  ;;  %v3383_v62 = vadd.f32 %v11321_v51, %v3095_v55  ;;  %v2815_v17 = vadd.f32 %v11322_v10, %v2501_v61  ;;  %v11323_v47 = vld [vmem:[#allocation205_spill] sm:$0xff]  ;;  %v4519_v33 = vadd.f32 %v9715_v44, %v4237_v0  ;;  %v11327_v61 = vld [vmem:[#allocation76_spill] sm:$0xff] }
 0x700   : > { %v3378_v30 = vadd.f32 %v11317_v9, %v3090_v15  ;;  %v9957_v46 = vmul.f32 %v8652_v48, %v11320_v52  ;;  %v3957_v42 = vadd.f32 %v11323_v47, %v3669_v56  ;;  %v11325_v2 = vld [vmem:[#allocation18_spill] sm:$0xff]  ;;  %v11326_v48 = vld [vmem:[#allocation8_spill] sm:$0xff]  ;;  %v11328_v55 = vld [vmem:[#allocation137_spill] sm:$0xff] }
 0x701   : > { %v9971_v15 = vmul.f32 %v8697_v24, %v11325_v2  ;;  %v9975_v38 = vmul.f32 %v8690_v3, %v11326_v48  ;;  %v3097_v44 = vadd.f32 %v11328_v55, %v2815_v17  ;;  %v11329_v60 = vld [vmem:[#allocation104_spill] sm:$0xff]  ;;  %v2810_v24 = vadd.f32 %v11331_v53, %v2496_v37  ;;  %v11332_v13 = vld [vmem:[#allocation3_spill] sm:$0xff]  ;;  %v11333_v3 = vld [vmem:[#allocation206_spill] sm:$0xff] }
 0x702   : > { %v3671_v56 = vadd.f32 %v11329_v60, %v3383_v62  ;;  %v4239_v0 = vadd.f32 %v9531_v39, %v3957_v42  ;;  %v9985_v52 = vmul.f32 %v8726_v22, %v11332_v13  ;;  %v11334_v10 = vld [vmem:[#allocation129_spill] sm:$0xff]  ;;  %v11335_v47 = vld [vmem:[#allocation139_spill] sm:$0xff]  ;;  %v11337_v39 = vld [vmem:[#allocation130_spill] sm:$0xff] }
 0x703   : > { %v11336_v17 = vld [vmem:[#allocation207_spill] sm:$0xff]  ;;  %v11338_v42 = vld [vmem:[#allocation28_spill] sm:$0xff]  ;;  %v11339_v22 = vld [vmem:[#allocation26_spill] sm:$0xff] }
 0x704   : > { %v3959_v2 = vadd.f32 %v11336_v17, %v3671_v56  ;;  %v4521_v62 = vadd.f32 %v9721_v49, %v4239_v0  ;;  %v9997_v37 = vmul.f32 %v8733_v25, %v11338_v42  ;;  %v11342_v60 = vld [vmem:[#allocation132_spill] sm:$0xff]  ;;  %v11343_v0 = vld [vmem:[#allocation23_spill] sm:$0xff]  ;;  %v11345_v53 = vld [vmem:[#allocation133_spill] sm:$0xff] }
 0x705   : > { %v11344_v25 = vld [vmem:[#allocation208_spill] sm:$0xff] }
 0x706   : > { %v4241_v49 = vadd.f32 %v9537_v59, %v3959_v2 }
 0x708   : > { %v4523_v59 = vadd.f32 %v9727_v1, %v4241_v49 }
 0x724   : > { %v4705_v6 = vpop.permute.xlu1 %4704 }
 0x725   : > { %v4799_v28 = vadd.f32 %v4705_v6, %v4517_v19  ;;  %v9967_v19 = vmul.f32 %v8659_v31, %v11324_v14  ;;  %v3664_v6 = vadd.f32 %v11327_v61, %v3376_v34  ;;  %v2817_v34 = vadd.f32 %v11334_v10, %v2503_v20  ;;  %v11340_v61 = vld [vmem:[#allocation131_spill] sm:$0xff] }
 0x726   : > { %v3385_v14 = vadd.f32 %v11335_v47, %v3097_v44  ;;  %v11349_v47 = vld [vmem:[#allocation7_spill] sm:$0xff] }
 0x727   : > { %4831 = vst.msk [vmem:[%s9934_s10 + $0x8] sm:$0xff] %vm282_vm1, %v4799_v28  ;;  %v11330_v28 = vld [vmem:[#allocation122_spill] sm:$0xff]  ;;  %v3952_v51 = vadd.f32 %v11333_v3, %v3664_v6  ;;  %v3099_v6 = vadd.f32 %v11340_v61, %v2817_v34  ;;  %v11347_v3 = vld [vmem:[#allocation209_spill] sm:$0xff]  ;;  %v11348_v34 = vld [vmem:[#allocation124_spill] sm:$0xff] }
 0x728   : > { %v4709_v57 = vpop.permute.xlu1 %4708  ;;  %v2812_v9 = vadd.f32 %v11330_v28, %v2498_v26  ;;  %v3092_v26 = vadd.f32 %v11337_v39, %v2810_v24  ;;  %v11346_v24 = vld [vmem:[#allocation145_spill] sm:$0xff] }
 0x729   : > { %v4801_v31 = vadd.f32 %v4709_v57, %v4519_v33  ;;  %v3666_v33 = vadd.f32 %v11339_v22, %v3378_v30  ;;  %v4234_v48 = vadd.f32 %v9535_v36, %v3952_v51  ;;  %v11341_v57 = vld [vmem:[#allocation82_spill] sm:$0xff]  ;;  %v3387_v36 = vadd.f32 %v11345_v53, %v3099_v6 }
 0x72a   : > { %v3673_v55 = vadd.f32 %v11341_v57, %v3385_v14  ;;  %v3380_v56 = vadd.f32 %v11342_v60, %v3092_v26  ;;  %v2819_v13 = vadd.f32 %v11346_v24, %v9898_v43  ;;  %v11351_v43 = vld [vmem:[#allocation21_spill] sm:$0xff]  ;;  %v11352_v22 = vld [vmem:[#allocation126_spill] sm:$0xff]  ;;  %v11361_v24 = vld [vmem:[#allocation183_spill] sm:$0xff] }
 0x72b   : > { %4833 = vst.msk [vmem:[%s9934_s10 + $0x18] sm:$0xff] %vm282_vm1, %v4801_v31  ;;  %v10007_v31 = vmul.f32 %v8769_v5, %v11343_v0  ;;  %v3954_v28 = vadd.f32 %v11344_v25, %v3666_v33  ;;  %v4516_v30 = vadd.f32 %v9725_v54, %v4234_v48  ;;  %v3094_v5 = vadd.f32 %v11348_v34, %v2812_v9  ;;  %v11353_v48 = vld [vmem:[#allocation141_spill] sm:$0xff]  ;;  %v11354_v9 = vld [vmem:[#allocation210_spill] sm:$0xff] }
 0x72c   : > { %v4713_v20 = vpop.permute.xlu1 %4712  ;;  %v3961_v51 = vadd.f32 %v11347_v3, %v3673_v55  ;;  %v3668_v14 = vadd.f32 %v11349_v47, %v3380_v56  ;;  %v3675_v26 = vadd.f32 %v11351_v43, %v3387_v36  ;;  %v11356_v55 = vld [vmem:[#allocation47_spill] sm:$0xff]  ;;  %v11359_v25 = vld [vmem:[#allocation182_spill] sm:$0xff] }
 0x72d   : > { %v4803_v44 = vadd.f32 %v4713_v20, %v4521_v62  ;;  %v4236_v17 = vadd.f32 %v9541_v23, %v3954_v28  ;;  %v11350_v62 = vld [vmem:[#allocation146_spill] sm:$0xff]  ;;  %v3382_v33 = vadd.f32 %v11352_v22, %v3094_v5  ;;  %v2814_v20 = vadd.f32 %v11353_v48, %v9883_v45  ;;  %v11358_v45 = vld [vmem:[#allocation143_spill] sm:$0xff]  ;;  %v11364_v5 = vld [vmem:[#allocation212_spill] sm:$0xff] }
 0x72e   : > { %v3101_v39 = vadd.f32 %v11350_v62, %v2819_v13  ;;  %v4243_v42 = vadd.f32 %v9543_v32, %v3961_v51  ;;  %v3956_v61 = vadd.f32 %v11354_v9, %v3668_v14  ;;  %v11355_v23 = vld [vmem:[#allocation142_spill] sm:$0xff]  ;;  %v11365_v14 = vld [vmem:[#allocation73_spill] sm:$0xff]  ;;  %v11371_v22 = vld [vmem:[#allocation184_spill] sm:$0xff] }
 0x72f   : > { %4835 = vst.msk [vmem:[%s9934_s10 + $0x28] sm:$0xff] %vm282_vm1, %v4803_v44  ;;  %v4703_v10 = vpop.permute.xlu0 %4702  ;;  %v4518_v6 = vadd.f32 %v9731_v7, %v4236_v17  ;;  %v2821_v57 = vadd.f32 %v11355_v23, %v9894_v16  ;;  %v11357_v44 = vld [vmem:[#allocation211_spill] sm:$0xff]  ;;  %v3096_v0 = vadd.f32 %v11358_v45, %v2814_v20  ;;  %v3670_v28 = vadd.f32 %v11359_v25, %v3382_v33  ;;  %v11360_v16 = vld [vmem:[#allocation144_spill] sm:$0xff]  ;;  %v11362_v51 = vld [vmem:[#allocation134_spill] sm:$0xff] }
 0x730   : > { %v4717_v54 = vpop.permute.xlu1 %4716  ;;  %v4798_v2 = vadd.f32 %v4703_v10, %v4516_v30  ;;  %v3389_v49 = vadd.f32 %v11356_v55, %v3101_v39  ;;  %v3963_v60 = vadd.f32 %v11357_v44, %v3675_v26  ;;  %v4525_v32 = vadd.f32 %v9733_v8, %v4243_v42  ;;  %v11363_v10 = vld [vmem:[#allocation30_spill] sm:$0xff]  ;;  %v11368_v39 = vld [vmem:[#allocation213_spill] sm:$0xff]  ;;  %v11370_v42 = vld [vmem:[#allocation136_spill] sm:$0xff] }
 0x731   : > { %v4805_v1 = vadd.f32 %v4717_v54, %v4523_v59  ;;  %v4238_v7 = vadd.f32 %v9547_v29, %v3956_v61  ;;  %v3103_v36 = vadd.f32 %v11360_v16, %v2821_v57  ;;  %v2816_v59 = vadd.f32 %v11362_v51, %v9879_v35  ;;  %v11366_v29 = vld [vmem:[#allocation80_spill] sm:$0xff]  ;;  %v11372_v48 = vld [vmem:[#allocation71_spill] sm:$0xff]  ;;  %v11375_v55 = vld [vmem:[#allocation5_spill] sm:$0xff] }
 0x732   : > { %4830 = vst.msk [vmem:[%s9934_s10] sm:$0xff] %vm282_vm1, %v4798_v2  ;;  %v3677_v13 = vadd.f32 %v11361_v24, %v3389_v49  ;;  %v4245_v3 = vadd.f32 %v9549_v21, %v3963_v60  ;;  %v3384_v34 = vadd.f32 %v11363_v10, %v3096_v0  ;;  %v3958_v47 = vadd.f32 %v11364_v5, %v3670_v28  ;;  %v11367_v2 = vld [vmem:[#allocation63_spill] sm:$0xff]  ;;  %v11369_v21 = vld [vmem:[#allocation22_spill] sm:$0xff]  ;;  %v11379_v28 = vld [vmem:[#allocation13_spill] sm:$0xff] }
 0x733   : > { %4837 = vst.msk [vmem:[%s9934_s10 + $0x38] sm:$0xff] %vm282_vm1, %v4805_v1  ;;  %v4707_v56 = vpop.permute.xlu0 %4706  ;;  %v4520_v17 = vadd.f32 %v11365_v14, %v4238_v7  ;;  %v3391_v54 = vadd.f32 %v11366_v29, %v3103_v36  ;;  %v2823_v62 = vadd.f32 %v11367_v2, %v9911_v41  ;;  %v3098_v1 = vadd.f32 %v11370_v42, %v2816_v59  ;;  %v11374_v41 = vld [vmem:[#allocation185_spill] sm:$0xff]  ;;  %v11376_v60 = vld [vmem:[#allocation138_spill] sm:$0xff]  ;;  %v11382_v24 = vld [vmem:[#allocation215_spill] sm:$0xff] }
 0x734   : > { %v4721_v30 = vpop.permute.xlu1 %4720  ;;  %v4800_v53 = vadd.f32 %v4707_v56, %v4518_v6  ;;  %v3965_v43 = vadd.f32 %v11368_v39, %v3677_v13  ;;  %v4527_v26 = vadd.f32 %v11369_v21, %v4245_v3  ;;  %v3672_v33 = vadd.f32 %v11371_v22, %v3384_v34  ;;  %v11373_v6 = vld [vmem:[#allocation74_spill] sm:$0xff]  ;;  %v11381_v16 = vld [vmem:[#allocation85_spill] sm:$0xff]  ;;  %v11383_v3 = vld [vmem:[#allocation27_spill] sm:$0xff] }
 0x735   : > { %v4807_v8 = vadd.f32 %v4721_v30, %v4525_v32  ;;  %v4240_v20 = vadd.f32 %v11372_v48, %v3958_v47  ;;  %v3105_v23 = vadd.f32 %v11373_v6, %v2823_v62  ;;  %v3679_v57 = vadd.f32 %v11374_v41, %v3391_v54  ;;  %v11377_v56 = vld [vmem:[#allocation38_spill] sm:$0xff]  ;;  %v11380_v30 = vld [vmem:[#allocation51_spill] sm:$0xff]  ;;  %v11386_v5 = vld [vmem:[#allocation65_spill] sm:$0xff] }
 0x736   : > { %4832 = vst.msk [vmem:[%s9934_s10 + $0x10] sm:$0xff] %vm282_vm1, %v4800_v53  ;;  %v4247_v49 = vadd.f32 %v11375_v55, %v3965_v43  ;;  %v3386_v32 = vadd.f32 %v11376_v60, %v3098_v1  ;;  %v2818_v45 = vadd.f32 %v11377_v56, %v9906_v40  ;;  %v11378_v0 = vld [vmem:[#allocation214_spill] sm:$0xff]  ;;  %v2825_v53 = vadd.f32 %v11380_v30, %v9902_v58  ;;  %v11387_v58 = vld [vmem:[#allocation53_spill] sm:$0xff]  ;;  %v11388_v54 = vld [vmem:[#allocation187_spill] sm:$0xff] }
 0x737   : > { %4839 = vst.msk [vmem:[%s9934_s10 + $0x48] sm:$0xff] %vm282_vm1, %v4807_v8  ;;  %v4711_v35 = vpop.permute.xlu0 %4710  ;;  %v3960_v25 = vadd.f32 %v11378_v0, %v3672_v33  ;;  %v4522_v7 = vadd.f32 %v11379_v28, %v4240_v20  ;;  %v3393_v36 = vadd.f32 %v11381_v16, %v3105_v23  ;;  %v3967_v13 = vadd.f32 %v11382_v24, %v3679_v57  ;;  %v11384_v40 = vld [vmem:[#allocation42_spill] sm:$0xff]  ;;  %v11389_v62 = vld [vmem:[#allocation72_spill] sm:$0xff]  ;;  %v11390_v21 = vld [vmem:[#allocation37_spill] sm:$0xff] }
 0x738   : > { %v4725_v9 = vpop.permute.xlu1 %4724  ;;  %v4802_v61 = vadd.f32 %v4711_v35, %v4520_v17  ;;  %v4529_v8 = vadd.f32 %v11383_v3, %v4247_v49  ;;  %v3100_v59 = vadd.f32 %v11384_v40, %v2818_v45  ;;  %v11385_v10 = vld [vmem:[#allocation186_spill] sm:$0xff]  ;;  %v3107_v29 = vadd.f32 %v11387_v58, %v2825_v53  ;;  %v11391_v35 = vld [vmem:[#allocation48_spill] sm:$0xff]  ;;  %v11393_v33 = vld [vmem:[#allocation33_spill] sm:$0xff] }
 0x739   : > { %v4809_v44 = vadd.f32 %v4725_v9, %v4527_v26  ;;  %v3674_v34 = vadd.f32 %v11385_v10, %v3386_v32  ;;  %v4242_v47 = vadd.f32 %v11386_v5, %v3960_v25  ;;  %v3681_v2 = vadd.f32 %v11388_v54, %v3393_v36  ;;  %v11392_v1 = vld [vmem:[#allocation216_spill] sm:$0xff]  ;;  %v11394_v20 = vld [vmem:[#allocation59_spill] sm:$0xff]  ;;  %v11396_v23 = vld [vmem:[#allocation217_spill] sm:$0xff] }
 0x73a   : > { %4834 = vst.msk [vmem:[%s9934_s10 + $0x20] sm:$0xff] %vm282_vm1, %v4802_v61  ;;  %v4249_v39 = vadd.f32 %v11389_v62, %v3967_v13  ;;  %v2820_v26 = vadd.f32 %v11390_v21, %v9889_v12  ;;  %v3388_v42 = vadd.f32 %v11391_v35, %v3100_v59  ;;  %v3395_v9 = vadd.f32 %v11394_v20, %v3107_v29  ;;  %v11395_v61 = vld [vmem:[#allocation151_spill] sm:$0xff]  ;;  %v11398_v49 = vld [vmem:[#allocation41_spill] sm:$0xff]  ;;  %v11399_v60 = vld [vmem:[#allocation188_spill] sm:$0xff] }
 0x73b   : > { %4841 = vst.msk [vmem:[%s9934_s10 + $0x58] sm:$0xff] %vm282_vm1, %v4809_v44  ;;  %v4715_v51 = vpop.permute.xlu0 %4714  ;;  %v3962_v22 = vadd.f32 %v11392_v1, %v3674_v34  ;;  %v4524_v48 = vadd.f32 %v11393_v33, %v4242_v47  ;;  %v2827_v6 = vadd.f32 %v11395_v61, %v9944_v18  ;;  %v3969_v41 = vadd.f32 %v11396_v23, %v3681_v2  ;;  %v11397_v57 = vld [vmem:[#allocation67_spill] sm:$0xff]  ;;  %v11400_v56 = vld [vmem:[#allocation2_spill] sm:$0xff]  ;;  %v11401_v28 = vld [vmem:[#allocation153_spill] sm:$0xff] }
 0x73c   : > { %v4729_v14 = vpop.permute.xlu1 %4728  ;;  %v4804_v17 = vadd.f32 %v4715_v51, %v4522_v7  ;;  %v4531_v55 = vadd.f32 %v11397_v57, %v4249_v39  ;;  %v3102_v44 = vadd.f32 %v11398_v49, %v2820_v26  ;;  %v3676_v32 = vadd.f32 %v11399_v60, %v3388_v42  ;;  %v11402_v18 = vld [vmem:[#allocation189_spill] sm:$0xff]  ;;  %v11403_v53 = vld [vmem:[#allocation4_spill] sm:$0xff]  ;;  %v11404_v24 = vld [vmem:[#allocation31_spill] sm:$0xff] }
 0x73d   : > { %v4811_v43 = vadd.f32 %v4729_v14, %v4529_v8  ;;  %v4244_v45 = vadd.f32 %v11400_v56, %v3962_v22  ;;  %v3109_v7 = vadd.f32 %v11401_v28, %v2827_v6  ;;  %v3683_v30 = vadd.f32 %v11402_v18, %v3395_v9  ;;  %v11405_v3 = vld [vmem:[#allocation64_spill] sm:$0xff]  ;;  %v11406_v51 = vld [vmem:[#allocation218_spill] sm:$0xff]  ;;  %v11407_v59 = vld [vmem:[#allocation35_spill] sm:$0xff] }
 0x73e   : > { %4836 = vst.msk [vmem:[%s9934_s10 + $0x30] sm:$0xff] %vm282_vm1, %v4804_v17  ;;  %v4251_v16 = vadd.f32 %v11403_v53, %v3969_v41  ;;  %v3390_v13 = vadd.f32 %v11404_v24, %v3102_v44  ;;  %v2822_v8 = vadd.f32 %v11405_v3, %v9923_v63  ;;  %v3964_v40 = vadd.f32 %v11406_v51, %v3676_v32  ;;  %v11408_v34 = vld [vmem:[#allocation97_spill] sm:$0xff]  ;;  %v11409_v47 = vld [vmem:[#allocation154_spill] sm:$0xff]  ;;  %v11410_v17 = vld [vmem:[#allocation219_spill] sm:$0xff] }
 0x73f   : > { %4843 = vst.msk [vmem:[%s9934_s10 + $0x68] sm:$0xff] %vm282_vm1, %v4811_v43  ;;  %v4719_v12 = vpop.permute.xlu0 %4718  ;;  %v4526_v10 = vadd.f32 %v11407_v59, %v4244_v45  ;;  %v2829_v5 = vadd.f32 %v11408_v34, %v9940_v50  ;;  %v3397_v14 = vadd.f32 %v11409_v47, %v3109_v7  ;;  %v3971_v58 = vadd.f32 %v11410_v17, %v3683_v30  ;;  %v11411_v29 = vld [vmem:[#allocation84_spill] sm:$0xff]  ;;  %v11412_v63 = vld [vmem:[#allocation147_spill] sm:$0xff]  ;;  %v11413_v39 = vld [vmem:[#allocation190_spill] sm:$0xff] }
 0x740   : > { %v4733_v0 = vpop.permute.xlu1 %4732  ;;  %v4806_v25 = vadd.f32 %v4719_v12, %v4524_v48  ;;  %v4533_v54 = vadd.f32 %v11411_v29, %v4251_v16  ;;  %v3104_v62 = vadd.f32 %v11412_v63, %v2822_v8  ;;  %v3678_v43 = vadd.f32 %v11413_v39, %v3390_v13  ;;  %v11414_v21 = vld [vmem:[#allocation68_spill] sm:$0xff]  ;;  %v11416_v22 = vld [vmem:[#allocation191_spill] sm:$0xff]  ;;  %v11422_v44 = vld [vmem:[#allocation81_spill] sm:$0xff] }
 0x741   : > { %v4813_v36 = vadd.f32 %v4733_v0, %v4531_v55  ;;  %v4246_v26 = vadd.f32 %v11414_v21, %v3964_v40  ;;  %v11415_v50 = vld [vmem:[#allocation148_spill] sm:$0xff]  ;;  %v3685_v33 = vadd.f32 %v11416_v22, %v3397_v14  ;;  %v11417_v48 = vld [vmem:[#allocation19_spill] sm:$0xff]  ;;  %v11424_v45 = vld [vmem:[#allocation221_spill] sm:$0xff] }
 0x742   : > { %4838 = vst.msk [vmem:[%s9934_s10 + $0x40] sm:$0xff] %vm282_vm1, %v4806_v25  ;;  %v3111_v1 = vadd.f32 %v11415_v50, %v2829_v5  ;;  %v4253_v20 = vadd.f32 %v11417_v48, %v3971_v58  ;;  %v11418_v61 = vld [vmem:[#allocation52_spill] sm:$0xff]  ;;  %v11419_v23 = vld [vmem:[#allocation107_spill] sm:$0xff]  ;;  %v11426_v7 = vld [vmem:[#allocation54_spill] sm:$0xff] }
 0x743   : > { %4845 = vst.msk [vmem:[%s9934_s10 + $0x78] sm:$0xff] %vm282_vm1, %v4813_v36  ;;  %v4723_v2 = vpop.permute.xlu0 %4722  ;;  %v2824_v6 = vadd.f32 %v11418_v61, %v9919_v27  ;;  %v3392_v41 = vadd.f32 %v11419_v23, %v3104_v62  ;;  %v11420_v57 = vld [vmem:[#allocation220_spill] sm:$0xff]  ;;  %v11423_v32 = vld [vmem:[#allocation163_spill] sm:$0xff]  ;;  %v3973_v0 = vadd.f32 %v11424_v45, %v3685_v33  ;;  %v11428_v16 = vld [vmem:[#allocation150_spill] sm:$0xff] }
 0x744   : > { %v4737_v35 = vpop.permute.xlu1 %4736  ;;  %v4808_v42 = vadd.f32 %v4723_v2, %v4526_v10  ;;  %v3966_v55 = vadd.f32 %v11420_v57, %v3678_v43  ;;  %v11421_v12 = vld [vmem:[#allocation40_spill] sm:$0xff]  ;;  %v3399_v60 = vadd.f32 %v11422_v44, %v3111_v1  ;;  %v2831_v56 = vadd.f32 %v11423_v32, %v9971_v15  ;;  %v11425_v25 = vld [vmem:[#allocation103_spill] sm:$0xff]  ;;  %v11429_v3 = vld [vmem:[#allocation165_spill] sm:$0xff] }
 0x745   : > { %v4815_v9 = vadd.f32 %v4737_v35, %v4533_v54  ;;  %v4528_v49 = vadd.f32 %v11421_v12, %v4246_v26  ;;  %v4535_v28 = vadd.f32 %v11425_v25, %v4253_v20  ;;  %v3106_v18 = vadd.f32 %v11426_v7, %v2824_v6  ;;  %v11427_v30 = vld [vmem:[#allocation192_spill] sm:$0xff]  ;;  %v11430_v15 = vld [vmem:[#allocation193_spill] sm:$0xff]  ;;  %v11431_v40 = vld [vmem:[#allocation11_spill] sm:$0xff] }
 0x746   : > { %4840 = vst.msk [vmem:[%s9934_s10 + $0x50] sm:$0xff] %vm282_vm1, %v4808_v42  ;;  %v3680_v53 = vadd.f32 %v11427_v30, %v3392_v41  ;;  %v4248_v36 = vadd.f32 %v11428_v16, %v3966_v55  ;;  %v3113_v8 = vadd.f32 %v11429_v3, %v2831_v56  ;;  %v3687_v51 = vadd.f32 %v11430_v15, %v3399_v60  ;;  %v11432_v34 = vld [vmem:[#allocation60_spill] sm:$0xff]  ;;  %v11434_v17 = vld [vmem:[#allocation222_spill] sm:$0xff]  ;;  %v11435_v29 = vld [vmem:[#allocation45_spill] sm:$0xff] }
 0x747   : > { %4847 = vst.msk [vmem:[%s9934_s10 + $0x88] sm:$0xff] %vm282_vm1, %v4815_v9  ;;  %v4727_v27 = vpop.permute.xlu0 %4726  ;;  %v4255_v59 = vadd.f32 %v11431_v40, %v3973_v0  ;;  %v3394_v5 = vadd.f32 %v11432_v34, %v3106_v18  ;;  %v11433_v47 = vld [vmem:[#allocation156_spill] sm:$0xff]  ;;  %v11436_v2 = vld [vmem:[#allocation157_spill] sm:$0xff]  ;;  %v11437_v62 = vld [vmem:[#allocation167_spill] sm:$0xff] }
 0x748   : > { %v4741_v24 = vpop.permute.xlu1 %4740  ;;  %v4810_v13 = vadd.f32 %v4727_v27, %v4528_v49  ;;  %v2826_v14 = vadd.f32 %v11433_v47, %v9957_v46  ;;  %v3968_v58 = vadd.f32 %v11434_v17, %v3680_v53  ;;  %v4530_v54 = vadd.f32 %v11435_v29, %v4248_v36  ;;  %v11438_v43 = vld [vmem:[#allocation223_spill] sm:$0xff]  ;;  %v11439_v26 = vld [vmem:[#allocation70_spill] sm:$0xff]  ;;  %v11446_v12 = vld [vmem:[#allocation149_spill] sm:$0xff] }
 0x749   : > { %v4817_v10 = vadd.f32 %v4741_v24, %v4535_v28  ;;  %v2833_v63 = vadd.f32 %v11436_v2, %v9967_v19  ;;  %v3401_v39 = vadd.f32 %v11437_v62, %v3113_v8  ;;  %v3975_v21 = vadd.f32 %v11438_v43, %v3687_v51  ;;  %v11440_v46 = vld [vmem:[#allocation158_spill] sm:$0xff]  ;;  %v11442_v33 = vld [vmem:[#allocation15_spill] sm:$0xff]  ;;  %v11447_v44 = vld [vmem:[#allocation160_spill] sm:$0xff] }
 0x74a   : > { %4842 = vst.msk [vmem:[%s9934_s10 + $0x60] sm:$0xff] %vm282_vm1, %v4810_v13  ;;  %v4537_v35 = vadd.f32 %v11439_v26, %v4255_v59  ;;  %v3108_v50 = vadd.f32 %v11440_v46, %v2826_v14  ;;  %v11441_v1 = vld [vmem:[#allocation194_spill] sm:$0xff]  ;;  %v4250_v48 = vadd.f32 %v11442_v33, %v3968_v58  ;;  %v11443_v19 = vld [vmem:[#allocation159_spill] sm:$0xff]  ;;  %v2828_v49 = vadd.f32 %v11446_v12, %v9953_v4  ;;  %v11448_v32 = vld [vmem:[#allocation224_spill] sm:$0xff] }
 0x74b   : > { %4849 = vst.msk [vmem:[%s9934_s10 + $0x98] sm:$0xff] %vm282_vm1, %v4817_v10  ;;  %v4731_v42 = vpop.permute.xlu0 %4730  ;;  %v3682_v22 = vadd.f32 %v11441_v1, %v3394_v5  ;;  %v3115_v61 = vadd.f32 %v11443_v19, %v2833_v63  ;;  %v11444_v6 = vld [vmem:[#allocation195_spill] sm:$0xff]  ;;  %v11449_v45 = vld [vmem:[#allocation50_spill] sm:$0xff]  ;;  %v11450_v25 = vld [vmem:[#allocation161_spill] sm:$0xff] }
 0x74c   : > { %v4745_v20 = vpop.permute.xlu1 %4744  ;;  %v4812_v9 = vadd.f32 %v4731_v42, %v4530_v54  ;;  %v3689_v23 = vadd.f32 %v11444_v6, %v3401_v39  ;;  %v11445_v41 = vld [vmem:[#allocation155_spill] sm:$0xff]  ;;  %v3396_v60 = vadd.f32 %v11447_v44, %v3108_v50  ;;  %v4532_v0 = vadd.f32 %v11449_v45, %v4250_v48  ;;  %v11452_v18 = vld [vmem:[#allocation225_spill] sm:$0xff]  ;;  %v11454_v36 = vld [vmem:[#allocation152_spill] sm:$0xff] }
 0x74d   : > { %v4257_v57 = vadd.f32 %v11445_v41, %v3975_v21  ;;  %v4819_v55 = vadd.f32 %v4745_v20, %v4537_v35  ;;  %v3970_v56 = vadd.f32 %v11448_v32, %v3682_v22  ;;  %v3403_v28 = vadd.f32 %v11450_v25, %v3115_v61  ;;  %v11451_v27 = vld [vmem:[#allocation175_spill] sm:$0xff]  ;;  %v11453_v53 = vld [vmem:[#allocation57_spill] sm:$0xff]  ;;  %v11455_v13 = vld [vmem:[#allocation196_spill] sm:$0xff] }
 0x74e   : > { %4844 = vst.msk [vmem:[%s9934_s10 + $0x70] sm:$0xff] %vm282_vm1, %v4812_v9  ;;  %v2835_v7 = vadd.f32 %v11451_v27, %v10007_v31  ;;  %v3977_v30 = vadd.f32 %v11452_v18, %v3689_v23  ;;  %v3110_v24 = vadd.f32 %v11454_v36, %v2828_v49  ;;  %v3684_v3 = vadd.f32 %v11455_v13, %v3396_v60  ;;  %v11456_v8 = vld [vmem:[#allocation235_spill] sm:$0xff]  ;;  %v11457_v59 = vld [vmem:[#allocation177_spill] sm:$0xff]  ;;  %v11459_v5 = vld [vmem:[#allocation236_spill] sm:$0xff] }
 0x74f   : > { %v4539_v16 = vadd.f32 %v11453_v53, %v4257_v57  ;;  %4851 = vst.msk [vmem:[%s9934_s10 + $0xa8] sm:$0xff] %vm282_vm1, %v4819_v55  ;;  %v4735_v4 = vpop.permute.xlu0 %4734  ;;  %v4252_v15 = vadd.f32 %v11456_v8, %v3970_v56  ;;  %v11458_v31 = vld [vmem:[#allocation197_spill] sm:$0xff]  ;;  %v11460_v17 = vld [vmem:[#allocation108_spill] sm:$0xff]  ;;  %v11462_v2 = vld [vmem:[#allocation226_spill] sm:$0xff] }
 0x750   : > { %v4749_v51 = vpop.permute.xlu1 %4748  ;;  %v4814_v40 = vadd.f32 %v4735_v4, %v4532_v0  ;;  %v3117_v10 = vadd.f32 %v11457_v59, %v2835_v7  ;;  %v3691_v34 = vadd.f32 %v11458_v31, %v3403_v28  ;;  %v4259_v47 = vadd.f32 %v11459_v5, %v3977_v30  ;;  %v11461_v29 = vld [vmem:[#allocation168_spill] sm:$0xff]  ;;  %v11463_v62 = vld [vmem:[#allocation69_spill] sm:$0xff]  ;;  %v11465_v26 = vld [vmem:[#allocation179_spill] sm:$0xff] }
 0x751   : > { %v4821_v14 = vadd.f32 %v4749_v51, %v4539_v16  ;;  %v3398_v58 = vadd.f32 %v11460_v17, %v3110_v24  ;;  %v2830_v54 = vadd.f32 %v11461_v29, %v9985_v52  ;;  %v3972_v63 = vadd.f32 %v11462_v2, %v3684_v3  ;;  %v11464_v43 = vld [vmem:[#allocation169_spill] sm:$0xff]  ;;  %v11466_v42 = vld [vmem:[#allocation227_spill] sm:$0xff]  ;;  %v11467_v50 = vld [vmem:[#allocation62_spill] sm:$0xff] }
 0x752   : > { %v4534_v39 = vadd.f32 %v11463_v62, %v4252_v15  ;;  %4846 = vst.msk [vmem:[%s9934_s10 + $0x80] sm:$0xff] %vm282_vm1, %v4814_v40  ;;  %v2837_v21 = vadd.f32 %v11464_v43, %v9997_v37  ;;  %v3405_v35 = vadd.f32 %v11465_v26, %v3117_v10  ;;  %v3979_v46 = vadd.f32 %v11466_v42, %v3691_v34  ;;  %v11468_v52 = vld [vmem:[#allocation170_spill] sm:$0xff]  ;;  %v11470_v9 = vld [vmem:[#allocation237_spill] sm:$0xff]  ;;  %v11471_v37 = vld [vmem:[#allocation171_spill] sm:$0xff] }
 0x753   : > { %v4541_v1 = vadd.f32 %v11467_v50, %v4259_v47  ;;  %4853 = vst.msk [vmem:[%s9934_s10 + $0xb8] sm:$0xff] %vm282_vm1, %v4821_v14  ;;  %v4739_v22 = vpop.permute.xlu0 %4738  ;;  %v3112_v33 = vadd.f32 %v11468_v52, %v2830_v54  ;;  %v11469_v48 = vld [vmem:[#allocation198_spill] sm:$0xff]  ;;  %v4254_v19 = vadd.f32 %v11470_v9, %v3972_v63  ;;  %v11472_v41 = vld [vmem:[#allocation199_spill] sm:$0xff]  ;;  %v11475_v32 = vld [vmem:[#allocation172_spill] sm:$0xff] }
 0x754   : > { %v3686_v20 = vadd.f32 %v11469_v48, %v3398_v58  ;;  %v4753_v61 = vpop.permute.xlu1 %4752  ;;  %v4816_v6 = vadd.f32 %v4739_v22, %v4534_v39  ;;  %v3119_v23 = vadd.f32 %v11471_v37, %v2837_v21  ;;  %v3693_v57 = vadd.f32 %v11472_v41, %v3405_v35  ;;  %v11473_v55 = vld [vmem:[#allocation238_spill] sm:$0xff]  ;;  %v11476_v45 = vld [vmem:[#allocation228_spill] sm:$0xff]  ;;  %v11477_v25 = vld [vmem:[#allocation109_spill] sm:$0xff] }
 0x755   : > { %v4261_v12 = vadd.f32 %v11473_v55, %v3979_v46  ;;  %v4823_v49 = vadd.f32 %v4753_v61, %v4541_v1  ;;  %v11474_v44 = vld [vmem:[#allocation162_spill] sm:$0xff]  ;;  %v3400_v56 = vadd.f32 %v11475_v32, %v3112_v33  ;;  %v4536_v28 = vadd.f32 %v11477_v25, %v4254_v19  ;;  %v11478_v27 = vld [vmem:[#allocation173_spill] sm:$0xff]  ;;  %v11479_v18 = vld [vmem:[#allocation12_spill] sm:$0xff] }
 0x756   : > { %v2832_v60 = vadd.f32 %v11474_v44, %v9975_v38  ;;  %v3974_v0 = vadd.f32 %v11476_v45, %v3686_v20  ;;  %4848 = vst.msk [vmem:[%s9934_s10 + $0x90] sm:$0xff] %vm282_vm1, %v4816_v6  ;;  %v3407_v7 = vadd.f32 %v11478_v27, %v3119_v23  ;;  %v11480_v30 = vld [vmem:[#allocation140_spill] sm:$0xff]  ;;  %v11481_v16 = vld [vmem:[#allocation229_spill] sm:$0xff]  ;;  %v11482_v36 = vld [vmem:[#allocation102_spill] sm:$0xff] }
 0x757   : > { %v2520_v53 = vmul.f32 %v11480_v30, %v11479_v18  ;;  %v3981_v4 = vadd.f32 %v11481_v16, %v3693_v57  ;;  %v4543_v24 = vadd.f32 %v11482_v36, %v4261_v12  ;;  %4855 = vst.msk [vmem:[%s9934_s10 + $0xc8] sm:$0xff] %vm282_vm1, %v4823_v49  ;;  %v4743_v38 = vpop.permute.xlu0 %4742  ;;  %v11483_v13 = vld [vmem:[#allocation164_spill] sm:$0xff]  ;;  %v11485_v51 = vld [vmem:[#allocation239_spill] sm:$0xff]  ;;  %v11486_v31 = vld [vmem:[#allocation201_spill] sm:$0xff] }
 0x758   : > { %v3114_v3 = vadd.f32 %v11483_v13, %v2832_v60  ;;  %v11484_v8 = vld [vmem:[#allocation200_spill] sm:$0xff]  ;;  %v4256_v40 = vadd.f32 %v11485_v51, %v3974_v0  ;;  %v4757_v59 = vpop.permute.xlu1 %4756  ;;  %v4818_v10 = vadd.f32 %v4743_v38, %v4536_v28  ;;  %v3695_v34 = vadd.f32 %v11486_v31, %v3407_v7  ;;  %v11488_v17 = vld [vmem:[#allocation166_spill] sm:$0xff]  ;;  %v11492_v43 = vld [vmem:[#allocation89_spill] sm:$0xff] }
 0x759   : > { %v3688_v15 = vadd.f32 %v11484_v8, %v3400_v56  ;;  %v11487_v5 = vld [vmem:[#allocation240_spill] sm:$0xff]  ;;  %v4825_v14 = vadd.f32 %v4757_v59, %v4543_v24  ;;  %v11490_v2 = vld [vmem:[#allocation230_spill] sm:$0xff]  ;;  %v2522_v21 = vmul.f32 %v8762_v11, %v11492_v43  ;;  %v11493_v26 = vld [vmem:[#allocation231_spill] sm:$0xff] }
 0x75a   : > { %v4263_v47 = vadd.f32 %v11487_v5, %v3981_v4  ;;  %v3402_v58 = vadd.f32 %v11488_v17, %v3114_v3  ;;  %v11489_v29 = vld [vmem:[#allocation180_spill] sm:$0xff]  ;;  %v11491_v62 = vld [vmem:[#allocation110_spill] sm:$0xff]  ;;  %4850 = vst.msk [vmem:[%s9934_s10 + $0xa0] sm:$0xff] %vm282_vm1, %v4818_v10  ;;  %v3983_v35 = vadd.f32 %v11493_v26, %v3695_v34  ;;  %v11494_v42 = vld [vmem:[#allocation111_spill] sm:$0xff] }
 0x75b   : > { %v2834_v54 = vadd.f32 %v11489_v29, %v2520_v53  ;;  %v3976_v63 = vadd.f32 %v11490_v2, %v3688_v15  ;;  %v4538_v39 = vadd.f32 %v11491_v62, %v4256_v40  ;;  %4857 = vst.msk [vmem:[%s9934_s10 + $0xd8] sm:$0xff] %vm282_vm1, %v4825_v14  ;;  %v4747_v50 = vpop.permute.xlu0 %4746  ;;  %v11495_v1 = vld [vmem:[#allocation88_spill] sm:$0xff]  ;;  %v11496_v52 = vld [vmem:[#allocation202_spill] sm:$0xff]  ;;  %v11497_v48 = vld [vmem:[#allocation241_spill] sm:$0xff] }
 0x75c   : > { %v4545_v46 = vadd.f32 %v11494_v42, %v4263_v47  ;;  %v3690_v33 = vadd.f32 %v11496_v52, %v3402_v58  ;;  %v4761_v9 = vpop.permute.xlu1 %4760  ;;  %v11498_v61 = vld [vmem:[#allocation242_spill] sm:$0xff]  ;;  %v11500_v41 = vld [vmem:[#allocation181_spill] sm:$0xff]  ;;  %v11501_v55 = vld [vmem:[#allocation232_spill] sm:$0xff] }
 0x75d   : > { %v3116_v22 = vadd.f32 %v11495_v1, %v2834_v54  ;;  %v4258_v20 = vadd.f32 %v11497_v48, %v3976_v63  ;;  %v4820_v19 = vadd.f32 %v4747_v50, %v4538_v39  ;;  %v4265_v6 = vadd.f32 %v11498_v61, %v3983_v35  ;;  %v11499_v37 = vld [vmem:[#allocation174_spill] sm:$0xff]  ;;  %v11502_v49 = vld [vmem:[#allocation112_spill] sm:$0xff]  ;;  %v11503_v60 = vld [vmem:[#allocation113_spill] sm:$0xff] }
 0x75e   : > { %v4827_v11 = vadd.f32 %v4761_v9, %v4545_v46  ;;  %v2836_v23 = vadd.f32 %v11499_v37, %v2522_v21  ;;  %v3978_v12 = vadd.f32 %v11501_v55, %v3690_v33  ;;  %v11504_v45 = vld [vmem:[#allocation176_spill] sm:$0xff]  ;;  %v11505_v25 = vld [vmem:[#allocation203_spill] sm:$0xff]  ;;  %v11507_v16 = vld [vmem:[#allocation178_spill] sm:$0xff] }
 0x75f   : > { %v3404_v57 = vadd.f32 %v11500_v41, %v3116_v22  ;;  %v4540_v44 = vadd.f32 %v11502_v49, %v4258_v20  ;;  %4852 = vst.msk [vmem:[%s9934_s10 + $0xb0] sm:$0xff] %vm282_vm1, %v4820_v19  ;;  %v4547_v32 = vadd.f32 %v11503_v60, %v4265_v6  ;;  %v4751_v56 = vpop.permute.xlu0 %4750  ;;  %v11506_v27 = vld [vmem:[#allocation243_spill] sm:$0xff]  ;;  %v11508_v36 = vld [vmem:[#allocation233_spill] sm:$0xff]  ;;  %v11510_v8 = vld [vmem:[#allocation204_spill] sm:$0xff] }
 0x760   : > { %4859 = vst.msk [vmem:[%s9934_s10 + $0xe8] sm:$0xff] %vm282_vm1, %v4827_v11  ;;  %v3118_v0 = vadd.f32 %v11504_v45, %v2836_v23  ;;  %v4260_v7 = vadd.f32 %v11506_v27, %v3978_v12  ;;  %v4765_v18 = vpop.permute.xlu1 %4764  ;;  %v11509_v38 = vld [vmem:[#allocation115_spill] sm:$0xff]  ;;  %v11511_v51 = vld [vmem:[#allocation244_spill] sm:$0xff]  ;;  %v11512_v10 = vld [vmem:[#allocation234_spill] sm:$0xff] }
 0x761   : > { %v3692_v28 = vadd.f32 %v11505_v25, %v3404_v57  ;;  %v4822_v30 = vadd.f32 %v4751_v56, %v4540_v44  ;;  %v4829_v53 = vadd.f32 %v4765_v18, %v4547_v32  ;;  %v11513_v34 = vld [vmem:[#allocation114_spill] sm:$0xff]  ;;  %v11514_v14 = vld [vmem:[#allocation245_spill] sm:$0xff]  ;;  %v11515_v29 = vld [vmem:[#allocation116_spill] sm:$0xff] }
 0x762   : > { %v3406_v4 = vadd.f32 %v11507_v16, %v3118_v0  ;;  %v4542_v13 = vadd.f32 %v11509_v38, %v4260_v7 }
 0x763   : > { %v3980_v24 = vadd.f32 %v11508_v36, %v3692_v28  ;;  %4854 = vst.msk [vmem:[%s9934_s10 + $0xc0] sm:$0xff] %vm282_vm1, %v4822_v30  ;;  %4861 = vst.msk [vmem:[%s9934_s10 + $0xf8] sm:$0xff] %vm282_vm1, %v4829_v53  ;;  %v4755_v3 = vpop.permute.xlu0 %4754 }
 0x764   : > { %v3694_v15 = vadd.f32 %v11510_v8, %v3406_v4  ;;  %v4824_v59 = vadd.f32 %v4755_v3, %v4542_v13 }
 0x765   : > { %v4262_v40 = vadd.f32 %v11511_v51, %v3980_v24 }
 0x766   : > { %v3982_v31 = vadd.f32 %v11512_v10, %v3694_v15  ;;  %4856 = vst.msk [vmem:[%s9934_s10 + $0xd0] sm:$0xff] %vm282_vm1, %v4824_v59 }
 0x767   : > { %v4544_v5 = vadd.f32 %v11513_v34, %v4262_v40  ;;  %v4759_v47 = vpop.permute.xlu0 %4758 }
 0x768   : > { %v4264_v17 = vadd.f32 %v11514_v14, %v3982_v31 }
 0x769   : > { %v4826_v58 = vadd.f32 %v4759_v47, %v4544_v5 }
 0x76a   : > { %v4546_v54 = vadd.f32 %v11515_v29, %v4264_v17 }
 0x76b   : > { %4858 = vst.msk [vmem:[%s9934_s10 + $0xe0] sm:$0xff] %vm282_vm1, %v4826_v58  ;;  %v4763_v2 = vpop.permute.xlu0 %4762 }
 0x76c   : > { %v4828_v63 = vadd.f32 %v4763_v2, %v4546_v54 }
 0x76e   : > { %4860 = vst.msk [vmem:[%s9934_s10 + $0xf0] sm:$0xff] %vm282_vm1, %v4828_v63 }
 0x76f PF: > { %s15_s18 = sadd.s32 1, %s5748_s18  }
 0x770   : > { %p12_p4 = scmp.ge.s32.totalorder %s15_s18, 4  }
 0x772   :  { %14 = sbr.rel (!%p12_p4) target bundleno = 1 (0x1), region = 70 }

</bundles_post_ra>
